<compile_context>
chip_gen: v5e
topology: v5e:2x2
jax: 0.10.0
libtpu: 0.0.40
codegen_flags: <defaults>
</compile_context>

<pallas_src>
import math

import jax
import jax.numpy as jnp
from jax.experimental import pallas as pl
from jax.experimental.pallas import tpu as pltpu

# --- module hyper-parameters (from training.py) ---
N_EMBD = 384
HIDDEN = 4 * N_EMBD          # 1536
# dropout = 0.2 -> identity at inference
# TODO(synk): training-mode dropout (RNG mask + scaling) not implemented.


def _ffwd_kernel(x_ref, w1_ref, b1_ref, w2_ref, b2_ref, o_ref):
    # x_ref : (TM, C)     bf16 token tile
    # w1_ref: (C, 4C)     bf16 (pre-transposed vs. torch Linear weight)
    # b1_ref: (1, 4C)     f32
    # w2_ref: (4C, C)     bf16
    # b2_ref: (1, C)      f32
    # o_ref : (TM, C)     f32
    x = x_ref[...]                                                     # bf16
    h = jnp.dot(x, w1_ref[...], preferred_element_type=jnp.float32)   # (TM, 4C) f32 acc
    h = jnp.maximum(h + b1_ref[...], 0.0)                             # bias + ReLU in f32
    h = h.astype(w2_ref.dtype)                                        # bf16 back onto the MXU
    y = jnp.dot(h, w2_ref[...], preferred_element_type=jnp.float32)   # (TM, C) f32 acc
    o_ref[...] = (y + b2_ref[...]).astype(o_ref.dtype)


def feed_forward(x, w1, b1, w2, b2, *, row_tile=64):
    """x: (B, T, C) bf16; w1: (C, 4C) bf16; b1: (4C,) f32; w2: (4C, C) bf16; b2: (C,) f32."""
    B, T, C = x.shape
    H = w1.shape[1]
    rows = B * T
    assert rows % row_tile == 0, "token count must be divisible by row_tile"

    x2 = x.reshape(rows, C)
    out = pl.pallas_call(
        _ffwd_kernel,
        out_shape=jax.ShapeDtypeStruct((rows, C), jnp.float32),
        grid_spec=pltpu.PrefetchScalarGridSpec(
            num_scalar_prefetch=0,
            grid=(rows // row_tile,),
            in_specs=[
                pl.BlockSpec((row_tile, C), lambda i: (i, 0)),   # token tile
                pl.BlockSpec((C, H), lambda i: (0, 0)),          # W1 (resident across grid)
                pl.BlockSpec((1, H), lambda i: (0, 0)),          # b1
                pl.BlockSpec((H, C), lambda i: (0, 0)),          # W2 (resident across grid)
                pl.BlockSpec((1, C), lambda i: (0, 0)),          # b2
            ],
            out_specs=pl.BlockSpec((row_tile, C), lambda i: (i, 0)),
        ),
        compiler_params=pltpu.CompilerParams(
            dimension_semantics=("parallel",)),
    )(x2, w1, b1.reshape(1, H), w2, b2.reshape(1, C))
    return out.reshape(B, T, C)


def _reference_f32(x, w1, b1, w2, b2):
    """Full-precision reference mirroring the PyTorch forward (dropout = identity)."""
    h = jnp.maximum(x @ w1 + b1, 0.0)
    return h @ w2 + b2


def _reference_mixed(x_bf, w1_bf, b1, w2_bf, b2):
    """Bit-for-bit emulation of the kernel's mixed-precision math (bf16 MXU, f32 acc)."""
    B, T, C = x_bf.shape
    x2 = x_bf.reshape(B * T, C)
    h = jnp.dot(x2, w1_bf, preferred_element_type=jnp.float32) + b1
    h = jnp.maximum(h, 0.0).astype(jnp.bfloat16)
    y = jnp.dot(h, w2_bf, preferred_element_type=jnp.float32) + b2
    return y.reshape(B, T, C)


if __name__ == "__main__":
    key = jax.random.PRNGKey(0)
    kx, k1, kb1, k2, kb2 = jax.random.split(key, 5)

    B, T, C = 2, 64, N_EMBD
    H = HIDDEN

    x = jax.random.normal(kx, (B, T, C), dtype=jnp.float32)

    # nn.Linear init ranges (weights stored pre-transposed as (in, out))
    s1 = 1.0 / math.sqrt(C)
    w1 = jax.random.uniform(k1, (C, H), minval=-s1, maxval=s1, dtype=jnp.float32)
    b1 = jax.random.uniform(kb1, (H,), minval=-s1, maxval=s1, dtype=jnp.float32)
    s2 = 1.0 / math.sqrt(H)
    w2 = jax.random.uniform(k2, (H, C), minval=-s2, maxval=s2, dtype=jnp.float32)
    b2 = jax.random.uniform(kb2, (C,), minval=-s2, maxval=s2, dtype=jnp.float32)

    # bf16 operands for the MXU (accumulation stays f32 inside the kernel)
    x_bf = x.astype(jnp.bfloat16)
    w1_bf = w1.astype(jnp.bfloat16)
    w2_bf = w2.astype(jnp.bfloat16)

    out = feed_forward(x_bf, w1_bf, b1, w2_bf, b2)
    out = jax.block_until_ready(out)
    assert out.shape == (B, T, C)

    # 1) exact check against a reference using identical mixed-precision math
    ref_mixed = _reference_mixed(x_bf, w1_bf, b1, w2_bf, b2)
    assert jnp.allclose(out, ref_mixed, atol=2e-4, rtol=2e-4), "mismatch vs mixed-precision reference"

    # 2) sanity check against the full f32 module semantics (bf16 rounding only)
    ref_f32 = _reference_f32(x, w1, b1, w2, b2)
    assert jnp.allclose(out, ref_f32, atol=3e-2, rtol=3e-2), "mismatch vs f32 reference"

    print("KERNEL_OK")
</pallas_src>

<mosaic_0001>
module attributes {stable_mosaic.version = 11 : i64} {
  func.func @_ffwd_kernel(%arg0: i32, %arg1: memref<64x384xbf16, #tpu.memory_space<vmem>>, %arg2: memref<384x1536xbf16, #tpu.memory_space<vmem>>, %arg3: memref<1x1536xf32, #tpu.memory_space<vmem>>, %arg4: memref<1536x384xbf16, #tpu.memory_space<vmem>>, %arg5: memref<1x384xf32, #tpu.memory_space<vmem>>, %arg6: memref<64x384xf32, #tpu.memory_space<vmem>>) attributes {dimension_semantics = [#tpu.dimension_semantics<parallel>], iteration_bounds = array<i64: 2>, scalar_prefetch = 0 : i64, scratch_operands = 0 : i64, tpu.core_type = #tpu.core_type<tc>, window_params = [{transform_indices = @transform_0, window_bounds = array<i64: 64, 384>}, {pipeline_mode = #tpu.pipeline_mode<synchronous>, transform_indices = @transform_1, window_bounds = array<i64: 384, 1536>}, {pipeline_mode = #tpu.pipeline_mode<synchronous>, transform_indices = @transform_2, window_bounds = array<i64: 1, 1536>}, {pipeline_mode = #tpu.pipeline_mode<synchronous>, transform_indices = @transform_3, window_bounds = array<i64: 1536, 384>}, {pipeline_mode = #tpu.pipeline_mode<synchronous>, transform_indices = @transform_4, window_bounds = array<i64: 1, 384>}, {transform_indices = @transform_5, window_bounds = array<i64: 64, 384>}]} {
    %c0 = arith.constant 0 : index
    %c0_0 = arith.constant 0 : index
    %0 = vector.load %arg1[%c0, %c0_0] : memref<64x384xbf16, #tpu.memory_space<vmem>>, vector<64x384xbf16>
    %c0_1 = arith.constant 0 : index
    %c0_2 = arith.constant 0 : index
    %1 = vector.load %arg2[%c0_1, %c0_2] : memref<384x1536xbf16, #tpu.memory_space<vmem>>, vector<384x1536xbf16>
    %cst = arith.constant dense<0.000000e+00> : vector<64x1536xf32>
    %2 = tpu.matmul %0, %1, %cst {dimension_numbers = #tpu.dot_dimension_numbers<[1], [0], [0], [1], [0, 0, 1, 1], [], []>} : vector<64x384xbf16>, vector<384x1536xbf16>, vector<64x1536xf32> -> vector<64x1536xf32>
    %c0_3 = arith.constant 0 : index
    %c0_4 = arith.constant 0 : index
    %3 = vector.load %arg3[%c0_3, %c0_4] : memref<1x1536xf32, #tpu.memory_space<vmem>>, vector<1x1536xf32>
    %4 = vector.broadcast %3 : vector<1x1536xf32> to vector<64x1536xf32>
    %5 = arith.addf %2, %4 : vector<64x1536xf32>
    %cst_5 = arith.constant 0.000000e+00 : f32
    %6 = vector.broadcast %cst_5 : f32 to vector<64x1536xf32>
    %7 = arith.maximumf %5, %6 : vector<64x1536xf32>
    %8 = arith.truncf %7 : vector<64x1536xf32> to vector<64x1536xbf16>
    %c0_6 = arith.constant 0 : index
    %c0_7 = arith.constant 0 : index
    %9 = vector.load %arg4[%c0_6, %c0_7] : memref<1536x384xbf16, #tpu.memory_space<vmem>>, vector<1536x384xbf16>
    %cst_8 = arith.constant dense<0.000000e+00> : vector<64x384xf32>
    %10 = tpu.matmul %8, %9, %cst_8 {dimension_numbers = #tpu.dot_dimension_numbers<[1], [0], [0], [1], [0, 0, 1, 1], [], []>} : vector<64x1536xbf16>, vector<1536x384xbf16>, vector<64x384xf32> -> vector<64x384xf32>
    %c0_9 = arith.constant 0 : index
    %c0_10 = arith.constant 0 : index
    %11 = vector.load %arg5[%c0_9, %c0_10] : memref<1x384xf32, #tpu.memory_space<vmem>>, vector<1x384xf32>
    %12 = vector.broadcast %11 : vector<1x384xf32> to vector<64x384xf32>
    %13 = arith.addf %10, %12 : vector<64x384xf32>
    %c0_11 = arith.constant 0 : index
    %c0_12 = arith.constant 0 : index
    %14 = vector.load %arg6[%c0_11, %c0_12] : memref<64x384xf32, #tpu.memory_space<vmem>>, vector<64x384xf32>
    tpu.vector_store %arg6[%c0_11, %c0_12], %13 {strides = array<i32>} : memref<64x384xf32, #tpu.memory_space<vmem>>, vector<64x384xf32>,
    return
  }
  func.func @transform_0(%arg0: i32) -> (i32, i32) {
    %c0_i32 = arith.constant 0 : i32
    %c0_i32_0 = arith.constant 0 : i32
    return %arg0, %c0_i32 : i32, i32
  }
  func.func @transform_1(%arg0: i32) -> (i32, i32) {
    %c0_i32 = arith.constant 0 : i32
    %c0_i32_0 = arith.constant 0 : i32
    %c0_i32_1 = arith.constant 0 : i32
    return %c0_i32, %c0_i32_0 : i32, i32
  }
  func.func @transform_2(%arg0: i32) -> (i32, i32) {
    %c0_i32 = arith.constant 0 : i32
    %c0_i32_0 = arith.constant 0 : i32
    %c0_i32_1 = arith.constant 0 : i32
    return %c0_i32, %c0_i32_0 : i32, i32
  }
  func.func @transform_3(%arg0: i32) -> (i32, i32) {
    %c0_i32 = arith.constant 0 : i32
    %c0_i32_0 = arith.constant 0 : i32
    %c0_i32_1 = arith.constant 0 : i32
    return %c0_i32, %c0_i32_0 : i32, i32
  }
  func.func @transform_4(%arg0: i32) -> (i32, i32) {
    %c0_i32 = arith.constant 0 : i32
    %c0_i32_0 = arith.constant 0 : i32
    %c0_i32_1 = arith.constant 0 : i32
    return %c0_i32, %c0_i32_0 : i32, i32
  }
  func.func @transform_5(%arg0: i32) -> (i32, i32) {
    %c0_i32 = arith.constant 0 : i32
    %c0_i32_0 = arith.constant 0 : i32
    return %arg0, %c0_i32 : i32, i32
  }
}

</mosaic_0001>

<bundles_post_ra>
// kernel: tpu_custom_call.1
= control target key start
LH: loop header
LB: loop body
LE: loop exit
PB: predicated region body
PF: predicated region fallthrough
CT: control target
= control target key end

     0   :  { %s11100_s0 = inlined_call_operand.hbm [shape: bf16[128,384], index: 0, kind: input, shape index: {}]   ;;  %s11101_s1 = inlined_call_operand.hbm [shape: bf16[384,1536], index: 1, kind: input, shape index: {}]   ;;  %s11102_s2 = inlined_call_operand.hbm [shape: f32[1,1536], index: 2, kind: input, shape index: {}]   ;;  %s11103_s3 = inlined_call_operand.hbm [shape: bf16[1536,384], index: 3, kind: input, shape index: {}]   ;;  %s11104_s4 = inlined_call_operand.hbm [shape: f32[1,384], index: 4, kind: input, shape index: {}]   ;;  %s11105_s5 = inlined_call_operand.hbm [shape: f32[128,384], index: 5, kind: output, shape index: {}]  }
   0x1   :  { %11177 = sst [smem:[#allocation64_spill]] %s11101_s1 }
   0x2   :  { %10 = vsyncpa [#allocation3], 0 }
   0x3   :  { %12 = vsyncpa [#allocation3 + $0x1], 0 }
   0x4   :  { %13 = vsyncpa [#allocation6], 0 }
   0x5   :  { %14 = vsyncpa [#allocation9], 0 }
   0x6   :  { %15 = vsyncpa [#allocation4], 0 }
   0x7   :  { %17 = vsyncpa [#allocation4 + $0x1], 0  ;;  %s9786_s18 = smov 0   ;;  %s9788_s19 = smov 0  }
   0x8   :  { %s9790_s20 = smov 0   ;;  %s9792_s21 = smov 0  }
   0x9 LB: > { %s9807_s22 = sadd.s32 4294967295, %s9744_s21   ;;  %s6458_s23 = sadd.s32 4294967294, %s9744_s21   ;;  %s9744_s21 = sphi %s9792_s21, %s11305_s21   ;;  %s9740_s20 = sphi %s9790_s20, %s11304_s20   ;;  %s9736_s19 = sphi %s9788_s19, %s11303_s19   ;;  %s9732_s18 = sphi %s9786_s18, %s11302_s18  }
   0xa   : > { %p43_p0 = scmp.ne.s32.totalorder %s9736_s19, %s9732_s18  ;;  %p44_p1 = scmp.eq.s32.totalorder %s9807_s22, 0 }
   0xb   : > { %p151_p2 = scmp.eq.s32.totalorder %s9807_s22, 1  ;;  %p157_p3 = scmp.eq.s32.totalorder %s6458_s23, 1 }
   0xc   : > { %p9816_p4 = por %p44_p1, %p43_p0  ;;  %p6459_p5 = scmp.ge.s32.totalorder %s9744_s21, 1 }
   0xd   : > { %p9821_p6 = por %p157_p3, %p43_p0  ;;  %p164_p7 = scmp.lt.s32.totalorder %s9744_s21, 3 }
   0xe   : > { %s11180_s1 = sld [smem:[#allocation64_spill]]  ;;  %s9746_s30 = smov [#allocation5]  }
   0xf   : > { %p9829_p8 = pnand %p6459_p5, %p164_p7  ;;  %s177_s6 = sshll.u32 %s9746_s30, 4  ;;  %s178_s6 = int_to_ptr.vmem [resolvable:$true] %s177_s6 }
  0x10   : > { %s201_s10 = sshll.u32 %s11103_s3, 4  ;;  %s9747_s11 = smov 768   ;;  %s202_s10 = int_to_ptr.hbm [resolvable:$true] %s201_s10 }
  0x11   : > { %p9443_p9 = pneg %p9829_p8  ;;  %s9748_s12 = smov 48  }
  0x12   : > { %s9749_s13 = smov [#allocation8]   ;;  %s11106_s15 = smov 192  }
  0x13   : > { %p9837_p10 = pnand %p9443_p9, %p44_p1  ;;  %s203_s14 = sshll.u32 %s9749_s13, 4  ;;  %s204_s14 = int_to_ptr.vmem [resolvable:$true] %s203_s14 }
  0x14   : > { %s175_s28 = sshll.u32 %s11180_s1, 4  ;;  %s11107_s16 = smov 12   ;;  %s176_s28 = int_to_ptr.hbm [resolvable:$true] %s175_s28 }
  0x15   : > { %9446 = dma.hbm_to_vmem [thread:$0]  (!%p9837_p10), %s176_s28, 36864, %s178_s6, [#allocation6], %s9747_s11, %s9747_s11, %s9748_s12  }
  0x16   : > { %9452 = dma.hbm_to_vmem [thread:$0]  (!%p9837_p10), %s202_s10, 36864, %s204_s14, [#allocation9], %s11106_s15, %s11106_s15, %s11107_s16  }
  0x17   : > { %s190_s26 = sshll.u32 %s11102_s2, 4  ;;  %s9752_s27 = smov [#allocation7]   ;;  %s191_s26 = int_to_ptr.hbm [resolvable:$true] %s190_s26 }
  0x18   : > { %s192_s28 = sshll.u32 %s9752_s27, 4  ;;  %s216_s8 = sshll.u32 %s11104_s4, 4  ;;  %s193_s28 = int_to_ptr.vmem [resolvable:$true] %s192_s28  ;;  %s217_s8 = int_to_ptr.hbm [resolvable:$true] %s216_s8 }
  0x19   : > { %9449 = dma.hbm_to_vmem [thread:$0]  (!%p9837_p10), %s191_s26, 192, %s193_s28, [#allocation6]  }
  0x1a   : > { %s9753_s9 = smov [#allocation10]   ;;  %s9863_s11 = sadd.s32 1, %s9744_s21  }
  0x1b   : > { %s218_s10 = sshll.u32 %s9753_s9, 4  ;;  %s30_s12 = sadd.s32 1, %s9740_s20  ;;  %s219_s10 = int_to_ptr.vmem [resolvable:$true] %s218_s10 }
  0x1c   : > { %9455 = dma.hbm_to_vmem [thread:$0]  (!%p9837_p10), %s217_s8, 48, %s219_s10, [#allocation9]  }
  0x1d   : > { %s27_s13 = ssub.s32 %s9744_s21, %s9863_s11  ;;  %p37_p12 = scmp.ne.s32.totalorder %s9740_s20, %s9736_s19 }
  0x1e   : > { %p28_p13 = scmp.eq.s32.totalorder %s27_s13, 0  ;;  %p38_p0 = scmp.eq.s32.totalorder %s9744_s21, 0 }
  0x1f   : > { %p9873_p3 = por %p151_p2, %p37_p12  ;;  %p9468_p5 = scmp.lt.s32.totalorder %s9744_s21, 2 }
  0x20   : > { %s9879_s17 = scalar_select %p28_p13, %s9740_s20, %s30_s12  }
  0x21   : > { %p39_p7 = por %p38_p0, %p37_p12  ;;  %s229_s23 = sand.u32 1, %s9740_s20  }
  0x22   : > { %s9418_s7 = smul.u32 96, %s229_s23  ;;  %s230_s12 = scalar_lea.sflag [#allocation3], %s229_s23 }
  0x23   : > { %s9419_s26 = smul.u32 96, %s9744_s21  ;;  %p9883_p9 = pnand %p9468_p5, %p39_p7 }
  0x24   : > { %s233_s8 = scalar_lea.vmem [#allocation2], %s9418_s7  ;;  %s9647_s28 = scalar_lea.hbm %s11100_s0, 192 }
  0x25   : > { %s239_s6 = scalar_lea.hbm %s11100_s0, %s9419_s26  ;;  %s242_s9 = sshll.u32 %s233_s8, 4  ;;  %s243_s9 = int_to_ptr.vmem [resolvable:$true] %s242_s9 }
  0x26   : > { %s240_s10 = sshll.u32 %s239_s6, 4  ;;  %p9644_p10 = pneg %p9883_p9  ;;  %s241_s10 = int_to_ptr.hbm [resolvable:$true] %s240_s10 }
  0x27   : > { %s9640_s13 = sshra.s32 %s241_s10, 4  ;;  %s9641_s13 = int_to_ptr.hbm [resolvable:$true] %s9640_s13 }
  0x28   : > { %s9642_s15 = scalar_lea.hbm %s9641_s13, 96  ;;  %p9648_p0 = scmp.lt.s32.totalorder %s9641_s13, %s11100_s0 }
  0x29   : > { %p9643_p2 = scmp.ne.s32.totalorder %s9641_s13, %s9642_s15  ;;  %p9649_p5 = scmp.lt.s32.totalorder %s9647_s28, %s9642_s15 }
  0x2b   : > { %p9645_p12 = pnand %p9644_p10, %p9643_p2  ;;  %p9650_p7 = por %p9649_p5, %p9648_p0 }
  0x2d   : > { %p9646_p13 = pneg %p9645_p12 }
  0x2f   : > { %p9651_p11 = pnand %p9650_p7, %p9646_p13 }
  0x31   : > { %9654 = shalt.err (!%p9651_p11)
}
  0x32   : > { %s11185_s23 = smov 12   ;;  %s11186_s7 = smov 192  }
  0x33   : > { %9459 = dma.hbm_to_vmem [thread:$0]  (!%p9883_p9), %s241_s10, 1536, %s243_s9, %s230_s12, %s11186_s7, %s11186_s7, %s11185_s23  }
  0x34   : > { %254 = sbr.rel (%p9829_p8) target bundleno = 1386 (0x56a), region = 40 }
  0x39   : > { %s9906_s1 = sand.u32 1, %s9736_s19  }
  0x3a   : > { %s9420_s16 = smul.u32 96, %s9906_s1  ;;  %s257_s15 = scalar_lea.sflag [#allocation3], %s9906_s1 }
  0x3c   : > { %s9910_s6 = scalar_lea.vmem [#allocation2], %s9420_s16 }
  0x3d   : > { %9715 = dma.done.wait (%p9816_p4), %s257_s15, 1536  }
  0x3e   : > { %9717 = vsyncadd (%p9816_p4), %s257_s15, 4294965760 }
  0x3f   : > { %9719 = dma.done.wait (%p44_p1), [#allocation6], 37056  }
  0x40   : > { %9721 = vsyncadd (%p44_p1), [#allocation6], 4294930240 }
  0x41   : > { %9723 = dma.done.wait (%p44_p1), [#allocation9], 36912  }
  0x42   : > { %9725 = vsyncadd (%p44_p1), [#allocation9], 4294930384  ;;  %v6859_v0 = vld [vmem:[#allocation5 + $0x2a0] sm:$0xf]  ;;  %v8932_v1 = vld [vmem:[#allocation5 + $0x2cc] sm:$0xf0] }
  0x43   : > { %v7243_v2 = vld [vmem:[#allocation5 + $0x5a0] sm:$0xf]  ;;  %v6860_v3 = vor.u32 %v8932_v1, %v6859_v0  ;;  %v9028_v4 = vld [vmem:[#allocation5 + $0x5cc] sm:$0xf0]  ;;  %v8926_v9 = vld [vmem:[#allocation5 + $0x2a4] sm:$0xf] }
  0x44   : > { %v7627_v5 = vld [vmem:[#allocation5 + $0x8a0] sm:$0xf]  ;;  %v9124_v6 = vld [vmem:[#allocation5 + $0x8cc] sm:$0xf0]  ;;  %v7244_v7 = vor.u32 %v9028_v4, %v7243_v2  ;;  %v6861_v10 = vld [vmem:[#allocation5 + $0x2d0] sm:$0xf0] }
  0x45   : > { %v7628_v8 = vor.u32 %v9124_v6, %v7627_v5  ;;  %v6811_v11 = vld [vmem:[#allocation5 + $0x240] sm:$0xf]  ;;  %2146 = vmatpush.bf16.msra.mxu0 %v6860_v3  ;;  %v6864_v12 = vor.u32 %v8926_v9, %v6861_v10  ;;  %v8920_v13 = vld [vmem:[#allocation5 + $0x26c] sm:$0xf0]  ;;  %v8914_v20 = vld [vmem:[#allocation5 + $0x244] sm:$0xf] }
  0x46   : > { %v7195_v14 = vld [vmem:[#allocation5 + $0x540] sm:$0xf]  ;;  %v9016_v15 = vld [vmem:[#allocation5 + $0x56c] sm:$0xf0]  ;;  %2175 = vmatpush.bf16.msra.mxu1 %v7244_v7  ;;  %v6812_v16 = vor.u32 %v8920_v13, %v6811_v11  ;;  %v6813_v22 = vld [vmem:[#allocation5 + $0x270] sm:$0xf0] }
  0x47   : > { %2204 = vmatpush.bf16.msra.mxu2 %v7628_v8  ;;  %v7196_v17 = vor.u32 %v9016_v15, %v7195_v14  ;;  %v7579_v18 = vld [vmem:[#allocation5 + $0x840] sm:$0xf]  ;;  %v9112_v19 = vld [vmem:[#allocation5 + $0x86c] sm:$0xf0]  ;;  %2233 = vmatpush.bf16.msra.mxu3 %v6864_v12  ;;  %v6816_v25 = vor.u32 %v8914_v20, %v6813_v22  ;;  %v8902_v31 = vld [vmem:[#allocation5 + $0x1e4] sm:$0xf] }
  0x48   : > { %v7580_v21 = vor.u32 %v9112_v19, %v7579_v18  ;;  %v6763_v23 = vld [vmem:[#allocation5 + $0x1e0] sm:$0xf]  ;;  %v8908_v24 = vld [vmem:[#allocation5 + $0x20c] sm:$0xf0]  ;;  %v6765_v32 = vld [vmem:[#allocation5 + $0x210] sm:$0xf0] }
  0x49   : > { %v7147_v26 = vld [vmem:[#allocation5 + $0x4e0] sm:$0xf]  ;;  %v9004_v27 = vld [vmem:[#allocation5 + $0x50c] sm:$0xf0]  ;;  %2147 = vmatpush.bf16.msra.mxu0 %v6812_v16  ;;  %v6764_v29 = vor.u32 %v8908_v24, %v6763_v23  ;;  %v6768_v38 = vor.u32 %v8902_v31, %v6765_v32  ;;  %v8890_v42 = vld [vmem:[#allocation5 + $0x184] sm:$0xf] }
  0x4a   : > { %v7531_v28 = vld [vmem:[#allocation5 + $0x7e0] sm:$0xf]  ;;  %v9100_v30 = vld [vmem:[#allocation5 + $0x80c] sm:$0xf0]  ;;  %2176 = vmatpush.bf16.msra.mxu1 %v7196_v17  ;;  %v7148_v33 = vor.u32 %v9004_v27, %v7147_v26  ;;  %v6717_v43 = vld [vmem:[#allocation5 + $0x1b0] sm:$0xf0] }
  0x4b   : > { %2205 = vmatpush.bf16.msra.mxu2 %v7580_v21  ;;  %v7532_v34 = vor.u32 %v9100_v30, %v7531_v28  ;;  %v6715_v35 = vld [vmem:[#allocation5 + $0x180] sm:$0xf]  ;;  %v8896_v36 = vld [vmem:[#allocation5 + $0x1ac] sm:$0xf0]  ;;  %2234 = vmatpush.bf16.msra.mxu3 %v6816_v25  ;;  %v6720_v50 = vor.u32 %v8890_v42, %v6717_v43  ;;  %v8878_v54 = vld [vmem:[#allocation5 + $0x124] sm:$0xf] }
  0x4c   : > { %v7099_v37 = vld [vmem:[#allocation5 + $0x480] sm:$0xf]  ;;  %v8992_v39 = vld [vmem:[#allocation5 + $0x4ac] sm:$0xf0]  ;;  %v6716_v44 = vor.u32 %v8896_v36, %v6715_v35  ;;  %v6669_v55 = vld [vmem:[#allocation5 + $0x150] sm:$0xf0] }
  0x4d   : > { %v7483_v40 = vld [vmem:[#allocation5 + $0x780] sm:$0xf]  ;;  %v9088_v41 = vld [vmem:[#allocation5 + $0x7ac] sm:$0xf0]  ;;  %2148 = vmatpush.bf16.msra.mxu0 %v6764_v29  ;;  %v7100_v45 = vor.u32 %v8992_v39, %v7099_v37  ;;  %v6672_v62 = vor.u32 %v8878_v54, %v6669_v55  ;;  %v8866_v2 = vld [vmem:[#allocation5 + $0xc4] sm:$0xf] }
  0x4e   : > { %2177 = vmatpush.bf16.msra.mxu1 %v7148_v33  ;;  %v7484_v46 = vor.u32 %v9088_v41, %v7483_v40  ;;  %v6667_v47 = vld [vmem:[#allocation5 + $0x120] sm:$0xf]  ;;  %v8884_v48 = vld [vmem:[#allocation5 + $0x14c] sm:$0xf0]  ;;  %v6621_v3 = vld [vmem:[#allocation5 + $0xf0] sm:$0xf0] }
  0x4f   : > { %2206 = vmatpush.bf16.msra.mxu2 %v7532_v34  ;;  %v7051_v49 = vld [vmem:[#allocation5 + $0x420] sm:$0xf]  ;;  %2235 = vmatpush.bf16.msra.mxu3 %v6768_v38  ;;  %v8980_v51 = vld [vmem:[#allocation5 + $0x44c] sm:$0xf0]  ;;  %v6668_v56 = vor.u32 %v8884_v48, %v6667_v47  ;;  %v6624_v10 = vor.u32 %v8866_v2, %v6621_v3  ;;  %v8854_v14 = vld [vmem:[#allocation5 + $0x64] sm:$0xf] }
  0x50   : > { %v7435_v52 = vld [vmem:[#allocation5 + $0x720] sm:$0xf]  ;;  %v9076_v53 = vld [vmem:[#allocation5 + $0x74c] sm:$0xf0]  ;;  %v7052_v57 = vor.u32 %v8980_v51, %v7051_v49  ;;  %v6573_v15 = vld [vmem:[#allocation5 + $0x90] sm:$0xf0] }
  0x51   : > { %2149 = vmatpush.bf16.msra.mxu0 %v6716_v44  ;;  %v7436_v58 = vor.u32 %v9076_v53, %v7435_v52  ;;  %v6619_v59 = vld [vmem:[#allocation5 + $0xc0] sm:$0xf]  ;;  %v8872_v60 = vld [vmem:[#allocation5 + $0xec] sm:$0xf0]  ;;  %v6576_v25 = vor.u32 %v8854_v14, %v6573_v15  ;;  %v8842_v26 = vld [vmem:[#allocation5 + $0x4] sm:$0xf] }
  0x52   : > { %2178 = vmatpush.bf16.msra.mxu1 %v7100_v45  ;;  %v7003_v61 = vld [vmem:[#allocation5 + $0x3c0] sm:$0xf]  ;;  %v8968_v63 = vld [vmem:[#allocation5 + $0x3ec] sm:$0xf0]  ;;  %v6620_v4 = vor.u32 %v8872_v60, %v6619_v59  ;;  %v6525_v27 = vld [vmem:[#allocation5 + $0x30] sm:$0xf0] }
  0x53   : > { %2207 = vmatpush.bf16.msra.mxu2 %v7484_v46  ;;  %2236 = vmatpush.bf16.msra.mxu3 %v6720_v50  ;;  %v7387_v0 = vld [vmem:[#allocation5 + $0x6c0] sm:$0xf]  ;;  %v9064_v1 = vld [vmem:[#allocation5 + $0x6ec] sm:$0xf0]  ;;  %v7004_v5 = vor.u32 %v8968_v63, %v7003_v61  ;;  %v8831_v29 = vld [vmem:[%s9910_s6 + $0x8] sm:$0xf0]  ;;  %v6528_v41 = vor.u32 %v8842_v26, %v6525_v27 }
  0x54   : > { %v7388_v6 = vor.u32 %v9064_v1, %v7387_v0  ;;  %v6571_v7 = vld [vmem:[#allocation5 + $0x60] sm:$0xf]  ;;  %v8860_v8 = vld [vmem:[#allocation5 + $0x8c] sm:$0xf0]  ;;  %v6867_v30 = vld [vmem:[#allocation5 + $0x2a8] sm:$0xf] }
  0x55   : > { %2150 = vmatpush.bf16.msra.mxu0 %v6668_v56  ;;  %v6955_v9 = vld [vmem:[#allocation5 + $0x360] sm:$0xf]  ;;  %v8956_v11 = vld [vmem:[#allocation5 + $0x38c] sm:$0xf0]  ;;  %v6572_v16 = vor.u32 %v8860_v8, %v6571_v7  ;;  %v8933_v31 = vld [vmem:[#allocation5 + $0x2d4] sm:$0xf0] }
  0x56   : > { %2179 = vmatpush.bf16.msra.mxu1 %v7052_v57  ;;  %v7339_v12 = vld [vmem:[#allocation5 + $0x660] sm:$0xf]  ;;  %v9052_v13 = vld [vmem:[#allocation5 + $0x68c] sm:$0xf0]  ;;  %v6956_v20 = vor.u32 %v8956_v11, %v6955_v9  ;;  %v8830_v33 = vld [vmem:[%s9910_s6 + $0x4] sm:$0xf]  ;;  %v6868_v42 = vor.u32 %v8933_v31, %v6867_v30 }
  0x57   : > { %2208 = vmatpush.bf16.msra.mxu2 %v7436_v58  ;;  %2237 = vmatpush.bf16.msra.mxu3 %v6672_v62  ;;  %v6523_v17 = vld [vmem:[#allocation5] sm:$0xf]  ;;  %v8848_v18 = vld [vmem:[#allocation5 + $0x2c] sm:$0xf0]  ;;  %v7340_v21 = vor.u32 %v9052_v13, %v7339_v12  ;;  %v7251_v34 = vld [vmem:[#allocation5 + $0x5a8] sm:$0xf] }
  0x58   : > { %v6907_v19 = vld [vmem:[#allocation5 + $0x300] sm:$0xf]  ;;  %v8944_v22 = vld [vmem:[#allocation5 + $0x32c] sm:$0xf0]  ;;  %v6524_v32 = vor.u32 %v8848_v18, %v6523_v17  ;;  %v9029_v35 = vld [vmem:[#allocation5 + $0x5d4] sm:$0xf0] }
  0x59   : > { %2151 = vmatpush.bf16.msra.mxu0 %v6620_v4  ;;  %v7291_v23 = vld [vmem:[#allocation5 + $0x600] sm:$0xf]  ;;  %v9040_v24 = vld [vmem:[#allocation5 + $0x62c] sm:$0xf0]  ;;  %v6908_v36 = vor.u32 %v8944_v22, %v6907_v19  ;;  %v6483_v39 = vld [vmem:[%s9910_s6 + $0x8] sm:$0xf]  ;;  %v7252_v47 = vor.u32 %v9029_v35, %v7251_v34 }
  0x5a   : > { %2180 = vmatpush.bf16.msra.mxu1 %v7004_v5  ;;  %v6475_v28 = vld [vmem:[%s9910_s6] sm:$0xf]  ;;  %v7292_v37 = vor.u32 %v9040_v24, %v7291_v23  ;;  %v6477_v38 = vld [vmem:[%s9910_s6 + $0xc] sm:$0xf0]  ;;  %v8832_v40 = vld [vmem:[%s9910_s6 + $0x10] sm:$0xf0] }
  0x5b   : > { %2209 = vmatpush.bf16.msra.mxu2 %v7388_v6  ;;  %2238 = vmatpush.bf16.msra.mxu3 %v6624_v10  ;;  %v9022_v43 = vld [vmem:[#allocation5 + $0x5a4] sm:$0xf]  ;;  %v7245_v44 = vld [vmem:[#allocation5 + $0x5d0] sm:$0xf0]  ;;  %v9930_v46 = vor.u32 %v8831_v29, %v6475_v28  ;;  %v6819_v49 = vld [vmem:[#allocation5 + $0x248] sm:$0xf]  ;;  %v9932_v51 = vor.u32 %v8830_v33, %v6477_v38  ;;  %v9934_v52 = vor.u32 %v8832_v40, %v6483_v39 }
  0x5c   : > { %v9118_v45 = vld [vmem:[#allocation5 + $0x8a4] sm:$0xf]  ;;  %v7629_v48 = vld [vmem:[#allocation5 + $0x8d0] sm:$0xf0]  ;;  %v8921_v50 = vld [vmem:[#allocation5 + $0x274] sm:$0xf0]  ;;  %v7248_v55 = vor.u32 %v9022_v43, %v7245_v44 }
  0x5d   : > { %2152 = vmatpush.bf16.msra.mxu0 %v6572_v16  ;;  %v7203_v53 = vld [vmem:[#allocation5 + $0x548] sm:$0xf]  ;;  %v9017_v54 = vld [vmem:[#allocation5 + $0x574] sm:$0xf0]  ;;  %v7632_v56 = vor.u32 %v9118_v45, %v7629_v48  ;;  %v6820_v57 = vor.u32 %v8921_v50, %v6819_v49  ;;  %v9010_v58 = vld [vmem:[#allocation5 + $0x544] sm:$0xf] }
  0x5e   : > { %2181 = vmatpush.bf16.msra.mxu1 %v6956_v20  ;;  %v7197_v59 = vld [vmem:[#allocation5 + $0x570] sm:$0xf0]  ;;  %v9106_v60 = vld [vmem:[#allocation5 + $0x844] sm:$0xf]  ;;  %v7204_v61 = vor.u32 %v9017_v54, %v7203_v53  ;;  %v6771_v63 = vld [vmem:[#allocation5 + $0x1e8] sm:$0xf] }
  0x5f   : > { %2210 = vmatpush.bf16.msra.mxu2 %v7340_v21  ;;  %2239 = vmatpush.bf16.msra.mxu3 %v6576_v25  ;;  %v7581_v62 = vld [vmem:[#allocation5 + $0x870] sm:$0xf0]  ;;  %v8909_v0 = vld [vmem:[#allocation5 + $0x214] sm:$0xf0]  ;;  %v7155_v1 = vld [vmem:[#allocation5 + $0x4e8] sm:$0xf]  ;;  %v7200_v3 = vor.u32 %v9010_v58, %v7197_v59 }
  0x60   : > { %v9005_v2 = vld [vmem:[#allocation5 + $0x514] sm:$0xf0]  ;;  %v7584_v4 = vor.u32 %v9106_v60, %v7581_v62  ;;  %v6772_v5 = vor.u32 %v8909_v0, %v6771_v63  ;;  %v8998_v6 = vld [vmem:[#allocation5 + $0x4e4] sm:$0xf]  ;;  %v7149_v7 = vld [vmem:[#allocation5 + $0x510] sm:$0xf0] }
  0x61   : > { %2153 = vmatpush.bf16.msra.mxu0 %v6524_v32  ;;  %v9094_v8 = vld [vmem:[#allocation5 + $0x7e4] sm:$0xf]  ;;  %v7156_v9 = vor.u32 %v9005_v2, %v7155_v1  ;;  %v7533_v10 = vld [vmem:[#allocation5 + $0x810] sm:$0xf0]  ;;  %v6723_v11 = vld [vmem:[#allocation5 + $0x188] sm:$0xf]  ;;  %v7152_v15 = vor.u32 %v8998_v6, %v7149_v7 }
  0x62   : > { %2182 = vmatpush.bf16.msra.mxu1 %v6908_v36  ;;  %v8897_v12 = vld [vmem:[#allocation5 + $0x1b4] sm:$0xf0]  ;;  %v7107_v13 = vld [vmem:[#allocation5 + $0x488] sm:$0xf]  ;;  %v8834_v17 = vld [vmem:[%s9910_s6 + $0x20] sm:$0xf0]  ;;  %v7536_v18 = vor.u32 %v9094_v8, %v7533_v10 }
  0x63   : > { %2211 = vmatpush.bf16.msra.mxu2 %v7292_v37  ;;  %2240 = vmatpush.bf16.msra.mxu3 %v6528_v41  ;;  %v8993_v14 = vld [vmem:[#allocation5 + $0x4b4] sm:$0xf0]  ;;  %v6724_v19 = vor.u32 %v8897_v12, %v6723_v11  ;;  %v8986_v20 = vld [vmem:[#allocation5 + $0x484] sm:$0xf]  ;;  %v7101_v21 = vld [vmem:[#allocation5 + $0x4b0] sm:$0xf0] }
  0x64   : > { %2154 = vmatmul.bf16.vlgmr.msra.gmra.mxu0 %v9930_v46  ;;  %v6487_v16 = vld [vmem:[%s9910_s6 + $0x18] sm:$0xf]  ;;  %v9082_v22 = vld [vmem:[#allocation5 + $0x784] sm:$0xf]  ;;  %v7108_v23 = vor.u32 %v8993_v14, %v7107_v13  ;;  %v7485_v24 = vld [vmem:[#allocation5 + $0x7b0] sm:$0xf0]  ;;  %v7104_v33 = vor.u32 %v8986_v20, %v7101_v21 }
  0x65   : > { %2183 = vmatmul.bf16.vlgmr.msra.gmra.mxu1 %v9932_v51  ;;  %2262 = vmatpush.bf16.msrb.mxu0 %v7248_v55  ;;  %v6675_v25 = vld [vmem:[#allocation5 + $0x128] sm:$0xf]  ;;  %v8885_v26 = vld [vmem:[#allocation5 + $0x154] sm:$0xf0]  ;;  %v8833_v27 = vld [vmem:[%s9910_s6 + $0x1c] sm:$0xf]  ;;  %v7488_v34 = vor.u32 %v9082_v22, %v7485_v24  ;;  %v9946_v39 = vor.u32 %v8834_v17, %v6487_v16 }
  0x66   : > { %2212 = vmatmul.bf16.vlgmr.msra.gmra.mxu2 %v9934_v52  ;;  %2241 = vmatmul.bf16.vlgmr.msra.gmra.mxu3 %v9930_v46  ;;  %v7059_v28 = vld [vmem:[#allocation5 + $0x428] sm:$0xf]  ;;  %v8981_v29 = vld [vmem:[#allocation5 + $0x454] sm:$0xf0]  ;;  %v6495_v31 = vld [vmem:[%s9910_s6 + $0x20] sm:$0xf]  ;;  %v6676_v35 = vor.u32 %v8885_v26, %v6675_v25 }
  0x67   : > { %2320 = vmatpush.bf16.msrb.mxu2 %v6868_v42  ;;  %2349 = vmatpush.bf16.msrb.mxu3 %v7252_v47  ;;  %v6489_v30 = vld [vmem:[%s9910_s6 + $0x24] sm:$0xf0]  ;;  %v8835_v32 = vld [vmem:[%s9910_s6 + $0x28] sm:$0xf0]  ;;  %v8974_v36 = vld [vmem:[#allocation5 + $0x424] sm:$0xf]  ;;  %v7060_v40 = vor.u32 %v8981_v29, %v7059_v28 }
  0x68   : > { %2291 = vmatpush.bf16.msrb.mxu1 %v7632_v56  ;;  %v7053_v37 = vld [vmem:[#allocation5 + $0x450] sm:$0xf0]  ;;  %v9070_v38 = vld [vmem:[#allocation5 + $0x724] sm:$0xf]  ;;  %v6627_v42 = vld [vmem:[#allocation5 + $0xc8] sm:$0xf]  ;;  %v9948_v44 = vor.u32 %v8833_v27, %v6489_v30  ;;  %v9950_v45 = vor.u32 %v8835_v32, %v6495_v31 }
  0x69   : > { %2263 = vmatpush.bf16.msrb.mxu0 %v7200_v3  ;;  %v7437_v41 = vld [vmem:[#allocation5 + $0x750] sm:$0xf0]  ;;  %v8873_v43 = vld [vmem:[#allocation5 + $0xf4] sm:$0xf0]  ;;  %v7011_v47 = vld [vmem:[#allocation5 + $0x3c8] sm:$0xf]  ;;  %v7056_v49 = vor.u32 %v8974_v36, %v7053_v37 }
  0x6a   : > { %v8969_v48 = vld [vmem:[#allocation5 + $0x3f4] sm:$0xf0]  ;;  %v7440_v50 = vor.u32 %v9070_v38, %v7437_v41  ;;  %v6628_v53 = vor.u32 %v8873_v43, %v6627_v42  ;;  %v8962_v54 = vld [vmem:[#allocation5 + $0x3c4] sm:$0xf]  ;;  %v7005_v55 = vld [vmem:[#allocation5 + $0x3f0] sm:$0xf0] }
  0x6b   : > { %2321 = vmatpush.bf16.msrb.mxu2 %v6820_v57  ;;  %2350 = vmatpush.bf16.msrb.mxu3 %v7204_v61  ;;  %v7012_v56 = vor.u32 %v8969_v48, %v7011_v47  ;;  %v9058_v57 = vld [vmem:[#allocation5 + $0x6c4] sm:$0xf]  ;;  %v7389_v58 = vld [vmem:[#allocation5 + $0x6f0] sm:$0xf0]  ;;  %v7008_v59 = vor.u32 %v8962_v54, %v7005_v55  ;;  %v6579_v60 = vld [vmem:[#allocation5 + $0x68] sm:$0xf] }
  0x6c   : > { %2292 = vmatpush.bf16.msrb.mxu1 %v7584_v4  ;;  %v8861_v61 = vld [vmem:[#allocation5 + $0x94] sm:$0xf0]  ;;  %v8950_v62 = vld [vmem:[#allocation5 + $0x364] sm:$0xf]  ;;  %v7392_v63 = vor.u32 %v9058_v57, %v7389_v58  ;;  %v6957_v1 = vld [vmem:[#allocation5 + $0x390] sm:$0xf0] }
  0x6d   : > { %2264 = vmatpush.bf16.msrb.mxu0 %v7152_v15  ;;  %v6580_v0 = vor.u32 %v8861_v61, %v6579_v60  ;;  %v6963_v2 = vld [vmem:[#allocation5 + $0x368] sm:$0xf]  ;;  %v8957_v3 = vld [vmem:[#allocation5 + $0x394] sm:$0xf0]  ;;  %v7341_v6 = vld [vmem:[#allocation5 + $0x690] sm:$0xf0] }
  0x6e   : > { %v6964_v4 = vor.u32 %v8957_v3, %v6963_v2  ;;  %v6531_v7 = vld [vmem:[#allocation5 + $0x8] sm:$0xf]  ;;  %v8849_v8 = vld [vmem:[#allocation5 + $0x34] sm:$0xf0]  ;;  %v8938_v14 = vld [vmem:[#allocation5 + $0x304] sm:$0xf] }
  0x6f   : > { %2322 = vmatpush.bf16.msrb.mxu2 %v6772_v5  ;;  %2351 = vmatpush.bf16.msrb.mxu3 %v7156_v9  ;;  %v9046_v5 = vld [vmem:[#allocation5 + $0x664] sm:$0xf]  ;;  %v6960_v9 = vor.u32 %v8950_v62, %v6957_v1  ;;  %v6915_v10 = vld [vmem:[#allocation5 + $0x308] sm:$0xf]  ;;  %v8945_v11 = vld [vmem:[#allocation5 + $0x334] sm:$0xf0]  ;;  %v6532_v13 = vor.u32 %v8849_v8, %v6531_v7 }
  0x70   : > { %2293 = vmatpush.bf16.msrb.mxu1 %v7536_v18  ;;  %v7344_v12 = vor.u32 %v9046_v5, %v7341_v6  ;;  %v6909_v15 = vld [vmem:[#allocation5 + $0x330] sm:$0xf0]  ;;  %v6916_v16 = vor.u32 %v8945_v11, %v6915_v10  ;;  %v9034_v17 = vld [vmem:[#allocation5 + $0x604] sm:$0xf]  ;;  %v8837_v20 = vld [vmem:[%s9910_s6 + $0x38] sm:$0xf0] }
  0x71   : > { %2265 = vmatpush.bf16.msrb.mxu0 %v7104_v33  ;;  %v7293_v18 = vld [vmem:[#allocation5 + $0x630] sm:$0xf0]  ;;  %v6501_v22 = vld [vmem:[%s9910_s6 + $0x3c] sm:$0xf0]  ;;  %v8838_v24 = vld [vmem:[%s9910_s6 + $0x40] sm:$0xf0]  ;;  %v6912_v25 = vor.u32 %v8938_v14, %v6909_v15 }
  0x72   : > { %v8836_v21 = vld [vmem:[%s9910_s6 + $0x34] sm:$0xf]  ;;  %v7296_v26 = vor.u32 %v9034_v17, %v7293_v18  ;;  %v9023_v30 = vld [vmem:[#allocation5 + $0x5ac] sm:$0xf]  ;;  %v7253_v31 = vld [vmem:[#allocation5 + $0x5d8] sm:$0xf0] }
  0x73   : > { %2323 = vmatpush.bf16.msrb.mxu2 %v6724_v19  ;;  %2352 = vmatpush.bf16.msrb.mxu3 %v7108_v23  ;;  %v6499_v19 = vld [vmem:[%s9910_s6 + $0x30] sm:$0xf]  ;;  %v6507_v23 = vld [vmem:[%s9910_s6 + $0x38] sm:$0xf]  ;;  %v9964_v28 = vor.u32 %v8836_v21, %v6501_v22  ;;  %v7635_v32 = vld [vmem:[#allocation5 + $0x8a8] sm:$0xf]  ;;  %v7256_v33 = vor.u32 %v9023_v30, %v7253_v31 }
  0x74   : > { %2294 = vmatpush.bf16.msrb.mxu1 %v7488_v34  ;;  %2159 = vmatmul.bf16.gmra.mxu0 %v9946_v39  ;;  %v9962_v27 = vor.u32 %v8837_v20, %v6499_v19  ;;  %v9966_v29 = vor.u32 %v8838_v24, %v6507_v23  ;;  %v9125_v34 = vld [vmem:[#allocation5 + $0x8d4] sm:$0xf0]  ;;  %v7637_v36 = vld [vmem:[#allocation5 + $0x8d8] sm:$0xf0]  ;;  %v9011_v42 = vld [vmem:[#allocation5 + $0x54c] sm:$0xf] }
  0x75   : > { %2188 = vmatmul.bf16.gmra.mxu1 %v9948_v44  ;;  %2266 = vmatpush.bf16.msrb.mxu0 %v7056_v49  ;;  %v7636_v37 = vor.u32 %v9125_v34, %v7635_v32  ;;  %v6869_v41 = vld [vmem:[#allocation5 + $0x2d8] sm:$0xf0]  ;;  %v7587_v48 = vld [vmem:[#allocation5 + $0x848] sm:$0xf]  ;;  %v9113_v49 = vld [vmem:[#allocation5 + $0x874] sm:$0xf0] }
  0x76   : > { %2217 = vmatmul.bf16.gmra.mxu2 %v9950_v45  ;;  %2246 = vmatmul.bf16.gmra.mxu3 %v9946_v39  ;;  %v7205_v47 = vld [vmem:[#allocation5 + $0x578] sm:$0xf0]  ;;  %v9107_v54 = vld [vmem:[#allocation5 + $0x84c] sm:$0xf]  ;;  %v6511_v60 = vld [vmem:[%s9910_s6 + $0x48] sm:$0xf] }
  0x77   : > { %2324 = vmatpush.bf16.msrb.mxu2 %v6676_v35  ;;  %2353 = vmatpush.bf16.msrb.mxu3 %v7060_v40  ;;  %v9119_v35 = vld [vmem:[#allocation5 + $0x8ac] sm:$0xf]  ;;  %v7589_v55 = vld [vmem:[#allocation5 + $0x878] sm:$0xf0]  ;;  %v8840_v61 = vld [vmem:[%s9910_s6 + $0x50] sm:$0xf0] }
  0x78   : > { %2295 = vmatpush.bf16.msrb.mxu1 %v7440_v50  ;;  %v7640_v38 = vor.u32 %v9119_v35, %v7637_v36  ;;  %v8927_v40 = vld [vmem:[#allocation5 + $0x2ac] sm:$0xf]  ;;  %v7208_v50 = vor.u32 %v9011_v42, %v7205_v47  ;;  %v7592_v57 = vor.u32 %v9107_v54, %v7589_v55  ;;  %v6821_v58 = vld [vmem:[#allocation5 + $0x278] sm:$0xf0]  ;;  %v9978_v2 = vor.u32 %v8840_v61, %v6511_v60  ;;  %v7539_v7 = vld [vmem:[#allocation5 + $0x7e8] sm:$0xf] }
  0x79   : > { %2267 = vmatpush.bf16.msrb.mxu0 %v7008_v59  ;;  %v6872_v43 = vor.u32 %v8927_v40, %v6869_v41  ;;  %v8839_v62 = vld [vmem:[%s9910_s6 + $0x4c] sm:$0xf]  ;;  %v8841_v1 = vld [vmem:[%s9910_s6 + $0x58] sm:$0xf0]  ;;  %v7491_v19 = vld [vmem:[#allocation5 + $0x788] sm:$0xf] }
  0x7a   : > { %v8999_v5 = vld [vmem:[#allocation5 + $0x4ec] sm:$0xf]  ;;  %v7157_v6 = vld [vmem:[#allocation5 + $0x518] sm:$0xf0]  ;;  %v9089_v20 = vld [vmem:[#allocation5 + $0x7b4] sm:$0xf0] }
  0x7b   : > { %2325 = vmatpush.bf16.msrb.mxu2 %v6628_v53  ;;  %2354 = vmatpush.bf16.msrb.mxu3 %v7012_v56  ;;  %v7588_v53 = vor.u32 %v9113_v49, %v7587_v48  ;;  %v8915_v56 = vld [vmem:[#allocation5 + $0x24c] sm:$0xf]  ;;  %v7160_v8 = vor.u32 %v8999_v5, %v7157_v6  ;;  %v7541_v11 = vld [vmem:[#allocation5 + $0x818] sm:$0xf0]  ;;  %v7492_v22 = vor.u32 %v9089_v20, %v7491_v19  ;;  %v7443_v34 = vld [vmem:[#allocation5 + $0x728] sm:$0xf] }
  0x7c   : > { %2296 = vmatpush.bf16.msrb.mxu1 %v7392_v63  ;;  %v6824_v59 = vor.u32 %v8915_v56, %v6821_v58  ;;  %v6513_v63 = vld [vmem:[%s9910_s6 + $0x54] sm:$0xf0]  ;;  %v9095_v10 = vld [vmem:[#allocation5 + $0x7ec] sm:$0xf]  ;;  %v6773_v15 = vld [vmem:[#allocation5 + $0x218] sm:$0xf0] }
  0x7d   : > { %2268 = vmatpush.bf16.msrb.mxu0 %v6960_v9  ;;  %v9980_v3 = vor.u32 %v8839_v62, %v6513_v63  ;;  %v9101_v9 = vld [vmem:[#allocation5 + $0x814] sm:$0xf0]  ;;  %v8903_v14 = vld [vmem:[#allocation5 + $0x1ec] sm:$0xf]  ;;  %v7109_v18 = vld [vmem:[#allocation5 + $0x4b8] sm:$0xf0] }
  0x7e   : > { %v6776_v17 = vor.u32 %v8903_v14, %v6773_v15  ;;  %v9083_v23 = vld [vmem:[#allocation5 + $0x78c] sm:$0xf]  ;;  %v7493_v24 = vld [vmem:[#allocation5 + $0x7b8] sm:$0xf0]  ;;  %v9077_v36 = vld [vmem:[#allocation5 + $0x754] sm:$0xf0] }
  0x7f   : > { %2326 = vmatpush.bf16.msrb.mxu2 %v6580_v0  ;;  %2355 = vmatpush.bf16.msrb.mxu3 %v6964_v4  ;;  %v6519_v0 = vld [vmem:[%s9910_s6 + $0x50] sm:$0xf]  ;;  %v6725_v30 = vld [vmem:[#allocation5 + $0x1b8] sm:$0xf0]  ;;  %v8975_v32 = vld [vmem:[#allocation5 + $0x42c] sm:$0xf]  ;;  %v7444_v40 = vor.u32 %v9077_v36, %v7443_v34 }
  0x80   : > { %2297 = vmatpush.bf16.msrb.mxu1 %v7344_v12  ;;  %v9982_v4 = vor.u32 %v8841_v1, %v6519_v0  ;;  %v7540_v12 = vor.u32 %v9101_v9, %v7539_v7  ;;  %v8879_v42 = vld [vmem:[#allocation5 + $0x12c] sm:$0xf]  ;;  %v7013_v49 = vld [vmem:[#allocation5 + $0x3f8] sm:$0xf0]  ;;  %v7347_v0 = vld [vmem:[#allocation5 + $0x668] sm:$0xf] }
  0x81   : > { %2269 = vmatpush.bf16.msrb.mxu0 %v6912_v25  ;;  %v8891_v25 = vld [vmem:[#allocation5 + $0x18c] sm:$0xf]  ;;  %v6629_v60 = vld [vmem:[#allocation5 + $0xf8] sm:$0xf0]  ;;  %v9053_v5 = vld [vmem:[#allocation5 + $0x694] sm:$0xf0] }
  0x82   : > { %v6728_v31 = vor.u32 %v8891_v25, %v6725_v30  ;;  %v8963_v47 = vld [vmem:[#allocation5 + $0x3cc] sm:$0xf]  ;;  %v6965_v63 = vld [vmem:[#allocation5 + $0x398] sm:$0xf0]  ;;  %v7299_v15 = vld [vmem:[#allocation5 + $0x608] sm:$0xf] }
  0x83   : > { %2327 = vmatpush.bf16.msrb.mxu2 %v6532_v13  ;;  %2356 = vmatpush.bf16.msrb.mxu3 %v6916_v16  ;;  %v7544_v13 = vor.u32 %v9095_v10, %v7541_v11  ;;  %v8987_v16 = vld [vmem:[#allocation5 + $0x48c] sm:$0xf]  ;;  %v7016_v54 = vor.u32 %v8963_v47, %v7013_v49  ;;  %v7349_v7 = vld [vmem:[#allocation5 + $0x698] sm:$0xf0]  ;;  %v7643_v25 = vld [vmem:[#allocation5 + $0x8b0] sm:$0xf] }
  0x84   : > { %2298 = vmatpush.bf16.msrb.mxu1 %v7296_v26  ;;  %2164 = vmatmul.bf16.gmra.mxu0 %v9962_v27  ;;  %v7112_v21 = vor.u32 %v8987_v16, %v7109_v18  ;;  %v7496_v26 = vor.u32 %v9083_v23, %v7493_v24  ;;  %v9059_v56 = vld [vmem:[#allocation5 + $0x6cc] sm:$0xf]  ;;  %v6581_v11 = vld [vmem:[#allocation5 + $0x98] sm:$0xf0]  ;;  %v9041_v16 = vld [vmem:[#allocation5 + $0x634] sm:$0xf0] }
  0x85   : > { %2193 = vmatmul.bf16.gmra.mxu1 %v9964_v28  ;;  %2378 = vmatpush.bf16.msra.mxu0 %v7636_v37  ;;  %v9071_v37 = vld [vmem:[#allocation5 + $0x72c] sm:$0xf]  ;;  %v6917_v14 = vld [vmem:[#allocation5 + $0x338] sm:$0xf0]  ;;  %v7300_v18 = vor.u32 %v9041_v16, %v7299_v15  ;;  %v6875_v30 = vld [vmem:[#allocation5 + $0x2b0] sm:$0xf] }
  0x86   : > { %2222 = vmatmul.bf16.gmra.mxu2 %v9966_v29  ;;  %2251 = vmatmul.bf16.gmra.mxu3 %v9962_v27  ;;  %v8867_v58 = vld [vmem:[#allocation5 + $0xcc] sm:$0xf]  ;;  %v7301_v20 = vld [vmem:[#allocation5 + $0x638] sm:$0xf0]  ;;  %v6877_v34 = vld [vmem:[#allocation5 + $0x2e0] sm:$0xf0] }
  0x87   : > { %2436 = vmatpush.bf16.msra.mxu2 %v7256_v33  ;;  %2465 = vmatpush.bf16.msra.mxu3 %v7640_v38  ;;  %v7061_v33 = vld [vmem:[#allocation5 + $0x458] sm:$0xf0]  ;;  %v6632_v61 = vor.u32 %v8867_v58, %v6629_v60  ;;  %v8951_v62 = vld [vmem:[#allocation5 + $0x36c] sm:$0xf]  ;;  %v8916_v49 = vld [vmem:[#allocation5 + $0x254] sm:$0xf] }
  0x88   : > { %2407 = vmatpush.bf16.msra.mxu1 %v6872_v43  ;;  %v7064_v35 = vor.u32 %v8975_v32, %v7061_v33  ;;  %v7445_v38 = vld [vmem:[#allocation5 + $0x758] sm:$0xf0]  ;;  %v6968_v1 = vor.u32 %v8951_v62, %v6965_v63  ;;  %v9047_v6 = vld [vmem:[#allocation5 + $0x66c] sm:$0xf]  ;;  %v8934_v32 = vld [vmem:[#allocation5 + $0x2dc] sm:$0xf0] }
  0x89   : > { %2379 = vmatpush.bf16.msra.mxu0 %v7588_v53  ;;  %v7448_v41 = vor.u32 %v9071_v37, %v7445_v38  ;;  %v6677_v43 = vld [vmem:[#allocation5 + $0x158] sm:$0xf0]  ;;  %v9065_v53 = vld [vmem:[#allocation5 + $0x6f4] sm:$0xf0]  ;;  %v7352_v9 = vor.u32 %v9047_v6, %v7349_v7  ;;  %v8855_v10 = vld [vmem:[#allocation5 + $0x6c] sm:$0xf] }
  0x8a   : > { %v6680_v48 = vor.u32 %v8879_v42, %v6677_v43  ;;  %v9035_v19 = vld [vmem:[#allocation5 + $0x60c] sm:$0xf]  ;;  %v6533_v23 = vld [vmem:[#allocation5 + $0x38] sm:$0xf0]  ;;  %v8928_v33 = vld [vmem:[#allocation5 + $0x2b4] sm:$0xf] }
  0x8b   : > { %2437 = vmatpush.bf16.msra.mxu2 %v7208_v50  ;;  %2466 = vmatpush.bf16.msra.mxu3 %v7592_v57  ;;  %v7395_v50 = vld [vmem:[#allocation5 + $0x6c8] sm:$0xf]  ;;  %v7397_v57 = vld [vmem:[#allocation5 + $0x6f8] sm:$0xf0]  ;;  %v6880_v36 = vor.u32 %v8928_v33, %v6877_v34  ;;  %v7259_v37 = vld [vmem:[#allocation5 + $0x5b0] sm:$0xf] }
  0x8c   : > { %2408 = vmatpush.bf16.msra.mxu1 %v6824_v59  ;;  %v7396_v55 = vor.u32 %v9065_v53, %v7395_v50  ;;  %v7400_v59 = vor.u32 %v9059_v56, %v7397_v57  ;;  %v9030_v38 = vld [vmem:[#allocation5 + $0x5dc] sm:$0xf0]  ;;  %v6827_v43 = vld [vmem:[#allocation5 + $0x250] sm:$0xf]  ;;  %v6829_v50 = vld [vmem:[#allocation5 + $0x280] sm:$0xf0] }
  0x8d   : > { %2380 = vmatpush.bf16.msra.mxu0 %v7540_v12  ;;  %v8939_v12 = vld [vmem:[#allocation5 + $0x30c] sm:$0xf]  ;;  %v9114_v42 = vld [vmem:[#allocation5 + $0x87c] sm:$0xf0]  ;;  %v7547_v58 = vld [vmem:[#allocation5 + $0x7f0] sm:$0xf] }
  0x8e   : > { %v9018_v56 = vld [vmem:[#allocation5 + $0x57c] sm:$0xf0]  ;;  %v6779_v60 = vld [vmem:[#allocation5 + $0x1f0] sm:$0xf]  ;;  %v8904_v63 = vld [vmem:[#allocation5 + $0x1f4] sm:$0xf] }
  0x8f   : > { %2438 = vmatpush.bf16.msra.mxu2 %v7160_v8  ;;  %2467 = vmatpush.bf16.msra.mxu3 %v7544_v13  ;;  %v7348_v8 = vor.u32 %v9053_v5, %v7347_v0  ;;  %v6584_v13 = vor.u32 %v8855_v10, %v6581_v11  ;;  %v8910_v62 = vld [vmem:[#allocation5 + $0x21c] sm:$0xf0]  ;;  %v6781_v0 = vld [vmem:[#allocation5 + $0x220] sm:$0xf0]  ;;  %v7163_v7 = vld [vmem:[#allocation5 + $0x4f0] sm:$0xf] }
  0x90   : > { %2409 = vmatpush.bf16.msra.mxu1 %v6776_v17  ;;  %v6920_v17 = vor.u32 %v8939_v12, %v6917_v14  ;;  %v6784_v5 = vor.u32 %v8904_v63, %v6781_v0  ;;  %v10004_v6 = vld [vmem:[#allocation7] sm:$0xff]  ;;  %v7499_v10 = vld [vmem:[#allocation5 + $0x790] sm:$0xf]  ;;  %v8892_v15 = vld [vmem:[#allocation5 + $0x194] sm:$0xf]  ;;  %s9421_s24 = smul.u32 192, %s9906_s1 }
  0x91   : > { %2381 = vmatpush.bf16.msra.mxu0 %v7492_v22  ;;  %v7304_v22 = vor.u32 %v9035_v19, %v7301_v20  ;;  %v9090_v11 = vld [vmem:[#allocation5 + $0x7bc] sm:$0xf0]  ;;  %v6731_v12 = vld [vmem:[#allocation5 + $0x190] sm:$0xf]  ;;  %v6733_v16 = vld [vmem:[#allocation5 + $0x1c0] sm:$0xf0] }
  0x92   : > { %v8898_v14 = vld [vmem:[#allocation5 + $0x1bc] sm:$0xf0]  ;;  %v6736_v19 = vor.u32 %v8892_v15, %v6733_v16  ;;  %s10738_s29 = scalar_lea.vmem [#allocation11], %s9421_s24  ;;  %s9422_s27 = smul.u32 192, %s9807_s22 }
  0x93   : > { %2439 = vmatpush.bf16.msra.mxu2 %v7112_v21  ;;  %2468 = vmatpush.bf16.msra.mxu3 %v7496_v26  ;;  %v8843_v21 = vld [vmem:[#allocation5 + $0xc] sm:$0xf]  ;;  %v9126_v26 = vld [vmem:[#allocation5 + $0x8dc] sm:$0xf0]  ;;  %s6344_s12 = sshll.u32 %s10738_s29, 4  ;;  %s6331_s22 = scalar_lea.sflag [#allocation4], %s9906_s1  ;;  %s6345_s12 = int_to_ptr.vmem [resolvable:$true] %s6344_s12 }
  0x94   : > { %2169 = vmatmul.bf16.gmra.mxu0 %v9978_v2  ;;  %2410 = vmatpush.bf16.msra.mxu1 %v6728_v31  ;;  %v6536_v24 = vor.u32 %v8843_v21, %v6533_v23  ;;  %v7644_v31 = vor.u32 %v9126_v26, %v7643_v25  ;;  %v7115_v23 = vld [vmem:[#allocation5 + $0x490] sm:$0xf]  ;;  %v8886_v34 = vld [vmem:[#allocation5 + $0x15c] sm:$0xf0]  ;;  %s6343_s10 = scalar_lea.hbm %s11105_s5, %s9422_s27  ;;  %s9690_s7 = scalar_lea.hbm %s11105_s5, 384 }
  0x95   : > { %2198 = vmatmul.bf16.gmra.mxu1 %v9980_v3  ;;  %2382 = vmatpush.bf16.msra.mxu0 %v7444_v40  ;;  %v7260_v40 = vor.u32 %v9030_v38, %v7259_v37  ;;  %s6346_s13 = sshll.u32 %s6343_s10, 4  ;;  %s6347_s13 = int_to_ptr.hbm [resolvable:$true] %s6346_s13 }
  0x96   : > { %2227 = vmatmul.bf16.gmra.mxu2 %v9982_v4  ;;  %2256 = vmatmul.bf16.gmra.mxu3 %v9978_v2  ;;  %s9684_s28 = sshra.s32 %s6347_s13, 4  ;;  %s9685_s28 = int_to_ptr.hbm [resolvable:$true] %s9684_s28 }
  0x97   : > { %2440 = vmatpush.bf16.msra.mxu2 %v7064_v35  ;;  %2469 = vmatpush.bf16.msra.mxu3 %v7448_v41  ;;  %v6876_v35 = vor.u32 %v8934_v32, %v6875_v30  ;;  %v7595_v41 = vld [vmem:[#allocation5 + $0x850] sm:$0xf]  ;;  %s9686_s30 = scalar_lea.hbm %s9685_s28, 192  ;;  %p9691_p11 = scmp.lt.s32.totalorder %s9685_s28, %s11105_s5 }
  0x98   : > { %2411 = vmatpush.bf16.msra.mxu1 %v6680_v48  ;;  %v7596_v47 = vor.u32 %v9114_v42, %v7595_v41  ;;  %v8922_v48 = vld [vmem:[#allocation5 + $0x27c] sm:$0xf0]  ;;  %v7451_v30 = vld [vmem:[#allocation5 + $0x730] sm:$0xf]  ;;  %p9687_p1 = scmp.ne.s32.totalorder %s9685_s28, %s9686_s30  ;;  %p9692_p9 = scmp.lt.s32.totalorder %s9690_s7, %s9686_s30 }
  0x99   : > { %2383 = vmatpush.bf16.msra.mxu0 %v7396_v55  ;;  %v6828_v53 = vor.u32 %v8922_v48, %v6827_v43  ;;  %v7211_v55 = vld [vmem:[#allocation5 + $0x550] sm:$0xf] }
  0x9a   : > { %v7212_v57 = vor.u32 %v9018_v56, %v7211_v55  ;;  %v6683_v32 = vld [vmem:[#allocation5 + $0x130] sm:$0xf]  ;;  %v9066_v56 = vld [vmem:[#allocation5 + $0x6fc] sm:$0xf0]  ;;  %p9688_p4 = pnand %p9687_p1, %p9873_p3  ;;  %p9693_p2 = por %p9692_p9, %p9691_p11 }
  0x9b   : > { %2441 = vmatpush.bf16.msra.mxu2 %v7016_v54  ;;  %2470 = vmatpush.bf16.msra.mxu3 %v7400_v59  ;;  %v6832_v54 = vor.u32 %v8916_v49, %v6829_v50  ;;  %v9102_v59 = vld [vmem:[#allocation5 + $0x81c] sm:$0xf0]  ;;  %v6684_v38 = vor.u32 %v8886_v34, %v6683_v32  ;;  %v7067_v49 = vld [vmem:[#allocation5 + $0x430] sm:$0xf] }
  0x9c   : > { %2412 = vmatpush.bf16.msra.mxu1 %v6632_v61  ;;  %v7548_v61 = vor.u32 %v9102_v59, %v7547_v58  ;;  %v8982_v50 = vld [vmem:[#allocation5 + $0x45c] sm:$0xf0]  ;;  %v7403_v55 = vld [vmem:[#allocation5 + $0x6d0] sm:$0xf]  ;;  %p9689_p8 = pneg %p9688_p4 }
  0x9d   : > { %2384 = vmatpush.bf16.msra.mxu0 %v7348_v8  ;;  %v9006_v8 = vld [vmem:[#allocation5 + $0x51c] sm:$0xf0]  ;;  %v7404_v58 = vor.u32 %v9066_v56, %v7403_v55 }
  0x9e   : > { %v8874_v59 = vld [vmem:[#allocation5 + $0xfc] sm:$0xf0]  ;;  %p9694_p10 = pnand %p9693_p2, %p9689_p8 }
  0x9f   : > { %2442 = vmatpush.bf16.msra.mxu2 %v6968_v1  ;;  %2471 = vmatpush.bf16.msra.mxu3 %v7352_v9  ;;  %v6780_v1 = vor.u32 %v8910_v62, %v6779_v60  ;;  %v7164_v9 = vor.u32 %v9006_v8, %v7163_v7  ;;  %v8868_v60 = vld [vmem:[#allocation5 + $0xd4] sm:$0xf] }
  0xa0   : > { %2413 = vmatpush.bf16.msra.mxu1 %v6584_v13  ;;  %v7500_v13 = vor.u32 %v9090_v11, %v7499_v10 }
  0xa1   : > { %2385 = vmatpush.bf16.msra.mxu0 %v7300_v18  ;;  %v6732_v18 = vor.u32 %v8898_v14, %v6731_v12  ;;  %v7019_v12 = vld [vmem:[#allocation5 + $0x3d0] sm:$0xf] }
  0xa3   : > { %2443 = vmatpush.bf16.msra.mxu2 %v6920_v17  ;;  %2472 = vmatpush.bf16.msra.mxu3 %v7304_v22  ;;  %v10007_v17 = vperm.slane %v10004_v6, 0 }
  0xa4   : > { %2270 = vmatmul.bf16.vlgmr.msrb.gmra.mxu0 %v9932_v51  ;;  %2414 = vmatpush.bf16.msra.mxu1 %v6536_v24  ;;  %v8994_v24 = vld [vmem:[#allocation5 + $0x4bc] sm:$0xf0] }
  0xa5   : > { %2299 = vmatmul.bf16.vlgmr.msrb.gmra.mxu1 %v9934_v52  ;;  %2494 = vmatpush.bf16.msrb.mxu0 %v6876_v35  ;;  %v7116_v26 = vor.u32 %v8994_v24, %v7115_v23  ;;  %v8880_v35 = vld [vmem:[#allocation5 + $0x134] sm:$0xf]  ;;  %v6589_v24 = vld [vmem:[#allocation5 + $0xa0] sm:$0xf0] }
  0xa6   : > { %2328 = vmatmul.bf16.vlgmr.msrb.gmra.mxu2 %v9930_v46  ;;  %2357 = vmatmul.bf16.vlgmr.msrb.gmra.mxu3 %v9932_v51  ;;  %v8856_v23 = vld [vmem:[#allocation5 + $0x74] sm:$0xf] }
  0xa7   : > { %2552 = vmatpush.bf16.msrb.mxu2 %v7644_v31  ;;  %2581 = vmatpush.bf16.msrb.mxu3 %v6880_v36  ;;  %v9078_v31 = vld [vmem:[#allocation5 + $0x75c] sm:$0xf0]  ;;  %v6685_v36 = vld [vmem:[#allocation5 + $0x160] sm:$0xf0] }
  0xa8   : > { %2523 = vmatpush.bf16.msrb.mxu1 %v7260_v40  ;;  %v7452_v33 = vor.u32 %v9078_v31, %v7451_v30  ;;  %v6688_v40 = vor.u32 %v8880_v35, %v6685_v36  ;;  %v6592_v30 = vor.u32 %v8856_v23, %v6589_v24  ;;  %v6971_v36 = vld [vmem:[#allocation5 + $0x370] sm:$0xf] }
  0xa9   : > { %2495 = vmatpush.bf16.msrb.mxu0 %v6828_v53 }
  0xab   : > { %2553 = vmatpush.bf16.msrb.mxu2 %v7596_v47  ;;  %2582 = vmatpush.bf16.msrb.mxu3 %v6832_v54  ;;  %v7068_v54 = vor.u32 %v8982_v50, %v7067_v49  ;;  %v8850_v49 = vld [vmem:[#allocation5 + $0x3c] sm:$0xf0]  ;;  %v8844_v50 = vld [vmem:[#allocation5 + $0x14] sm:$0xf] }
  0xac   : > { %2524 = vmatpush.bf16.msrb.mxu1 %v7212_v57  ;;  %v6635_v57 = vld [vmem:[#allocation5 + $0xd0] sm:$0xf] }
  0xad   : > { %2496 = vmatpush.bf16.msrb.mxu0 %v6780_v1  ;;  %v6636_v62 = vor.u32 %v8874_v59, %v6635_v57  ;;  %v6923_v57 = vld [vmem:[#allocation5 + $0x310] sm:$0xf] }
  0xaf   : > { %2554 = vmatpush.bf16.msrb.mxu2 %v7548_v61  ;;  %2583 = vmatpush.bf16.msrb.mxu3 %v6784_v5  ;;  %v6637_v61 = vld [vmem:[#allocation5 + $0x100] sm:$0xf0] }
  0xb0   : > { %2525 = vmatpush.bf16.msrb.mxu1 %v7164_v9  ;;  %v6640_v63 = vor.u32 %v8868_v60, %v6637_v61 }
  0xb1   : > { %2497 = vmatpush.bf16.msrb.mxu0 %v6732_v18  ;;  %v7355_v18 = vld [vmem:[#allocation5 + $0x670] sm:$0xf] }
  0xb3   : > { %2555 = vmatpush.bf16.msrb.mxu2 %v7500_v13  ;;  %2584 = vmatpush.bf16.msrb.mxu3 %v6736_v19  ;;  %v8970_v13 = vld [vmem:[#allocation5 + $0x3fc] sm:$0xf0] }
  0xb4   : > { %2275 = vmatmul.bf16.gmra.mxu0 %v9948_v44  ;;  %2526 = vmatpush.bf16.msrb.mxu1 %v7116_v26  ;;  %v7020_v15 = vor.u32 %v8970_v13, %v7019_v12  ;;  %v9054_v19 = vld [vmem:[#allocation5 + $0x69c] sm:$0xf0]  ;;  %v9024_v12 = vld [vmem:[#allocation5 + $0x5b4] sm:$0xf] }
  0xb5   : > { %2304 = vmatmul.bf16.gmra.mxu1 %v9950_v45  ;;  %2498 = vmatpush.bf16.msrb.mxu0 %v6684_v38 }
  0xb6   : > { %2333 = vmatmul.bf16.gmra.mxu2 %v9946_v39  ;;  %2362 = vmatmul.bf16.gmra.mxu3 %v9948_v44 }
  0xb7   : > { %2556 = vmatpush.bf16.msrb.mxu2 %v7452_v33  ;;  %2585 = vmatpush.bf16.msrb.mxu3 %v6688_v40 }
  0xb8   : > { %2527 = vmatpush.bf16.msrb.mxu1 %v7068_v54 }
  0xb9   : > { %2499 = vmatpush.bf16.msrb.mxu0 %v6636_v62 }
  0xbb   : > { %2557 = vmatpush.bf16.msrb.mxu2 %v7404_v58  ;;  %2586 = vmatpush.bf16.msrb.mxu3 %v6640_v63  ;;  %v8946_v58 = vld [vmem:[#allocation5 + $0x33c] sm:$0xf0] }
  0xbc   : > { %2528 = vmatpush.bf16.msrb.mxu1 %v7020_v15  ;;  %v6924_v62 = vor.u32 %v8946_v58, %v6923_v57  ;;  %v7267_v15 = vld [vmem:[#allocation5 + $0x5b8] sm:$0xf] }
  0xbf   : > { %2587 = vmatpush.bf16.msrb.mxu3 %v6592_v30  ;;  %v9120_v30 = vld [vmem:[#allocation5 + $0x8b4] sm:$0xf] }
  0xc4   : > { %2280 = vmatmul.bf16.gmra.mxu0 %v9964_v28 }
  0xc5   : > { %2309 = vmatmul.bf16.gmra.mxu1 %v9966_v29 }
  0xc6   : > { %2338 = vmatmul.bf16.gmra.mxu2 %v9962_v27  ;;  %2367 = vmatmul.bf16.gmra.mxu3 %v9964_v28 }
  0xd4   : > { %2285 = vmatmul.bf16.gmra.mxu0 %v9980_v3 }
  0xd5   : > { %2314 = vmatmul.bf16.gmra.mxu1 %v9982_v4 }
  0xd6   : > { %2343 = vmatmul.bf16.gmra.mxu2 %v9978_v2  ;;  %2372 = vmatmul.bf16.gmra.mxu3 %v9980_v3 }
  0xe1   : > { %v2155_v20 = vpop.f32.mrf.mxu0 }
  0xe2   : > { %v2156_v21 = vadd.f32 %v2155_v20, %v10007_v17  ;;  %v2184_v22 = vpop.f32.mrf.mxu1  ;;  %v6587_v20 = vld [vmem:[#allocation5 + $0x70] sm:$0xf] }
  0xe4   : > { %v2185_v25 = vadd.f32 %v2184_v22, %v2156_v21  ;;  %2386 = vmatmul.bf16.vlgmr.msra.gmra.mxu0 %v9934_v52  ;;  %v7356_v21 = vor.u32 %v9054_v19, %v7355_v18  ;;  %v8862_v22 = vld [vmem:[#allocation5 + $0x9c] sm:$0xf0]  ;;  %v9031_v18 = vld [vmem:[#allocation5 + $0x5e4] sm:$0xf0] }
  0xe5   : > { %2415 = vmatmul.bf16.vlgmr.msra.gmra.mxu1 %v9930_v46  ;;  %v6588_v26 = vor.u32 %v8862_v22, %v6587_v20 }
  0xe6   : > { %2444 = vmatmul.bf16.vlgmr.msra.gmra.mxu2 %v9932_v51  ;;  %2473 = vmatmul.bf16.vlgmr.msra.gmra.mxu3 %v9934_v52 }
  0xe7   : > { %2558 = vmatpush.bf16.msrb.mxu2 %v7356_v21  ;;  %2500 = vmatpush.bf16.msrb.mxu0 %v6588_v26  ;;  %v7268_v21 = vor.u32 %v9031_v18, %v7267_v15 }
  0xe9   : > { %v2213_v37 = vpop.f32.mrf.mxu2  ;;  %v10014_v42 = vpop.f32.mrf.mxu3 }
  0xea   : > { %v2214_v41 = vadd.f32 %v2213_v37, %v2185_v25  ;;  %v2157_v43 = vpop.f32.mrf.mxu0  ;;  %v2186_v48 = vpop.f32.mrf.mxu1  ;;  %v8958_v37 = vld [vmem:[#allocation5 + $0x39c] sm:$0xf0] }
  0xeb   : > { %v2158_v47 = vadd.f32 %v2157_v43, %v10007_v17  ;;  %v6972_v40 = vor.u32 %v8958_v37, %v6971_v36  ;;  %v9042_v43 = vld [vmem:[#allocation5 + $0x63c] sm:$0xf0]  ;;  %v6835_v36 = vld [vmem:[#allocation5 + $0x258] sm:$0xf]  ;;  %v8923_v37 = vld [vmem:[#allocation5 + $0x284] sm:$0xf0] }
  0xec   : > { %v3190_v10 = vmax.f32 %v2214_v41, 0.0  ;;  %v7307_v41 = vld [vmem:[#allocation5 + $0x610] sm:$0xf] }
  0xed   : > { %v2187_v53 = vadd.f32 %v2186_v48, %v2158_v47  ;;  %v6539_v47 = vld [vmem:[#allocation5 + $0x10] sm:$0xf]  ;;  %v7308_v48 = vor.u32 %v9042_v43, %v7307_v41  ;;  %2529 = vmatpush.bf16.msrb.mxu1 %v6972_v40 }
  0xee   : > { %v6540_v54 = vor.u32 %v8850_v49, %v6539_v47  ;;  %v6836_v47 = vor.u32 %v8923_v37, %v6835_v36  ;;  %v7219_v49 = vld [vmem:[#allocation5 + $0x558] sm:$0xf]  ;;  %v8988_v36 = vld [vmem:[#allocation5 + $0x494] sm:$0xf] }
  0xef   : > { %2559 = vmatpush.bf16.msrb.mxu2 %v7308_v48  ;;  %v7213_v48 = vld [vmem:[#allocation5 + $0x580] sm:$0xf0] }
  0xf0   : > { %2501 = vmatpush.bf16.msrb.mxu0 %v6540_v54 }
  0xf1   : > { %v2215_v0 = vpop.f32.mrf.mxu2  ;;  %v10017_v5 = vpop.f32.mrf.mxu3  ;;  %2530 = vmatpush.bf16.msrb.mxu1 %v6924_v62 }
  0xf2   : > { %v2216_v1 = vadd.f32 %v2215_v0, %v2187_v53  ;;  %v2160_v7 = vpop.f32.mrf.mxu0  ;;  %v2189_v9 = vpop.f32.mrf.mxu1  ;;  %v6541_v53 = vld [vmem:[#allocation5 + $0x40] sm:$0xf0] }
  0xf3   : > { %v2161_v8 = vadd.f32 %v2160_v7, %v10007_v17  ;;  %v6544_v55 = vor.u32 %v8844_v50, %v6541_v53  ;;  %v9019_v50 = vld [vmem:[#allocation5 + $0x584] sm:$0xf0] }
  0xf4   : > { %v3202_v11 = vmax.f32 %v2216_v1, 0.0  ;;  %2391 = vmatmul.bf16.gmra.mxu0 %v9950_v45 }
  0xf5   : > { %v2190_v14 = vadd.f32 %v2189_v9, %v2161_v8  ;;  %2420 = vmatmul.bf16.gmra.mxu1 %v9946_v39  ;;  %2588 = vmatpush.bf16.msrb.mxu3 %v6544_v55 }
  0xf6   : > { %v10021_v16 = vpack.c.bf16 %v3202_v11, %v3190_v10  ;;  %2449 = vmatmul.bf16.gmra.mxu2 %v9948_v44  ;;  %2478 = vmatmul.bf16.gmra.mxu3 %v9950_v45  ;;  %v6883_v10 = vld [vmem:[#allocation5 + $0x2b8] sm:$0xf]  ;;  %v8935_v11 = vld [vmem:[#allocation5 + $0x2e4] sm:$0xf0] }
  0xf7   : > { %v6884_v13 = vor.u32 %v8935_v11, %v6883_v10  ;;  %v7165_v11 = vld [vmem:[#allocation5 + $0x520] sm:$0xf0] }
  0xf8   : > { %11187 = vst [vmem:[#allocation16_spill] sm:$0xff] %v10021_v16 }
  0xf9   : > { %v2218_v25 = vpop.f32.mrf.mxu2  ;;  %v10026_v32 = vpop.f32.mrf.mxu3  ;;  %2668 = vmatpush.bf16.msra.mxu2 %v6884_v13  ;;  %2697 = vmatpush.bf16.msra.mxu3 %v7268_v21  ;;  %v9007_v13 = vld [vmem:[#allocation5 + $0x524] sm:$0xf0] }
  0xfa   : > { %v2219_v31 = vadd.f32 %v2218_v25, %v2190_v14  ;;  %v2162_v33 = vpop.f32.mrf.mxu0  ;;  %v2191_v35 = vpop.f32.mrf.mxu1  ;;  %v7261_v14 = vld [vmem:[#allocation5 + $0x5e0] sm:$0xf0] }
  0xfb   : > { %v2163_v34 = vadd.f32 %v2162_v33, %v10007_v17  ;;  %v7264_v20 = vor.u32 %v9024_v12, %v7261_v14  ;;  %v7171_v12 = vld [vmem:[#allocation5 + $0x4f8] sm:$0xf] }
  0xfc   : > { %v3214_v1 = vmax.f32 %v2219_v31, 0.0  ;;  %v7645_v31 = vld [vmem:[#allocation5 + $0x8e0] sm:$0xf0]  ;;  %v7172_v18 = vor.u32 %v9007_v13, %v7171_v12  ;;  %v7075_v13 = vld [vmem:[#allocation5 + $0x438] sm:$0xf] }
  0xfd   : > { %v2192_v38 = vadd.f32 %v2191_v35, %v2163_v34  ;;  %2610 = vmatpush.bf16.msra.mxu0 %v7264_v20  ;;  %v7648_v34 = vor.u32 %v9120_v30, %v7645_v31  ;;  %2669 = vmatpush.bf16.msra.mxu2 %v6836_v47  ;;  %v10054_v30 = vperm.slane %v10004_v6, 1  ;;  %v7069_v12 = vld [vmem:[#allocation5 + $0x460] sm:$0xf0] }
  0xff   : > { %2639 = vmatpush.bf16.msra.mxu1 %v7648_v34  ;;  %v6739_v34 = vld [vmem:[#allocation5 + $0x198] sm:$0xf] }
 0x101   : > { %v2220_v56 = vpop.f32.mrf.mxu2  ;;  %v10029_v60 = vpop.f32.mrf.mxu3 }
 0x102   : > { %v2221_v59 = vadd.f32 %v2220_v56, %v2192_v38  ;;  %v2165_v61 = vpop.f32.mrf.mxu0  ;;  %v2194_v0 = vpop.f32.mrf.mxu1  ;;  %v9012_v38 = vld [vmem:[#allocation5 + $0x554] sm:$0xf]  ;;  %v7220_v56 = vor.u32 %v9019_v50, %v7219_v49 }
 0x103   : > { %v2166_v63 = vadd.f32 %v2165_v61, %v10007_v17  ;;  %v7216_v55 = vor.u32 %v9012_v38, %v7213_v48  ;;  %v7597_v61 = vld [vmem:[#allocation5 + $0x880] sm:$0xf0] }
 0x104   : > { %v3226_v7 = vmax.f32 %v2221_v59, 0.0  ;;  %2396 = vmatmul.bf16.gmra.mxu0 %v9966_v29  ;;  %v9108_v59 = vld [vmem:[#allocation5 + $0x854] sm:$0xf]  ;;  %2698 = vmatpush.bf16.msra.mxu3 %v7220_v56  ;;  %v7117_v38 = vld [vmem:[#allocation5 + $0x4c0] sm:$0xf0] }
 0x105   : > { %v2195_v8 = vadd.f32 %v2194_v0, %v2166_v63  ;;  %2425 = vmatmul.bf16.gmra.mxu1 %v9962_v27  ;;  %v7600_v63 = vor.u32 %v9108_v59, %v7597_v61  ;;  %2611 = vmatpush.bf16.msra.mxu0 %v7216_v55  ;;  %v7120_v48 = vor.u32 %v8988_v36, %v7117_v38  ;;  %v9084_v59 = vld [vmem:[#allocation5 + $0x794] sm:$0xf]  ;;  %v7501_v61 = vld [vmem:[#allocation5 + $0x7c0] sm:$0xf0] }
 0x106   : > { %2454 = vmatmul.bf16.gmra.mxu2 %v9964_v28  ;;  %v10035_v9 = vpack.c.bf16 %v3226_v7, %v3214_v1  ;;  %2483 = vmatmul.bf16.gmra.mxu3 %v9966_v29  ;;  %v6787_v1 = vld [vmem:[#allocation5 + $0x1f8] sm:$0xf]  ;;  %v8911_v7 = vld [vmem:[#allocation5 + $0x224] sm:$0xf0] }
 0x107   : > { %2640 = vmatpush.bf16.msra.mxu1 %v7600_v63  ;;  %v6788_v10 = vor.u32 %v8911_v7, %v6787_v1  ;;  %v10064_v63 = vperm.slane %v10004_v6, 2  ;;  %v6691_v7 = vld [vmem:[#allocation5 + $0x138] sm:$0xf] }
 0x108   : > { %11188 = vst [vmem:[#allocation17_spill] sm:$0xff] %v10035_v9  ;;  %2699 = vmatpush.bf16.msra.mxu3 %v7172_v18 }
 0x109   : > { %v2223_v19 = vpop.f32.mrf.mxu2  ;;  %v10038_v23 = vpop.f32.mrf.mxu3  ;;  %2670 = vmatpush.bf16.msra.mxu2 %v6788_v10 }
 0x10a   : > { %v2224_v22 = vadd.f32 %v2223_v19, %v2195_v8  ;;  %v2167_v24 = vpop.f32.mrf.mxu0  ;;  %v2196_v26 = vpop.f32.mrf.mxu1  ;;  %v9000_v8 = vld [vmem:[#allocation5 + $0x4f4] sm:$0xf] }
 0x10b   : > { %v2168_v25 = vadd.f32 %v2167_v24, %v10007_v17  ;;  %v7168_v15 = vor.u32 %v9000_v8, %v7165_v11  ;;  %v8887_v8 = vld [vmem:[#allocation5 + $0x164] sm:$0xf0]  ;;  %v8976_v11 = vld [vmem:[#allocation5 + $0x434] sm:$0xf] }
 0x10c   : > { %v3238_v57 = vmax.f32 %v2224_v22, 0.0  ;;  %v6692_v10 = vor.u32 %v8887_v8, %v6691_v7  ;;  %v7072_v18 = vor.u32 %v8976_v11, %v7069_v12  ;;  %v7405_v11 = vld [vmem:[#allocation5 + $0x700] sm:$0xf0] }
 0x10d   : > { %v2197_v33 = vadd.f32 %v2196_v26, %v2168_v25  ;;  %2612 = vmatpush.bf16.msra.mxu0 %v7168_v15  ;;  %v9096_v25 = vld [vmem:[#allocation5 + $0x7f4] sm:$0xf]  ;;  %v7549_v26 = vld [vmem:[#allocation5 + $0x820] sm:$0xf0] }
 0x111   : > { %v2225_v35 = vpop.f32.mrf.mxu2  ;;  %v10041_v41 = vpop.f32.mrf.mxu3  ;;  %2613 = vmatpush.bf16.msra.mxu0 %v7120_v48  ;;  %v7021_v48 = vld [vmem:[#allocation5 + $0x400] sm:$0xf0] }
 0x112   : > { %v2226_v40 = vadd.f32 %v2225_v35, %v2197_v33  ;;  %v2170_v43 = vpop.f32.mrf.mxu0  ;;  %v2199_v54 = vpop.f32.mrf.mxu1  ;;  %v7552_v33 = vor.u32 %v9096_v25, %v7549_v26  ;;  %v8899_v35 = vld [vmem:[#allocation5 + $0x1c4] sm:$0xf0] }
 0x113   : > { %v2171_v53 = vadd.f32 %v2170_v43, %v10007_v17  ;;  %v6740_v37 = vor.u32 %v8899_v35, %v6739_v34  ;;  %v8995_v43 = vld [vmem:[#allocation5 + $0x4c4] sm:$0xf0]  ;;  %v9072_v34 = vld [vmem:[#allocation5 + $0x734] sm:$0xf]  ;;  %v7453_v35 = vld [vmem:[#allocation5 + $0x760] sm:$0xf0] }
 0x114   : > { %v3250_v58 = vmax.f32 %v2226_v40, 0.0  ;;  %2401 = vmatmul.bf16.gmra.mxu0 %v9982_v4  ;;  %2641 = vmatpush.bf16.msra.mxu1 %v7552_v33  ;;  %v7123_v40 = vld [vmem:[#allocation5 + $0x498] sm:$0xf] }
 0x115   : > { %v2200_v62 = vadd.f32 %v2199_v54, %v2171_v53  ;;  %2430 = vmatmul.bf16.gmra.mxu1 %v9978_v2  ;;  %v7124_v49 = vor.u32 %v8995_v43, %v7123_v40  ;;  %2671 = vmatpush.bf16.msra.mxu2 %v6740_v37  ;;  %v7456_v37 = vor.u32 %v9072_v34, %v7453_v35  ;;  %v6643_v40 = vld [vmem:[#allocation5 + $0xd8] sm:$0xf]  ;;  %v8875_v43 = vld [vmem:[#allocation5 + $0x104] sm:$0xf0] }
 0x116   : > { %2459 = vmatmul.bf16.gmra.mxu2 %v9980_v3  ;;  %v10047_v0 = vpack.c.bf16 %v3250_v58, %v3238_v57  ;;  %2488 = vmatmul.bf16.gmra.mxu3 %v9982_v4 }
 0x117   : > { %2700 = vmatpush.bf16.msra.mxu3 %v7124_v49  ;;  %2614 = vmatpush.bf16.msra.mxu0 %v7072_v18  ;;  %v7027_v49 = vld [vmem:[#allocation5 + $0x3d8] sm:$0xf]  ;;  %v8952_v18 = vld [vmem:[#allocation5 + $0x374] sm:$0xf] }
 0x118   : > { %11189 = vst [vmem:[#allocation18_spill] sm:$0xff] %v10047_v0 }
 0x119   : > { %v2228_v14 = vpop.f32.mrf.mxu2  ;;  %v10050_v20 = vpop.f32.mrf.mxu3  ;;  %2672 = vmatpush.bf16.msra.mxu2 %v6692_v10  ;;  %v9060_v10 = vld [vmem:[#allocation5 + $0x6d4] sm:$0xf] }
 0x11a   : > { %v2229_v19 = vadd.f32 %v2228_v14, %v2200_v62  ;;  %v2172_v21 = vpop.f32.mrf.mxu0  ;;  %v2201_v24 = vpop.f32.mrf.mxu1  ;;  %v2245_v14 = vadd.f32 %v10017_v5, %v10054_v30  ;;  %v7408_v12 = vor.u32 %v9060_v10, %v7405_v11  ;;  %v7309_v10 = vld [vmem:[#allocation5 + $0x640] sm:$0xf0] }
 0x11b   : > { %v2173_v22 = vadd.f32 %v2172_v21, %v10007_v17  ;;  %v2243_v17 = vadd.f32 %v10014_v42, %v10054_v30  ;;  %v7504_v42 = vor.u32 %v9084_v59, %v7501_v61 }
 0x11c   : > { %v3262_v57 = vmax.f32 %v2229_v19, 0.0  ;;  %v8983_v19 = vld [vmem:[#allocation5 + $0x464] sm:$0xf0] }
 0x11d   : > { %v2202_v31 = vadd.f32 %v2201_v24, %v2173_v22  ;;  %2642 = vmatpush.bf16.msra.mxu1 %v7504_v42  ;;  %v7076_v25 = vor.u32 %v8983_v19, %v7075_v13  ;;  %v6595_v13 = vld [vmem:[#allocation5 + $0x78] sm:$0xf]  ;;  %v6973_v19 = vld [vmem:[#allocation5 + $0x3a0] sm:$0xf0] }
 0x11f   : > { %2701 = vmatpush.bf16.msra.mxu3 %v7076_v25  ;;  %v6976_v25 = vor.u32 %v8952_v18, %v6973_v19 }
 0x121   : > { %v2230_v47 = vpop.f32.mrf.mxu2  ;;  %v10058_v53 = vpop.f32.mrf.mxu3  ;;  %2643 = vmatpush.bf16.msra.mxu1 %v7456_v37 }
 0x122   : > { %v2231_v50 = vadd.f32 %v2230_v47, %v2202_v31  ;;  %v2271_v54 = vpop.f32.mrf.mxu0  ;;  %v2300_v56 = vpop.f32.mrf.mxu1  ;;  %v8964_v47 = vld [vmem:[#allocation5 + $0x3d4] sm:$0xf] }
 0x123   : > { %v2272_v55 = vadd.f32 %v2271_v54, %v2243_v17  ;;  %v6644_v17 = vor.u32 %v8875_v43, %v6643_v40  ;;  %v9048_v40 = vld [vmem:[#allocation5 + $0x674] sm:$0xf]  ;;  %v7357_v43 = vld [vmem:[#allocation5 + $0x6a0] sm:$0xf0] }
 0x124   : > { %v3274_v58 = vmax.f32 %v2231_v50, 0.0  ;;  %2502 = vmatmul.bf16.vlgmr.msrb.gmra.mxu0 %v9930_v46  ;;  %v2248_v50 = vadd.f32 %v10026_v32, %v10054_v30 }
 0x125   : > { %v2301_v62 = vadd.f32 %v2300_v56, %v2272_v55  ;;  %2531 = vmatmul.bf16.vlgmr.msrb.gmra.mxu1 %v9932_v51  ;;  %v7024_v56 = vor.u32 %v8964_v47, %v7021_v48  ;;  %2673 = vmatpush.bf16.msra.mxu2 %v6644_v17  ;;  %v7360_v47 = vor.u32 %v9048_v40, %v7357_v43 }
 0x126   : > { %2560 = vmatmul.bf16.vlgmr.msrb.gmra.mxu2 %v9934_v52  ;;  %v10066_v1 = vpack.c.bf16 %v3274_v58, %v3262_v57  ;;  %2589 = vmatmul.bf16.vlgmr.msrb.gmra.mxu3 %v9930_v46  ;;  %v8971_v57 = vld [vmem:[#allocation5 + $0x404] sm:$0xf0] }
 0x127   : > { %v3191_v5 = vmax.f32 %v2301_v62, 0.0  ;;  %v7028_v62 = vor.u32 %v8971_v57, %v7027_v49  ;;  %2615 = vmatpush.bf16.msra.mxu0 %v7024_v56  ;;  %2644 = vmatpush.bf16.msra.mxu1 %v7408_v12  ;;  %v6547_v49 = vld [vmem:[#allocation5 + $0x18] sm:$0xf]  ;;  %v8940_v56 = vld [vmem:[#allocation5 + $0x314] sm:$0xf] }
 0x128   : > { %11190 = vst [vmem:[#allocation19_spill] sm:$0xff] %v10066_v1  ;;  %v6925_v57 = vld [vmem:[#allocation5 + $0x340] sm:$0xf0] }
 0x129   : > { %v2329_v15 = vpop.f32.mrf.mxu2  ;;  %v2358_v22 = vpop.f32.mrf.mxu3  ;;  %2702 = vmatpush.bf16.msra.mxu3 %v7028_v62  ;;  %v6928_v62 = vor.u32 %v8940_v56, %v6925_v57  ;;  %v6885_v56 = vld [vmem:[#allocation5 + $0x2e8] sm:$0xf0] }
 0x12a   : > { %v2330_v21 = vadd.f32 %v2329_v15, %v10064_v63  ;;  %v2273_v24 = vpop.f32.mrf.mxu0  ;;  %v2302_v31 = vpop.f32.mrf.mxu1 }
 0x12b   : > { %v2274_v26 = vadd.f32 %v2273_v24, %v2245_v14  ;;  %v8863_v14 = vld [vmem:[#allocation5 + $0xa4] sm:$0xf0]  ;;  %2616 = vmatpush.bf16.msra.mxu0 %v6976_v25  ;;  %2645 = vmatpush.bf16.msra.mxu1 %v7360_v47 }
 0x12c   : > { %v10072_v33 = vadd.f32 %v2358_v22, %v2330_v21  ;;  %v6596_v15 = vor.u32 %v8863_v14, %v6595_v13  ;;  %v6979_v21 = vld [vmem:[#allocation5 + $0x378] sm:$0xf]  ;;  %v2250_v22 = vadd.f32 %v10029_v60, %v10054_v30 }
 0x12d   : > { %v2303_v36 = vadd.f32 %v2302_v31, %v2274_v26  ;;  %v8959_v26 = vld [vmem:[#allocation5 + $0x3a4] sm:$0xf0] }
 0x12e   : > { %2674 = vmatpush.bf16.msra.mxu2 %v6596_v15 }
 0x12f   : > { %v3203_v38 = vmax.f32 %v2303_v36, 0.0  ;;  %v6980_v36 = vor.u32 %v8959_v26, %v6979_v21  ;;  %2617 = vmatpush.bf16.msra.mxu0 %v6928_v62  ;;  %v7651_v26 = vld [vmem:[#allocation5 + $0x8b8] sm:$0xf] }
 0x131   : > { %v10076_v54 = vpack.c.bf16 %v3203_v38, %v3191_v5  ;;  %v2331_v55 = vpop.f32.mrf.mxu2  ;;  %v2360_v59 = vpop.f32.mrf.mxu3  ;;  %2703 = vmatpush.bf16.msra.mxu3 %v6980_v36 }
 0x132   : > { %v2332_v58 = vadd.f32 %v2331_v55, %v10064_v63  ;;  %v2276_v61 = vpop.f32.mrf.mxu0  ;;  %v2305_v7 = vpop.f32.mrf.mxu1 }
 0x133   : > { %11191 = vst [vmem:[#allocation20_spill] sm:$0xff] %v10076_v54  ;;  %v2277_v42 = vadd.f32 %v2276_v61, %v2248_v50  ;;  %v8851_v50 = vld [vmem:[#allocation5 + $0x44] sm:$0xf0] }
 0x134   : > { %v10079_v8 = vadd.f32 %v2360_v59, %v2332_v58  ;;  %2507 = vmatmul.bf16.gmra.mxu0 %v9946_v39  ;;  %v6548_v55 = vor.u32 %v8851_v50, %v6547_v49  ;;  %v6931_v58 = vld [vmem:[#allocation5 + $0x318] sm:$0xf]  ;;  %v2253_v59 = vadd.f32 %v10038_v23, %v10054_v30 }
 0x135   : > { %v2306_v32 = vadd.f32 %v2305_v7, %v2277_v42  ;;  %2536 = vmatmul.bf16.gmra.mxu1 %v9948_v44  ;;  %v8947_v42 = vld [vmem:[#allocation5 + $0x344] sm:$0xf0]  ;;  %v9036_v7 = vld [vmem:[#allocation5 + $0x614] sm:$0xf] }
 0x136   : > { %2565 = vmatmul.bf16.gmra.mxu2 %v9950_v45  ;;  %2594 = vmatmul.bf16.gmra.mxu3 %v9946_v39  ;;  %v6932_v14 = vor.u32 %v8947_v42, %v6931_v58  ;;  %v7312_v15 = vor.u32 %v9036_v7, %v7309_v10  ;;  %v7603_v42 = vld [vmem:[#allocation5 + $0x858] sm:$0xf]  ;;  %v9115_v7 = vld [vmem:[#allocation5 + $0x884] sm:$0xf0]  ;;  %v9109_v10 = vld [vmem:[#allocation5 + $0x85c] sm:$0xf] }
 0x137   : > { %v3215_v60 = vmax.f32 %v2306_v32, 0.0  ;;  %2675 = vmatpush.bf16.msra.mxu2 %v6548_v55  ;;  %v8929_v55 = vld [vmem:[#allocation5 + $0x2bc] sm:$0xf] }
 0x138   : > { %2704 = vmatpush.bf16.msra.mxu3 %v6932_v14  ;;  %2646 = vmatpush.bf16.msra.mxu1 %v7312_v15  ;;  %v6888_v58 = vor.u32 %v8929_v55, %v6885_v56  ;;  %v7605_v14 = vld [vmem:[#allocation5 + $0x888] sm:$0xf0]  ;;  %v9097_v56 = vld [vmem:[#allocation5 + $0x7fc] sm:$0xf] }
 0x139   : > { %v2334_v24 = vpop.f32.mrf.mxu2  ;;  %v2363_v34 = vpop.f32.mrf.mxu3 }
 0x13a   : > { %v2335_v31 = vadd.f32 %v2334_v24, %v10064_v63  ;;  %v2278_v35 = vpop.f32.mrf.mxu0  ;;  %v2307_v5 = vpop.f32.mrf.mxu1  ;;  %v7269_v24 = vld [vmem:[#allocation5 + $0x5e8] sm:$0xf0] }
 0x13b   : > { %v2279_v37 = vadd.f32 %v2278_v35, %v2250_v22  ;;  %v9025_v22 = vld [vmem:[#allocation5 + $0x5bc] sm:$0xf]  ;;  %v2255_v35 = vadd.f32 %v10041_v41, %v10054_v30 }
 0x13c   : > { %v10088_v38 = vadd.f32 %v2363_v34, %v2335_v31  ;;  %v7272_v25 = vor.u32 %v9025_v22, %v7269_v24  ;;  %v9127_v31 = vld [vmem:[#allocation5 + $0x8e4] sm:$0xf0]  ;;  %v9121_v34 = vld [vmem:[#allocation5 + $0x8bc] sm:$0xf]  ;;  %2755 = vmatpush.bf16.msrb.mxu1 %v6888_v58  ;;  %v7608_v22 = vor.u32 %v9109_v10, %v7605_v14 }
 0x13d   : > { %v2308_v17 = vadd.f32 %v2307_v5, %v2279_v37  ;;  %v7652_v37 = vor.u32 %v9127_v31, %v7651_v26  ;;  %v7653_v5 = vld [vmem:[#allocation5 + $0x8e8] sm:$0xf0] }
 0x13e   : > { %2784 = vmatpush.bf16.msrb.mxu2 %v7272_v25  ;;  %v7656_v47 = vor.u32 %v9121_v34, %v7653_v5  ;;  %v6837_v34 = vld [vmem:[#allocation5 + $0x288] sm:$0xf0] }
 0x13f   : > { %v3227_v48 = vmax.f32 %v2308_v17, 0.0  ;;  %2726 = vmatpush.bf16.msrb.mxu0 %v7652_v37 }
 0x140   : > { %2813 = vmatpush.bf16.msrb.mxu3 %v7656_v47 }
 0x141   : > { %v2336_v61 = vpop.f32.mrf.mxu2  ;;  %v10092_v11 = vpack.c.bf16 %v3227_v48, %v3215_v60  ;;  %v2365_v12 = vpop.f32.mrf.mxu3 }
 0x142   : > { %v2337_v32 = vadd.f32 %v2336_v61, %v10064_v63  ;;  %v2281_v13 = vpop.f32.mrf.mxu0  ;;  %v2310_v19 = vpop.f32.mrf.mxu1  ;;  %v7221_v61 = vld [vmem:[#allocation5 + $0x588] sm:$0xf0] }
 0x143   : > { %11192 = vst [vmem:[#allocation21_spill] sm:$0xff] %v10092_v11  ;;  %v2282_v18 = vadd.f32 %v2281_v13, %v2253_v59  ;;  %v9013_v59 = vld [vmem:[#allocation5 + $0x55c] sm:$0xf]  ;;  %v7604_v13 = vor.u32 %v9115_v7, %v7603_v42 }
 0x144   : > { %v10095_v21 = vadd.f32 %v2365_v12, %v2337_v32  ;;  %2512 = vmatmul.bf16.gmra.mxu0 %v9962_v27  ;;  %v7224_v62 = vor.u32 %v9013_v59, %v7221_v61  ;;  %v2258_v32 = vadd.f32 %v10050_v20, %v10054_v30  ;;  %2814 = vmatpush.bf16.msrb.mxu3 %v7608_v22  ;;  %v8917_v20 = vld [vmem:[#allocation5 + $0x25c] sm:$0xf] }
 0x145   : > { %v2311_v23 = vadd.f32 %v2310_v19, %v2282_v18  ;;  %2541 = vmatmul.bf16.gmra.mxu1 %v9964_v28  ;;  %2727 = vmatpush.bf16.msrb.mxu0 %v7604_v13  ;;  %v6840_v5 = vor.u32 %v8917_v20, %v6837_v34  ;;  %v8989_v42 = vld [vmem:[#allocation5 + $0x49c] sm:$0xf]  ;;  %v7507_v13 = vld [vmem:[#allocation5 + $0x798] sm:$0xf] }
 0x146   : > { %2570 = vmatmul.bf16.gmra.mxu2 %v9966_v29  ;;  %2599 = vmatmul.bf16.gmra.mxu3 %v9962_v27 }
 0x147   : > { %v3239_v57 = vmax.f32 %v2311_v23, 0.0  ;;  %2785 = vmatpush.bf16.msrb.mxu2 %v7224_v62  ;;  %2756 = vmatpush.bf16.msrb.mxu1 %v6840_v5  ;;  %v6789_v62 = vld [vmem:[#allocation5 + $0x228] sm:$0xf0] }
 0x149   : > { %v2339_v36 = vpop.f32.mrf.mxu2  ;;  %v2368_v43 = vpop.f32.mrf.mxu3 }
 0x14a   : > { %v2340_v40 = vadd.f32 %v2339_v36, %v10064_v63  ;;  %v2283_v17 = vpop.f32.mrf.mxu0  ;;  %v2312_v48 = vpop.f32.mrf.mxu1  ;;  %v2260_v36 = vadd.f32 %v10058_v53, %v10054_v30  ;;  %v8905_v53 = vld [vmem:[#allocation5 + $0x1fc] sm:$0xf] }
 0x14b   : > { %v2284_v60 = vadd.f32 %v2283_v17, %v2255_v35  ;;  %v9001_v35 = vld [vmem:[#allocation5 + $0x4fc] sm:$0xf]  ;;  %v9103_v17 = vld [vmem:[#allocation5 + $0x824] sm:$0xf0] }
 0x14c   : > { %v10104_v49 = vadd.f32 %v2368_v43, %v2340_v40  ;;  %v7173_v40 = vld [vmem:[#allocation5 + $0x528] sm:$0xf0]  ;;  %v7555_v43 = vld [vmem:[#allocation5 + $0x7f8] sm:$0xf] }
 0x14d   : > { %v2313_v50 = vadd.f32 %v2312_v48, %v2284_v60  ;;  %v7556_v55 = vor.u32 %v9103_v17, %v7555_v43  ;;  %v6741_v17 = vld [vmem:[#allocation5 + $0x1c8] sm:$0xf0] }
 0x14f   : > { %v3251_v41 = vmax.f32 %v2313_v50, 0.0  ;;  %v7176_v50 = vor.u32 %v9001_v35, %v7173_v40  ;;  %2728 = vmatpush.bf16.msrb.mxu0 %v7556_v55  ;;  %v9073_v55 = vld [vmem:[#allocation5 + $0x73c] sm:$0xf] }
 0x151   : > { %v2341_v12 = vpop.f32.mrf.mxu2  ;;  %v10108_v15 = vpack.c.bf16 %v3251_v41, %v3239_v57  ;;  %v2370_v19 = vpop.f32.mrf.mxu3  ;;  %v7557_v57 = vld [vmem:[#allocation5 + $0x828] sm:$0xf0]  ;;  %2786 = vmatpush.bf16.msrb.mxu2 %v7176_v50  ;;  %v9079_v50 = vld [vmem:[#allocation5 + $0x764] sm:$0xf0] }
 0x152   : > { %v2342_v18 = vadd.f32 %v2341_v12, %v10064_v63  ;;  %v2286_v23 = vpop.f32.mrf.mxu0  ;;  %v2315_v25 = vpop.f32.mrf.mxu1  ;;  %v7560_v59 = vor.u32 %v9097_v56, %v7557_v57  ;;  %v7125_v12 = vld [vmem:[#allocation5 + $0x4c8] sm:$0xf0] }
 0x153   : > { %11193 = vst [vmem:[#allocation22_spill] sm:$0xff] %v10108_v15  ;;  %v2287_v24 = vadd.f32 %v2286_v23, %v2258_v32  ;;  %v6792_v32 = vor.u32 %v8905_v53, %v6789_v62  ;;  %v7128_v14 = vor.u32 %v8989_v42, %v7125_v12  ;;  %v7509_v23 = vld [vmem:[#allocation5 + $0x7c8] sm:$0xf0]  ;;  %v8881_v12 = vld [vmem:[#allocation5 + $0x13c] sm:$0xf] }
 0x154   : > { %v10111_v26 = vadd.f32 %v2370_v19, %v2342_v18  ;;  %2517 = vmatmul.bf16.gmra.mxu0 %v9978_v2  ;;  %2815 = vmatpush.bf16.msrb.mxu3 %v7560_v59  ;;  %v9091_v18 = vld [vmem:[#allocation5 + $0x7c4] sm:$0xf0]  ;;  %v9085_v19 = vld [vmem:[#allocation5 + $0x79c] sm:$0xf]  ;;  %v7461_v56 = vld [vmem:[#allocation5 + $0x768] sm:$0xf0] }
 0x155   : > { %v2316_v31 = vadd.f32 %v2315_v25, %v2287_v24  ;;  %2546 = vmatmul.bf16.gmra.mxu1 %v9980_v3  ;;  %v7508_v24 = vor.u32 %v9091_v18, %v7507_v13  ;;  %v7512_v25 = vor.u32 %v9085_v19, %v7509_v23  ;;  %2787 = vmatpush.bf16.msrb.mxu2 %v7128_v14  ;;  %v6693_v13 = vld [vmem:[#allocation5 + $0x168] sm:$0xf0]  ;;  %v8965_v19 = vld [vmem:[#allocation5 + $0x3dc] sm:$0xf] }
 0x156   : > { %2575 = vmatmul.bf16.gmra.mxu2 %v9982_v4  ;;  %2604 = vmatmul.bf16.gmra.mxu3 %v9978_v2  ;;  %v6696_v18 = vor.u32 %v8881_v12, %v6693_v13  ;;  %v7029_v23 = vld [vmem:[#allocation5 + $0x408] sm:$0xf0] }
 0x157   : > { %v3263_v7 = vmax.f32 %v2316_v31, 0.0  ;;  %2757 = vmatpush.bf16.msrb.mxu1 %v6792_v32  ;;  %v10126_v31 = vperm.slane %v10004_v6, 3  ;;  %2729 = vmatpush.bf16.msrb.mxu0 %v7508_v24 }
 0x158   : > { %2816 = vmatpush.bf16.msrb.mxu3 %v7512_v25  ;;  %v7032_v25 = vor.u32 %v8965_v19, %v7029_v23 }
 0x159   : > { %v2344_v37 = vpop.f32.mrf.mxu2  ;;  %v2373_v60 = vpop.f32.mrf.mxu3 }
 0x15a   : > { %v2345_v47 = vadd.f32 %v2344_v37, %v10064_v63  ;;  %v2288_v48 = vpop.f32.mrf.mxu0  ;;  %v2317_v58 = vpop.f32.mrf.mxu1 }
 0x15b   : > { %v2289_v41 = vadd.f32 %v2288_v48, %v2260_v36 }
 0x15c   : > { %v10120_v61 = vadd.f32 %v2373_v60, %v2345_v47  ;;  %v8977_v47 = vld [vmem:[#allocation5 + $0x43c] sm:$0xf]  ;;  %v7459_v60 = vld [vmem:[#allocation5 + $0x738] sm:$0xf] }
 0x15d   : > { %v2318_v30 = vadd.f32 %v2317_v58, %v2289_v41  ;;  %v7460_v41 = vor.u32 %v9079_v50, %v7459_v60  ;;  %v7464_v58 = vor.u32 %v9073_v55, %v7461_v56  ;;  %v8869_v55 = vld [vmem:[#allocation5 + $0xdc] sm:$0xf]  ;;  %v6645_v56 = vld [vmem:[#allocation5 + $0x108] sm:$0xf0] }
 0x15f   : > { %v3275_v10 = vmax.f32 %v2318_v30, 0.0  ;;  %2730 = vmatpush.bf16.msrb.mxu0 %v7460_v41  ;;  %2817 = vmatpush.bf16.msrb.mxu3 %v7464_v58  ;;  %v6981_v41 = vld [vmem:[#allocation5 + $0x3a8] sm:$0xf0]  ;;  %v7363_v58 = vld [vmem:[#allocation5 + $0x678] sm:$0xf] }
 0x161   : > { %v2346_v22 = vpop.f32.mrf.mxu2  ;;  %v10122_v20 = vpack.c.bf16 %v3275_v10, %v3263_v7  ;;  %v2375_v35 = vpop.f32.mrf.mxu3 }
 0x162   : > { %v2347_v34 = vadd.f32 %v2346_v22, %v10064_v63  ;;  %v2387_v36 = vpop.f32.mrf.mxu0  ;;  %v2416_v5 = vpop.f32.mrf.mxu1  ;;  %v8893_v63 = vld [vmem:[#allocation5 + $0x19c] sm:$0xf]  ;;  %v7411_v22 = vld [vmem:[#allocation5 + $0x6d8] sm:$0xf] }
 0x163   : > { %11194 = vst [vmem:[#allocation23_spill] sm:$0xff] %v10122_v20  ;;  %v2388_v37 = vadd.f32 %v2387_v36, %v10072_v33  ;;  %v2417_v43 = vadd.f32 %v2416_v5, %v10126_v31  ;;  %v6744_v6 = vor.u32 %v8893_v63, %v6741_v17  ;;  %v7077_v33 = vld [vmem:[#allocation5 + $0x468] sm:$0xf0] }
 0x164   : > { %v10129_v40 = vadd.f32 %v2375_v35, %v2347_v34  ;;  %2618 = vmatmul.bf16.vlgmr.msra.gmra.mxu0 %v9932_v51  ;;  %v7080_v48 = vor.u32 %v8977_v47, %v7077_v33  ;;  %v9067_v34 = vld [vmem:[#allocation5 + $0x704] sm:$0xf0]  ;;  %v9061_v35 = vld [vmem:[#allocation5 + $0x6dc] sm:$0xf] }
 0x165   : > { %2647 = vmatmul.bf16.vlgmr.msra.gmra.mxu1 %v9934_v52  ;;  %v3192_v10 = vmax.f32 %v2388_v37, 0.0  ;;  %v7412_v5 = vor.u32 %v9067_v34, %v7411_v22  ;;  %v8857_v34 = vld [vmem:[#allocation5 + $0x7c] sm:$0xf] }
 0x166   : > { %2676 = vmatmul.bf16.vlgmr.msra.gmra.mxu2 %v9930_v46  ;;  %2705 = vmatmul.bf16.vlgmr.msra.gmra.mxu3 %v9932_v51 }
 0x167   : > { %2758 = vmatpush.bf16.msrb.mxu1 %v6744_v6  ;;  %2788 = vmatpush.bf16.msrb.mxu2 %v7080_v48 }
 0x168   : > { %2731 = vmatpush.bf16.msrb.mxu0 %v7412_v5  ;;  %v6933_v5 = vld [vmem:[#allocation5 + $0x348] sm:$0xf0] }
 0x169   : > { %v2445_v57 = vpop.f32.mrf.mxu2  ;;  %v2474_v30 = vpop.f32.mrf.mxu3 }
 0x16a   : > { %v2446_v59 = vadd.f32 %v2445_v57, %v2417_v43  ;;  %v2389_v53 = vpop.f32.mrf.mxu0  ;;  %v2418_v42 = vpop.f32.mrf.mxu1  ;;  %v6648_v57 = vor.u32 %v8869_v55, %v6645_v56  ;;  %v6549_v55 = vld [vmem:[#allocation5 + $0x48] sm:$0xf0] }
 0x16b   : > { %v2390_v62 = vadd.f32 %v2389_v53, %v10079_v8  ;;  %v2419_v24 = vadd.f32 %v2418_v42, %v10126_v31  ;;  %v7413_v8 = vld [vmem:[#allocation5 + $0x708] sm:$0xf0]  ;;  %2759 = vmatpush.bf16.msrb.mxu1 %v6696_v18  ;;  %2789 = vmatpush.bf16.msrb.mxu2 %v7032_v25  ;;  %v9055_v53 = vld [vmem:[#allocation5 + $0x6a4] sm:$0xf0] }
 0x16c   : > { %v2475_v7 = vadd.f32 %v2474_v30, %v2446_v59  ;;  %v7416_v43 = vor.u32 %v9061_v35, %v7413_v8  ;;  %v7365_v42 = vld [vmem:[#allocation5 + $0x6a8] sm:$0xf0] }
 0x16d   : > { %v3204_v32 = vmax.f32 %v2390_v62, 0.0  ;;  %v9049_v62 = vld [vmem:[#allocation5 + $0x67c] sm:$0xf]  ;;  %v6597_v35 = vld [vmem:[#allocation5 + $0xa8] sm:$0xf0] }
 0x16e   : > { %2818 = vmatpush.bf16.msrb.mxu3 %v7416_v43  ;;  %v3193_v60 = vmax.f32 %v2475_v7, 0.0  ;;  %v6600_v8 = vor.u32 %v8857_v34, %v6597_v35 }
 0x16f   : > { %v10137_v14 = vpack.c.bf16 %v3204_v32, %v3192_v10  ;;  %2760 = vmatpush.bf16.msrb.mxu1 %v6648_v57  ;;  %v7364_v10 = vor.u32 %v9055_v53, %v7363_v58  ;;  %v7368_v32 = vor.u32 %v9049_v62, %v7365_v42 }
 0x171   : > { %11195 = vst [vmem:[#allocation24_spill] sm:$0xff] %v10137_v14  ;;  %v2447_v36 = vpop.f32.mrf.mxu2  ;;  %v2476_v63 = vpop.f32.mrf.mxu3  ;;  %2732 = vmatpush.bf16.msrb.mxu0 %v7364_v10  ;;  %v7659_v10 = vld [vmem:[#allocation5 + $0x8c0] sm:$0xf] }
 0x172   : > { %v2448_v37 = vadd.f32 %v2447_v36, %v2419_v24  ;;  %v2392_v17 = vpop.f32.mrf.mxu0  ;;  %v2421_v47 = vpop.f32.mrf.mxu1  ;;  %2819 = vmatpush.bf16.msrb.mxu3 %v7368_v32  ;;  %v8941_v36 = vld [vmem:[#allocation5 + $0x31c] sm:$0xf]  ;;  %v9128_v32 = vld [vmem:[#allocation5 + $0x8ec] sm:$0xf0] }
 0x173   : > { %v2393_v6 = vadd.f32 %v2392_v17, %v10088_v38  ;;  %v2422_v50 = vadd.f32 %v2421_v47, %v10126_v31  ;;  %v8953_v38 = vld [vmem:[#allocation5 + $0x37c] sm:$0xf]  ;;  %v6936_v43 = vor.u32 %v8941_v36, %v6933_v5  ;;  %2761 = vmatpush.bf16.msrb.mxu1 %v6600_v8 }
 0x174   : > { %v2477_v33 = vadd.f32 %v2476_v63, %v2448_v37  ;;  %2623 = vmatmul.bf16.gmra.mxu0 %v9948_v44  ;;  %v6984_v30 = vor.u32 %v8953_v38, %v6981_v41  ;;  %v7315_v37 = vld [vmem:[#allocation5 + $0x618] sm:$0xf]  ;;  %v9043_v63 = vld [vmem:[#allocation5 + $0x644] sm:$0xf0]  ;;  %v9037_v17 = vld [vmem:[#allocation5 + $0x61c] sm:$0xf] }
 0x175   : > { %2652 = vmatmul.bf16.gmra.mxu1 %v9950_v45  ;;  %v3216_v24 = vmax.f32 %v2393_v6, 0.0 }
 0x176   : > { %v3205_v48 = vmax.f32 %v2477_v33, 0.0  ;;  %2681 = vmatmul.bf16.gmra.mxu2 %v9946_v39  ;;  %2710 = vmatmul.bf16.gmra.mxu3 %v9948_v44 }
 0x177   : > { %2790 = vmatpush.bf16.msrb.mxu2 %v6984_v30 }
 0x178   : > { %v10146_v59 = vpack.c.bf16 %v3205_v48, %v3193_v60  ;;  %v7317_v60 = vld [vmem:[#allocation5 + $0x648] sm:$0xf0] }
 0x179   : > { %v2450_v7 = vpop.f32.mrf.mxu2  ;;  %v2479_v13 = vpop.f32.mrf.mxu3  ;;  %v7320_v6 = vor.u32 %v9037_v17, %v7317_v60  ;;  %v7611_v60 = vld [vmem:[#allocation5 + $0x860] sm:$0xf] }
 0x17a   : > { %11196 = vst [vmem:[#allocation25_spill] sm:$0xff] %v10146_v59  ;;  %v2451_v12 = vadd.f32 %v2450_v7, %v2422_v50  ;;  %v2394_v18 = vpop.f32.mrf.mxu0  ;;  %v2423_v23 = vpop.f32.mrf.mxu1  ;;  %v8845_v50 = vld [vmem:[#allocation5 + $0x1c] sm:$0xf] }
 0x17b   : > { %v2395_v19 = vadd.f32 %v2394_v18, %v10095_v21  ;;  %v2424_v33 = vadd.f32 %v2423_v23, %v10126_v31  ;;  %v7316_v21 = vor.u32 %v9043_v63, %v7315_v37  ;;  %2791 = vmatpush.bf16.msrb.mxu2 %v6936_v43  ;;  %v6552_v41 = vor.u32 %v8845_v50, %v6549_v55  ;;  %v8930_v18 = vld [vmem:[#allocation5 + $0x2c4] sm:$0xf]  ;;  %v7275_v37 = vld [vmem:[#allocation5 + $0x5c0] sm:$0xf]  ;;  %v9032_v63 = vld [vmem:[#allocation5 + $0x5ec] sm:$0xf0] }
 0x17c   : > { %v2480_v22 = vadd.f32 %v2479_v13, %v2451_v12  ;;  %2820 = vmatpush.bf16.msrb.mxu3 %v7320_v6  ;;  %v6891_v12 = vld [vmem:[#allocation5 + $0x2c0] sm:$0xf]  ;;  %v8936_v13 = vld [vmem:[#allocation5 + $0x2ec] sm:$0xf0] }
 0x17d   : > { %v3228_v25 = vmax.f32 %v2395_v19, 0.0  ;;  %2733 = vmatpush.bf16.msrb.mxu0 %v7316_v21  ;;  %2762 = vmatpush.bf16.msrb.mxu1 %v6552_v41  ;;  %v6893_v19 = vld [vmem:[#allocation5 + $0x2f0] sm:$0xf0]  ;;  %v7276_v21 = vor.u32 %v9032_v63, %v7275_v37  ;;  %v6843_v50 = vld [vmem:[#allocation5 + $0x260] sm:$0xf] }
 0x17e   : > { %v3217_v62 = vmax.f32 %v2480_v22, 0.0  ;;  %v6892_v22 = vor.u32 %v8936_v13, %v6891_v12  ;;  %v8924_v55 = vld [vmem:[#allocation5 + $0x28c] sm:$0xf0] }
 0x17f   : > { %v10149_v47 = vpack.c.bf16 %v3228_v25, %v3216_v24  ;;  %v6896_v25 = vor.u32 %v8930_v18, %v6893_v19  ;;  %v7227_v18 = vld [vmem:[#allocation5 + $0x560] sm:$0xf]  ;;  %v9020_v19 = vld [vmem:[#allocation5 + $0x58c] sm:$0xf0] }
 0x181   : > { %11197 = vst [vmem:[#allocation26_spill] sm:$0xff] %v10149_v47  ;;  %v2452_v48 = vpop.f32.mrf.mxu2  ;;  %v2481_v57 = vpop.f32.mrf.mxu3  ;;  %2842 = vmatpush.bf16.msra.mxu0 %v6892_v22  ;;  %2929 = vmatpush.bf16.msra.mxu3 %v6896_v25  ;;  %v7563_v22 = vld [vmem:[#allocation5 + $0x800] sm:$0xf]  ;;  %v9104_v25 = vld [vmem:[#allocation5 + $0x82c] sm:$0xf0] }
 0x182   : > { %v2453_v56 = vadd.f32 %v2452_v48, %v2424_v33  ;;  %v2397_v38 = vpop.f32.mrf.mxu0  ;;  %v2426_v30 = vpop.f32.mrf.mxu1  ;;  %v9116_v48 = vld [vmem:[#allocation5 + $0x88c] sm:$0xf0]  ;;  %2871 = vmatpush.bf16.msra.mxu1 %v7276_v21 }
 0x183   : > { %v2398_v58 = vadd.f32 %v2397_v38, %v10104_v49  ;;  %v2427_v7 = vadd.f32 %v2426_v30, %v10126_v31  ;;  %v7660_v49 = vor.u32 %v9128_v32, %v7659_v10  ;;  %v7612_v6 = vor.u32 %v9116_v48, %v7611_v60  ;;  %v6845_v38 = vld [vmem:[#allocation5 + $0x290] sm:$0xf0] }
 0x184   : > { %v2482_v53 = vadd.f32 %v2481_v57, %v2453_v56  ;;  %2628 = vmatmul.bf16.gmra.mxu0 %v9964_v28  ;;  %v6844_v56 = vor.u32 %v8924_v55, %v6843_v50  ;;  %v8918_v57 = vld [vmem:[#allocation5 + $0x264] sm:$0xf]  ;;  %v7179_v50 = vld [vmem:[#allocation5 + $0x500] sm:$0xf]  ;;  %v9008_v55 = vld [vmem:[#allocation5 + $0x52c] sm:$0xf0] }
 0x185   : > { %2657 = vmatmul.bf16.gmra.mxu1 %v9966_v29  ;;  %2900 = vmatpush.bf16.msra.mxu2 %v7660_v49  ;;  %v3240_v17 = vmax.f32 %v2398_v58, 0.0  ;;  %v6848_v30 = vor.u32 %v8918_v57, %v6845_v38  ;;  %v7180_v38 = vor.u32 %v9008_v55, %v7179_v50  ;;  %v6701_v50 = vld [vmem:[#allocation5 + $0x170] sm:$0xf0] }
 0x186   : > { %v3229_v42 = vmax.f32 %v2482_v53, 0.0  ;;  %2686 = vmatmul.bf16.gmra.mxu2 %v9962_v27  ;;  %2715 = vmatmul.bf16.gmra.mxu3 %v9964_v28 }
 0x187   : > { %2843 = vmatpush.bf16.msra.mxu0 %v6844_v56  ;;  %2930 = vmatpush.bf16.msra.mxu3 %v6848_v30  ;;  %v9092_v30 = vld [vmem:[#allocation5 + $0x7cc] sm:$0xf0] }
 0x188   : > { %v10158_v23 = vpack.c.bf16 %v3229_v42, %v3217_v62 }
 0x189   : > { %v2455_v24 = vpop.f32.mrf.mxu2  ;;  %v2484_v35 = vpop.f32.mrf.mxu3  ;;  %2901 = vmatpush.bf16.msra.mxu2 %v7612_v6 }
 0x18a   : > { %11198 = vst [vmem:[#allocation27_spill] sm:$0xff] %v10158_v23  ;;  %v2456_v34 = vadd.f32 %v2455_v24, %v2427_v7  ;;  %v2399_v8 = vpop.f32.mrf.mxu0  ;;  %v2428_v5 = vpop.f32.mrf.mxu1  ;;  %v7228_v24 = vor.u32 %v9020_v19, %v7227_v18 }
 0x18b   : > { %v2400_v36 = vadd.f32 %v2399_v8, %v10111_v26  ;;  %v2429_v26 = vadd.f32 %v2428_v5, %v10126_v31  ;;  %v8906_v8 = vld [vmem:[#allocation5 + $0x204] sm:$0xf] }
 0x18c   : > { %v2485_v43 = vadd.f32 %v2484_v35, %v2456_v34  ;;  %v7564_v34 = vor.u32 %v9104_v25, %v7563_v22  ;;  %v8912_v35 = vld [vmem:[#allocation5 + $0x22c] sm:$0xf0]  ;;  %2872 = vmatpush.bf16.msra.mxu1 %v7228_v24 }
 0x18d   : > { %v3252_v33 = vmax.f32 %v2400_v36, 0.0  ;;  %v6797_v36 = vld [vmem:[#allocation5 + $0x230] sm:$0xf0] }
 0x18e   : > { %v3241_v12 = vmax.f32 %v2485_v43, 0.0  ;;  %v6800_v63 = vor.u32 %v8906_v8, %v6797_v36  ;;  %2902 = vmatpush.bf16.msra.mxu2 %v7564_v34  ;;  %v8996_v8 = vld [vmem:[#allocation5 + $0x4cc] sm:$0xf0] }
 0x18f   : > { %v10161_v41 = vpack.c.bf16 %v3252_v33, %v3240_v17 }
 0x190   : > { %2931 = vmatpush.bf16.msra.mxu3 %v6800_v63  ;;  %2873 = vmatpush.bf16.msra.mxu1 %v7180_v38  ;;  %v7467_v63 = vld [vmem:[#allocation5 + $0x740] sm:$0xf] }
 0x191   : > { %11199 = vst [vmem:[#allocation28_spill] sm:$0xff] %v10161_v41  ;;  %v2457_v53 = vpop.f32.mrf.mxu2  ;;  %v2486_v62 = vpop.f32.mrf.mxu3 }
 0x192   : > { %v2458_v58 = vadd.f32 %v2457_v53, %v2429_v26  ;;  %v2402_v42 = vpop.f32.mrf.mxu0  ;;  %v2431_v10 = vpop.f32.mrf.mxu1  ;;  %v7515_v26 = vld [vmem:[#allocation5 + $0x7a0] sm:$0xf] }
 0x193   : > { %v2403_v7 = vadd.f32 %v2402_v42, %v10120_v61  ;;  %v2432_v13 = vadd.f32 %v2431_v10, %v10126_v31  ;;  %v6795_v61 = vld [vmem:[#allocation5 + $0x200] sm:$0xf]  ;;  %v7516_v53 = vor.u32 %v9092_v30, %v7515_v26 }
 0x194   : > { %v2487_v32 = vadd.f32 %v2486_v62, %v2458_v58  ;;  %2633 = vmatmul.bf16.gmra.mxu0 %v9980_v3  ;;  %v6796_v37 = vor.u32 %v8912_v35, %v6795_v61  ;;  %v6747_v58 = vld [vmem:[#allocation5 + $0x1a0] sm:$0xf]  ;;  %v8900_v62 = vld [vmem:[#allocation5 + $0x1cc] sm:$0xf0] }
 0x195   : > { %2662 = vmatmul.bf16.gmra.mxu1 %v9982_v4  ;;  %v3264_v56 = vmax.f32 %v2403_v7, 0.0  ;;  %v10173_v42 = vld [vmem:[#allocation7] sm:$0xff]  ;;  %2903 = vmatpush.bf16.msra.mxu2 %v7516_v53 }
 0x196   : > { %v3253_v49 = vmax.f32 %v2487_v32, 0.0  ;;  %2691 = vmatmul.bf16.gmra.mxu2 %v9978_v2  ;;  %2720 = vmatmul.bf16.gmra.mxu3 %v9980_v3  ;;  %v10176_v10 = vperm.slane %v10173_v42, 4  ;;  %v8894_v32 = vld [vmem:[#allocation5 + $0x1a4] sm:$0xf]  ;;  %v7131_v35 = vld [vmem:[#allocation5 + $0x4a0] sm:$0xf] }
 0x197   : > { %2844 = vmatpush.bf16.msra.mxu0 %v6796_v37 }
 0x198   : > { %v10170_v5 = vpack.c.bf16 %v3253_v49, %v3241_v12  ;;  %v6749_v12 = vld [vmem:[#allocation5 + $0x1d0] sm:$0xf0] }
 0x199   : > { %v2460_v43 = vpop.f32.mrf.mxu2  ;;  %v2489_v33 = vpop.f32.mrf.mxu3 }
 0x19a   : > { %11200 = vst [vmem:[#allocation29_spill] sm:$0xff] %v10170_v5  ;;  %v2461_v17 = vadd.f32 %v2460_v43, %v2432_v13  ;;  %v2404_v21 = vpop.f32.mrf.mxu0  ;;  %v2433_v48 = vpop.f32.mrf.mxu1  ;;  %v6752_v13 = vor.u32 %v8894_v32, %v6749_v12  ;;  %v7132_v43 = vor.u32 %v8996_v8, %v7131_v35 }
 0x19b   : > { %v2405_v60 = vadd.f32 %v2404_v21, %v10129_v40  ;;  %v6748_v40 = vor.u32 %v8900_v62, %v6747_v58  ;;  %v2434_v7 = vadd.f32 %v2433_v48, %v10126_v31  ;;  %v8882_v48 = vld [vmem:[#allocation5 + $0x144] sm:$0xf]  ;;  %v7083_v62 = vld [vmem:[#allocation5 + $0x440] sm:$0xf] }
 0x19c   : > { %v2490_v6 = vadd.f32 %v2489_v33, %v2461_v17  ;;  %2932 = vmatpush.bf16.msra.mxu3 %v6752_v13  ;;  %2874 = vmatpush.bf16.msra.mxu1 %v7132_v43  ;;  %v9080_v17 = vld [vmem:[#allocation5 + $0x76c] sm:$0xf0]  ;;  %v6699_v33 = vld [vmem:[#allocation5 + $0x140] sm:$0xf] }
 0x19d   : > { %v3276_v57 = vmax.f32 %v2405_v60, 0.0  ;;  %2845 = vmatpush.bf16.msra.mxu0 %v6748_v40  ;;  %v7468_v21 = vor.u32 %v9080_v17, %v7467_v63  ;;  %v8888_v60 = vld [vmem:[#allocation5 + $0x16c] sm:$0xf0] }
 0x19e   : > { %v3265_v37 = vmax.f32 %v2490_v6, 0.0  ;;  %v6704_v6 = vor.u32 %v8882_v48, %v6701_v50  ;;  %v8984_v40 = vld [vmem:[#allocation5 + $0x46c] sm:$0xf0] }
 0x19f   : > { %v10178_v49 = vpack.c.bf16 %v3276_v57, %v3264_v56  ;;  %v6700_v57 = vor.u32 %v8888_v60, %v6699_v33  ;;  %2904 = vmatpush.bf16.msra.mxu2 %v7468_v21  ;;  %v7084_v12 = vor.u32 %v8984_v40, %v7083_v62  ;;  %v9068_v13 = vld [vmem:[#allocation5 + $0x70c] sm:$0xf0]  ;;  %v7035_v33 = vld [vmem:[#allocation5 + $0x3e0] sm:$0xf] }
 0x1a0   : > { %2933 = vmatpush.bf16.msra.mxu3 %v6704_v6  ;;  %v8972_v21 = vld [vmem:[#allocation5 + $0x40c] sm:$0xf0]  ;;  %v6603_v6 = vld [vmem:[#allocation5 + $0x80] sm:$0xf] }
 0x1a1   : > { %11201 = vst [vmem:[#allocation30_spill] sm:$0xff] %v10178_v49  ;;  %v2462_v18 = vpop.f32.mrf.mxu2  ;;  %v2491_v24 = vpop.f32.mrf.mxu3  ;;  %2846 = vmatpush.bf16.msra.mxu0 %v6700_v57  ;;  %2875 = vmatpush.bf16.msra.mxu1 %v7084_v12  ;;  %v7036_v48 = vor.u32 %v8972_v21, %v7035_v33  ;;  %v9056_v57 = vld [vmem:[#allocation5 + $0x6ac] sm:$0xf0] }
 0x1a2   : > { %v2463_v19 = vadd.f32 %v2462_v18, %v2434_v7  ;;  %v2503_v22 = vpop.f32.mrf.mxu0  ;;  %v2532_v61 = vpop.f32.mrf.mxu1  ;;  %v7419_v7 = vld [vmem:[#allocation5 + $0x6e0] sm:$0xf] }
 0x1a3   : > { %v2504_v25 = vadd.f32 %v2503_v22, %v10176_v10  ;;  %v6651_v18 = vld [vmem:[#allocation5 + $0xe0] sm:$0xf]  ;;  %v8870_v22 = vld [vmem:[#allocation5 + $0xe4] sm:$0xf] }
 0x1a4   : > { %v2492_v34 = vadd.f32 %v2491_v24, %v2463_v19  ;;  %2734 = vmatmul.bf16.vlgmr.msrb.gmra.mxu0 %v9934_v52  ;;  %v7420_v19 = vor.u32 %v9068_v13, %v7419_v7  ;;  %v8876_v24 = vld [vmem:[#allocation5 + $0x10c] sm:$0xf0] }
 0x1a5   : > { %v2533_v36 = vadd.f32 %v2532_v61, %v2504_v25  ;;  %2763 = vmatmul.bf16.vlgmr.msrb.gmra.mxu1 %v9930_v46  ;;  %v6653_v25 = vld [vmem:[#allocation5 + $0x110] sm:$0xf0]  ;;  %v6652_v61 = vor.u32 %v8876_v24, %v6651_v18  ;;  %v6987_v24 = vld [vmem:[#allocation5 + $0x380] sm:$0xf] }
 0x1a6   : > { %v3277_v31 = vmax.f32 %v2492_v34, 0.0  ;;  %2792 = vmatmul.bf16.vlgmr.msrb.gmra.mxu2 %v9932_v51  ;;  %2821 = vmatmul.bf16.vlgmr.msrb.gmra.mxu3 %v9934_v52  ;;  %v6656_v34 = vor.u32 %v8870_v22, %v6653_v25  ;;  %v8960_v22 = vld [vmem:[#allocation5 + $0x3ac] sm:$0xf0] }
 0x1a7   : > { %2905 = vmatpush.bf16.msra.mxu2 %v7420_v19  ;;  %2847 = vmatpush.bf16.msra.mxu0 %v6652_v61  ;;  %v6988_v61 = vor.u32 %v8960_v22, %v6987_v24  ;;  %v7277_v22 = vld [vmem:[#allocation5 + $0x5f0] sm:$0xf0] }
 0x1a8   : > { %v10186_v55 = vpack.c.bf16 %v3277_v31, %v3265_v37  ;;  %2934 = vmatpush.bf16.msra.mxu3 %v6656_v34  ;;  %2876 = vmatpush.bf16.msra.mxu1 %v7036_v48  ;;  %v7323_v34 = vld [vmem:[#allocation5 + $0x620] sm:$0xf]  ;;  %v8948_v48 = vld [vmem:[#allocation5 + $0x34c] sm:$0xf0] }
 0x1a9   : > { %v2561_v56 = vpop.f32.mrf.mxu2  ;;  %v10188_v26 = vpop.f32.mrf.mxu3 }
 0x1aa   : > { %11202 = vst [vmem:[#allocation31_spill] sm:$0xff] %v10186_v55  ;;  %v2562_v38 = vadd.f32 %v2561_v56, %v2533_v36  ;;  %v2505_v30 = vpop.f32.mrf.mxu0  ;;  %v2534_v58 = vpop.f32.mrf.mxu1  ;;  %v7371_v56 = vld [vmem:[#allocation5 + $0x680] sm:$0xf] }
 0x1ab   : > { %v2506_v53 = vadd.f32 %v2505_v30, %v10176_v10  ;;  %v8864_v30 = vld [vmem:[#allocation5 + $0xac] sm:$0xf0] }
 0x1ac   : > { %v3194_v63 = vmax.f32 %v2562_v38, 0.0  ;;  %v7372_v38 = vor.u32 %v9056_v57, %v7371_v56  ;;  %v6604_v40 = vor.u32 %v8864_v30, %v6603_v6  ;;  %2877 = vmatpush.bf16.msra.mxu1 %v6988_v61 }
 0x1ad   : > { %v2535_v32 = vadd.f32 %v2534_v58, %v2506_v53  ;;  %v8858_v53 = vld [vmem:[#allocation5 + $0x84] sm:$0xf]  ;;  %v6605_v58 = vld [vmem:[#allocation5 + $0xb0] sm:$0xf0] }
 0x1ae   : > { %2906 = vmatpush.bf16.msra.mxu2 %v7372_v38  ;;  %2848 = vmatpush.bf16.msra.mxu0 %v6604_v40 }
 0x1b1   : > { %v2563_v35 = vpop.f32.mrf.mxu2  ;;  %v10191_v36 = vpop.f32.mrf.mxu3 }
 0x1b2   : > { %v2564_v8 = vadd.f32 %v2563_v35, %v2535_v32  ;;  %v2508_v43 = vpop.f32.mrf.mxu0  ;;  %v2537_v31 = vpop.f32.mrf.mxu1  ;;  %v6608_v32 = vor.u32 %v8858_v53, %v6605_v58  ;;  %v9044_v35 = vld [vmem:[#allocation5 + $0x64c] sm:$0xf0] }
 0x1b3   : > { %v2509_v37 = vadd.f32 %v2508_v43, %v10176_v10  ;;  %v7324_v43 = vor.u32 %v9044_v35, %v7323_v34 }
 0x1b4   : > { %v3206_v17 = vmax.f32 %v2564_v8, 0.0  ;;  %2739 = vmatmul.bf16.gmra.mxu0 %v9950_v45  ;;  %2935 = vmatpush.bf16.msra.mxu3 %v6608_v32  ;;  %v6555_v8 = vld [vmem:[#allocation5 + $0x20] sm:$0xf] }
 0x1b5   : > { %v2538_v60 = vadd.f32 %v2537_v31, %v2509_v37  ;;  %2768 = vmatmul.bf16.gmra.mxu1 %v9946_v39  ;;  %v8852_v37 = vld [vmem:[#allocation5 + $0x4c] sm:$0xf0]  ;;  %v8846_v31 = vld [vmem:[#allocation5 + $0x24] sm:$0xf]  ;;  %2907 = vmatpush.bf16.msra.mxu2 %v7324_v43 }
 0x1b6   : > { %v10195_v50 = vpack.c.bf16 %v3206_v17, %v3194_v63  ;;  %2797 = vmatmul.bf16.gmra.mxu2 %v9948_v44  ;;  %2826 = vmatmul.bf16.gmra.mxu3 %v9950_v45  ;;  %v6557_v63 = vld [vmem:[#allocation5 + $0x50] sm:$0xf0]  ;;  %v6556_v17 = vor.u32 %v8852_v37, %v6555_v8 }
 0x1b7   : > { %v6560_v33 = vor.u32 %v8846_v31, %v6557_v63 }
 0x1b8   : > { %11203 = vst [vmem:[#allocation32_spill] sm:$0xff] %v10195_v50  ;;  %2849 = vmatpush.bf16.msra.mxu0 %v6556_v17  ;;  %v9122_v17 = vld [vmem:[#allocation5 + $0x8c4] sm:$0xf] }
 0x1b9   : > { %v2566_v62 = vpop.f32.mrf.mxu2  ;;  %v10200_v7 = vpop.f32.mrf.mxu3  ;;  %2936 = vmatpush.bf16.msra.mxu3 %v6560_v33  ;;  %v7661_v33 = vld [vmem:[#allocation5 + $0x8f0] sm:$0xf0] }
 0x1ba   : > { %v2567_v12 = vadd.f32 %v2566_v62, %v2538_v60  ;;  %v2510_v13 = vpop.f32.mrf.mxu0  ;;  %v2539_v19 = vpop.f32.mrf.mxu1  ;;  %v6939_v60 = vld [vmem:[#allocation5 + $0x320] sm:$0xf] }
 0x1bb   : > { %v2511_v18 = vadd.f32 %v2510_v13, %v10176_v10  ;;  %v6940_v38 = vor.u32 %v8948_v48, %v6939_v60  ;;  %v6899_v13 = vld [vmem:[#allocation5 + $0x2c8] sm:$0xf]  ;;  %v7664_v60 = vor.u32 %v9122_v17, %v7661_v33  ;;  %v9002_v33 = vld [vmem:[#allocation5 + $0x504] sm:$0xf] }
 0x1bc   : > { %v3218_v58 = vmax.f32 %v2567_v12, 0.0  ;;  %v9033_v12 = vld [vmem:[#allocation5 + $0x5f4] sm:$0xf0]  ;;  %v6803_v17 = vld [vmem:[#allocation5 + $0x208] sm:$0xf] }
 0x1bd   : > { %v2540_v25 = vadd.f32 %v2539_v19, %v2511_v18  ;;  %2878 = vmatpush.bf16.msra.mxu1 %v6940_v38  ;;  %v8937_v18 = vld [vmem:[#allocation5 + $0x2f4] sm:$0xf0]  ;;  %v9026_v19 = vld [vmem:[#allocation5 + $0x5c4] sm:$0xf] }
 0x1be   : > { %v6900_v24 = vor.u32 %v8937_v18, %v6899_v13  ;;  %v7280_v34 = vor.u32 %v9026_v19, %v7277_v22  ;;  %v9014_v38 = vld [vmem:[#allocation5 + $0x564] sm:$0xf]  ;;  %v7235_v13 = vld [vmem:[#allocation5 + $0x568] sm:$0xf]  ;;  %v9021_v18 = vld [vmem:[#allocation5 + $0x594] sm:$0xf0] }
 0x1c0   : > { %3016 = vmatpush.bf16.msrb.mxu2 %v6900_v24  ;;  %2958 = vmatpush.bf16.msrb.mxu0 %v7280_v34  ;;  %v9110_v34 = vld [vmem:[#allocation5 + $0x864] sm:$0xf] }
 0x1c1   : > { %v2568_v21 = vpop.f32.mrf.mxu2  ;;  %v10203_v57 = vpop.f32.mrf.mxu3  ;;  %2987 = vmatpush.bf16.msrb.mxu1 %v7664_v60  ;;  %v7181_v60 = vld [vmem:[#allocation5 + $0x530] sm:$0xf0] }
 0x1c2   : > { %v2569_v56 = vadd.f32 %v2568_v21, %v2540_v25  ;;  %v2513_v6 = vpop.f32.mrf.mxu0  ;;  %v2542_v53 = vpop.f32.mrf.mxu1  ;;  %v7283_v25 = vld [vmem:[#allocation5 + $0x5c8] sm:$0xf] }
 0x1c3   : > { %v2514_v30 = vadd.f32 %v2513_v6, %v10176_v10  ;;  %v7284_v35 = vor.u32 %v9033_v12, %v7283_v25  ;;  %v8925_v6 = vld [vmem:[#allocation5 + $0x294] sm:$0xf0]  ;;  %v7236_v25 = vor.u32 %v9021_v18, %v7235_v13 }
 0x1c4   : > { %v3230_v62 = vmax.f32 %v2569_v56, 0.0  ;;  %2744 = vmatmul.bf16.gmra.mxu0 %v9966_v29  ;;  %v6851_v56 = vld [vmem:[#allocation5 + $0x268] sm:$0xf] }
 0x1c5   : > { %v2543_v40 = vadd.f32 %v2542_v53, %v2514_v30  ;;  %2773 = vmatmul.bf16.gmra.mxu1 %v9962_v27  ;;  %3045 = vmatpush.bf16.msrb.mxu3 %v7284_v35  ;;  %v7613_v35 = vld [vmem:[#allocation5 + $0x890] sm:$0xf0] }
 0x1c6   : > { %2802 = vmatmul.bf16.gmra.mxu2 %v9964_v28  ;;  %v10209_v32 = vpack.c.bf16 %v3230_v62, %v3218_v58  ;;  %2831 = vmatmul.bf16.gmra.mxu3 %v9966_v29  ;;  %v6852_v62 = vor.u32 %v8925_v6, %v6851_v56  ;;  %v9009_v56 = vld [vmem:[#allocation5 + $0x534] sm:$0xf0] }
 0x1c8   : > { %11204 = vst [vmem:[#allocation33_spill] sm:$0xff] %v10209_v32  ;;  %3017 = vmatpush.bf16.msrb.mxu2 %v6852_v62  ;;  %v9111_v32 = vld [vmem:[#allocation5 + $0x86c] sm:$0xf] }
 0x1c9   : > { %v2571_v61 = vpop.f32.mrf.mxu2  ;;  %v10212_v43 = vpop.f32.mrf.mxu3  ;;  %3046 = vmatpush.bf16.msrb.mxu3 %v7236_v25 }
 0x1ca   : > { %v2572_v8 = vadd.f32 %v2571_v61, %v2543_v40  ;;  %v2515_v37 = vpop.f32.mrf.mxu0  ;;  %v2544_v63 = vpop.f32.mrf.mxu1  ;;  %v7229_v40 = vld [vmem:[#allocation5 + $0x590] sm:$0xf0] }
 0x1cb   : > { %v2516_v31 = vadd.f32 %v2515_v37, %v10176_v10  ;;  %v7232_v22 = vor.u32 %v9014_v38, %v7229_v40  ;;  %v7184_v38 = vor.u32 %v9002_v33, %v7181_v60 }
 0x1cc   : > { %v3242_v12 = vmax.f32 %v2572_v8, 0.0  ;;  %v8913_v8 = vld [vmem:[#allocation5 + $0x234] sm:$0xf0] }
 0x1cd   : > { %v2545_v21 = vadd.f32 %v2544_v63, %v2516_v31  ;;  %v7616_v31 = vor.u32 %v9110_v34, %v7613_v35  ;;  %2959 = vmatpush.bf16.msrb.mxu0 %v7232_v22  ;;  %v10228_v22 = vperm.slane %v10173_v42, 5  ;;  %v8901_v34 = vld [vmem:[#allocation5 + $0x1d4] sm:$0xf0]  ;;  %v8990_v35 = vld [vmem:[#allocation5 + $0x4a4] sm:$0xf] }
 0x1cf   : > { %2988 = vmatpush.bf16.msrb.mxu1 %v7616_v31  ;;  %v7133_v31 = vld [vmem:[#allocation5 + $0x4d0] sm:$0xf0] }
 0x1d1   : > { %v2573_v48 = vpop.f32.mrf.mxu2  ;;  %v10215_v53 = vpop.f32.mrf.mxu3  ;;  %2960 = vmatpush.bf16.msrb.mxu0 %v7184_v38 }
 0x1d2   : > { %v2574_v30 = vadd.f32 %v2573_v48, %v2545_v21  ;;  %v2518_v58 = vpop.f32.mrf.mxu0  ;;  %v2547_v24 = vpop.f32.mrf.mxu1  ;;  %v6804_v21 = vor.u32 %v8913_v8, %v6803_v17  ;;  %v7187_v48 = vld [vmem:[#allocation5 + $0x508] sm:$0xf]  ;;  %v8997_v8 = vld [vmem:[#allocation5 + $0x4d4] sm:$0xf0] }
 0x1d3   : > { %v2519_v19 = vadd.f32 %v2518_v58, %v10176_v10  ;;  %v7139_v17 = vld [vmem:[#allocation5 + $0x4a8] sm:$0xf] }
 0x1d4   : > { %v3254_v61 = vmax.f32 %v2574_v30, 0.0  ;;  %2749 = vmatmul.bf16.gmra.mxu0 %v9982_v4  ;;  %v7188_v30 = vor.u32 %v9009_v56, %v7187_v48  ;;  %3018 = vmatpush.bf16.msrb.mxu2 %v6804_v21  ;;  %v7136_v21 = vor.u32 %v8990_v35, %v7133_v31  ;;  %v7140_v60 = vor.u32 %v8997_v8, %v7139_v17  ;;  %v8978_v35 = vld [vmem:[#allocation5 + $0x444] sm:$0xf]  ;;  %v7091_v31 = vld [vmem:[#allocation5 + $0x448] sm:$0xf] }
 0x1d5   : > { %v2548_v37 = vadd.f32 %v2547_v24, %v2519_v19  ;;  %2778 = vmatmul.bf16.gmra.mxu1 %v9978_v2  ;;  %v9098_v19 = vld [vmem:[#allocation5 + $0x804] sm:$0xf]  ;;  %v7565_v24 = vld [vmem:[#allocation5 + $0x830] sm:$0xf0]  ;;  %v2593_v17 = vadd.f32 %v10191_v36, %v10228_v22 }
 0x1d6   : > { %2807 = vmatmul.bf16.gmra.mxu2 %v9980_v3  ;;  %v10221_v63 = vpack.c.bf16 %v3254_v61, %v3242_v12  ;;  %2836 = vmatmul.bf16.gmra.mxu3 %v9982_v4  ;;  %v7568_v12 = vor.u32 %v9098_v19, %v7565_v24  ;;  %v6755_v61 = vld [vmem:[#allocation5 + $0x1a8] sm:$0xf]  ;;  %v7517_v19 = vld [vmem:[#allocation5 + $0x7d0] sm:$0xf0] }
 0x1d7   : > { %3047 = vmatpush.bf16.msrb.mxu3 %v7188_v30  ;;  %2961 = vmatpush.bf16.msrb.mxu0 %v7136_v21 }
 0x1d8   : > { %11205 = vst [vmem:[#allocation34_spill] sm:$0xff] %v10221_v63  ;;  %2989 = vmatpush.bf16.msrb.mxu1 %v7568_v12  ;;  %v6941_v63 = vld [vmem:[#allocation5 + $0x350] sm:$0xf0] }
 0x1d9   : > { %v2576_v6 = vpop.f32.mrf.mxu2  ;;  %v10224_v62 = vpop.f32.mrf.mxu3 }
 0x1da   : > { %v2577_v58 = vadd.f32 %v2576_v6, %v2548_v37  ;;  %v2520_v40 = vpop.f32.mrf.mxu0  ;;  %v2549_v18 = vpop.f32.mrf.mxu1  ;;  %v6756_v37 = vor.u32 %v8901_v34, %v6755_v61  ;;  %v8889_v61 = vld [vmem:[#allocation5 + $0x174] sm:$0xf0] }
 0x1db   : > { %v2521_v13 = vadd.f32 %v2520_v40, %v10176_v10  ;;  %v2591_v10 = vadd.f32 %v10188_v26, %v10228_v22  ;;  %3048 = vmatpush.bf16.msrb.mxu3 %v7140_v60 }
 0x1dc   : > { %3019 = vmatpush.bf16.msrb.mxu2 %v6756_v37  ;;  %v3266_v40 = vmax.f32 %v2577_v58, 0.0  ;;  %v6707_v58 = vld [vmem:[#allocation5 + $0x148] sm:$0xf]  ;;  %v7085_v37 = vld [vmem:[#allocation5 + $0x470] sm:$0xf0] }
 0x1dd   : > { %v2550_v25 = vadd.f32 %v2549_v18, %v2521_v13  ;;  %v9086_v18 = vld [vmem:[#allocation5 + $0x7a4] sm:$0xf]  ;;  %v6708_v34 = vor.u32 %v8889_v61, %v6707_v58  ;;  %v6659_v61 = vld [vmem:[#allocation5 + $0xe8] sm:$0xf] }
 0x1de   : > { %v7520_v26 = vor.u32 %v9086_v18, %v7517_v19  ;;  %v7469_v18 = vld [vmem:[#allocation5 + $0x770] sm:$0xf0] }
 0x1e0   : > { %2990 = vmatpush.bf16.msrb.mxu1 %v7520_v26  ;;  %3020 = vmatpush.bf16.msrb.mxu2 %v6708_v34  ;;  %v7043_v34 = vld [vmem:[#allocation5 + $0x3e8] sm:$0xf] }
 0x1e1   : > { %v2578_v33 = vpop.f32.mrf.mxu2  ;;  %v10232_v56 = vpop.f32.mrf.mxu3 }
 0x1e2   : > { %v2579_v48 = vadd.f32 %v2578_v33, %v2550_v25  ;;  %v2619_v6 = vpop.f32.mrf.mxu0  ;;  %v2648_v30 = vpop.f32.mrf.mxu1  ;;  %v10238_v25 = vperm.slane %v10173_v42, 6  ;;  %v8985_v33 = vld [vmem:[#allocation5 + $0x474] sm:$0xf0] }
 0x1e3   : > { %v2620_v38 = vadd.f32 %v2619_v6, %v2591_v10  ;;  %v7088_v10 = vor.u32 %v8978_v35, %v7085_v37  ;;  %v7092_v6 = vor.u32 %v8985_v33, %v7091_v31  ;;  %v8877_v35 = vld [vmem:[#allocation5 + $0x114] sm:$0xf0]  ;;  %v2596_v31 = vadd.f32 %v10200_v7, %v10228_v22 }
 0x1e4   : > { %v3278_v13 = vmax.f32 %v2579_v48, 0.0  ;;  %2850 = vmatmul.bf16.vlgmr.msra.gmra.mxu0 %v9930_v46  ;;  %v6660_v37 = vor.u32 %v8877_v35, %v6659_v61  ;;  %v8954_v61 = vld [vmem:[#allocation5 + $0x384] sm:$0xf]  ;;  %v6989_v35 = vld [vmem:[#allocation5 + $0x3b0] sm:$0xf0] }
 0x1e5   : > { %v2649_v24 = vadd.f32 %v2648_v30, %v2620_v38  ;;  %2879 = vmatmul.bf16.vlgmr.msra.gmra.mxu1 %v9932_v51  ;;  %2962 = vmatpush.bf16.msrb.mxu0 %v7088_v10 }
 0x1e6   : > { %2908 = vmatmul.bf16.vlgmr.msra.gmra.mxu2 %v9934_v52  ;;  %v10240_v12 = vpack.c.bf16 %v3278_v13, %v3266_v40  ;;  %2937 = vmatmul.bf16.vlgmr.msra.gmra.mxu3 %v9930_v46  ;;  %v9074_v13 = vld [vmem:[#allocation5 + $0x744] sm:$0xf] }
 0x1e7   : > { %3049 = vmatpush.bf16.msrb.mxu3 %v7092_v6  ;;  %v7472_v26 = vor.u32 %v9074_v13, %v7469_v18  ;;  %v3195_v36 = vmax.f32 %v2649_v24, 0.0  ;;  %3021 = vmatpush.bf16.msrb.mxu2 %v6660_v37  ;;  %v9062_v18 = vld [vmem:[#allocation5 + $0x6e4] sm:$0xf]  ;;  %v6995_v37 = vld [vmem:[#allocation5 + $0x388] sm:$0xf] }
 0x1e8   : > { %11206 = vst [vmem:[#allocation35_spill] sm:$0xff] %v10240_v12  ;;  %v7037_v12 = vld [vmem:[#allocation5 + $0x410] sm:$0xf0] }
 0x1e9   : > { %v2677_v8 = vpop.f32.mrf.mxu2  ;;  %v2706_v60 = vpop.f32.mrf.mxu3  ;;  %2991 = vmatpush.bf16.msrb.mxu1 %v7472_v26 }
 0x1ea   : > { %v2678_v21 = vadd.f32 %v2677_v8, %v10238_v25  ;;  %v2621_v48 = vpop.f32.mrf.mxu0  ;;  %v2650_v30 = vpop.f32.mrf.mxu1  ;;  %v8966_v8 = vld [vmem:[#allocation5 + $0x3e4] sm:$0xf] }
 0x1eb   : > { %v2622_v38 = vadd.f32 %v2621_v48, %v2593_v17  ;;  %v7040_v33 = vor.u32 %v8966_v8, %v7037_v12  ;;  %v6611_v12 = vld [vmem:[#allocation5 + $0x88] sm:$0xf]  ;;  %v2598_v8 = vadd.f32 %v10203_v57, %v10228_v22 }
 0x1ec   : > { %v10246_v40 = vadd.f32 %v2706_v60, %v2678_v21  ;;  %v8973_v21 = vld [vmem:[#allocation5 + $0x414] sm:$0xf0] }
 0x1ed   : > { %v2651_v19 = vadd.f32 %v2650_v30, %v2622_v38  ;;  %v7044_v6 = vor.u32 %v8973_v21, %v7043_v34  ;;  %2963 = vmatpush.bf16.msrb.mxu0 %v7040_v33 }
 0x1ef   : > { %v3207_v58 = vmax.f32 %v2651_v19, 0.0  ;;  %3050 = vmatpush.bf16.msrb.mxu3 %v7044_v6  ;;  %v7421_v19 = vld [vmem:[#allocation5 + $0x710] sm:$0xf0] }
 0x1f0   : > { %v7424_v26 = vor.u32 %v9062_v18, %v7421_v19  ;;  %v7373_v18 = vld [vmem:[#allocation5 + $0x6b0] sm:$0xf0] }
 0x1f1   : > { %v10250_v17 = vpack.c.bf16 %v3207_v58, %v3195_v36  ;;  %v2679_v10 = vpop.f32.mrf.mxu2  ;;  %v2708_v48 = vpop.f32.mrf.mxu3  ;;  %v8865_v36 = vld [vmem:[#allocation5 + $0xb4] sm:$0xf0] }
 0x1f2   : > { %v2680_v60 = vadd.f32 %v2679_v10, %v10238_v25  ;;  %v2624_v24 = vpop.f32.mrf.mxu0  ;;  %v2653_v30 = vpop.f32.mrf.mxu1  ;;  %2992 = vmatpush.bf16.msrb.mxu1 %v7424_v26  ;;  %v6612_v58 = vor.u32 %v8865_v36, %v6611_v12  ;;  %v8961_v10 = vld [vmem:[#allocation5 + $0x3b4] sm:$0xf0]  ;;  %v6563_v36 = vld [vmem:[#allocation5 + $0x28] sm:$0xf] }
 0x1f3   : > { %11207 = vst [vmem:[#allocation36_spill] sm:$0xff] %v10250_v17  ;;  %v2625_v38 = vadd.f32 %v2624_v24, %v2596_v31  ;;  %v6992_v31 = vor.u32 %v8954_v61, %v6989_v35  ;;  %v8853_v61 = vld [vmem:[#allocation5 + $0x54] sm:$0xf0] }
 0x1f4   : > { %v10253_v13 = vadd.f32 %v2708_v48, %v2680_v60  ;;  %2855 = vmatmul.bf16.gmra.mxu0 %v9946_v39  ;;  %3022 = vmatpush.bf16.msrb.mxu2 %v6612_v58  ;;  %v6996_v48 = vor.u32 %v8961_v10, %v6995_v37  ;;  %v6564_v35 = vor.u32 %v8853_v61, %v6563_v36  ;;  %v6947_v58 = vld [vmem:[#allocation5 + $0x328] sm:$0xf]  ;;  %v8949_v10 = vld [vmem:[#allocation5 + $0x354] sm:$0xf0] }
 0x1f5   : > { %v2654_v7 = vadd.f32 %v2653_v30, %v2625_v38  ;;  %2884 = vmatmul.bf16.gmra.mxu1 %v9948_v44  ;;  %2964 = vmatpush.bf16.msrb.mxu0 %v6992_v31  ;;  %v9050_v30 = vld [vmem:[#allocation5 + $0x684] sm:$0xf]  ;;  %v2601_v37 = vadd.f32 %v10212_v43, %v10228_v22  ;;  %v7667_v36 = vld [vmem:[#allocation5 + $0x8c8] sm:$0xf]  ;;  %v9129_v61 = vld [vmem:[#allocation5 + $0x8f4] sm:$0xf0] }
 0x1f6   : > { %2913 = vmatmul.bf16.gmra.mxu2 %v9950_v45  ;;  %2942 = vmatmul.bf16.gmra.mxu3 %v9946_v39  ;;  %v7376_v26 = vor.u32 %v9050_v30, %v7373_v18 }
 0x1f7   : > { %3051 = vmatpush.bf16.msrb.mxu3 %v6996_v48  ;;  %v3219_v57 = vmax.f32 %v2654_v7, 0.0 }
 0x1f8   : > { %2993 = vmatpush.bf16.msrb.mxu1 %v7376_v26  ;;  %3023 = vmatpush.bf16.msrb.mxu2 %v6564_v35  ;;  %v9123_v35 = vld [vmem:[#allocation5 + $0x8cc] sm:$0xf] }
 0x1f9   : > { %v2682_v34 = vpop.f32.mrf.mxu2  ;;  %v2711_v21 = vpop.f32.mrf.mxu3 }
 0x1fa   : > { %v2683_v33 = vadd.f32 %v2682_v34, %v10238_v25  ;;  %v2626_v60 = vpop.f32.mrf.mxu0  ;;  %v2655_v6 = vpop.f32.mrf.mxu1  ;;  %v8942_v34 = vld [vmem:[#allocation5 + $0x324] sm:$0xf] }
 0x1fb   : > { %v2627_v24 = vadd.f32 %v2626_v60, %v2598_v8  ;;  %v6944_v31 = vor.u32 %v8942_v34, %v6941_v63  ;;  %v9027_v63 = vld [vmem:[#allocation5 + $0x5cc] sm:$0xf]  ;;  %v2603_v34 = vadd.f32 %v10215_v53, %v10228_v22 }
 0x1fc   : > { %v10262_v38 = vadd.f32 %v2711_v21, %v2683_v33  ;;  %v9038_v33 = vld [vmem:[#allocation5 + $0x624] sm:$0xf]  ;;  %v7325_v21 = vld [vmem:[#allocation5 + $0x650] sm:$0xf0] }
 0x1fd   : > { %v2656_v19 = vadd.f32 %v2655_v6, %v2627_v24  ;;  %v6948_v6 = vor.u32 %v8949_v10, %v6947_v58  ;;  %v7328_v30 = vor.u32 %v9038_v33, %v7325_v21  ;;  %2965 = vmatpush.bf16.msrb.mxu0 %v6944_v31 }
 0x1ff   : > { %v3231_v12 = vmax.f32 %v2656_v19, 0.0  ;;  %3052 = vmatpush.bf16.msrb.mxu3 %v6948_v6  ;;  %2994 = vmatpush.bf16.msrb.mxu1 %v7328_v30  ;;  %v8931_v30 = vld [vmem:[#allocation5 + $0x2cc] sm:$0xf] }
 0x201   : > { %v2684_v8 = vpop.f32.mrf.mxu2  ;;  %v10266_v60 = vpack.c.bf16 %v3231_v12, %v3219_v57  ;;  %v2713_v48 = vpop.f32.mrf.mxu3  ;;  %v7285_v57 = vld [vmem:[#allocation5 + $0x5f8] sm:$0xf0] }
 0x202   : > { %v2685_v7 = vadd.f32 %v2684_v8, %v10238_v25  ;;  %v2629_v24 = vpop.f32.mrf.mxu0  ;;  %v2658_v19 = vpop.f32.mrf.mxu1  ;;  %v7288_v12 = vor.u32 %v9027_v63, %v7285_v57  ;;  %v7669_v8 = vld [vmem:[#allocation5 + $0x8f8] sm:$0xf0]  ;;  %v9015_v57 = vld [vmem:[#allocation5 + $0x56c] sm:$0xf] }
 0x203   : > { %11208 = vst [vmem:[#allocation37_spill] sm:$0xff] %v10266_v60  ;;  %v2630_v18 = vadd.f32 %v2629_v24, %v2601_v37  ;;  %v7668_v37 = vor.u32 %v9129_v61, %v7667_v36  ;;  %v7672_v21 = vor.u32 %v9123_v35, %v7669_v8  ;;  %v7237_v36 = vld [vmem:[#allocation5 + $0x598] sm:$0xf0]  ;;  %v9117_v60 = vld [vmem:[#allocation5 + $0x894] sm:$0xf0] }
 0x204   : > { %v10269_v26 = vadd.f32 %v2713_v48, %v2685_v7  ;;  %2860 = vmatmul.bf16.gmra.mxu0 %v9962_v27  ;;  %3132 = vmatpush.bf16.msra.mxu2 %v7288_v12  ;;  %v7240_v61 = vor.u32 %v9015_v57, %v7237_v36  ;;  %v2606_v12 = vadd.f32 %v10224_v62, %v10228_v22  ;;  %v8919_v62 = vld [vmem:[#allocation5 + $0x26c] sm:$0xf]  ;;  %v9105_v57 = vld [vmem:[#allocation5 + $0x834] sm:$0xf0] }
 0x205   : > { %v2659_v43 = vadd.f32 %v2658_v19, %v2630_v18  ;;  %2889 = vmatmul.bf16.gmra.mxu1 %v9964_v28  ;;  %3074 = vmatpush.bf16.msra.mxu0 %v7668_v37  ;;  %v6901_v18 = vld [vmem:[#allocation5 + $0x2f8] sm:$0xf0] }
 0x206   : > { %2918 = vmatmul.bf16.gmra.mxu2 %v9966_v29  ;;  %2947 = vmatmul.bf16.gmra.mxu3 %v9962_v27  ;;  %v6904_v63 = vor.u32 %v8931_v30, %v6901_v18  ;;  %v7621_v37 = vld [vmem:[#allocation5 + $0x898] sm:$0xf0]  ;;  %v9003_v30 = vld [vmem:[#allocation5 + $0x50c] sm:$0xf] }
 0x207   : > { %3161 = vmatpush.bf16.msra.mxu3 %v7672_v21  ;;  %v3243_v19 = vmax.f32 %v2659_v43, 0.0 }
 0x208   : > { %3103 = vmatpush.bf16.msra.mxu1 %v6904_v63  ;;  %3133 = vmatpush.bf16.msra.mxu2 %v7240_v61  ;;  %v7571_v63 = vld [vmem:[#allocation5 + $0x808] sm:$0xf] }
 0x209   : > { %v2687_v58 = vpop.f32.mrf.mxu2  ;;  %v2716_v10 = vpop.f32.mrf.mxu3 }
 0x20a   : > { %v2688_v31 = vadd.f32 %v2687_v58, %v10238_v25  ;;  %v2631_v33 = vpop.f32.mrf.mxu0  ;;  %v2660_v48 = vpop.f32.mrf.mxu1  ;;  %v7619_v58 = vld [vmem:[#allocation5 + $0x868] sm:$0xf] }
 0x20b   : > { %v2632_v7 = vadd.f32 %v2631_v33, %v2603_v34  ;;  %v7620_v34 = vor.u32 %v9117_v60, %v7619_v58  ;;  %v7624_v33 = vor.u32 %v9111_v32, %v7621_v37  ;;  %v6853_v60 = vld [vmem:[#allocation5 + $0x298] sm:$0xf0]  ;;  %v2608_v32 = vadd.f32 %v10232_v56, %v10228_v22  ;;  %v8907_v56 = vld [vmem:[#allocation5 + $0x20c] sm:$0xf] }
 0x20c   : > { %v10278_v24 = vadd.f32 %v2716_v10, %v2688_v31  ;;  %v7573_v37 = vld [vmem:[#allocation5 + $0x838] sm:$0xf0] }
 0x20d   : > { %v2661_v6 = vadd.f32 %v2660_v48, %v2632_v7  ;;  %3075 = vmatpush.bf16.msra.mxu0 %v7620_v34  ;;  %3162 = vmatpush.bf16.msra.mxu3 %v7624_v33  ;;  %v9099_v34 = vld [vmem:[#allocation5 + $0x80c] sm:$0xf] }
 0x20f   : > { %v3255_v53 = vmax.f32 %v2661_v6, 0.0 }
 0x211   : > { %v2689_v35 = vpop.f32.mrf.mxu2  ;;  %v10282_v8 = vpack.c.bf16 %v3255_v53, %v3243_v19  ;;  %v2718_v43 = vpop.f32.mrf.mxu3  ;;  %v6856_v19 = vor.u32 %v8919_v62, %v6853_v60  ;;  %v7189_v53 = vld [vmem:[#allocation5 + $0x538] sm:$0xf0] }
 0x212   : > { %v2690_v31 = vadd.f32 %v2689_v35, %v10238_v25  ;;  %v2634_v10 = vpop.f32.mrf.mxu0  ;;  %v2663_v7 = vpop.f32.mrf.mxu1  ;;  %v7572_v35 = vor.u32 %v9105_v57, %v7571_v63  ;;  %v9093_v57 = vld [vmem:[#allocation5 + $0x7d4] sm:$0xf0] }
 0x213   : > { %11209 = vst [vmem:[#allocation38_spill] sm:$0xff] %v10282_v8  ;;  %v2635_v21 = vadd.f32 %v2634_v10, %v2606_v12  ;;  %v7192_v12 = vor.u32 %v9003_v30, %v7189_v53  ;;  %3104 = vmatpush.bf16.msra.mxu1 %v6856_v19  ;;  %v7576_v10 = vor.u32 %v9099_v34, %v7573_v37  ;;  %v7141_v30 = vld [vmem:[#allocation5 + $0x4d8] sm:$0xf0]  ;;  %v7523_v53 = vld [vmem:[#allocation5 + $0x7a8] sm:$0xf] }
 0x214   : > { %v10285_v48 = vadd.f32 %v2718_v43, %v2690_v31  ;;  %2865 = vmatmul.bf16.gmra.mxu0 %v9978_v2 }
 0x215   : > { %v2664_v6 = vadd.f32 %v2663_v7, %v2635_v21  ;;  %2894 = vmatmul.bf16.gmra.mxu1 %v9980_v3  ;;  %3134 = vmatpush.bf16.msra.mxu2 %v7192_v12  ;;  %v6805_v21 = vld [vmem:[#allocation5 + $0x238] sm:$0xf0]  ;;  %v8991_v7 = vld [vmem:[#allocation5 + $0x4ac] sm:$0xf] }
 0x216   : > { %2923 = vmatmul.bf16.gmra.mxu2 %v9982_v4  ;;  %2952 = vmatmul.bf16.gmra.mxu3 %v9978_v2  ;;  %v7144_v63 = vor.u32 %v8991_v7, %v7141_v30  ;;  %v7475_v7 = vld [vmem:[#allocation5 + $0x748] sm:$0xf]  ;;  %v7477_v30 = vld [vmem:[#allocation5 + $0x778] sm:$0xf0] }
 0x217   : > { %3076 = vmatpush.bf16.msra.mxu0 %v7572_v35  ;;  %3163 = vmatpush.bf16.msra.mxu3 %v7576_v10  ;;  %v3267_v62 = vmax.f32 %v2664_v6, 0.0  ;;  %v10300_v6 = vperm.slane %v10173_v42, 7 }
 0x219   : > { %v2692_v18 = vpop.f32.mrf.mxu2  ;;  %v2721_v61 = vpop.f32.mrf.mxu3  ;;  %3135 = vmatpush.bf16.msra.mxu2 %v7144_v63 }
 0x21a   : > { %v2693_v36 = vadd.f32 %v2692_v18, %v10238_v25  ;;  %v2636_v58 = vpop.f32.mrf.mxu0  ;;  %v2665_v43 = vpop.f32.mrf.mxu1  ;;  %v6808_v18 = vor.u32 %v8907_v56, %v6805_v21  ;;  %v6757_v56 = vld [vmem:[#allocation5 + $0x1d8] sm:$0xf0]  ;;  %v8979_v21 = vld [vmem:[#allocation5 + $0x44c] sm:$0xf] }
 0x21b   : > { %v2637_v31 = vadd.f32 %v2636_v58, %v2608_v32  ;;  %v9087_v32 = vld [vmem:[#allocation5 + $0x7ac] sm:$0xf]  ;;  %v7525_v58 = vld [vmem:[#allocation5 + $0x7d8] sm:$0xf0] }
 0x21c   : > { %v10294_v33 = vadd.f32 %v2721_v61, %v2693_v36  ;;  %3105 = vmatpush.bf16.msra.mxu1 %v6808_v18  ;;  %v7524_v36 = vor.u32 %v9093_v57, %v7523_v53  ;;  %v7528_v61 = vor.u32 %v9087_v32, %v7525_v58  ;;  %v9075_v18 = vld [vmem:[#allocation5 + $0x74c] sm:$0xf] }
 0x21d   : > { %v2666_v22 = vadd.f32 %v2665_v43, %v2637_v31  ;;  %v7480_v57 = vor.u32 %v9075_v18, %v7477_v30  ;;  %v9063_v18 = vld [vmem:[#allocation5 + $0x6ec] sm:$0xf] }
 0x21e   : > { %3077 = vmatpush.bf16.msra.mxu0 %v7524_v36  ;;  %3164 = vmatpush.bf16.msra.mxu3 %v7528_v61 }
 0x21f   : > { %v3279_v60 = vmax.f32 %v2666_v22, 0.0 }
 0x221   : > { %v2694_v19 = vpop.f32.mrf.mxu2  ;;  %v10296_v12 = vpack.c.bf16 %v3279_v60, %v3267_v62  ;;  %v2723_v34 = vpop.f32.mrf.mxu3  ;;  %v9081_v60 = vld [vmem:[#allocation5 + $0x774] sm:$0xf0] }
 0x222   : > { %v2695_v35 = vadd.f32 %v2694_v19, %v10238_v25  ;;  %v2735_v37 = vpop.f32.mrf.mxu0  ;;  %v2764_v43 = vpop.f32.mrf.mxu1  ;;  %v8895_v25 = vld [vmem:[#allocation5 + $0x1ac] sm:$0xf]  ;;  %v7476_v63 = vor.u32 %v9081_v60, %v7475_v7  ;;  %3165 = vmatpush.bf16.msra.mxu3 %v7480_v57  ;;  %v7427_v7 = vld [vmem:[#allocation5 + $0x6e8] sm:$0xf] }
 0x223   : > { %11210 = vst [vmem:[#allocation39_spill] sm:$0xff] %v10296_v12  ;;  %v2736_v31 = vadd.f32 %v2735_v37, %v10246_v40  ;;  %v2765_v22 = vadd.f32 %v2764_v43, %v10300_v6  ;;  %v6760_v42 = vor.u32 %v8895_v25, %v6757_v56  ;;  %v7093_v40 = vld [vmem:[#allocation5 + $0x478] sm:$0xf0]  ;;  %v8883_v43 = vld [vmem:[#allocation5 + $0x14c] sm:$0xf] }
 0x224   : > { %v10303_v10 = vadd.f32 %v2723_v34, %v2695_v35  ;;  %2966 = vmatmul.bf16.vlgmr.msrb.gmra.mxu0 %v9932_v51  ;;  %v7096_v62 = vor.u32 %v8979_v21, %v7093_v40  ;;  %v6709_v25 = vld [vmem:[#allocation5 + $0x178] sm:$0xf0] }
 0x225   : > { %2995 = vmatmul.bf16.vlgmr.msrb.gmra.mxu1 %v9934_v52  ;;  %3078 = vmatpush.bf16.msra.mxu0 %v7476_v63  ;;  %v3196_v34 = vmax.f32 %v2736_v31, 0.0  ;;  %v6712_v21 = vor.u32 %v8883_v43, %v6709_v25  ;;  %v7045_v40 = vld [vmem:[#allocation5 + $0x418] sm:$0xf0]  ;;  %v8871_v43 = vld [vmem:[#allocation5 + $0xec] sm:$0xf] }
 0x226   : > { %3024 = vmatmul.bf16.vlgmr.msrb.gmra.mxu2 %v9930_v46  ;;  %3053 = vmatmul.bf16.vlgmr.msrb.gmra.mxu3 %v9932_v51  ;;  %v6661_v25 = vld [vmem:[#allocation5 + $0x118] sm:$0xf0] }
 0x227   : > { %3106 = vmatpush.bf16.msra.mxu1 %v6760_v42  ;;  %3136 = vmatpush.bf16.msra.mxu2 %v7096_v62  ;;  %v8967_v42 = vld [vmem:[#allocation5 + $0x3ec] sm:$0xf]  ;;  %v9069_v62 = vld [vmem:[#allocation5 + $0x714] sm:$0xf0] }
 0x228   : > { %v7048_v60 = vor.u32 %v8967_v42, %v7045_v40  ;;  %v6997_v42 = vld [vmem:[#allocation5 + $0x3b8] sm:$0xf0]  ;;  %v7379_v40 = vld [vmem:[#allocation5 + $0x688] sm:$0xf] }
 0x229   : > { %v2793_v53 = vpop.f32.mrf.mxu2  ;;  %v2822_v58 = vpop.f32.mrf.mxu3 }
 0x22a   : > { %v2794_v32 = vadd.f32 %v2793_v53, %v2765_v22  ;;  %v2737_v19 = vpop.f32.mrf.mxu0  ;;  %v2766_v61 = vpop.f32.mrf.mxu1  ;;  %v7428_v53 = vor.u32 %v9069_v62, %v7427_v7  ;;  %v7381_v62 = vld [vmem:[#allocation5 + $0x6b8] sm:$0xf0] }
 0x22b   : > { %v2738_v36 = vadd.f32 %v2737_v19, %v10253_v13  ;;  %v2767_v22 = vadd.f32 %v2766_v61, %v10300_v6  ;;  %v7429_v13 = vld [vmem:[#allocation5 + $0x718] sm:$0xf0]  ;;  %3107 = vmatpush.bf16.msra.mxu1 %v6712_v21  ;;  %3137 = vmatpush.bf16.msra.mxu2 %v7048_v60  ;;  %v6664_v21 = vor.u32 %v8871_v43, %v6661_v25  ;;  %v9057_v60 = vld [vmem:[#allocation5 + $0x6b4] sm:$0xf0] }
 0x22c   : > { %v2823_v35 = vadd.f32 %v2822_v58, %v2794_v32  ;;  %v7432_v63 = vor.u32 %v9063_v18, %v7429_v13  ;;  %3079 = vmatpush.bf16.msra.mxu0 %v7428_v53  ;;  %v7380_v13 = vor.u32 %v9057_v60, %v7379_v40  ;;  %v6613_v43 = vld [vmem:[#allocation5 + $0xb8] sm:$0xf0]  ;;  %v7331_v40 = vld [vmem:[#allocation5 + $0x628] sm:$0xf]  ;;  %v9045_v60 = vld [vmem:[#allocation5 + $0x654] sm:$0xf0] }
 0x22d   : > { %v3208_v37 = vmax.f32 %v2738_v36, 0.0 }
 0x22e   : > { %3166 = vmatpush.bf16.msra.mxu3 %v7432_v63  ;;  %v3197_v61 = vmax.f32 %v2823_v35, 0.0  ;;  %v9051_v35 = vld [vmem:[#allocation5 + $0x68c] sm:$0xf] }
 0x22f   : > { %v10311_v56 = vpack.c.bf16 %v3208_v37, %v3196_v34  ;;  %3108 = vmatpush.bf16.msra.mxu1 %v6664_v21 }
 0x230   : > { %3080 = vmatpush.bf16.msra.mxu0 %v7380_v13  ;;  %v8847_v13 = vld [vmem:[#allocation5 + $0x2c] sm:$0xf] }
 0x231   : > { %11211 = vst [vmem:[#allocation40_spill] sm:$0xff] %v10311_v56  ;;  %v2795_v30 = vpop.f32.mrf.mxu2  ;;  %v2824_v57 = vpop.f32.mrf.mxu3 }
 0x232   : > { %v2796_v31 = vadd.f32 %v2795_v30, %v2767_v22  ;;  %v2740_v32 = vpop.f32.mrf.mxu0  ;;  %v2769_v19 = vpop.f32.mrf.mxu1  ;;  %v7384_v30 = vor.u32 %v9051_v35, %v7381_v62  ;;  %v7333_v62 = vld [vmem:[#allocation5 + $0x658] sm:$0xf0] }
 0x233   : > { %v2741_v58 = vadd.f32 %v2740_v32, %v10262_v38  ;;  %v2770_v37 = vadd.f32 %v2769_v19, %v10300_v6  ;;  %v8955_v38 = vld [vmem:[#allocation5 + $0x38c] sm:$0xf] }
 0x234   : > { %v2825_v36 = vadd.f32 %v2824_v57, %v2796_v31  ;;  %2971 = vmatmul.bf16.gmra.mxu0 %v9948_v44  ;;  %v7000_v22 = vor.u32 %v8955_v38, %v6997_v42  ;;  %3167 = vmatpush.bf16.msra.mxu3 %v7384_v30  ;;  %v8943_v38 = vld [vmem:[#allocation5 + $0x32c] sm:$0xf]  ;;  %v6949_v42 = vld [vmem:[#allocation5 + $0x358] sm:$0xf0] }
 0x235   : > { %3000 = vmatmul.bf16.gmra.mxu1 %v9950_v45  ;;  %v6952_v21 = vor.u32 %v8943_v38, %v6949_v42  ;;  %v6565_v30 = vld [vmem:[#allocation5 + $0x58] sm:$0xf0]  ;;  %v7951_v38 = vld [vmem:[#allocation8 + $0x228] sm:$0xf]  ;;  %v9200_v42 = vld [vmem:[#allocation8 + $0x230] sm:$0xf0] }
 0x236   : > { %v3209_v34 = vmax.f32 %v2825_v36, 0.0  ;;  %3029 = vmatmul.bf16.gmra.mxu2 %v9946_v39  ;;  %3058 = vmatmul.bf16.gmra.mxu3 %v9948_v44  ;;  %v3220_v36 = vmax.f32 %v2741_v58, 0.0 }
 0x237   : > { %3138 = vmatpush.bf16.msra.mxu2 %v7000_v22 }
 0x238   : > { %v10320_v7 = vpack.c.bf16 %v3209_v34, %v3197_v61  ;;  %v8859_v34 = vld [vmem:[#allocation5 + $0x8c] sm:$0xf] }
 0x239   : > { %v2798_v18 = vpop.f32.mrf.mxu2  ;;  %v2827_v63 = vpop.f32.mrf.mxu3  ;;  %v6616_v25 = vor.u32 %v8859_v34, %v6613_v43 }
 0x23a   : > { %11212 = vst [vmem:[#allocation41_spill] sm:$0xff] %v10320_v7  ;;  %v2799_v53 = vadd.f32 %v2798_v18, %v2770_v37  ;;  %v2742_v31 = vpop.f32.mrf.mxu0  ;;  %v2771_v32 = vpop.f32.mrf.mxu1  ;;  %v9039_v37 = vld [vmem:[#allocation5 + $0x62c] sm:$0xf] }
 0x23b   : > { %v2743_v57 = vadd.f32 %v2742_v31, %v10269_v26  ;;  %v2772_v22 = vadd.f32 %v2771_v32, %v10300_v6  ;;  %3109 = vmatpush.bf16.msra.mxu1 %v6616_v25  ;;  %v7332_v26 = vor.u32 %v9045_v60, %v7331_v40  ;;  %3139 = vmatpush.bf16.msra.mxu2 %v6952_v21  ;;  %v7759_v21 = vld [vmem:[#allocation8 + $0xa8] sm:$0xf]  ;;  %v9152_v40 = vld [vmem:[#allocation8 + $0xb0] sm:$0xf0] }
 0x23c   : > { %v2828_v19 = vadd.f32 %v2827_v63, %v2799_v53  ;;  %v7336_v58 = vor.u32 %v9039_v37, %v7333_v62  ;;  %v8047_v60 = vld [vmem:[#allocation8 + $0x2e8] sm:$0xf]  ;;  %v9224_v37 = vld [vmem:[#allocation8 + $0x2f0] sm:$0xf0] }
 0x23d   : > { %v3232_v61 = vmax.f32 %v2743_v57, 0.0  ;;  %3081 = vmatpush.bf16.msra.mxu0 %v7332_v26  ;;  %v6568_v57 = vor.u32 %v8847_v13, %v6565_v30  ;;  %v8048_v62 = vor.u32 %v9224_v37, %v8047_v60  ;;  %v8035_v60 = vld [vmem:[#allocation8 + $0x2d0] sm:$0xf] }
 0x23e   : > { %3168 = vmatpush.bf16.msra.mxu3 %v7336_v58  ;;  %v3221_v32 = vmax.f32 %v2828_v19, 0.0  ;;  %v7760_v19 = vor.u32 %v9152_v40, %v7759_v21  ;;  %v7747_v21 = vld [vmem:[#allocation8 + $0x90] sm:$0xf]  ;;  %v9149_v40 = vld [vmem:[#allocation8 + $0x98] sm:$0xf0] }
 0x23f   : > { %v10323_v35 = vpack.c.bf16 %v3232_v61, %v3220_v36  ;;  %3110 = vmatpush.bf16.msra.mxu1 %v6568_v57  ;;  %v9176_v57 = vld [vmem:[#allocation8 + $0x170] sm:$0xf0] }
 0x241   : > { %11213 = vst [vmem:[#allocation42_spill] sm:$0xff] %v10323_v35  ;;  %v2800_v18 = vpop.f32.mrf.mxu2  ;;  %v2829_v63 = vpop.f32.mrf.mxu3  ;;  %5262 = vmatpush.bf16.msrb.mxu0 %v7760_v19 }
 0x242   : > { %v2801_v53 = vadd.f32 %v2800_v18, %v2772_v22  ;;  %v2745_v31 = vpop.f32.mrf.mxu0  ;;  %v2774_v43 = vpop.f32.mrf.mxu1  ;;  %5349 = vmatpush.bf16.msrb.mxu3 %v8048_v62 }
 0x243   : > { %v2746_v34 = vadd.f32 %v2745_v31, %v10278_v24  ;;  %v2775_v25 = vadd.f32 %v2774_v43, %v10300_v6  ;;  %v7952_v24 = vor.u32 %v9200_v42, %v7951_v38  ;;  %v7855_v31 = vld [vmem:[#allocation8 + $0x168] sm:$0xf] }
 0x244   : > { %v2830_v36 = vadd.f32 %v2829_v63, %v2801_v53  ;;  %2976 = vmatmul.bf16.gmra.mxu0 %v9964_v28  ;;  %v7856_v38 = vor.u32 %v9176_v57, %v7855_v31 }
 0x245   : > { %3005 = vmatmul.bf16.gmra.mxu1 %v9966_v29  ;;  %5320 = vmatpush.bf16.msrb.mxu2 %v7952_v24  ;;  %v3244_v43 = vmax.f32 %v2746_v34, 0.0  ;;  %v9221_v24 = vld [vmem:[#allocation8 + $0x2d8] sm:$0xf0] }
 0x246   : > { %v3233_v61 = vmax.f32 %v2830_v36, 0.0  ;;  %3034 = vmatmul.bf16.gmra.mxu2 %v9962_v27  ;;  %3063 = vmatmul.bf16.gmra.mxu3 %v9964_v28 }
 0x247   : > { %5291 = vmatpush.bf16.msrb.mxu1 %v7856_v38 }
 0x248   : > { %v10332_v22 = vpack.c.bf16 %v3233_v61, %v3221_v32  ;;  %v7939_v32 = vld [vmem:[#allocation8 + $0x210] sm:$0xf]  ;;  %v9197_v61 = vld [vmem:[#allocation8 + $0x218] sm:$0xf0] }
 0x249   : > { %v2803_v26 = vpop.f32.mrf.mxu2  ;;  %v2832_v58 = vpop.f32.mrf.mxu3  ;;  %v7940_v42 = vor.u32 %v9197_v61, %v7939_v32  ;;  %v7927_v32 = vld [vmem:[#allocation8 + $0x1f8] sm:$0xf]  ;;  %v9194_v61 = vld [vmem:[#allocation8 + $0x200] sm:$0xf0] }
 0x24a   : > { %11214 = vst [vmem:[#allocation43_spill] sm:$0xff] %v10332_v22  ;;  %v2804_v18 = vadd.f32 %v2803_v26, %v2775_v25  ;;  %v2747_v13 = vpop.f32.mrf.mxu0  ;;  %v2776_v53 = vpop.f32.mrf.mxu1  ;;  %v7748_v25 = vor.u32 %v9149_v40, %v7747_v21  ;;  %v8036_v26 = vor.u32 %v9221_v24, %v8035_v60  ;;  %v9146_v21 = vld [vmem:[#allocation8 + $0x80] sm:$0xf0]  ;;  %v8023_v40 = vld [vmem:[#allocation8 + $0x2b8] sm:$0xf] }
 0x24b   : > { %v2748_v30 = vadd.f32 %v2747_v13, %v10285_v48  ;;  %v2777_v48 = vadd.f32 %v2776_v53, %v10300_v6  ;;  %5321 = vmatpush.bf16.msrb.mxu2 %v7940_v42  ;;  %v7843_v53 = vld [vmem:[#allocation8 + $0x150] sm:$0xf]  ;;  %v7928_v42 = vor.u32 %v9194_v61, %v7927_v32  ;;  %v9191_v61 = vld [vmem:[#allocation8 + $0x1e8] sm:$0xf0] }
 0x24c   : > { %v2833_v63 = vadd.f32 %v2832_v58, %v2804_v18  ;;  %5263 = vmatpush.bf16.msrb.mxu0 %v7748_v25  ;;  %5350 = vmatpush.bf16.msrb.mxu3 %v8036_v26  ;;  %v9218_v25 = vld [vmem:[#allocation8 + $0x2c0] sm:$0xf0] }
 0x24d   : > { %v3256_v36 = vmax.f32 %v2748_v30, 0.0 }
 0x24e   : > { %v3245_v31 = vmax.f32 %v2833_v63, 0.0 }
 0x24f   : > { %v10335_v37 = vpack.c.bf16 %v3256_v36, %v3244_v43  ;;  %v9173_v36 = vld [vmem:[#allocation8 + $0x158] sm:$0xf0]  ;;  %5322 = vmatpush.bf16.msrb.mxu2 %v7928_v42 }
 0x250   : > { %v7844_v38 = vor.u32 %v9173_v36, %v7843_v53  ;;  %v7831_v53 = vld [vmem:[#allocation8 + $0x138] sm:$0xf]  ;;  %v9170_v36 = vld [vmem:[#allocation8 + $0x140] sm:$0xf0] }
 0x251   : > { %11215 = vst [vmem:[#allocation44_spill] sm:$0xff] %v10335_v37  ;;  %v2805_v19 = vpop.f32.mrf.mxu2  ;;  %v2834_v62 = vpop.f32.mrf.mxu3  ;;  %v7832_v32 = vor.u32 %v9170_v36, %v7831_v53 }
 0x252   : > { %v2806_v34 = vadd.f32 %v2805_v19, %v2777_v48  ;;  %v2750_v18 = vpop.f32.mrf.mxu0  ;;  %v2779_v13 = vpop.f32.mrf.mxu1  ;;  %5292 = vmatpush.bf16.msrb.mxu1 %v7844_v38  ;;  %v8024_v48 = vor.u32 %v9218_v25, %v8023_v40  ;;  %v7915_v38 = vld [vmem:[#allocation8 + $0x1e0] sm:$0xf]  ;;  %v9215_v25 = vld [vmem:[#allocation8 + $0x2a8] sm:$0xf0] }
 0x253   : > { %v2751_v58 = vadd.f32 %v2750_v18, %v10294_v33  ;;  %v2780_v43 = vadd.f32 %v2779_v13, %v10300_v6  ;;  %v7735_v33 = vld [vmem:[#allocation8 + $0x78] sm:$0xf]  ;;  %v8011_v40 = vld [vmem:[#allocation8 + $0x2a0] sm:$0xf] }
 0x254   : > { %v2835_v30 = vadd.f32 %v2834_v62, %v2806_v34  ;;  %2981 = vmatmul.bf16.gmra.mxu0 %v9980_v3  ;;  %v7736_v24 = vor.u32 %v9146_v21, %v7735_v33  ;;  %5351 = vmatpush.bf16.msrb.mxu3 %v8024_v48  ;;  %v7916_v33 = vor.u32 %v9191_v61, %v7915_v38  ;;  %v9143_v21 = vld [vmem:[#allocation8 + $0x68] sm:$0xf0] }
 0x255   : > { %3010 = vmatmul.bf16.gmra.mxu1 %v9982_v4  ;;  %v9167_v38 = vld [vmem:[#allocation8 + $0x128] sm:$0xf0] }
 0x256   : > { %v3257_v57 = vmax.f32 %v2835_v30, 0.0  ;;  %3039 = vmatmul.bf16.gmra.mxu2 %v9978_v2  ;;  %3068 = vmatmul.bf16.gmra.mxu3 %v9980_v3  ;;  %v10347_v30 = vld [vmem:[#allocation7 + $0x8] sm:$0xf] }
 0x257   : > { %5264 = vmatpush.bf16.msrb.mxu0 %v7736_v24  ;;  %v10350_v42 = vperm.slane %v10347_v30, 0  ;;  %5293 = vmatpush.bf16.msrb.mxu1 %v7832_v32  ;;  %v7819_v32 = vld [vmem:[#allocation8 + $0x120] sm:$0xf] }
 0x258   : > { %v10344_v63 = vpack.c.bf16 %v3257_v57, %v3245_v31  ;;  %v3268_v31 = vmax.f32 %v2751_v58, 0.0  ;;  %5323 = vmatpush.bf16.msrb.mxu2 %v7916_v33  ;;  %v8012_v58 = vor.u32 %v9215_v25, %v8011_v40  ;;  %v9188_v33 = vld [vmem:[#allocation8 + $0x1d0] sm:$0xf0]  ;;  %v7999_v40 = vld [vmem:[#allocation8 + $0x288] sm:$0xf] }
 0x259   : > { %v2808_v60 = vpop.f32.mrf.mxu2  ;;  %v2837_v19 = vpop.f32.mrf.mxu3  ;;  %v9212_v25 = vld [vmem:[#allocation8 + $0x290] sm:$0xf0] }
 0x25a   : > { %11216 = vst [vmem:[#allocation45_spill] sm:$0xff] %v10344_v63  ;;  %v2809_v26 = vadd.f32 %v2808_v60, %v2780_v43  ;;  %v2752_v34 = vpop.f32.mrf.mxu0  ;;  %v2781_v18 = vpop.f32.mrf.mxu1  ;;  %v7723_v43 = vld [vmem:[#allocation8 + $0x60] sm:$0xf]  ;;  %5352 = vmatpush.bf16.msrb.mxu3 %v8012_v58 }
 0x25b   : > { %v2753_v62 = vadd.f32 %v2752_v34, %v10303_v10  ;;  %v7724_v10 = vor.u32 %v9143_v21, %v7723_v43  ;;  %v2782_v24 = vadd.f32 %v2781_v18, %v10300_v6  ;;  %v7903_v18 = vld [vmem:[#allocation8 + $0x1c8] sm:$0xf] }
 0x25c   : > { %v2838_v13 = vadd.f32 %v2837_v19, %v2809_v26  ;;  %v7711_v43 = vld [vmem:[#allocation8 + $0x48] sm:$0xf]  ;;  %v7904_v21 = vor.u32 %v9188_v33, %v7903_v18  ;;  %v7987_v18 = vld [vmem:[#allocation8 + $0x270] sm:$0xf] }
 0x25d   : > { %v3280_v57 = vmax.f32 %v2753_v62, 0.0  ;;  %5265 = vmatpush.bf16.msrb.mxu0 %v7724_v10  ;;  %v9140_v10 = vld [vmem:[#allocation8 + $0x50] sm:$0xf0] }
 0x25e   : > { %5324 = vmatpush.bf16.msrb.mxu2 %v7904_v21 }
 0x25f   : > { %v10352_v60 = vpack.c.bf16 %v3280_v57, %v3268_v31  ;;  %v7820_v31 = vor.u32 %v9167_v38, %v7819_v32  ;;  %v3269_v57 = vmax.f32 %v2838_v13, 0.0  ;;  %v8000_v13 = vor.u32 %v9212_v25, %v7999_v40  ;;  %v7891_v32 = vld [vmem:[#allocation8 + $0x1b0] sm:$0xf]  ;;  %v9185_v38 = vld [vmem:[#allocation8 + $0x1b8] sm:$0xf0] }
 0x261   : > { %11217 = vst [vmem:[#allocation46_spill] sm:$0xff] %v10352_v60  ;;  %v2810_v48 = vpop.f32.mrf.mxu2  ;;  %v2839_v19 = vpop.f32.mrf.mxu3  ;;  %5294 = vmatpush.bf16.msrb.mxu1 %v7820_v31  ;;  %5353 = vmatpush.bf16.msrb.mxu3 %v8000_v13  ;;  %v7699_v31 = vld [vmem:[#allocation8 + $0x30] sm:$0xf] }
 0x262   : > { %v2811_v26 = vadd.f32 %v2810_v48, %v2782_v24  ;;  %v2851_v34 = vpop.f32.mrf.mxu0  ;;  %v2880_v53 = vpop.f32.mrf.mxu1  ;;  %v7712_v48 = vor.u32 %v9140_v10, %v7711_v43 }
 0x263   : > { %v2852_v62 = vadd.f32 %v2851_v34, %v10350_v42  ;;  %v7807_v34 = vld [vmem:[#allocation8 + $0x108] sm:$0xf] }
 0x264   : > { %v2840_v36 = vadd.f32 %v2839_v19, %v2811_v26  ;;  %3082 = vmatmul.bf16.vlgmr.msra.gmra.mxu0 %v9934_v52 }
 0x265   : > { %v2881_v61 = vadd.f32 %v2880_v53, %v2852_v62  ;;  %3111 = vmatmul.bf16.vlgmr.msra.gmra.mxu1 %v9930_v46  ;;  %5266 = vmatpush.bf16.msrb.mxu0 %v7712_v48  ;;  %v9164_v62 = vld [vmem:[#allocation8 + $0x110] sm:$0xf0] }
 0x266   : > { %v3281_v6 = vmax.f32 %v2840_v36, 0.0  ;;  %3140 = vmatmul.bf16.vlgmr.msra.gmra.mxu2 %v9932_v51  ;;  %3169 = vmatmul.bf16.vlgmr.msra.gmra.mxu3 %v9934_v52  ;;  %v7808_v36 = vor.u32 %v9164_v62, %v7807_v34 }
 0x268   : > { %v10360_v24 = vpack.c.bf16 %v3281_v6, %v3269_v57  ;;  %v7892_v57 = vor.u32 %v9185_v38, %v7891_v32  ;;  %v9137_v6 = vld [vmem:[#allocation8 + $0x38] sm:$0xf0]  ;;  %5295 = vmatpush.bf16.msrb.mxu1 %v7808_v36  ;;  %v9182_v32 = vld [vmem:[#allocation8 + $0x1a0] sm:$0xf0]  ;;  %v7687_v38 = vld [vmem:[#allocation8 + $0x18] sm:$0xf] }
 0x269   : > { %v2909_v58 = vpop.f32.mrf.mxu2  ;;  %v10362_v19 = vpop.f32.mrf.mxu3  ;;  %v7700_v33 = vor.u32 %v9137_v6, %v7699_v31  ;;  %v9134_v31 = vld [vmem:[#allocation8 + $0x20] sm:$0xf0] }
 0x26a   : > { %11218 = vst [vmem:[#allocation47_spill] sm:$0xff] %v10360_v24  ;;  %v2910_v26 = vadd.f32 %v2909_v58, %v2881_v61  ;;  %v2853_v46 = vpop.f32.mrf.mxu0  ;;  %v2882_v52 = vpop.f32.mrf.mxu1  ;;  %v9209_v61 = vld [vmem:[#allocation8 + $0x278] sm:$0xf0]  ;;  %5325 = vmatpush.bf16.msrb.mxu2 %v7892_v57  ;;  %v7975_v57 = vld [vmem:[#allocation8 + $0x258] sm:$0xf] }
 0x26b   : > { %v2854_v51 = vadd.f32 %v2853_v46, %v10350_v42  ;;  %v7988_v43 = vor.u32 %v9209_v61, %v7987_v18  ;;  %5267 = vmatpush.bf16.msrb.mxu0 %v7700_v33  ;;  %v9206_v6 = vld [vmem:[#allocation8 + $0x260] sm:$0xf0]  ;;  %v7688_v61 = vor.u32 %v9134_v31, %v7687_v38  ;;  %v7771_v31 = vld [vmem:[#allocation8 + $0xc0] sm:$0xf] }
 0x26c   : > { %v3198_v13 = vmax.f32 %v2910_v26, 0.0  ;;  %v7976_v33 = vor.u32 %v9206_v6, %v7975_v57  ;;  %v9155_v57 = vld [vmem:[#allocation8 + $0xc8] sm:$0xf0] }
 0x26d   : > { %v2883_v53 = vadd.f32 %v2882_v52, %v2854_v51  ;;  %5354 = vmatpush.bf16.msrb.mxu3 %v7988_v43  ;;  %v7795_v51 = vld [vmem:[#allocation8 + $0xf0] sm:$0xf]  ;;  %v9161_v52 = vld [vmem:[#allocation8 + $0xf8] sm:$0xf0] }
 0x26e   : > { %v7796_v62 = vor.u32 %v9161_v52, %v7795_v51  ;;  %v7675_v51 = vld [vmem:[#allocation8] sm:$0xf] }
 0x26f   : > { %5268 = vmatpush.bf16.msrb.mxu0 %v7688_v61 }
 0x270   : > { %5296 = vmatpush.bf16.msrb.mxu1 %v7796_v62  ;;  %v9131_v62 = vld [vmem:[#allocation8 + $0x8] sm:$0xf0] }
 0x271   : > { %v2911_v21 = vpop.f32.mrf.mxu2  ;;  %v10365_v40 = vpop.f32.mrf.mxu3  ;;  %5355 = vmatpush.bf16.msrb.mxu3 %v7976_v33  ;;  %v7772_v33 = vor.u32 %v9155_v57, %v7771_v31  ;;  %v9272_v57 = vld [vmem:[#allocation8 + $0x470] sm:$0xf0] }
 0x272   : > { %v2912_v10 = vadd.f32 %v2911_v21, %v2883_v53  ;;  %v2856_v25 = vpop.f32.mrf.mxu0  ;;  %v2885_v48 = vpop.f32.mrf.mxu1  ;;  %v7879_v53 = vld [vmem:[#allocation8 + $0x198] sm:$0xf] }
 0x273   : > { %v2857_v58 = vadd.f32 %v2856_v25, %v10350_v42  ;;  %v7880_v26 = vor.u32 %v9182_v32, %v7879_v53  ;;  %v9158_v25 = vld [vmem:[#allocation8 + $0xe0] sm:$0xf0]  ;;  %v7963_v53 = vld [vmem:[#allocation8 + $0x240] sm:$0xf]  ;;  %v7676_v32 = vor.u32 %v9131_v62, %v7675_v51  ;;  %v8431_v62 = vld [vmem:[#allocation8 + $0x5e8] sm:$0xf] }
 0x274   : > { %v3210_v46 = vmax.f32 %v2912_v10, 0.0  ;;  %3087 = vmatmul.bf16.gmra.mxu0 %v9950_v45 }
 0x275   : > { %v2886_v34 = vadd.f32 %v2885_v48, %v2857_v58  ;;  %3116 = vmatmul.bf16.gmra.mxu1 %v9946_v39  ;;  %5326 = vmatpush.bf16.msrb.mxu2 %v7880_v26 }
 0x276   : > { %v10369_v36 = vpack.c.bf16 %v3210_v46, %v3198_v13  ;;  %3145 = vmatmul.bf16.gmra.mxu2 %v9948_v44  ;;  %3174 = vmatmul.bf16.gmra.mxu3 %v9950_v45  ;;  %v7783_v45 = vld [vmem:[#allocation8 + $0xd8] sm:$0xf]  ;;  %v7867_v13 = vld [vmem:[#allocation8 + $0x180] sm:$0xf]  ;;  %v9179_v46 = vld [vmem:[#allocation8 + $0x188] sm:$0xf0] }
 0x277   : > { %v7784_v48 = vor.u32 %v9158_v25, %v7783_v45  ;;  %v7868_v52 = vor.u32 %v9179_v46, %v7867_v13  ;;  %5269 = vmatpush.bf16.msrb.mxu0 %v7676_v32  ;;  %v9296_v13 = vld [vmem:[#allocation8 + $0x530] sm:$0xf0]  ;;  %v8143_v46 = vld [vmem:[#allocation8 + $0x3a8] sm:$0xf] }
 0x278   : > { %11219 = vst [vmem:[#allocation48_spill] sm:$0xff] %v10369_v36 }
 0x279   : > { %v2914_v18 = vpop.f32.mrf.mxu2  ;;  %v10374_v21 = vpop.f32.mrf.mxu3  ;;  %5297 = vmatpush.bf16.msrb.mxu1 %v7784_v48  ;;  %5327 = vmatpush.bf16.msrb.mxu2 %v7868_v52  ;;  %v9248_v52 = vld [vmem:[#allocation8 + $0x3b0] sm:$0xf0] }
 0x27a   : > { %v2915_v43 = vadd.f32 %v2914_v18, %v2886_v34  ;;  %v2858_v10 = vpop.f32.mrf.mxu0  ;;  %v2887_v44 = vpop.f32.mrf.mxu1  ;;  %v9203_v34 = vld [vmem:[#allocation8 + $0x248] sm:$0xf0] }
 0x27b   : > { %v2859_v39 = vadd.f32 %v2858_v10, %v10350_v42  ;;  %v7964_v38 = vor.u32 %v9203_v34, %v7963_v53  ;;  %v8144_v34 = vor.u32 %v9248_v52, %v8143_v46  ;;  %v9245_v46 = vld [vmem:[#allocation8 + $0x398] sm:$0xf0] }
 0x27c   : > { %v9317_v52 = vld [vmem:[#allocation8 + $0x5d8] sm:$0xf0] }
 0x27d   : > { %v2888_v58 = vadd.f32 %v2887_v44, %v2859_v39  ;;  %5356 = vmatpush.bf16.msrb.mxu3 %v7964_v38  ;;  %v3222_v44 = vmax.f32 %v2915_v43, 0.0  ;;  %5298 = vmatpush.bf16.msrb.mxu1 %v7772_v33  ;;  %v9320_v43 = vld [vmem:[#allocation8 + $0x5f0] sm:$0xf0] }
 0x27e   : > { %v8432_v32 = vor.u32 %v9320_v43, %v8431_v62  ;;  %5378 = vmatpush.bf16.msra.mxu0 %v8144_v34 }
 0x281   : > { %v2916_v26 = vpop.f32.mrf.mxu2  ;;  %v10377_v18 = vpop.f32.mrf.mxu3  ;;  %5465 = vmatpush.bf16.msra.mxu3 %v8432_v32 }
 0x282   : > { %v2917_v6 = vadd.f32 %v2916_v26, %v2888_v58  ;;  %v2861_v61 = vpop.f32.mrf.mxu0  ;;  %v2890_v39 = vpop.f32.mrf.mxu1  ;;  %v8335_v58 = vld [vmem:[#allocation8 + $0x528] sm:$0xf] }
 0x283   : > { %v2862_v10 = vadd.f32 %v2861_v61, %v10350_v42  ;;  %v8336_v51 = vor.u32 %v9296_v13, %v8335_v58 }
 0x284   : > { %v3234_v45 = vmax.f32 %v2917_v6, 0.0  ;;  %3092 = vmatmul.bf16.gmra.mxu0 %v9966_v29 }
 0x285   : > { %v2891_v25 = vadd.f32 %v2890_v39, %v2862_v10  ;;  %3121 = vmatmul.bf16.gmra.mxu1 %v9962_v27  ;;  %5436 = vmatpush.bf16.msra.mxu2 %v8336_v51  ;;  %v8323_v10 = vld [vmem:[#allocation8 + $0x510] sm:$0xf]  ;;  %v9293_v39 = vld [vmem:[#allocation8 + $0x518] sm:$0xf0] }
 0x286   : > { %3150 = vmatmul.bf16.gmra.mxu2 %v9964_v28  ;;  %v10383_v48 = vpack.c.bf16 %v3234_v45, %v3222_v44  ;;  %3179 = vmatmul.bf16.gmra.mxu3 %v9966_v29  ;;  %v8239_v29 = vld [vmem:[#allocation8 + $0x468] sm:$0xf]  ;;  %v8131_v44 = vld [vmem:[#allocation8 + $0x390] sm:$0xf]  ;;  %v8324_v13 = vor.u32 %v9293_v39, %v8323_v10  ;;  %v9242_v39 = vld [vmem:[#allocation8 + $0x380] sm:$0xf0] }
 0x287   : > { %v8240_v61 = vor.u32 %v9272_v57, %v8239_v29  ;;  %v8419_v51 = vld [vmem:[#allocation8 + $0x5d0] sm:$0xf] }
 0x288   : > { %11220 = vst [vmem:[#allocation49_spill] sm:$0xff] %v10383_v48  ;;  %v8420_v34 = vor.u32 %v9317_v52, %v8419_v51 }
 0x289   : > { %v2919_v53 = vpop.f32.mrf.mxu2  ;;  %v10386_v26 = vpop.f32.mrf.mxu3  ;;  %5407 = vmatpush.bf16.msra.mxu1 %v8240_v61  ;;  %5437 = vmatpush.bf16.msra.mxu2 %v8324_v13  ;;  %v8311_v61 = vld [vmem:[#allocation8 + $0x4f8] sm:$0xf] }
 0x28a   : > { %v2920_v38 = vadd.f32 %v2919_v53, %v2891_v25  ;;  %v2863_v27 = vpop.f32.mrf.mxu0  ;;  %v2892_v31 = vpop.f32.mrf.mxu1  ;;  %v8132_v53 = vor.u32 %v9245_v46, %v8131_v44  ;;  %5466 = vmatpush.bf16.msra.mxu3 %v8420_v34  ;;  %v8407_v44 = vld [vmem:[#allocation8 + $0x5b8] sm:$0xf] }
 0x28b   : > { %v2864_v28 = vadd.f32 %v2863_v27, %v10350_v42 }
 0x28c   : > { %v3246_v32 = vmax.f32 %v2920_v38, 0.0  ;;  %5379 = vmatpush.bf16.msra.mxu0 %v8132_v53  ;;  %v9290_v38 = vld [vmem:[#allocation8 + $0x500] sm:$0xf0]  ;;  %v10402_v53 = vperm.slane %v10347_v30, 1 }
 0x28d   : > { %v2893_v6 = vadd.f32 %v2892_v31, %v2864_v28  ;;  %v8227_v28 = vld [vmem:[#allocation8 + $0x450] sm:$0xf]  ;;  %v9269_v31 = vld [vmem:[#allocation8 + $0x458] sm:$0xf0]  ;;  %v8312_v10 = vor.u32 %v9290_v38, %v8311_v61  ;;  %v8395_v61 = vld [vmem:[#allocation8 + $0x5a0] sm:$0xf] }
 0x28e   : > { %v8228_v57 = vor.u32 %v9269_v31, %v8227_v28  ;;  %v9287_v28 = vld [vmem:[#allocation8 + $0x4e8] sm:$0xf0]  ;;  %v8107_v31 = vld [vmem:[#allocation8 + $0x360] sm:$0xf] }
 0x28f   : > { %5438 = vmatpush.bf16.msra.mxu2 %v8312_v10  ;;  %v9311_v38 = vld [vmem:[#allocation8 + $0x5a8] sm:$0xf0] }
 0x290   : > { %5408 = vmatpush.bf16.msra.mxu1 %v8228_v57  ;;  %v9239_v57 = vld [vmem:[#allocation8 + $0x368] sm:$0xf0] }
 0x291   : > { %v2921_v33 = vpop.f32.mrf.mxu2  ;;  %v10389_v25 = vpop.f32.mrf.mxu3  ;;  %v8108_v10 = vor.u32 %v9239_v57, %v8107_v31  ;;  %v8095_v31 = vld [vmem:[#allocation8 + $0x348] sm:$0xf] }
 0x292   : > { %v2922_v45 = vadd.f32 %v2921_v33, %v2893_v6  ;;  %v2866_v58 = vpop.f32.mrf.mxu0  ;;  %v2895_v43 = vpop.f32.mrf.mxu1  ;;  %v8119_v33 = vld [vmem:[#allocation8 + $0x378] sm:$0xf]  ;;  %v8383_v57 = vld [vmem:[#allocation8 + $0x588] sm:$0xf] }
 0x293   : > { %v2867_v62 = vadd.f32 %v2866_v58, %v10350_v42  ;;  %v8120_v13 = vor.u32 %v9242_v39, %v8119_v33  ;;  %v8396_v39 = vor.u32 %v9311_v38, %v8395_v61  ;;  %v2941_v61 = vadd.f32 %v10365_v40, %v10402_v53 }
 0x294   : > { %v3258_v27 = vmax.f32 %v2922_v45, 0.0  ;;  %3097 = vmatmul.bf16.gmra.mxu0 %v9982_v4  ;;  %v9314_v45 = vld [vmem:[#allocation8 + $0x5c0] sm:$0xf0] }
 0x295   : > { %v2896_v29 = vadd.f32 %v2895_v43, %v2867_v62  ;;  %3126 = vmatmul.bf16.gmra.mxu1 %v9978_v2  ;;  %v8408_v46 = vor.u32 %v9314_v45, %v8407_v44  ;;  %5380 = vmatpush.bf16.msra.mxu0 %v8120_v13  ;;  %v8215_v62 = vld [vmem:[#allocation8 + $0x438] sm:$0xf]  ;;  %v9266_v43 = vld [vmem:[#allocation8 + $0x440] sm:$0xf0] }
 0x296   : > { %3155 = vmatmul.bf16.gmra.mxu2 %v9980_v3  ;;  %v10395_v6 = vpack.c.bf16 %v3258_v27, %v3246_v32  ;;  %3184 = vmatmul.bf16.gmra.mxu3 %v9982_v4  ;;  %v8216_v32 = vor.u32 %v9266_v43, %v8215_v62  ;;  %v8299_v27 = vld [vmem:[#allocation8 + $0x4e0] sm:$0xf]  ;;  %v9263_v62 = vld [vmem:[#allocation8 + $0x428] sm:$0xf0] }
 0x297   : > { %5467 = vmatpush.bf16.msra.mxu3 %v8408_v46 }
 0x298   : > { %11221 = vst [vmem:[#allocation50_spill] sm:$0xff] %v10395_v6  ;;  %5409 = vmatpush.bf16.msra.mxu1 %v8216_v32 }
 0x299   : > { %v2924_v58 = vpop.f32.mrf.mxu2  ;;  %v10398_v2 = vpop.f32.mrf.mxu3  ;;  %5381 = vmatpush.bf16.msra.mxu0 %v8108_v10 }
 0x29a   : > { %v2925_v51 = vadd.f32 %v2924_v58, %v2896_v29  ;;  %v2868_v3 = vpop.f32.mrf.mxu0  ;;  %v2897_v4 = vpop.f32.mrf.mxu1  ;;  %v8300_v29 = vor.u32 %v9287_v28, %v8299_v27  ;;  %v9284_v27 = vld [vmem:[#allocation8 + $0x4d0] sm:$0xf0] }
 0x29b   : > { %v2869_v52 = vadd.f32 %v2868_v3, %v10350_v42  ;;  %v2939_v42 = vadd.f32 %v10362_v19, %v10402_v53  ;;  %5468 = vmatpush.bf16.msra.mxu3 %v8396_v39 }
 0x29c   : > { %5439 = vmatpush.bf16.msra.mxu2 %v8300_v29  ;;  %v3270_v3 = vmax.f32 %v2925_v51, 0.0  ;;  %v8287_v51 = vld [vmem:[#allocation8 + $0x4c8] sm:$0xf]  ;;  %v9236_v29 = vld [vmem:[#allocation8 + $0x350] sm:$0xf0] }
 0x29d   : > { %v2898_v34 = vadd.f32 %v2897_v4, %v2869_v52  ;;  %v8203_v4 = vld [vmem:[#allocation8 + $0x420] sm:$0xf]  ;;  %v8288_v28 = vor.u32 %v9284_v27, %v8287_v51  ;;  %v8275_v51 = vld [vmem:[#allocation8 + $0x4b0] sm:$0xf]  ;;  %v9281_v27 = vld [vmem:[#allocation8 + $0x4b8] sm:$0xf0] }
 0x29e   : > { %v8204_v19 = vor.u32 %v9263_v62, %v8203_v4 }
 0x2a0   : > { %5410 = vmatpush.bf16.msra.mxu1 %v8204_v19  ;;  %5440 = vmatpush.bf16.msra.mxu2 %v8288_v28  ;;  %v8371_v28 = vld [vmem:[#allocation8 + $0x570] sm:$0xf] }
 0x2a1   : > { %v2926_v33 = vpop.f32.mrf.mxu2  ;;  %v10406_v45 = vpop.f32.mrf.mxu3 }
 0x2a2   : > { %v2927_v44 = vadd.f32 %v2926_v33, %v2898_v34  ;;  %v2967_v58 = vpop.f32.mrf.mxu0  ;;  %v2996_v46 = vpop.f32.mrf.mxu1  ;;  %v10412_v34 = vperm.slane %v10347_v30, 2  ;;  %v9308_v33 = vld [vmem:[#allocation8 + $0x590] sm:$0xf0] }
 0x2a3   : > { %v2968_v13 = vadd.f32 %v2967_v58, %v2939_v42  ;;  %v8096_v42 = vor.u32 %v9236_v29, %v8095_v31  ;;  %v8276_v31 = vor.u32 %v9281_v27, %v8275_v51  ;;  %v8083_v29 = vld [vmem:[#allocation8 + $0x330] sm:$0xf]  ;;  %v8071_v27 = vld [vmem:[#allocation8 + $0x318] sm:$0xf] }
 0x2a4   : > { %v3282_v52 = vmax.f32 %v2927_v44, 0.0  ;;  %5270 = vmatmul.bf16.vlgmr.msrb.gmra.mxu0 %v10021_v16  ;;  %v8384_v44 = vor.u32 %v9308_v33, %v8383_v57  ;;  %v2944_v57 = vadd.f32 %v10374_v21, %v10402_v53 }
 0x2a5   : > { %v2997_v43 = vadd.f32 %v2996_v46, %v2968_v13  ;;  %5299 = vmatmul.bf16.vlgmr.msrb.gmra.mxu1 %v10076_v54  ;;  %5382 = vmatpush.bf16.msra.mxu0 %v8096_v42 }
 0x2a6   : > { %5328 = vmatmul.bf16.vlgmr.msrb.gmra.mxu2 %v10137_v14  ;;  %v10414_v32 = vpack.c.bf16 %v3282_v52, %v3270_v3  ;;  %5357 = vmatmul.bf16.vlgmr.msrb.gmra.mxu3 %v10146_v59  ;;  %v8191_v3 = vld [vmem:[#allocation8 + $0x408] sm:$0xf]  ;;  %v9260_v52 = vld [vmem:[#allocation8 + $0x410] sm:$0xf0] }
 0x2a7   : > { %5469 = vmatpush.bf16.msra.mxu3 %v8384_v44  ;;  %v8192_v62 = vor.u32 %v9260_v52, %v8191_v3  ;;  %v3199_v40 = vmax.f32 %v2997_v43, 0.0  ;;  %5441 = vmatpush.bf16.msra.mxu2 %v8276_v31  ;;  %v8179_v52 = vld [vmem:[#allocation8 + $0x3f0] sm:$0xf]  ;;  %v9230_v31 = vld [vmem:[#allocation8 + $0x320] sm:$0xf0] }
 0x2a8   : > { %11222 = vst [vmem:[#allocation51_spill] sm:$0xff] %v10414_v32 }
 0x2a9   : > { %v3025_v38 = vpop.f32.mrf.mxu2  ;;  %v3054_v10 = vpop.f32.mrf.mxu3  ;;  %5411 = vmatpush.bf16.msra.mxu1 %v8192_v62 }
 0x2aa   : > { %v3026_v30 = vadd.f32 %v3025_v38, %v10412_v34  ;;  %v2969_v39 = vpop.f32.mrf.mxu0  ;;  %v2998_v13 = vpop.f32.mrf.mxu1  ;;  %v9233_v38 = vld [vmem:[#allocation8 + $0x338] sm:$0xf0] }
 0x2ab   : > { %v2970_v58 = vadd.f32 %v2969_v39, %v2941_v61  ;;  %v8084_v33 = vor.u32 %v9233_v38, %v8083_v29  ;;  %v8359_v29 = vld [vmem:[#allocation8 + $0x558] sm:$0xf]  ;;  %v2946_v38 = vadd.f32 %v10377_v18, %v10402_v53 }
 0x2ac   : > { %v10420_v46 = vadd.f32 %v3054_v10, %v3026_v30  ;;  %v9305_v30 = vld [vmem:[#allocation8 + $0x578] sm:$0xf0] }
 0x2ad   : > { %v2999_v4 = vadd.f32 %v2998_v13, %v2970_v58  ;;  %v8372_v44 = vor.u32 %v9305_v30, %v8371_v28  ;;  %5383 = vmatpush.bf16.msra.mxu0 %v8084_v33 }
 0x2af   : > { %v3211_v19 = vmax.f32 %v2999_v4, 0.0  ;;  %5470 = vmatpush.bf16.msra.mxu3 %v8372_v44  ;;  %v9257_v4 = vld [vmem:[#allocation8 + $0x3f8] sm:$0xf0] }
 0x2b0   : > { %v8180_v62 = vor.u32 %v9257_v4, %v8179_v52  ;;  %v9254_v52 = vld [vmem:[#allocation8 + $0x3e0] sm:$0xf0] }
 0x2b1   : > { %v10424_v61 = vpack.c.bf16 %v3211_v19, %v3199_v40  ;;  %v3027_v42 = vpop.f32.mrf.mxu2  ;;  %v3056_v39 = vpop.f32.mrf.mxu3  ;;  %v8263_v40 = vld [vmem:[#allocation8 + $0x498] sm:$0xf]  ;;  %v9278_v19 = vld [vmem:[#allocation8 + $0x4a0] sm:$0xf0] }
 0x2b2   : > { %v3028_v10 = vadd.f32 %v3027_v42, %v10412_v34  ;;  %v2972_v43 = vpop.f32.mrf.mxu0  ;;  %v3001_v13 = vpop.f32.mrf.mxu1  ;;  %5412 = vmatpush.bf16.msra.mxu1 %v8180_v62  ;;  %v8264_v51 = vor.u32 %v9278_v19, %v8263_v40  ;;  %v9302_v42 = vld [vmem:[#allocation8 + $0x560] sm:$0xf0]  ;;  %v8251_v19 = vld [vmem:[#allocation8 + $0x480] sm:$0xf] }
 0x2b3   : > { %11223 = vst [vmem:[#allocation52_spill] sm:$0xff] %v10424_v61  ;;  %v2973_v58 = vadd.f32 %v2972_v43, %v2944_v57  ;;  %v8072_v57 = vor.u32 %v9230_v31, %v8071_v27  ;;  %v9275_v27 = vld [vmem:[#allocation8 + $0x488] sm:$0xf0] }
 0x2b4   : > { %v10427_v3 = vadd.f32 %v3056_v39, %v3028_v10  ;;  %5275 = vmatmul.bf16.gmra.mxu0 %v10035_v9  ;;  %5442 = vmatpush.bf16.msra.mxu2 %v8264_v51  ;;  %v8360_v39 = vor.u32 %v9302_v42, %v8359_v29  ;;  %v8252_v31 = vor.u32 %v9275_v27, %v8251_v19  ;;  %v8347_v51 = vld [vmem:[#allocation8 + $0x540] sm:$0xf]  ;;  %v9299_v42 = vld [vmem:[#allocation8 + $0x548] sm:$0xf0]  ;;  %v8527_v19 = vld [vmem:[#allocation8 + $0x6a8] sm:$0xf] }
 0x2b5   : > { %v3002_v21 = vadd.f32 %v3001_v13, %v2973_v58  ;;  %5304 = vmatmul.bf16.gmra.mxu1 %v10092_v11  ;;  %5384 = vmatpush.bf16.msra.mxu0 %v8072_v57  ;;  %v8167_v13 = vld [vmem:[#allocation8 + $0x3d8] sm:$0xf]  ;;  %v2949_v29 = vadd.f32 %v10386_v26, %v10402_v53  ;;  %v8719_v26 = vld [vmem:[#allocation8 + $0x828] sm:$0xf]  ;;  %v9344_v27 = vld [vmem:[#allocation8 + $0x6b0] sm:$0xf0] }
 0x2b6   : > { %5333 = vmatmul.bf16.gmra.mxu2 %v10149_v47  ;;  %5362 = vmatmul.bf16.gmra.mxu3 %v10158_v23  ;;  %v8168_v62 = vor.u32 %v9254_v52, %v8167_v13  ;;  %v9227_v23 = vld [vmem:[#allocation8 + $0x308] sm:$0xf0] }
 0x2b7   : > { %5471 = vmatpush.bf16.msra.mxu3 %v8360_v39  ;;  %v3223_v18 = vmax.f32 %v3002_v21, 0.0 }
 0x2b8   : > { %5413 = vmatpush.bf16.msra.mxu1 %v8168_v62  ;;  %5443 = vmatpush.bf16.msra.mxu2 %v8252_v31  ;;  %v8815_v31 = vld [vmem:[#allocation8 + $0x8e8] sm:$0xf] }
 0x2b9   : > { %v3030_v28 = vpop.f32.mrf.mxu2  ;;  %v3059_v30 = vpop.f32.mrf.mxu3 }
 0x2ba   : > { %v3031_v33 = vadd.f32 %v3030_v28, %v10412_v34  ;;  %v2974_v10 = vpop.f32.mrf.mxu0  ;;  %v3003_v44 = vpop.f32.mrf.mxu1  ;;  %v8059_v28 = vld [vmem:[#allocation8 + $0x300] sm:$0xf] }
 0x2bb   : > { %v2975_v43 = vadd.f32 %v2974_v10, %v2946_v38  ;;  %v8060_v57 = vor.u32 %v9227_v23, %v8059_v28  ;;  %v2951_v28 = vadd.f32 %v10389_v25, %v10402_v53 }
 0x2bc   : > { %v10436_v58 = vadd.f32 %v3059_v30, %v3031_v33  ;;  %v8155_v33 = vld [vmem:[#allocation8 + $0x3c0] sm:$0xf]  ;;  %v9251_v30 = vld [vmem:[#allocation8 + $0x3c8] sm:$0xf0] }
 0x2bd   : > { %v3004_v4 = vadd.f32 %v3003_v44, %v2975_v43  ;;  %v8348_v44 = vor.u32 %v9299_v42, %v8347_v51  ;;  %v8156_v13 = vor.u32 %v9251_v30, %v8155_v33  ;;  %5385 = vmatpush.bf16.msra.mxu0 %v8060_v57 }
 0x2bf   : > { %v3235_v40 = vmax.f32 %v3004_v4, 0.0  ;;  %5472 = vmatpush.bf16.msra.mxu3 %v8348_v44  ;;  %5414 = vmatpush.bf16.msra.mxu1 %v8156_v13  ;;  %v8623_v13 = vld [vmem:[#allocation8 + $0x768] sm:$0xf] }
 0x2c1   : > { %v3032_v38 = vpop.f32.mrf.mxu2  ;;  %v10440_v10 = vpack.c.bf16 %v3235_v40, %v3223_v18  ;;  %v3061_v39 = vpop.f32.mrf.mxu3  ;;  %v9392_v18 = vld [vmem:[#allocation8 + $0x830] sm:$0xf0] }
 0x2c2   : > { %v3033_v21 = vadd.f32 %v3032_v38, %v10412_v34  ;;  %v2977_v43 = vpop.f32.mrf.mxu0  ;;  %v3006_v4 = vpop.f32.mrf.mxu1  ;;  %v8720_v40 = vor.u32 %v9392_v18, %v8719_v26  ;;  %v9416_v38 = vld [vmem:[#allocation8 + $0x8f0] sm:$0xf0]  ;;  %v8707_v18 = vld [vmem:[#allocation8 + $0x810] sm:$0xf] }
 0x2c3   : > { %11224 = vst [vmem:[#allocation53_spill] sm:$0xff] %v10440_v10  ;;  %v2978_v52 = vadd.f32 %v2977_v43, %v2949_v29  ;;  %v8528_v29 = vor.u32 %v9344_v27, %v8527_v19  ;;  %v8816_v30 = vor.u32 %v9416_v38, %v8815_v31  ;;  %v9389_v19 = vld [vmem:[#allocation8 + $0x818] sm:$0xf0] }
 0x2c4   : > { %v10443_v62 = vadd.f32 %v3061_v39, %v3033_v21  ;;  %5280 = vmatmul.bf16.gmra.mxu0 %v10047_v0  ;;  %5552 = vmatpush.bf16.msrb.mxu2 %v8720_v40  ;;  %v8708_v27 = vor.u32 %v9389_v19, %v8707_v18  ;;  %v2954_v40 = vadd.f32 %v10398_v2, %v10402_v53  ;;  %v9365_v2 = vld [vmem:[#allocation8 + $0x758] sm:$0xf0]  ;;  %v9338_v18 = vld [vmem:[#allocation8 + $0x680] sm:$0xf0] }
 0x2c5   : > { %v3007_v23 = vadd.f32 %v3006_v4, %v2978_v52  ;;  %5309 = vmatmul.bf16.gmra.mxu1 %v10108_v15  ;;  %5494 = vmatpush.bf16.msrb.mxu0 %v8528_v29  ;;  %v9368_v52 = vld [vmem:[#allocation8 + $0x770] sm:$0xf0]  ;;  %v9413_v29 = vld [vmem:[#allocation8 + $0x8d8] sm:$0xf0] }
 0x2c6   : > { %5338 = vmatmul.bf16.gmra.mxu2 %v10161_v41  ;;  %5367 = vmatmul.bf16.gmra.mxu3 %v10170_v5  ;;  %v8624_v26 = vor.u32 %v9368_v52, %v8623_v13  ;;  %v9341_v5 = vld [vmem:[#allocation8 + $0x698] sm:$0xf0]  ;;  %v8803_v41 = vld [vmem:[#allocation8 + $0x8d0] sm:$0xf]  ;;  %v8695_v13 = vld [vmem:[#allocation8 + $0x7f8] sm:$0xf] }
 0x2c7   : > { %5581 = vmatpush.bf16.msrb.mxu3 %v8816_v30  ;;  %v3247_v4 = vmax.f32 %v3007_v23, 0.0 }
 0x2c8   : > { %5523 = vmatpush.bf16.msrb.mxu1 %v8624_v26  ;;  %5553 = vmatpush.bf16.msrb.mxu2 %v8708_v27  ;;  %v8503_v26 = vld [vmem:[#allocation8 + $0x678] sm:$0xf] }
 0x2c9   : > { %v3035_v51 = vpop.f32.mrf.mxu2  ;;  %v3064_v42 = vpop.f32.mrf.mxu3 }
 0x2ca   : > { %v3036_v57 = vadd.f32 %v3035_v51, %v10412_v34  ;;  %v2979_v33 = vpop.f32.mrf.mxu0  ;;  %v3008_v39 = vpop.f32.mrf.mxu1  ;;  %v8515_v51 = vld [vmem:[#allocation8 + $0x690] sm:$0xf] }
 0x2cb   : > { %v2980_v21 = vadd.f32 %v2979_v33, %v2951_v28  ;;  %v8516_v28 = vor.u32 %v9341_v5, %v8515_v51  ;;  %v8804_v33 = vor.u32 %v9413_v29, %v8803_v41  ;;  %v8611_v5 = vld [vmem:[#allocation8 + $0x750] sm:$0xf]  ;;  %v2956_v41 = vadd.f32 %v10406_v45, %v10402_v53  ;;  %v9410_v29 = vld [vmem:[#allocation8 + $0x8c0] sm:$0xf0]  ;;  %v8599_v45 = vld [vmem:[#allocation8 + $0x738] sm:$0xf] }
 0x2cc   : > { %v10452_v43 = vadd.f32 %v3064_v42, %v3036_v57 }
 0x2cd   : > { %v3009_v44 = vadd.f32 %v3008_v39, %v2980_v21  ;;  %5495 = vmatpush.bf16.msrb.mxu0 %v8516_v28  ;;  %5582 = vmatpush.bf16.msrb.mxu3 %v8804_v33  ;;  %v8791_v28 = vld [vmem:[#allocation8 + $0x8b8] sm:$0xf] }
 0x2cf   : > { %v3259_v25 = vmax.f32 %v3009_v44, 0.0 }
 0x2d1   : > { %v3037_v31 = vpop.f32.mrf.mxu2  ;;  %v10456_v38 = vpack.c.bf16 %v3259_v25, %v3247_v4  ;;  %v3066_v23 = vpop.f32.mrf.mxu3  ;;  %v8612_v4 = vor.u32 %v9365_v2, %v8611_v5  ;;  %v9386_v25 = vld [vmem:[#allocation8 + $0x800] sm:$0xf0] }
 0x2d2   : > { %v3038_v57 = vadd.f32 %v3037_v31, %v10412_v34  ;;  %v2982_v42 = vpop.f32.mrf.mxu0  ;;  %v3011_v21 = vpop.f32.mrf.mxu1  ;;  %v8504_v31 = vor.u32 %v9338_v18, %v8503_v26  ;;  %v9335_v18 = vld [vmem:[#allocation8 + $0x668] sm:$0xf0] }
 0x2d3   : > { %11225 = vst [vmem:[#allocation54_spill] sm:$0xff] %v10456_v38  ;;  %v2983_v30 = vadd.f32 %v2982_v42, %v2954_v40  ;;  %v8696_v40 = vor.u32 %v9386_v25, %v8695_v13  ;;  %5524 = vmatpush.bf16.msrb.mxu1 %v8612_v4  ;;  %v8792_v42 = vor.u32 %v9410_v29, %v8791_v28  ;;  %v9383_v13 = vld [vmem:[#allocation8 + $0x7e8] sm:$0xf0]  ;;  %v8491_v25 = vld [vmem:[#allocation8 + $0x660] sm:$0xf] }
 0x2d4   : > { %v10459_v39 = vadd.f32 %v3066_v23, %v3038_v57  ;;  %5285 = vmatmul.bf16.gmra.mxu0 %v10066_v1 }
 0x2d5   : > { %v3012_v44 = vadd.f32 %v3011_v21, %v2983_v30  ;;  %5314 = vmatmul.bf16.gmra.mxu1 %v10122_v20  ;;  %5554 = vmatpush.bf16.msrb.mxu2 %v8696_v40  ;;  %v9362_v30 = vld [vmem:[#allocation8 + $0x740] sm:$0xf0]  ;;  %v8683_v21 = vld [vmem:[#allocation8 + $0x7e0] sm:$0xf] }
 0x2d6   : > { %5343 = vmatmul.bf16.gmra.mxu2 %v10178_v49  ;;  %5372 = vmatmul.bf16.gmra.mxu3 %v10186_v55  ;;  %v8684_v26 = vor.u32 %v9383_v13, %v8683_v21  ;;  %v7725_v55 = vld [vmem:[#allocation8 + $0x6c] sm:$0xf0] }
 0x2d7   : > { %5496 = vmatpush.bf16.msrb.mxu0 %v8504_v31  ;;  %5583 = vmatpush.bf16.msrb.mxu3 %v8792_v42  ;;  %v3271_v5 = vmax.f32 %v3012_v44, 0.0  ;;  %v9359_v42 = vld [vmem:[#allocation8 + $0x728] sm:$0xf0] }
 0x2d9   : > { %v3040_v52 = vpop.f32.mrf.mxu2  ;;  %v3069_v27 = vpop.f32.mrf.mxu3  ;;  %5555 = vmatpush.bf16.msrb.mxu2 %v8684_v26 }
 0x2da   : > { %v3041_v19 = vadd.f32 %v3040_v52, %v10412_v34  ;;  %v2984_v51 = vpop.f32.mrf.mxu0  ;;  %v3013_v23 = vpop.f32.mrf.mxu1  ;;  %v8600_v52 = vor.u32 %v9362_v30, %v8599_v45  ;;  %v9380_v45 = vld [vmem:[#allocation8 + $0x7d0] sm:$0xf0]  ;;  %v8479_v30 = vld [vmem:[#allocation8 + $0x648] sm:$0xf] }
 0x2db   : > { %v2985_v57 = vadd.f32 %v2984_v51, %v2956_v41  ;;  %v8779_v41 = vld [vmem:[#allocation8 + $0x8a0] sm:$0xf]  ;;  %v9407_v51 = vld [vmem:[#allocation8 + $0x8a8] sm:$0xf0] }
 0x2dc   : > { %v10468_v33 = vadd.f32 %v3069_v27, %v3041_v19  ;;  %5525 = vmatpush.bf16.msrb.mxu1 %v8600_v52  ;;  %v8492_v19 = vor.u32 %v9335_v18, %v8491_v25  ;;  %v8780_v27 = vor.u32 %v9407_v51, %v8779_v41  ;;  %v9404_v52 = vld [vmem:[#allocation8 + $0x890] sm:$0xf0] }
 0x2dd   : > { %v3014_v53 = vadd.f32 %v3013_v23, %v2985_v57  ;;  %v8587_v23 = vld [vmem:[#allocation8 + $0x720] sm:$0xf] }
 0x2de   : > { %5497 = vmatpush.bf16.msrb.mxu0 %v8492_v19  ;;  %5584 = vmatpush.bf16.msrb.mxu3 %v8780_v27 }
 0x2df   : > { %v3283_v2 = vmax.f32 %v3014_v53, 0.0  ;;  %v8671_v53 = vld [vmem:[#allocation8 + $0x7c8] sm:$0xf] }
 0x2e0   : > { %v8672_v21 = vor.u32 %v9380_v45, %v8671_v53  ;;  %v8467_v53 = vld [vmem:[#allocation8 + $0x630] sm:$0xf] }
 0x2e1   : > { %v3042_v4 = vpop.f32.mrf.mxu2  ;;  %v10470_v40 = vpack.c.bf16 %v3283_v2, %v3271_v5  ;;  %v3071_v28 = vpop.f32.mrf.mxu3  ;;  %v9332_v5 = vld [vmem:[#allocation8 + $0x650] sm:$0xf0]  ;;  %v8767_v2 = vld [vmem:[#allocation8 + $0x888] sm:$0xf] }
 0x2e2   : > { %v3043_v31 = vadd.f32 %v3042_v4, %v10412_v34  ;;  %v3083_v29 = vpop.f32.mrf.mxu0  ;;  %v10473_v44 = vpop.f32.mrf.mxu1  ;;  %v8588_v34 = vor.u32 %v9359_v42, %v8587_v23  ;;  %v8480_v26 = vor.u32 %v9332_v5, %v8479_v30  ;;  %v8768_v18 = vor.u32 %v9404_v52, %v8767_v2  ;;  %5556 = vmatpush.bf16.msrb.mxu2 %v8672_v21  ;;  %v9356_v23 = vld [vmem:[#allocation8 + $0x710] sm:$0xf0]  ;;  %v8659_v42 = vld [vmem:[#allocation8 + $0x7b0] sm:$0xf]  ;;  %v9329_v30 = vld [vmem:[#allocation8 + $0x638] sm:$0xf0] }
 0x2e3   : > { %11226 = vst [vmem:[#allocation55_spill] sm:$0xff] %v10470_v40  ;;  %v3084_v13 = vadd.f32 %v3083_v29, %v10420_v46  ;;  %v8755_v5 = vld [vmem:[#allocation8 + $0x870] sm:$0xf]  ;;  %v9401_v21 = vld [vmem:[#allocation8 + $0x878] sm:$0xf0] }
 0x2e4   : > { %v10475_v57 = vadd.f32 %v3071_v28, %v3043_v31  ;;  %5386 = vmatmul.bf16.vlgmr.msra.gmra.mxu0 %v10195_v50  ;;  %5526 = vmatpush.bf16.msrb.mxu1 %v8588_v34  ;;  %v8575_v28 = vld [vmem:[#allocation8 + $0x708] sm:$0xf]  ;;  %v9377_v34 = vld [vmem:[#allocation8 + $0x7b8] sm:$0xf0]  ;;  %v8756_v52 = vor.u32 %v9401_v21, %v8755_v5 }
 0x2e5   : > { %5415 = vmatmul.bf16.vlgmr.msra.gmra.mxu1 %v10250_v17  ;;  %5498 = vmatpush.bf16.msrb.mxu0 %v8480_v26  ;;  %v3200_v27 = vmax.f32 %v3084_v13, 0.0  ;;  %v8576_v29 = vor.u32 %v9356_v23, %v8575_v28  ;;  %v8660_v45 = vor.u32 %v9377_v34, %v8659_v42  ;;  %v8647_v23 = vld [vmem:[#allocation8 + $0x798] sm:$0xf] }
 0x2e6   : > { %5444 = vmatmul.bf16.vlgmr.msra.gmra.mxu2 %v10311_v56  ;;  %5473 = vmatmul.bf16.vlgmr.msra.gmra.mxu3 %v10320_v7  ;;  %v8455_v42 = vld [vmem:[#allocation8 + $0x618] sm:$0xf]  ;;  %v9371_v7 = vld [vmem:[#allocation8 + $0x788] sm:$0xf0] }
 0x2e7   : > { %5585 = vmatpush.bf16.msrb.mxu3 %v8768_v18  ;;  %5557 = vmatpush.bf16.msrb.mxu2 %v8660_v45  ;;  %v8743_v45 = vld [vmem:[#allocation8 + $0x858] sm:$0xf] }
 0x2e8   : > { %5527 = vmatpush.bf16.msrb.mxu1 %v8576_v29  ;;  %v9374_v29 = vld [vmem:[#allocation8 + $0x7a0] sm:$0xf0] }
 0x2e9   : > { %v10482_v25 = vpop.f32.mrf.mxu2  ;;  %v10484_v41 = vpop.f32.mrf.mxu3  ;;  %v8648_v34 = vor.u32 %v9374_v29, %v8647_v23 }
 0x2ea   : > { %v3085_v51 = vpop.f32.mrf.mxu0  ;;  %v10487_v19 = vpop.f32.mrf.mxu1 }
 0x2eb   : > { %v3086_v4 = vadd.f32 %v3085_v51, %v10427_v3  ;;  %v8468_v3 = vor.u32 %v9329_v30, %v8467_v53  ;;  %5586 = vmatpush.bf16.msrb.mxu3 %v8756_v52  ;;  %v11228_v51 = vld [vmem:[#allocation33_spill] sm:$0xff]  ;;  %v9326_v53 = vld [vmem:[#allocation8 + $0x620] sm:$0xf0]  ;;  %5558 = vmatpush.bf16.msrb.mxu2 %v8648_v34 }
 0x2ec   : > { %v9398_v30 = vld [vmem:[#allocation8 + $0x860] sm:$0xf0] }
 0x2ed   : > { %v3212_v31 = vmax.f32 %v3086_v4, 0.0  ;;  %5499 = vmatpush.bf16.msrb.mxu0 %v8468_v3  ;;  %v11229_v4 = vld [vmem:[#allocation37_spill] sm:$0xff]  ;;  %v8456_v3 = vor.u32 %v9326_v53, %v8455_v42  ;;  %v8744_v52 = vor.u32 %v9398_v30, %v8743_v45  ;;  %v8443_v42 = vld [vmem:[#allocation8 + $0x600] sm:$0xf] }
 0x2ee   : > { %v9323_v53 = vld [vmem:[#allocation8 + $0x608] sm:$0xf0]  ;;  %v8731_v45 = vld [vmem:[#allocation8 + $0x840] sm:$0xf] }
 0x2ef   : > { %v10489_v46 = vpack.c.bf16 %v3212_v31, %v3200_v27  ;;  %v8563_v27 = vld [vmem:[#allocation8 + $0x6f0] sm:$0xf]  ;;  %v9353_v31 = vld [vmem:[#allocation8 + $0x6f8] sm:$0xf0]  ;;  %5587 = vmatpush.bf16.msrb.mxu3 %v8744_v52  ;;  %v8444_v34 = vor.u32 %v9323_v53, %v8443_v42  ;;  %v9347_v52 = vld [vmem:[#allocation8 + $0x6c8] sm:$0xf0] }
 0x2f0   : > { %v8564_v28 = vor.u32 %v9353_v31, %v8563_v27  ;;  %v7761_v42 = vld [vmem:[#allocation8 + $0xb4] sm:$0xf0]  ;;  %v9223_v53 = vld [vmem:[#allocation8 + $0x2ec] sm:$0xf] }
 0x2f1   : > { %11227 = vst [vmem:[#allocation56_spill] sm:$0xff] %v10489_v46  ;;  %v10491_v2 = vpop.f32.mrf.mxu2  ;;  %v10493_v26 = vpop.f32.mrf.mxu3  ;;  %5500 = vmatpush.bf16.msrb.mxu0 %v8456_v3 }
 0x2f2   : > { %v3088_v13 = vpop.f32.mrf.mxu0  ;;  %v10495_v18 = vpop.f32.mrf.mxu1  ;;  %5528 = vmatpush.bf16.msrb.mxu1 %v8564_v28 }
 0x2f3   : > { %v3089_v5 = vadd.f32 %v3088_v13, %v10436_v58  ;;  %v8635_v13 = vld [vmem:[#allocation8 + $0x780] sm:$0xf] }
 0x2f4   : > { %5391 = vmatmul.bf16.gmra.mxu0 %v11228_v51  ;;  %v9350_v51 = vld [vmem:[#allocation8 + $0x6e0] sm:$0xf0]  ;;  %v8636_v28 = vor.u32 %v9371_v7, %v8635_v13  ;;  %v9151_v13 = vld [vmem:[#allocation8 + $0xac] sm:$0xf] }
 0x2f5   : > { %5420 = vmatmul.bf16.gmra.mxu1 %v11229_v4  ;;  %v3224_v23 = vmax.f32 %v3089_v5, 0.0  ;;  %v8539_v5 = vld [vmem:[#allocation8 + $0x6c0] sm:$0xf]  ;;  %5501 = vmatpush.bf16.msrb.mxu0 %v8444_v34 }
 0x2f6   : > { %5449 = vmatmul.bf16.gmra.mxu2 %v10323_v35  ;;  %5478 = vmatmul.bf16.gmra.mxu3 %v10332_v22  ;;  %v8551_v22 = vld [vmem:[#allocation8 + $0x6d8] sm:$0xf] }
 0x2f7   : > { %v8552_v58 = vor.u32 %v9350_v51, %v8551_v22  ;;  %5559 = vmatpush.bf16.msrb.mxu2 %v8636_v28  ;;  %v8540_v51 = vor.u32 %v9347_v52, %v8539_v5 }
 0x2f9   : > { %v10502_v21 = vpop.f32.mrf.mxu2  ;;  %v10504_v35 = vpop.f32.mrf.mxu3  ;;  %5529 = vmatpush.bf16.msrb.mxu1 %v8552_v58  ;;  %v7953_v58 = vld [vmem:[#allocation8 + $0x234] sm:$0xf0] }
 0x2fa   : > { %v3090_v4 = vpop.f32.mrf.mxu0  ;;  %v10507_v31 = vpop.f32.mrf.mxu1 }
 0x2fb   : > { %v3091_v27 = vadd.f32 %v3090_v4, %v10443_v62  ;;  %v9395_v62 = vld [vmem:[#allocation8 + $0x848] sm:$0xf0] }
 0x2fc   : > { %v8732_v3 = vor.u32 %v9395_v62, %v8731_v45  ;;  %v8049_v45 = vld [vmem:[#allocation8 + $0x2f4] sm:$0xf0] }
 0x2fd   : > { %v3236_v29 = vmax.f32 %v3091_v27, 0.0  ;;  %5530 = vmatpush.bf16.msrb.mxu1 %v8540_v51  ;;  %v8052_v5 = vor.u32 %v9223_v53, %v8049_v45  ;;  %v9220_v45 = vld [vmem:[#allocation8 + $0x2d4] sm:$0xf] }
 0x2fe   : > { %5588 = vmatpush.bf16.msrb.mxu3 %v8732_v3  ;;  %v7764_v3 = vor.u32 %v9151_v13, %v7761_v42  ;;  %v9148_v13 = vld [vmem:[#allocation8 + $0x94] sm:$0xf]  ;;  %v7749_v42 = vld [vmem:[#allocation8 + $0x9c] sm:$0xf0] }
 0x2ff   : > { %v10509_v30 = vpack.c.bf16 %v3236_v29, %v3224_v23  ;;  %v11231_v23 = vld [vmem:[#allocation34_spill] sm:$0xff]  ;;  %v9199_v29 = vld [vmem:[#allocation8 + $0x22c] sm:$0xf]  ;;  %v7752_v53 = vor.u32 %v9148_v13, %v7749_v42  ;;  %v7929_v13 = vld [vmem:[#allocation8 + $0x204] sm:$0xf0] }
 0x300   : > { %v7956_v28 = vor.u32 %v9199_v29, %v7953_v58  ;;  %5610 = vmatpush.bf16.msra.mxu0 %v7764_v3  ;;  %v9175_v29 = vld [vmem:[#allocation8 + $0x16c] sm:$0xf]  ;;  %v7857_v58 = vld [vmem:[#allocation8 + $0x174] sm:$0xf0]  ;;  %v9145_v42 = vld [vmem:[#allocation8 + $0x7c] sm:$0xf] }
 0x301   : > { %11230 = vst [vmem:[#allocation57_spill] sm:$0xff] %v10509_v30  ;;  %v10511_v4 = vpop.f32.mrf.mxu2  ;;  %v10513_v27 = vpop.f32.mrf.mxu3  ;;  %v7860_v56 = vor.u32 %v9175_v29, %v7857_v58  ;;  %v7845_v58 = vld [vmem:[#allocation8 + $0x15c] sm:$0xf0] }
 0x302   : > { %v3093_v22 = vpop.f32.mrf.mxu0  ;;  %v10515_v7 = vpop.f32.mrf.mxu1  ;;  %5668 = vmatpush.bf16.msra.mxu2 %v7956_v28  ;;  %5697 = vmatpush.bf16.msra.mxu3 %v8052_v5  ;;  %v8037_v28 = vld [vmem:[#allocation8 + $0x2dc] sm:$0xf0] }
 0x303   : > { %v3094_v34 = vadd.f32 %v3093_v22, %v10452_v43  ;;  %v9196_v43 = vld [vmem:[#allocation8 + $0x214] sm:$0xf]  ;;  %v7941_v22 = vld [vmem:[#allocation8 + $0x21c] sm:$0xf0]  ;;  %5639 = vmatpush.bf16.msra.mxu1 %v7860_v56 }
 0x304   : > { %5396 = vmatmul.bf16.gmra.mxu0 %v11231_v23  ;;  %v7944_v17 = vor.u32 %v9196_v43, %v7941_v22  ;;  %v9172_v56 = vld [vmem:[#allocation8 + $0x154] sm:$0xf]  ;;  %v11233_v43 = vld [vmem:[#allocation35_spill] sm:$0xff] }
 0x305   : > { %5425 = vmatmul.bf16.gmra.mxu1 %v10282_v8  ;;  %v3248_v8 = vmax.f32 %v3094_v34, 0.0  ;;  %5611 = vmatpush.bf16.msra.mxu0 %v7752_v53  ;;  %v9517_v34 = vld [vmem:[#allocation7 + $0x8] sm:$0xf] }
 0x306   : > { %5454 = vmatmul.bf16.gmra.mxu2 %v10335_v37  ;;  %5483 = vmatmul.bf16.gmra.mxu3 %v10344_v63  ;;  %v9193_v22 = vld [vmem:[#allocation8 + $0x1fc] sm:$0xf] }
 0x307   : > { %5669 = vmatpush.bf16.msra.mxu2 %v7944_v17  ;;  %v7932_v53 = vor.u32 %v9193_v22, %v7929_v13  ;;  %v3718_v13 = vld [vmem:[#allocation10] sm:$0x7] }
 0x309   : > { %v10522_v62 = vpop.f32.mrf.mxu2  ;;  %v10524_v52 = vpop.f32.mrf.mxu3 }
 0x30a   : > { %v3095_v51 = vpop.f32.mrf.mxu0  ;;  %v10527_v63 = vpop.f32.mrf.mxu1 }
 0x30b   : > { %v3096_v37 = vadd.f32 %v3095_v51, %v10459_v39  ;;  %v8040_v39 = vor.u32 %v9220_v45, %v8037_v28  ;;  %v10535_v51 = vperm.slane %v9517_v34, 3  ;;  %v7737_v45 = vld [vmem:[#allocation8 + $0x84] sm:$0xf0]  ;;  %v9217_v28 = vld [vmem:[#allocation8 + $0x2bc] sm:$0xf]  ;;  %5670 = vmatpush.bf16.msra.mxu2 %v7932_v53 }
 0x30c   : > { %v9142_v53 = vld [vmem:[#allocation8 + $0x64] sm:$0xf] }
 0x30d   : > { %v3260_v23 = vmax.f32 %v3096_v37, 0.0  ;;  %5698 = vmatpush.bf16.msra.mxu3 %v8040_v39  ;;  %v3113_v17 = vadd.f32 %v10473_v44, %v10535_v51  ;;  %v8025_v39 = vld [vmem:[#allocation8 + $0x2c4] sm:$0xf0]  ;;  %v7740_v44 = vor.u32 %v9145_v42, %v7737_v45 }
 0x30f   : > { %v10529_v50 = vpack.c.bf16 %v3260_v23, %v3248_v8  ;;  %v7848_v8 = vor.u32 %v9172_v56, %v7845_v58  ;;  %v3115_v23 = vadd.f32 %v10487_v19, %v10535_v51  ;;  %5612 = vmatpush.bf16.msra.mxu0 %v7740_v44  ;;  %v8013_v44 = vld [vmem:[#allocation8 + $0x2ac] sm:$0xf0] }
 0x311   : > { %11232 = vst [vmem:[#allocation58_spill] sm:$0xff] %v10529_v50  ;;  %v10531_v3 = vpop.f32.mrf.mxu2  ;;  %v10533_v5 = vpop.f32.mrf.mxu3  ;;  %5640 = vmatpush.bf16.msra.mxu1 %v7848_v8  ;;  %v3144_v34 = vadd.f32 %v10491_v2, %v3115_v23  ;;  %v3142_v8 = vadd.f32 %v10482_v25, %v3113_v17  ;;  %v9169_v2 = vld [vmem:[#allocation8 + $0x13c] sm:$0xf]  ;;  %v7833_v23 = vld [vmem:[#allocation8 + $0x144] sm:$0xf0]  ;;  %v7728_v17 = vor.u32 %v9142_v53, %v7725_v55 }
 0x312   : > { %v3098_v37 = vpop.f32.mrf.mxu0  ;;  %v10537_v29 = vpop.f32.mrf.mxu1  ;;  %v7836_v45 = vor.u32 %v9169_v2, %v7833_v23  ;;  %v7821_v55 = vld [vmem:[#allocation8 + $0x12c] sm:$0xf0]  ;;  %v9139_v53 = vld [vmem:[#allocation8 + $0x4c] sm:$0xf] }
 0x313   : > { %v3099_v56 = vadd.f32 %v3098_v37, %v10468_v33  ;;  %v3173_v33 = vadd.f32 %v10493_v26, %v3144_v34  ;;  %v3171_v25 = vadd.f32 %v10484_v41, %v3142_v8  ;;  %5613 = vmatpush.bf16.msra.mxu0 %v7728_v17  ;;  %v7713_v17 = vld [vmem:[#allocation8 + $0x54] sm:$0xf0] }
 0x314   : > { %5401 = vmatmul.bf16.gmra.mxu0 %v11233_v43 }
 0x315   : > { %5430 = vmatmul.bf16.gmra.mxu1 %v10296_v12  ;;  %v3272_v37 = vmax.f32 %v3099_v56, 0.0  ;;  %v3213_v34 = vmax.f32 %v3173_v33, 0.0  ;;  %v3201_v23 = vmax.f32 %v3171_v25, 0.0  ;;  %v3118_v33 = vadd.f32 %v10495_v18, %v10535_v51 }
 0x316   : > { %5459 = vmatmul.bf16.gmra.mxu2 %v10352_v60  ;;  %5488 = vmatmul.bf16.gmra.mxu3 %v10360_v24  ;;  %v8028_v60 = vor.u32 %v9217_v28, %v8025_v39  ;;  %v9190_v28 = vld [vmem:[#allocation8 + $0x1e4] sm:$0xf]  ;;  %v7917_v39 = vld [vmem:[#allocation8 + $0x1ec] sm:$0xf0] }
 0x317   : > { %v7920_v43 = vor.u32 %v9190_v28, %v7917_v39  ;;  %5641 = vmatpush.bf16.msra.mxu1 %v7836_v45  ;;  %v10568_v45 = vpack.c.bf16 %v3213_v34, %v3201_v23  ;;  %v9187_v28 = vld [vmem:[#allocation8 + $0x1cc] sm:$0xf]  ;;  %v7905_v39 = vld [vmem:[#allocation8 + $0x1d4] sm:$0xf0] }
 0x318   : > { %5699 = vmatpush.bf16.msra.mxu3 %v8028_v60  ;;  %v9214_v60 = vld [vmem:[#allocation8 + $0x2a4] sm:$0xf]  ;;  %v7908_v25 = vor.u32 %v9187_v28, %v7905_v39  ;;  %v9163_v28 = vld [vmem:[#allocation8 + $0x10c] sm:$0xf]  ;;  %v7809_v39 = vld [vmem:[#allocation8 + $0x114] sm:$0xf0] }
 0x319   : > { %v10549_v58 = vpop.f32.mrf.mxu2  ;;  %v10551_v12 = vpop.f32.mrf.mxu3  ;;  %5671 = vmatpush.bf16.msra.mxu2 %v7920_v43  ;;  %v8016_v26 = vor.u32 %v9214_v60, %v8013_v44  ;;  %11235 = vst [vmem:[#allocation60_spill] sm:$0xff] %v10568_v45  ;;  %v9211_v60 = vld [vmem:[#allocation8 + $0x28c] sm:$0xf]  ;;  %v8001_v44 = vld [vmem:[#allocation8 + $0x294] sm:$0xf0] }
 0x31a   : > { %v3100_v19 = vpop.f32.mrf.mxu0  ;;  %v10555_v22 = vpop.f32.mrf.mxu1  ;;  %v8004_v23 = vor.u32 %v9211_v60, %v8001_v44  ;;  %v9136_v60 = vld [vmem:[#allocation8 + $0x34] sm:$0xf] }
 0x31b   : > { %v3101_v24 = vadd.f32 %v3100_v19, %v10475_v57  ;;  %v10559_v57 = vperm.slane %v3718_v13, 0  ;;  %v9166_v13 = vld [vmem:[#allocation8 + $0x124] sm:$0xf] }
 0x31c   : > { %5700 = vmatpush.bf16.msra.mxu3 %v8016_v26  ;;  %v7824_v43 = vor.u32 %v9166_v13, %v7821_v55 }
 0x31d   : > { %v3284_v42 = vmax.f32 %v3101_v24, 0.0  ;;  %5672 = vmatpush.bf16.msra.mxu2 %v7908_v25  ;;  %v7701_v25 = vld [vmem:[#allocation8 + $0x3c] sm:$0xf0] }
 0x31e   : > { %5642 = vmatpush.bf16.msra.mxu1 %v7824_v43 }
 0x31f   : > { %v10561_v19 = vpack.c.bf16 %v3284_v42, %v3272_v37  ;;  %v3120_v42 = vadd.f32 %v10507_v31, %v10535_v51  ;;  %v3147_v31 = vadd.f32 %v10502_v21, %v3118_v33  ;;  %v7989_v21 = vld [vmem:[#allocation8 + $0x27c] sm:$0xf0] }
 0x320   : > { %5701 = vmatpush.bf16.msra.mxu3 %v8004_v23 }
 0x321   : > { %11234 = vst [vmem:[#allocation59_spill] sm:$0xff] %v10561_v19  ;;  %v10563_v24 = vpop.f32.mrf.mxu2  ;;  %v10565_v56 = vpop.f32.mrf.mxu3  ;;  %v3149_v26 = vadd.f32 %v10511_v4, %v3120_v42  ;;  %v3176_v33 = vadd.f32 %v10504_v35, %v3147_v31 }
 0x322   : > { %v5271_v2 = vpop.f32.mrf.mxu0  ;;  %v5300_v8 = vpop.f32.mrf.mxu1 }
 0x323   : > { %v5272_v41 = vadd.f32 %v5271_v2, %v10559_v57  ;;  %v7716_v2 = vor.u32 %v9139_v53, %v7713_v17  ;;  %v3178_v4 = vadd.f32 %v10513_v27, %v3149_v26  ;;  %v7812_v53 = vor.u32 %v9163_v28, %v7809_v39  ;;  %v9184_v17 = vld [vmem:[#allocation8 + $0x1b4] sm:$0xf] }
 0x324   : > { %5502 = vmatmul.bf16.vlgmr.msrb.gmra.mxu0 %v10369_v36 }
 0x325   : > { %v5301_v37 = vadd.f32 %v5300_v8, %v5272_v41  ;;  %5531 = vmatmul.bf16.vlgmr.msrb.gmra.mxu1 %v10424_v61  ;;  %5614 = vmatpush.bf16.msra.mxu0 %v7716_v2  ;;  %v7704_v2 = vor.u32 %v9136_v60, %v7701_v25  ;;  %v9181_v60 = vld [vmem:[#allocation8 + $0x19c] sm:$0xf] }
 0x326   : > { %5560 = vmatmul.bf16.vlgmr.msrb.gmra.mxu2 %v10489_v46  ;;  %5589 = vmatmul.bf16.vlgmr.msrb.gmra.mxu3 %v10568_v45  ;;  %v9133_v25 = vld [vmem:[#allocation8 + $0x1c] sm:$0xf] }
 0x327   : > { %5643 = vmatpush.bf16.msra.mxu1 %v7812_v53  ;;  %v3125_v53 = vadd.f32 %v10527_v63, %v10535_v51 }
 0x329   : > { %v5329_v34 = vpop.f32.mrf.mxu2  ;;  %v5358_v18 = vpop.f32.mrf.mxu3  ;;  %5615 = vmatpush.bf16.msra.mxu0 %v7704_v2  ;;  %v7977_v2 = vld [vmem:[#allocation8 + $0x264] sm:$0xf0] }
 0x32a   : > { %v5330_v41 = vadd.f32 %v5329_v34, %v5301_v37  ;;  %v5273_v8 = vpop.f32.mrf.mxu0  ;;  %v5302_v55 = vpop.f32.mrf.mxu1  ;;  %v7893_v37 = vld [vmem:[#allocation8 + $0x1bc] sm:$0xf0]  ;;  %v9208_v34 = vld [vmem:[#allocation8 + $0x274] sm:$0xf] }
 0x32b   : > { %v5274_v13 = vadd.f32 %v5273_v8, %v10559_v57  ;;  %v7896_v44 = vor.u32 %v9184_v17, %v7893_v37  ;;  %v7992_v23 = vor.u32 %v9208_v34, %v7989_v21  ;;  %v9160_v17 = vld [vmem:[#allocation8 + $0xf4] sm:$0xf]  ;;  %v7797_v37 = vld [vmem:[#allocation8 + $0xfc] sm:$0xf0]  ;;  %v7689_v21 = vld [vmem:[#allocation8 + $0x24] sm:$0xf0] }
 0x32c   : > { %v10581_v43 = vadd.f32 %v5358_v18, %v5330_v41  ;;  %v3237_v41 = vmax.f32 %v3178_v4, 0.0  ;;  %v7800_v4 = vor.u32 %v9160_v17, %v7797_v37  ;;  %v9157_v17 = vld [vmem:[#allocation8 + $0xdc] sm:$0xf]  ;;  %v7785_v37 = vld [vmem:[#allocation8 + $0xe4] sm:$0xf0] }
 0x32d   : > { %v5303_v42 = vadd.f32 %v5302_v55, %v5274_v13  ;;  %5673 = vmatpush.bf16.msra.mxu2 %v7896_v44  ;;  %5702 = vmatpush.bf16.msra.mxu3 %v7992_v23  ;;  %v3225_v13 = vmax.f32 %v3176_v33, 0.0  ;;  %v7881_v44 = vld [vmem:[#allocation8 + $0x1a4] sm:$0xf0]  ;;  %v9205_v33 = vld [vmem:[#allocation8 + $0x25c] sm:$0xf]  ;;  %v3154_v23 = vadd.f32 %v10531_v3, %v3125_v53  ;;  %v7788_v53 = vor.u32 %v9157_v17, %v7785_v37 }
 0x32e   : > { %5644 = vmatpush.bf16.msra.mxu1 %v7800_v4  ;;  %v7884_v34 = vor.u32 %v9181_v60, %v7881_v44  ;;  %v9178_v60 = vld [vmem:[#allocation8 + $0x184] sm:$0xf] }
 0x32f   : > { %v10589_v31 = vpack.c.bf16 %v3237_v41, %v3225_v13  ;;  %v3183_v3 = vadd.f32 %v10533_v5, %v3154_v23  ;;  %v9130_v44 = vld [vmem:[#allocation8 + $0x4] sm:$0xf]  ;;  %v7773_v23 = vld [vmem:[#allocation8 + $0xcc] sm:$0xf0] }
 0x330   : > { %v9154_v5 = vld [vmem:[#allocation8 + $0xc4] sm:$0xf] }
 0x331   : > { %v5331_v18 = vpop.f32.mrf.mxu2  ;;  %v5360_v26 = vpop.f32.mrf.mxu3  ;;  %11236 = vst [vmem:[#allocation61_spill] sm:$0xff] %v10589_v31  ;;  %5674 = vmatpush.bf16.msra.mxu2 %v7884_v34  ;;  %v7677_v34 = vld [vmem:[#allocation8 + $0xc] sm:$0xf0] }
 0x332   : > { %v5332_v27 = vadd.f32 %v5331_v18, %v5303_v42  ;;  %v5276_v8 = vpop.f32.mrf.mxu0  ;;  %v5305_v28 = vpop.f32.mrf.mxu1  ;;  %v3123_v42 = vadd.f32 %v10515_v7, %v10535_v51  ;;  %v7692_v18 = vor.u32 %v9133_v25, %v7689_v21  ;;  %v9202_v21 = vld [vmem:[#allocation8 + $0x244] sm:$0xf]  ;;  %5645 = vmatpush.bf16.msra.mxu1 %v7788_v53  ;;  %v9295_v53 = vld [vmem:[#allocation8 + $0x52c] sm:$0xf] }
 0x333   : > { %v5277_v55 = vadd.f32 %v5276_v8, %v10559_v57 }
 0x334   : > { %v10586_v39 = vadd.f32 %v5360_v26, %v5332_v27  ;;  %5507 = vmatmul.bf16.gmra.mxu0 %v10383_v48  ;;  %v7980_v27 = vor.u32 %v9205_v33, %v7977_v2  ;;  %v3152_v63 = vadd.f32 %v10522_v62, %v3123_v42  ;;  %v7965_v62 = vld [vmem:[#allocation8 + $0x24c] sm:$0xf0]  ;;  %v7680_v33 = vor.u32 %v9130_v44, %v7677_v34  ;;  %v9319_v34 = vld [vmem:[#allocation8 + $0x5ec] sm:$0xf] }
 0x335   : > { %v5306_v35 = vadd.f32 %v5305_v28, %v5277_v55  ;;  %5536 = vmatmul.bf16.gmra.mxu1 %v10440_v10  ;;  %5616 = vmatpush.bf16.msra.mxu0 %v7692_v18  ;;  %v7968_v2 = vor.u32 %v9202_v21, %v7965_v62  ;;  %v8433_v21 = vld [vmem:[#allocation8 + $0x5f4] sm:$0xf0] }
 0x336   : > { %5565 = vmatmul.bf16.gmra.mxu2 %v10509_v30  ;;  %5594 = vmatmul.bf16.gmra.mxu3 %v10589_v31  ;;  %v3181_v42 = vadd.f32 %v10524_v52, %v3152_v63 }
 0x337   : > { %5703 = vmatpush.bf16.msra.mxu3 %v7980_v27 }
 0x339   : > { %v5334_v41 = vpop.f32.mrf.mxu2  ;;  %v5363_v7 = vpop.f32.mrf.mxu3  ;;  %5617 = vmatpush.bf16.msra.mxu0 %v7680_v33 }
 0x33a   : > { %v5335_v26 = vadd.f32 %v5334_v41, %v5306_v35  ;;  %v5278_v8 = vpop.f32.mrf.mxu0  ;;  %v5307_v55 = vpop.f32.mrf.mxu1  ;;  %v7869_v35 = vld [vmem:[#allocation8 + $0x18c] sm:$0xf0]  ;;  %v3261_v41 = vmax.f32 %v3183_v3, 0.0  ;;  %v3128_v3 = vadd.f32 %v10537_v29, %v10535_v51 }
 0x33b   : > { %v5279_v13 = vadd.f32 %v5278_v8, %v10559_v57  ;;  %v7872_v25 = vor.u32 %v9178_v60, %v7869_v35  ;;  %5704 = vmatpush.bf16.msra.mxu3 %v7968_v2  ;;  %v7776_v8 = vor.u32 %v9154_v5, %v7773_v23  ;;  %v8337_v60 = vld [vmem:[#allocation8 + $0x534] sm:$0xf0]  ;;  %v9247_v35 = vld [vmem:[#allocation8 + $0x3ac] sm:$0xf]  ;;  %v8436_v2 = vor.u32 %v9319_v34, %v8433_v21 }
 0x33c   : > { %v10601_v28 = vadd.f32 %v5363_v7, %v5335_v26  ;;  %v8340_v44 = vor.u32 %v9295_v53, %v8337_v60  ;;  %v9316_v53 = vld [vmem:[#allocation8 + $0x5d4] sm:$0xf] }
 0x33d   : > { %v5308_v4 = vadd.f32 %v5307_v55, %v5279_v13  ;;  %5675 = vmatpush.bf16.msra.mxu2 %v7872_v25  ;;  %v3249_v13 = vmax.f32 %v3181_v42, 0.0  ;;  %5646 = vmatpush.bf16.msra.mxu1 %v7776_v8  ;;  %v8145_v25 = vld [vmem:[#allocation8 + $0x3b4] sm:$0xf0] }
 0x33e   : > { %v8148_v33 = vor.u32 %v9247_v35, %v8145_v25 }
 0x33f   : > { %v10609_v63 = vpack.c.bf16 %v3261_v41, %v3249_v13  ;;  %5813 = vmatpush.bf16.msrb.mxu3 %v8436_v2  ;;  %v9292_v13 = vld [vmem:[#allocation8 + $0x514] sm:$0xf] }
 0x340   : > { %5726 = vmatpush.bf16.msrb.mxu0 %v8148_v33 }
 0x341   : > { %v5336_v18 = vpop.f32.mrf.mxu2  ;;  %v5365_v26 = vpop.f32.mrf.mxu3  ;;  %11237 = vst [vmem:[#allocation62_spill] sm:$0xff] %v10609_v63  ;;  %5784 = vmatpush.bf16.msrb.mxu2 %v8340_v44 }
 0x342   : > { %v5337_v27 = vadd.f32 %v5336_v18, %v5308_v4  ;;  %v5281_v7 = vpop.f32.mrf.mxu0  ;;  %v5310_v17 = vpop.f32.mrf.mxu1  ;;  %v3130_v4 = vadd.f32 %v10555_v22, %v10535_v51  ;;  %v3157_v51 = vadd.f32 %v10549_v58, %v3128_v3  ;;  %v8421_v58 = vld [vmem:[#allocation8 + $0x5dc] sm:$0xf0] }
 0x343   : > { %v5282_v55 = vadd.f32 %v5281_v7, %v10559_v57  ;;  %v8424_v35 = vor.u32 %v9316_v53, %v8421_v58 }
 0x344   : > { %v10606_v37 = vadd.f32 %v5365_v26, %v5337_v27  ;;  %5512 = vmatmul.bf16.gmra.mxu0 %v10395_v6  ;;  %v3159_v62 = vadd.f32 %v10563_v24, %v3130_v4  ;;  %v9271_v27 = vld [vmem:[#allocation8 + $0x46c] sm:$0xf]  ;;  %v8241_v26 = vld [vmem:[#allocation8 + $0x474] sm:$0xf0]  ;;  %v8133_v4 = vld [vmem:[#allocation8 + $0x39c] sm:$0xf0]  ;;  %v3186_v3 = vadd.f32 %v10551_v12, %v3157_v51 }
 0x345   : > { %v5311_v52 = vadd.f32 %v5310_v17, %v5282_v55  ;;  %5541 = vmatmul.bf16.gmra.mxu1 %v10456_v38  ;;  %v8244_v8 = vor.u32 %v9271_v27, %v8241_v26  ;;  %v8325_v55 = vld [vmem:[#allocation8 + $0x51c] sm:$0xf0]  ;;  %v9244_v17 = vld [vmem:[#allocation8 + $0x394] sm:$0xf]  ;;  %5814 = vmatpush.bf16.msrb.mxu3 %v8424_v35  ;;  %v9241_v27 = vld [vmem:[#allocation8 + $0x37c] sm:$0xf] }
 0x346   : > { %5570 = vmatmul.bf16.gmra.mxu2 %v10529_v50  ;;  %5599 = vmatmul.bf16.gmra.mxu3 %v10609_v63  ;;  %v3188_v24 = vadd.f32 %v10565_v56, %v3159_v62  ;;  %v8136_v60 = vor.u32 %v9244_v17, %v8133_v4  ;;  %v3273_v62 = vmax.f32 %v3186_v3, 0.0  ;;  %v9265_v35 = vld [vmem:[#allocation8 + $0x43c] sm:$0xf]  ;;  %v8781_v63 = vld [vmem:[#allocation8 + $0x8ac] sm:$0xf0] }
 0x347   : > { %5755 = vmatpush.bf16.msrb.mxu1 %v8244_v8  ;;  %v8409_v8 = vld [vmem:[#allocation8 + $0x5c4] sm:$0xf0] }
 0x348   : > { %v3285_v44 = vmax.f32 %v3188_v24, 0.0  ;;  %5727 = vmatpush.bf16.msrb.mxu0 %v8136_v60  ;;  %v8121_v24 = vld [vmem:[#allocation8 + $0x384] sm:$0xf0] }
 0x349   : > { %v5339_v42 = vpop.f32.mrf.mxu2  ;;  %v5368_v18 = vpop.f32.mrf.mxu3 }
 0x34a   : > { %v5340_v41 = vadd.f32 %v5339_v42, %v5311_v52  ;;  %v5283_v29 = vpop.f32.mrf.mxu0  ;;  %v5312_v5 = vpop.f32.mrf.mxu1  ;;  %v8328_v52 = vor.u32 %v9292_v13, %v8325_v55  ;;  %v8124_v55 = vor.u32 %v9241_v27, %v8121_v24 }
 0x34b   : > { %v5284_v22 = vadd.f32 %v5283_v29, %v10559_v57  ;;  %v10629_v29 = vpack.c.bf16 %v3285_v44, %v3273_v62  ;;  %v8217_v44 = vld [vmem:[#allocation8 + $0x444] sm:$0xf0]  ;;  %v9238_v62 = vld [vmem:[#allocation8 + $0x364] sm:$0xf] }
 0x34c   : > { %v10621_v23 = vadd.f32 %v5368_v18, %v5340_v41  ;;  %5785 = vmatpush.bf16.msrb.mxu2 %v8328_v52  ;;  %v9268_v41 = vld [vmem:[#allocation8 + $0x454] sm:$0xf]  ;;  %v8229_v18 = vld [vmem:[#allocation8 + $0x45c] sm:$0xf0]  ;;  %5728 = vmatpush.bf16.msrb.mxu0 %v8124_v55  ;;  %v9283_v55 = vld [vmem:[#allocation8 + $0x4cc] sm:$0xf] }
 0x34d   : > { %v5313_v7 = vadd.f32 %v5312_v5, %v5284_v22  ;;  %11238 = vst [vmem:[#allocation63_spill] sm:$0xff] %v10629_v29  ;;  %v8232_v51 = vor.u32 %v9268_v41, %v8229_v18  ;;  %v9289_v22 = vld [vmem:[#allocation8 + $0x4fc] sm:$0xf]  ;;  %v8313_v5 = vld [vmem:[#allocation8 + $0x504] sm:$0xf0] }
 0x34e   : > { %v8316_v26 = vor.u32 %v9289_v22, %v8313_v5  ;;  %v9310_v41 = vld [vmem:[#allocation8 + $0x5a4] sm:$0xf]  ;;  %v8397_v18 = vld [vmem:[#allocation8 + $0x5ac] sm:$0xf0] }
 0x34f   : > { %5756 = vmatpush.bf16.msrb.mxu1 %v8232_v51  ;;  %v8400_v51 = vor.u32 %v9310_v41, %v8397_v18  ;;  %v9280_v41 = vld [vmem:[#allocation8 + $0x4b4] sm:$0xf]  ;;  %v8277_v18 = vld [vmem:[#allocation8 + $0x4bc] sm:$0xf0] }
 0x350   : > { %5786 = vmatpush.bf16.msrb.mxu2 %v8316_v26 }
 0x351   : > { %v5341_v25 = vpop.f32.mrf.mxu2  ;;  %v5370_v34 = vpop.f32.mrf.mxu3 }
 0x352   : > { %v5342_v56 = vadd.f32 %v5341_v25, %v5313_v7  ;;  %v5286_v21 = vpop.f32.mrf.mxu0  ;;  %v5315_v33 = vpop.f32.mrf.mxu1  ;;  %v9313_v7 = vld [vmem:[#allocation8 + $0x5bc] sm:$0xf] }
 0x353   : > { %v5287_v42 = vadd.f32 %v5286_v21, %v10559_v57  ;;  %v8412_v17 = vor.u32 %v9313_v7, %v8409_v8  ;;  %v8301_v21 = vld [vmem:[#allocation8 + $0x4ec] sm:$0xf0]  ;;  %v9262_v7 = vld [vmem:[#allocation8 + $0x424] sm:$0xf] }
 0x354   : > { %v10626_v2 = vadd.f32 %v5370_v34, %v5342_v56  ;;  %5517 = vmatmul.bf16.gmra.mxu0 %v10414_v32  ;;  %v8220_v56 = vor.u32 %v9265_v35, %v8217_v44  ;;  %v9286_v34 = vld [vmem:[#allocation8 + $0x4e4] sm:$0xf]  ;;  %v8205_v8 = vld [vmem:[#allocation8 + $0x42c] sm:$0xf0] }
 0x355   : > { %v5316_v12 = vadd.f32 %v5315_v33, %v5287_v42  ;;  %5546 = vmatmul.bf16.gmra.mxu1 %v10470_v40  ;;  %5815 = vmatpush.bf16.msrb.mxu3 %v8412_v17  ;;  %v8304_v42 = vor.u32 %v9286_v34, %v8301_v21  ;;  %v8109_v33 = vld [vmem:[#allocation8 + $0x36c] sm:$0xf0]  ;;  %v8289_v17 = vld [vmem:[#allocation8 + $0x4d4] sm:$0xf0]  ;;  %v9406_v32 = vld [vmem:[#allocation8 + $0x8a4] sm:$0xf] }
 0x356   : > { %5575 = vmatmul.bf16.gmra.mxu2 %v10561_v19  ;;  %5604 = vmatmul.bf16.gmra.mxu3 %v10629_v29 }
 0x357   : > { %5757 = vmatpush.bf16.msrb.mxu1 %v8220_v56  ;;  %5787 = vmatpush.bf16.msrb.mxu2 %v8304_v42  ;;  %v8193_v42 = vld [vmem:[#allocation8 + $0x414] sm:$0xf0] }
 0x359   : > { %v5344_v13 = vpop.f32.mrf.mxu2  ;;  %v5373_v4 = vpop.f32.mrf.mxu3  ;;  %5816 = vmatpush.bf16.msrb.mxu3 %v8400_v51  ;;  %v8280_v51 = vor.u32 %v9280_v41, %v8277_v18  ;;  %v9301_v41 = vld [vmem:[#allocation8 + $0x55c] sm:$0xf]  ;;  %v8361_v18 = vld [vmem:[#allocation8 + $0x564] sm:$0xf0] }
 0x35a   : > { %v5345_v52 = vadd.f32 %v5344_v13, %v5316_v12  ;;  %v5288_v53 = vpop.f32.mrf.mxu0  ;;  %v5317_v3 = vpop.f32.mrf.mxu1  ;;  %v8112_v12 = vor.u32 %v9238_v62, %v8109_v33  ;;  %v8208_v13 = vor.u32 %v9262_v7, %v8205_v8  ;;  %v9259_v62 = vld [vmem:[#allocation8 + $0x40c] sm:$0xf] }
 0x35b   : > { %v5289_v58 = vadd.f32 %v5288_v53, %v10559_v57  ;;  %v8097_v53 = vld [vmem:[#allocation8 + $0x354] sm:$0xf0]  ;;  %v8196_v33 = vor.u32 %v9259_v62, %v8193_v42  ;;  %v9229_v62 = vld [vmem:[#allocation8 + $0x31c] sm:$0xf] }
 0x35c   : > { %v10635_v60 = vadd.f32 %v5373_v4, %v5345_v52  ;;  %5729 = vmatpush.bf16.msrb.mxu0 %v8112_v12  ;;  %5758 = vmatpush.bf16.msrb.mxu1 %v8208_v13  ;;  %v9235_v52 = vld [vmem:[#allocation8 + $0x34c] sm:$0xf]  ;;  %v8292_v4 = vor.u32 %v9283_v55, %v8289_v17  ;;  %v9232_v12 = vld [vmem:[#allocation8 + $0x334] sm:$0xf] }
 0x35d   : > { %v5318_v25 = vadd.f32 %v5317_v3, %v5289_v58  ;;  %v9307_v58 = vld [vmem:[#allocation8 + $0x58c] sm:$0xf]  ;;  %v8385_v3 = vld [vmem:[#allocation8 + $0x594] sm:$0xf0]  ;;  %v8100_v44 = vor.u32 %v9235_v52, %v8097_v53  ;;  %v8181_v53 = vld [vmem:[#allocation8 + $0x3fc] sm:$0xf0] }
 0x35e   : > { %5788 = vmatpush.bf16.msrb.mxu2 %v8292_v4  ;;  %v9256_v4 = vld [vmem:[#allocation8 + $0x3f4] sm:$0xf] }
 0x360   : > { %5730 = vmatpush.bf16.msrb.mxu0 %v8100_v44  ;;  %5759 = vmatpush.bf16.msrb.mxu1 %v8196_v33  ;;  %v9277_v44 = vld [vmem:[#allocation8 + $0x49c] sm:$0xf]  ;;  %v8073_v33 = vld [vmem:[#allocation8 + $0x324] sm:$0xf0] }
 0x361   : > { %v5346_v57 = vpop.f32.mrf.mxu2  ;;  %v5375_v5 = vpop.f32.mrf.mxu3 }
 0x362   : > { %v5347_v22 = vadd.f32 %v5346_v57, %v5318_v25  ;;  %v10637_v27 = vpop.f32.mrf.mxu0  ;;  %v10639_v26 = vpop.f32.mrf.mxu1  ;;  %v8388_v25 = vor.u32 %v9307_v58, %v8385_v3  ;;  %v8085_v57 = vld [vmem:[#allocation8 + $0x33c] sm:$0xf0]  ;;  %5789 = vmatpush.bf16.msrb.mxu2 %v8280_v51  ;;  %v8184_v58 = vor.u32 %v9256_v4, %v8181_v53  ;;  %v8076_v51 = vor.u32 %v9229_v62, %v8073_v33  ;;  %v8169_v4 = vld [vmem:[#allocation8 + $0x3e4] sm:$0xf0]  ;;  %v8349_v62 = vld [vmem:[#allocation8 + $0x54c] sm:$0xf0] }
 0x363   : > { %v8088_v7 = vor.u32 %v9232_v12, %v8085_v57  ;;  %v11239_v3 = vld [vmem:[#allocation27_spill] sm:$0xff]  ;;  %v8364_v57 = vor.u32 %v9301_v41, %v8361_v18 }
 0x364   : > { %v10641_v24 = vadd.f32 %v5375_v5, %v5347_v22  ;;  %5618 = vmatmul.bf16.vlgmr.msra.gmra.mxu0 %v10021_v16  ;;  %5817 = vmatpush.bf16.msrb.mxu3 %v8388_v25  ;;  %v9304_v22 = vld [vmem:[#allocation8 + $0x574] sm:$0xf]  ;;  %v8373_v5 = vld [vmem:[#allocation8 + $0x57c] sm:$0xf0]  ;;  %v8265_v25 = vld [vmem:[#allocation8 + $0x4a4] sm:$0xf0] }
 0x365   : > { %5647 = vmatmul.bf16.vlgmr.msra.gmra.mxu1 %v10076_v54  ;;  %v8376_v8 = vor.u32 %v9304_v22, %v8373_v5  ;;  %5731 = vmatpush.bf16.msrb.mxu0 %v8088_v7  ;;  %v8268_v42 = vor.u32 %v9277_v44, %v8265_v25  ;;  %v8253_v44 = vld [vmem:[#allocation8 + $0x48c] sm:$0xf0]  ;;  %v9226_v25 = vld [vmem:[#allocation8 + $0x304] sm:$0xf]  ;;  %v8517_v54 = vld [vmem:[#allocation8 + $0x69c] sm:$0xf0] }
 0x366   : > { %5676 = vmatmul.bf16.vlgmr.msra.gmra.mxu2 %v10137_v14  ;;  %5705 = vmatmul.bf16.vlgmr.msra.gmra.mxu3 %v10146_v59  ;;  %v9388_v59 = vld [vmem:[#allocation8 + $0x814] sm:$0xf] }
 0x367   : > { %5760 = vmatpush.bf16.msrb.mxu1 %v8184_v58  ;;  %5790 = vmatpush.bf16.msrb.mxu2 %v8268_v42  ;;  %v9274_v58 = vld [vmem:[#allocation8 + $0x484] sm:$0xf]  ;;  %v9340_v14 = vld [vmem:[#allocation8 + $0x694] sm:$0xf] }
 0x368   : > { %5818 = vmatpush.bf16.msrb.mxu3 %v8376_v8  ;;  %v9253_v8 = vld [vmem:[#allocation8 + $0x3dc] sm:$0xf]  ;;  %v9250_v42 = vld [vmem:[#allocation8 + $0x3c4] sm:$0xf]  ;;  %v8520_v29 = vor.u32 %v9340_v14, %v8517_v54  ;;  %v9364_v54 = vld [vmem:[#allocation8 + $0x754] sm:$0xf] }
 0x369   : > { %v10647_v35 = vpop.f32.mrf.mxu2  ;;  %v10649_v56 = vpop.f32.mrf.mxu3  ;;  %5732 = vmatpush.bf16.msrb.mxu0 %v8076_v51  ;;  %v8172_v53 = vor.u32 %v9253_v8, %v8169_v4  ;;  %v8157_v51 = vld [vmem:[#allocation8 + $0x3cc] sm:$0xf0]  ;;  %v8613_v14 = vld [vmem:[#allocation8 + $0x75c] sm:$0xf0] }
 0x36a   : > { %v10651_v34 = vpop.f32.mrf.mxu0  ;;  %v10653_v21 = vpop.f32.mrf.mxu1  ;;  %v8160_v4 = vor.u32 %v9250_v42, %v8157_v51 }
 0x36b   : > { %5761 = vmatpush.bf16.msrb.mxu1 %v8172_v53  ;;  %v8721_v53 = vld [vmem:[#allocation8 + $0x834] sm:$0xf0] }
 0x36c   : > { %5819 = vmatpush.bf16.msrb.mxu3 %v8364_v57 }
 0x36f   : > { %5762 = vmatpush.bf16.msrb.mxu1 %v8160_v4 }
 0x371   : > { %v10655_v13 = vpop.f32.mrf.mxu2  ;;  %v10657_v55 = vpop.f32.mrf.mxu3 }
 0x372   : > { %v10659_v17 = vpop.f32.mrf.mxu0  ;;  %v10661_v52 = vpop.f32.mrf.mxu1 }
 0x374   : > { %5623 = vmatmul.bf16.gmra.mxu0 %v10035_v9 }
 0x375   : > { %5652 = vmatmul.bf16.gmra.mxu1 %v10092_v11  ;;  %v9298_v11 = vld [vmem:[#allocation8 + $0x544] sm:$0xf] }
 0x376   : > { %5681 = vmatmul.bf16.gmra.mxu2 %v10149_v47  ;;  %5710 = vmatmul.bf16.gmra.mxu3 %v11239_v3  ;;  %v8256_v3 = vor.u32 %v9274_v58, %v8253_v44  ;;  %v8061_v47 = vld [vmem:[#allocation8 + $0x30c] sm:$0xf0]  ;;  %v8352_v41 = vor.u32 %v9298_v11, %v8349_v62  ;;  %v11240_v11 = vld [vmem:[#allocation28_spill] sm:$0xff]  ;;  %v9343_v58 = vld [vmem:[#allocation8 + $0x6ac] sm:$0xf] }
 0x377   : > { %v8064_v33 = vor.u32 %v9226_v25, %v8061_v47  ;;  %v11241_v47 = vld [vmem:[#allocation29_spill] sm:$0xff]  ;;  %v8529_v25 = vld [vmem:[#allocation8 + $0x6b4] sm:$0xf0] }
 0x378   : > { %5791 = vmatpush.bf16.msrb.mxu2 %v8256_v3  ;;  %5820 = vmatpush.bf16.msrb.mxu3 %v8352_v41  ;;  %v9391_v3 = vld [vmem:[#allocation8 + $0x82c] sm:$0xf]  ;;  %v8532_v42 = vor.u32 %v9343_v58, %v8529_v25  ;;  %v9412_v58 = vld [vmem:[#allocation8 + $0x8d4] sm:$0xf]  ;;  %v8805_v25 = vld [vmem:[#allocation8 + $0x8dc] sm:$0xf0] }
 0x379   : > { %v10667_v12 = vpop.f32.mrf.mxu2  ;;  %v10669_v22 = vpop.f32.mrf.mxu3  ;;  %5733 = vmatpush.bf16.msrb.mxu0 %v8064_v33  ;;  %v8724_v44 = vor.u32 %v9391_v3, %v8721_v53  ;;  %v9415_v62 = vld [vmem:[#allocation8 + $0x8ec] sm:$0xf]  ;;  %v8817_v33 = vld [vmem:[#allocation8 + $0x8f4] sm:$0xf0]  ;;  %v8709_v53 = vld [vmem:[#allocation8 + $0x81c] sm:$0xf0] }
 0x37a   : > { %v10671_v5 = vpop.f32.mrf.mxu0  ;;  %v10673_v7 = vpop.f32.mrf.mxu1  ;;  %v8820_v51 = vor.u32 %v9415_v62, %v8817_v33  ;;  %v8712_v16 = vor.u32 %v9388_v59, %v8709_v53  ;;  %v8808_v33 = vor.u32 %v9412_v58, %v8805_v25  ;;  %v11242_v59 = vld [vmem:[#allocation31_spill] sm:$0xff]  ;;  %v8505_v53 = vld [vmem:[#allocation8 + $0x684] sm:$0xf0] }
 0x37b   : > { %v9409_v58 = vld [vmem:[#allocation8 + $0x8bc] sm:$0xf]  ;;  %v8793_v25 = vld [vmem:[#allocation8 + $0x8c4] sm:$0xf0] }
 0x37c   : > { %5900 = vmatpush.bf16.msra.mxu2 %v8724_v44  ;;  %5929 = vmatpush.bf16.msra.mxu3 %v8820_v51  ;;  %v8697_v51 = vld [vmem:[#allocation8 + $0x804] sm:$0xf0] }
 0x37d   : > { %5842 = vmatpush.bf16.msra.mxu0 %v8532_v42 }
 0x380   : > { %5901 = vmatpush.bf16.msra.mxu2 %v8712_v16  ;;  %5930 = vmatpush.bf16.msra.mxu3 %v8808_v33  ;;  %v5388_v16 = vadd.f32 %v10637_v27, %v10581_v43 }
 0x381   : > { %v10675_v18 = vpop.f32.mrf.mxu2  ;;  %v10677_v57 = vpop.f32.mrf.mxu3  ;;  %5843 = vmatpush.bf16.msra.mxu0 %v8520_v29 }
 0x382   : > { %v10679_v8 = vpop.f32.mrf.mxu0  ;;  %v10681_v9 = vpop.f32.mrf.mxu1  ;;  %v5417_v43 = vadd.f32 %v10639_v26, %v5388_v16 }
 0x384   : > { %5628 = vmatmul.bf16.gmra.mxu0 %v10047_v0  ;;  %v5446_v27 = vadd.f32 %v10647_v35, %v5417_v43 }
 0x385   : > { %5657 = vmatmul.bf16.gmra.mxu1 %v10108_v15 }
 0x386   : > { %5686 = vmatmul.bf16.gmra.mxu2 %v11240_v11  ;;  %5715 = vmatmul.bf16.gmra.mxu3 %v11241_v47  ;;  %v9367_v47 = vld [vmem:[#allocation8 + $0x76c] sm:$0xf]  ;;  %v8625_v11 = vld [vmem:[#allocation8 + $0x774] sm:$0xf0]  ;;  %v5475_v26 = vadd.f32 %v10649_v56, %v5446_v27 }
 0x387   : > { %v8628_v3 = vor.u32 %v9367_v47, %v8625_v11  ;;  %v8616_v11 = vor.u32 %v9364_v54, %v8613_v14  ;;  %v9385_v47 = vld [vmem:[#allocation8 + $0x7fc] sm:$0xf]  ;;  %v11246_v56 = vld [vmem:[#allocation41_spill] sm:$0xff] }
 0x388   : > { %v8700_v29 = vor.u32 %v9385_v47, %v8697_v51  ;;  %v9361_v14 = vld [vmem:[#allocation8 + $0x73c] sm:$0xf]  ;;  %v8601_v47 = vld [vmem:[#allocation8 + $0x744] sm:$0xf0]  ;;  %v9382_v51 = vld [vmem:[#allocation8 + $0x7e4] sm:$0xf] }
 0x389   : > { %v10687_v41 = vpop.f32.mrf.mxu2  ;;  %v10689_v4 = vpop.f32.mrf.mxu3  ;;  %5871 = vmatpush.bf16.msra.mxu1 %v8628_v3  ;;  %v9337_v3 = vld [vmem:[#allocation8 + $0x67c] sm:$0xf] }
 0x38a   : > { %v10691_v0 = vpop.f32.mrf.mxu0  ;;  %v10693_v15 = vpop.f32.mrf.mxu1  ;;  %5902 = vmatpush.bf16.msra.mxu2 %v8700_v29 }
 0x38d   : > { %5872 = vmatpush.bf16.msra.mxu1 %v8616_v11  ;;  %v8685_v11 = vld [vmem:[#allocation8 + $0x7ec] sm:$0xf0] }
 0x391   : > { %v10695_v62 = vpop.f32.mrf.mxu2  ;;  %v10697_v44 = vpop.f32.mrf.mxu3 }
 0x392   : > { %v10699_v19 = vpop.f32.mrf.mxu0  ;;  %v10701_v42 = vpop.f32.mrf.mxu1 }
 0x394   : > { %5633 = vmatmul.bf16.gmra.mxu0 %v10066_v1 }
 0x395   : > { %5662 = vmatmul.bf16.gmra.mxu1 %v10122_v20  ;;  %v8508_v20 = vor.u32 %v9337_v3, %v8505_v53  ;;  %v9334_v3 = vld [vmem:[#allocation8 + $0x664] sm:$0xf]  ;;  %v8493_v53 = vld [vmem:[#allocation8 + $0x66c] sm:$0xf0] }
 0x396   : > { %5691 = vmatmul.bf16.gmra.mxu2 %v10178_v49  ;;  %5720 = vmatmul.bf16.gmra.mxu3 %v11242_v59  ;;  %v8796_v49 = vor.u32 %v9409_v58, %v8793_v25  ;;  %v8604_v59 = vor.u32 %v9361_v14, %v8601_v47  ;;  %v5390_v58 = vadd.f32 %v10651_v34, %v10586_v39  ;;  %v11243_v14 = vld [vmem:[#allocation32_spill] sm:$0xff] }
 0x397   : > { %5844 = vmatpush.bf16.msra.mxu0 %v8508_v20  ;;  %v8688_v25 = vor.u32 %v9382_v51, %v8685_v11  ;;  %v8496_v29 = vor.u32 %v9334_v3, %v8493_v53  ;;  %v11244_v51 = vld [vmem:[#allocation36_spill] sm:$0xff]  ;;  %v9379_v11 = vld [vmem:[#allocation8 + $0x7cc] sm:$0xf]  ;;  %v8673_v3 = vld [vmem:[#allocation8 + $0x7d4] sm:$0xf0] }
 0x398   : > { %5931 = vmatpush.bf16.msra.mxu3 %v8796_v49  ;;  %5873 = vmatpush.bf16.msra.mxu1 %v8604_v59  ;;  %v8784_v49 = vor.u32 %v9406_v32, %v8781_v63  ;;  %v5419_v39 = vadd.f32 %v10653_v21, %v5390_v58  ;;  %v11245_v59 = vld [vmem:[#allocation40_spill] sm:$0xff]  ;;  %v8589_v63 = vld [vmem:[#allocation8 + $0x72c] sm:$0xf0]  ;;  %v9331_v53 = vld [vmem:[#allocation8 + $0x64c] sm:$0xf]  ;;  %v5393_v21 = vadd.f32 %v10659_v17, %v10601_v28 }
 0x399   : > { %v10709_v33 = vpop.f32.mrf.mxu2  ;;  %v10711_v1 = vpop.f32.mrf.mxu3  ;;  %5903 = vmatpush.bf16.msra.mxu2 %v8688_v25  ;;  %v9358_v32 = vld [vmem:[#allocation8 + $0x724] sm:$0xf]  ;;  %v8676_v25 = vor.u32 %v9379_v11, %v8673_v3  ;;  %v8577_v11 = vld [vmem:[#allocation8 + $0x714] sm:$0xf0]  ;;  %v8661_v3 = vld [vmem:[#allocation8 + $0x7bc] sm:$0xf0] }
 0x39a   : > { %v10713_v40 = vpop.f32.mrf.mxu0  ;;  %v10715_v54 = vpop.f32.mrf.mxu1  ;;  %v5448_v47 = vadd.f32 %v10655_v13, %v5419_v39  ;;  %v8592_v27 = vor.u32 %v9358_v32, %v8589_v63  ;;  %v9403_v13 = vld [vmem:[#allocation8 + $0x88c] sm:$0xf]  ;;  %v5422_v28 = vadd.f32 %v10661_v52, %v5393_v21 }
 0x39b   : > { %5845 = vmatpush.bf16.msra.mxu0 %v8496_v29  ;;  %v8481_v29 = vld [vmem:[#allocation8 + $0x654] sm:$0xf0] }
 0x39c   : > { %5932 = vmatpush.bf16.msra.mxu3 %v8784_v49  ;;  %v8769_v49 = vld [vmem:[#allocation8 + $0x894] sm:$0xf0]  ;;  %5874 = vmatpush.bf16.msra.mxu1 %v8592_v27  ;;  %v9355_v27 = vld [vmem:[#allocation8 + $0x70c] sm:$0xf] }
 0x39d   : > { %v8772_v39 = vor.u32 %v9403_v13, %v8769_v49  ;;  %5904 = vmatpush.bf16.msra.mxu2 %v8676_v25  ;;  %v5395_v25 = vadd.f32 %v10671_v5, %v10606_v37 }
 0x39f   : > { %v5424_v37 = vadd.f32 %v10673_v7, %v5395_v25  ;;  %v5398_v7 = vadd.f32 %v10679_v8, %v10621_v23  ;;  %v8457_v25 = vld [vmem:[#allocation8 + $0x624] sm:$0xf0] }
 0x3a0   : > { %5933 = vmatpush.bf16.msra.mxu3 %v8772_v39 }
 0x3a1   : > { %v10721_v20 = vpop.f32.mrf.mxu2  ;;  %v10724_v35 = vpop.f32.mrf.mxu3  ;;  %v5427_v23 = vadd.f32 %v10681_v9, %v5398_v7 }
 0x3a2   : > { %v5503_v16 = vpop.f32.mrf.mxu0  ;;  %v5532_v43 = vpop.f32.mrf.mxu1 }
 0x3a3   : > { %v5504_v34 = vadd.f32 %v5503_v16, %v5475_v26  ;;  %v8484_v16 = vor.u32 %v9331_v53, %v8481_v29  ;;  %v9328_v53 = vld [vmem:[#allocation8 + $0x634] sm:$0xf] }
 0x3a4   : > { %5734 = vmatmul.bf16.vlgmr.msrb.gmra.mxu0 %v11243_v14 }
 0x3a5   : > { %5763 = vmatmul.bf16.vlgmr.msrb.gmra.mxu1 %v11244_v51  ;;  %v5533_v58 = vadd.f32 %v5532_v43, %v5504_v34  ;;  %5846 = vmatpush.bf16.msra.mxu0 %v8484_v16  ;;  %v5451_v34 = vadd.f32 %v10667_v12, %v5422_v28  ;;  %v5453_v28 = vadd.f32 %v10675_v18, %v5424_v37  ;;  %v9397_v18 = vld [vmem:[#allocation8 + $0x85c] sm:$0xf] }
 0x3a6   : > { %5792 = vmatmul.bf16.vlgmr.msrb.gmra.mxu2 %v11245_v59  ;;  %5821 = vmatmul.bf16.vlgmr.msrb.gmra.mxu3 %v11246_v56  ;;  %v5477_v59 = vadd.f32 %v10657_v55, %v5448_v47  ;;  %v9376_v55 = vld [vmem:[#allocation8 + $0x7b4] sm:$0xf]  ;;  %v8580_v47 = vor.u32 %v9355_v27, %v8577_v11  ;;  %v11250_v27 = vld [vmem:[#allocation43_spill] sm:$0xff]  ;;  %v5456_v37 = vadd.f32 %v10687_v41, %v5427_v23  ;;  %v8541_v41 = vld [vmem:[#allocation8 + $0x6cc] sm:$0xf0] }
 0x3a7   : > { %v8664_v52 = vor.u32 %v9376_v55, %v8661_v3  ;;  %v5480_v13 = vadd.f32 %v10669_v22, %v5451_v34  ;;  %v9352_v22 = vld [vmem:[#allocation8 + $0x6f4] sm:$0xf]  ;;  %v8565_v34 = vld [vmem:[#allocation8 + $0x6fc] sm:$0xf0]  ;;  %v9373_v55 = vld [vmem:[#allocation8 + $0x79c] sm:$0xf] }
 0x3a8   : > { %5875 = vmatpush.bf16.msra.mxu1 %v8580_v47  ;;  %v8568_v11 = vor.u32 %v9352_v22, %v8565_v34  ;;  %v8649_v47 = vld [vmem:[#allocation8 + $0x7a4] sm:$0xf0]  ;;  %v9325_v3 = vld [vmem:[#allocation8 + $0x61c] sm:$0xf]  ;;  %v8637_v22 = vld [vmem:[#allocation8 + $0x78c] sm:$0xf0] }
 0x3a9   : > { %v5561_v26 = vpop.f32.mrf.mxu2  ;;  %v5590_v56 = vpop.f32.mrf.mxu3  ;;  %5905 = vmatpush.bf16.msra.mxu2 %v8664_v52  ;;  %v8445_v34 = vld [vmem:[#allocation8 + $0x60c] sm:$0xf0] }
 0x3aa   : > { %v5562_v51 = vadd.f32 %v5561_v26, %v5533_v58  ;;  %v5505_v32 = vpop.f32.mrf.mxu0  ;;  %v5534_v63 = vpop.f32.mrf.mxu1  ;;  %v8469_v58 = vld [vmem:[#allocation8 + $0x63c] sm:$0xf0]  ;;  %v7959_v23 = vld [vmem:[#allocation8 + $0x230] sm:$0xf] }
 0x3ab   : > { %v5506_v43 = vadd.f32 %v5505_v32, %v5477_v59  ;;  %v9400_v59 = vld [vmem:[#allocation8 + $0x874] sm:$0xf] }
 0x3ac   : > { %v5591_v17 = vadd.f32 %v5590_v56, %v5562_v51  ;;  %v8472_v51 = vor.u32 %v9328_v53, %v8469_v58  ;;  %v8757_v56 = vld [vmem:[#allocation8 + $0x87c] sm:$0xf0]  ;;  %v8652_v58 = vor.u32 %v9373_v55, %v8649_v47  ;;  %5876 = vmatpush.bf16.msra.mxu1 %v8568_v11  ;;  %v9394_v11 = vld [vmem:[#allocation8 + $0x844] sm:$0xf]  ;;  %v5400_v55 = vadd.f32 %v10691_v0, %v10626_v2 }
 0x3ad   : > { %v5535_v29 = vadd.f32 %v5534_v63, %v5506_v43  ;;  %v8760_v21 = vor.u32 %v9400_v59, %v8757_v56  ;;  %v11247_v63 = vld [vmem:[#allocation33_spill] sm:$0xff]  ;;  %v11249_v43 = vld [vmem:[#allocation42_spill] sm:$0xff]  ;;  %v5482_v56 = vadd.f32 %v10677_v57, %v5453_v28  ;;  %v9322_v28 = vld [vmem:[#allocation8 + $0x604] sm:$0xf] }
 0x3ae   : > { %6306 = vst [vmem:[%s10738_s29] sm:$0xff] %v5591_v17  ;;  %5847 = vmatpush.bf16.msra.mxu0 %v8472_v51  ;;  %v11248_v17 = vld [vmem:[#allocation37_spill] sm:$0xff]  ;;  %v8460_v51 = vor.u32 %v9325_v3, %v8457_v25  ;;  %5906 = vmatpush.bf16.msra.mxu2 %v8652_v58  ;;  %v8448_v9 = vor.u32 %v9322_v28, %v8445_v34  ;;  %v9346_v58 = vld [vmem:[#allocation8 + $0x6c4] sm:$0xf] }
 0x3af   : > { %5934 = vmatpush.bf16.msra.mxu3 %v8760_v21  ;;  %v8733_v3 = vld [vmem:[#allocation8 + $0x84c] sm:$0xf0]  ;;  %v5485_v25 = vadd.f32 %v10689_v4, %v5456_v37  ;;  %v5429_v0 = vadd.f32 %v10693_v15, %v5400_v55  ;;  %v11253_v4 = vld [vmem:[#allocation44_spill] sm:$0xff]  ;;  %v5403_v15 = vadd.f32 %v10699_v19, %v10635_v60  ;;  %v9153_v37 = vld [vmem:[#allocation8 + $0xb8] sm:$0xf0] }
 0x3b1   : > { %v5563_v12 = vpop.f32.mrf.mxu2  ;;  %v5592_v26 = vpop.f32.mrf.mxu3  ;;  %v5432_v19 = vadd.f32 %v10701_v42, %v5403_v15  ;;  %v5405_v42 = vadd.f32 %v10713_v40, %v10641_v24  ;;  %v11255_v40 = vld [vmem:[#allocation35_spill] sm:$0xff] }
 0x3b2   : > { %v5564_v49 = vadd.f32 %v5563_v12, %v5535_v29  ;;  %v5508_v16 = vpop.f32.mrf.mxu0  ;;  %v5537_v39 = vpop.f32.mrf.mxu1  ;;  %v8745_v29 = vld [vmem:[#allocation8 + $0x864] sm:$0xf0]  ;;  %5848 = vmatpush.bf16.msra.mxu0 %v8460_v51  ;;  %v8544_v51 = vor.u32 %v9346_v58, %v8541_v41  ;;  %v7947_v58 = vld [vmem:[#allocation8 + $0x218] sm:$0xf]  ;;  %v9198_v41 = vld [vmem:[#allocation8 + $0x220] sm:$0xf0] }
 0x3b3   : > { %v5509_v32 = vadd.f32 %v5508_v16, %v5480_v13  ;;  %v8748_v59 = vor.u32 %v9397_v18, %v8745_v29  ;;  %v9349_v16 = vld [vmem:[#allocation8 + $0x6dc] sm:$0xf]  ;;  %v5434_v15 = vadd.f32 %v10715_v54, %v5405_v42  ;;  %v7743_v54 = vld [vmem:[#allocation8 + $0x80] sm:$0xf]  ;;  %v7731_v42 = vld [vmem:[#allocation8 + $0x68] sm:$0xf] }
 0x3b4   : > { %v5593_v5 = vadd.f32 %v5592_v26, %v5564_v49  ;;  %5739 = vmatmul.bf16.gmra.mxu0 %v11247_v63 }
 0x3b5   : > { %5768 = vmatmul.bf16.gmra.mxu1 %v11248_v17  ;;  %v5538_v53 = vadd.f32 %v5537_v39, %v5509_v32  ;;  %5935 = vmatpush.bf16.msra.mxu3 %v8748_v59  ;;  %v8553_v39 = vld [vmem:[#allocation8 + $0x6e4] sm:$0xf0]  ;;  %v9370_v32 = vld [vmem:[#allocation8 + $0x784] sm:$0xf] }
 0x3b6   : > { %6309 = vst [vmem:[%s10738_s29 + $0x18] sm:$0xff] %v5593_v5  ;;  %5797 = vmatmul.bf16.gmra.mxu2 %v11249_v43  ;;  %5826 = vmatmul.bf16.gmra.mxu3 %v11250_v27  ;;  %v8556_v5 = vor.u32 %v9349_v16, %v8553_v39  ;;  %v8640_v57 = vor.u32 %v9370_v32, %v8637_v22  ;;  %v9225_v32 = vld [vmem:[#allocation8 + $0x2f8] sm:$0xf0] }
 0x3b7   : > { %5849 = vmatpush.bf16.msra.mxu0 %v8448_v9 }
 0x3b8   : > { %5877 = vmatpush.bf16.msra.mxu1 %v8556_v5  ;;  %5907 = vmatpush.bf16.msra.mxu2 %v8640_v57  ;;  %v8055_v5 = vld [vmem:[#allocation8 + $0x2f0] sm:$0xf] }
 0x3b9   : > { %v5566_v52 = vpop.f32.mrf.mxu2  ;;  %v5595_v21 = vpop.f32.mrf.mxu3  ;;  %v8056_v57 = vor.u32 %v9225_v32, %v8055_v5  ;;  %v9174_v5 = vld [vmem:[#allocation8 + $0x160] sm:$0xf0]  ;;  %v5463_v32 = vadd.f32 %v10721_v20, %v5434_v15 }
 0x3ba   : > { %v5567_v12 = vadd.f32 %v5566_v52, %v5538_v53  ;;  %v5510_v13 = vpop.f32.mrf.mxu0  ;;  %v5539_v49 = vpop.f32.mrf.mxu1  ;;  %v8736_v53 = vor.u32 %v9394_v11, %v8733_v3  ;;  %v7863_v3 = vld [vmem:[#allocation8 + $0x170] sm:$0xf] }
 0x3bb   : > { %v5511_v26 = vadd.f32 %v5510_v13, %v5482_v56  ;;  %v11252_v13 = vld [vmem:[#allocation38_spill] sm:$0xff]  ;;  %v5492_v20 = vadd.f32 %v10724_v35, %v5463_v32  ;;  %v8019_v35 = vld [vmem:[#allocation8 + $0x2a8] sm:$0xf] }
 0x3bc   : > { %v5596_v8 = vadd.f32 %v5595_v21, %v5567_v12  ;;  %5936 = vmatpush.bf16.msra.mxu3 %v8736_v53  ;;  %5878 = vmatpush.bf16.msra.mxu1 %v8544_v51  ;;  %v11251_v12 = vld [vmem:[#allocation34_spill] sm:$0xff]  ;;  %v5458_v21 = vadd.f32 %v10695_v62, %v5429_v0 }
 0x3bd   : > { %v5540_v47 = vadd.f32 %v5539_v49, %v5511_v26  ;;  %v11254_v49 = vld [vmem:[#allocation45_spill] sm:$0xff] }
 0x3be   : > { %6312 = vst [vmem:[%s10738_s29 + $0x30] sm:$0xff] %v5596_v8  ;;  %v9201_v8 = vld [vmem:[#allocation8 + $0x238] sm:$0xf0]  ;;  %v7767_v26 = vld [vmem:[#allocation8 + $0xb0] sm:$0xf]  ;;  %v5487_v28 = vadd.f32 %v10697_v44, %v5458_v21  ;;  %v5461_v44 = vadd.f32 %v10709_v33, %v5432_v19 }
 0x3bf   : > { %v7960_v39 = vor.u32 %v9201_v8, %v7959_v23  ;;  %v7768_v62 = vor.u32 %v9153_v37, %v7767_v26  ;;  %v7851_v37 = vld [vmem:[#allocation8 + $0x158] sm:$0xf]  ;;  %v9219_v19 = vld [vmem:[#allocation8 + $0x2c8] sm:$0xf0] }
 0x3c0   : > { %6045 = vmatpush.bf16.msrb.mxu3 %v8056_v57  ;;  %v5490_v21 = vadd.f32 %v10711_v1, %v5461_v44  ;;  %v7852_v24 = vor.u32 %v9174_v5, %v7851_v37  ;;  %v11257_v1 = vld [vmem:[#allocation46_spill] sm:$0xff]  ;;  %v7935_v57 = vld [vmem:[#allocation8 + $0x200] sm:$0xf] }
 0x3c1   : > { %v5568_v7 = vpop.f32.mrf.mxu2  ;;  %v5597_v29 = vpop.f32.mrf.mxu3  ;;  %6016 = vmatpush.bf16.msrb.mxu2 %v7960_v39  ;;  %5958 = vmatpush.bf16.msrb.mxu0 %v7768_v62  ;;  %v11258_v62 = vld [vmem:[#allocation47_spill] sm:$0xff] }
 0x3c2   : > { %v5569_v18 = vadd.f32 %v5568_v7, %v5540_v47  ;;  %v5513_v52 = vpop.f32.mrf.mxu0  ;;  %v5542_v59 = vpop.f32.mrf.mxu1  ;;  %v9177_v7 = vld [vmem:[#allocation8 + $0x178] sm:$0xf0] }
 0x3c3   : > { %v5514_v56 = vadd.f32 %v5513_v52, %v5485_v25  ;;  %v7864_v53 = vor.u32 %v9177_v7, %v7863_v3  ;;  %v7755_v25 = vld [vmem:[#allocation8 + $0x98] sm:$0xf] }
 0x3c4   : > { %v5598_v2 = vadd.f32 %v5597_v29, %v5569_v18  ;;  %5744 = vmatmul.bf16.gmra.mxu0 %v11251_v12  ;;  %v7948_v18 = vor.u32 %v9198_v41, %v7947_v58  ;;  %v9150_v29 = vld [vmem:[#allocation8 + $0xa0] sm:$0xf0]  ;;  %v8043_v52 = vld [vmem:[#allocation8 + $0x2d8] sm:$0xf] }
 0x3c5   : > { %5773 = vmatmul.bf16.gmra.mxu1 %v11252_v13  ;;  %v5543_v16 = vadd.f32 %v5542_v59, %v5514_v56  ;;  %v7756_v51 = vor.u32 %v9150_v29, %v7755_v25  ;;  %v9222_v59 = vld [vmem:[#allocation8 + $0x2e0] sm:$0xf0]  ;;  %v9171_v29 = vld [vmem:[#allocation8 + $0x148] sm:$0xf0] }
 0x3c6   : > { %6315 = vst [vmem:[%s10738_s29 + $0x48] sm:$0xff] %v5598_v2  ;;  %5802 = vmatmul.bf16.gmra.mxu2 %v11253_v4  ;;  %5831 = vmatmul.bf16.gmra.mxu3 %v11254_v49  ;;  %v8044_v2 = vor.u32 %v9222_v59, %v8043_v52  ;;  %v9192_v59 = vld [vmem:[#allocation8 + $0x1f0] sm:$0xf0] }
 0x3c7   : > { %5987 = vmatpush.bf16.msrb.mxu1 %v7864_v53  ;;  %6017 = vmatpush.bf16.msrb.mxu2 %v7948_v18  ;;  %v7839_v18 = vld [vmem:[#allocation8 + $0x140] sm:$0xf] }
 0x3c8   : > { %5959 = vmatpush.bf16.msrb.mxu0 %v7756_v51  ;;  %6046 = vmatpush.bf16.msrb.mxu3 %v8044_v2  ;;  %v7840_v52 = vor.u32 %v9171_v29, %v7839_v18  ;;  %v7923_v51 = vld [vmem:[#allocation8 + $0x1e8] sm:$0xf]  ;;  %v9144_v2 = vld [vmem:[#allocation8 + $0x70] sm:$0xf0] }
 0x3c9   : > { %v5571_v22 = vpop.f32.mrf.mxu2  ;;  %v5600_v11 = vpop.f32.mrf.mxu3 }
 0x3ca   : > { %v5572_v34 = vadd.f32 %v5571_v22, %v5543_v16  ;;  %v5515_v55 = vpop.f32.mrf.mxu0  ;;  %v5544_v47 = vpop.f32.mrf.mxu1  ;;  %v11256_v22 = vld [vmem:[#allocation39_spill] sm:$0xff] }
 0x3cb   : > { %v5516_v9 = vadd.f32 %v5515_v55, %v5487_v28  ;;  %5988 = vmatpush.bf16.msrb.mxu1 %v7852_v24  ;;  %v9195_v28 = vld [vmem:[#allocation8 + $0x208] sm:$0xf0] }
 0x3cc   : > { %v5601_v60 = vadd.f32 %v5600_v11, %v5572_v34  ;;  %v7936_v11 = vor.u32 %v9195_v28, %v7935_v57  ;;  %v9147_v55 = vld [vmem:[#allocation8 + $0x88] sm:$0xf0]  ;;  %v7827_v57 = vld [vmem:[#allocation8 + $0x128] sm:$0xf]  ;;  %v9168_v28 = vld [vmem:[#allocation8 + $0x130] sm:$0xf0] }
 0x3cd   : > { %v5545_v0 = vadd.f32 %v5544_v47, %v5516_v9  ;;  %v8031_v47 = vld [vmem:[#allocation8 + $0x2c0] sm:$0xf]  ;;  %v7744_v9 = vor.u32 %v9147_v55, %v7743_v54  ;;  %v9189_v55 = vld [vmem:[#allocation8 + $0x1d8] sm:$0xf0] }
 0x3ce   : > { %6318 = vst [vmem:[%s10738_s29 + $0x60] sm:$0xff] %v5601_v60  ;;  %v8032_v3 = vor.u32 %v9219_v19, %v8031_v47  ;;  %6018 = vmatpush.bf16.msrb.mxu2 %v7936_v11  ;;  %v7911_v11 = vld [vmem:[#allocation8 + $0x1d0] sm:$0xf] }
 0x3cf   : > { %5960 = vmatpush.bf16.msrb.mxu0 %v7744_v9  ;;  %5989 = vmatpush.bf16.msrb.mxu1 %v7840_v52  ;;  %v7719_v47 = vld [vmem:[#allocation8 + $0x50] sm:$0xf]  ;;  %v7912_v19 = vor.u32 %v9189_v55, %v7911_v11  ;;  %v7887_v55 = vld [vmem:[#allocation8 + $0x1a0] sm:$0xf] }
 0x3d0   : > { %6047 = vmatpush.bf16.msrb.mxu3 %v8032_v3  ;;  %v8007_v9 = vld [vmem:[#allocation8 + $0x290] sm:$0xf]  ;;  %v9213_v3 = vld [vmem:[#allocation8 + $0x298] sm:$0xf0] }
 0x3d1   : > { %v5573_v56 = vpop.f32.mrf.mxu2  ;;  %v5602_v33 = vpop.f32.mrf.mxu3  ;;  %v7815_v52 = vld [vmem:[#allocation8 + $0x110] sm:$0xf] }
 0x3d2   : > { %v5574_v23 = vadd.f32 %v5573_v56, %v5545_v0  ;;  %v5518_v8 = vpop.f32.mrf.mxu0  ;;  %v5547_v26 = vpop.f32.mrf.mxu1  ;;  %v7924_v0 = vor.u32 %v9192_v59, %v7923_v51  ;;  %v9518_v56 = vld [vmem:[#allocation10] sm:$0x7]  ;;  %v9165_v51 = vld [vmem:[#allocation8 + $0x118] sm:$0xf0] }
 0x3d3   : > { %v5519_v39 = vadd.f32 %v5518_v8, %v5490_v21  ;;  %v10785_v21 = vperm.slane %v9518_v56, 1 }
 0x3d4   : > { %v5603_v16 = vadd.f32 %v5602_v33, %v5574_v23  ;;  %5749 = vmatmul.bf16.gmra.mxu0 %v11255_v40  ;;  %v7732_v23 = vor.u32 %v9144_v2, %v7731_v42  ;;  %v9216_v33 = vld [vmem:[#allocation8 + $0x2b0] sm:$0xf0]  ;;  %6019 = vmatpush.bf16.msrb.mxu2 %v7924_v0  ;;  %v7816_v42 = vor.u32 %v9165_v51, %v7815_v52  ;;  %v7899_v0 = vld [vmem:[#allocation8 + $0x1b8] sm:$0xf]  ;;  %v9186_v2 = vld [vmem:[#allocation8 + $0x1c0] sm:$0xf0] }
 0x3d5   : > { %5778 = vmatmul.bf16.gmra.mxu1 %v11256_v22  ;;  %v5548_v34 = vadd.f32 %v5547_v26, %v5519_v39  ;;  %v8020_v26 = vor.u32 %v9216_v33, %v8019_v35  ;;  %v7707_v35 = vld [vmem:[#allocation8 + $0x38] sm:$0xf]  ;;  %v7900_v56 = vor.u32 %v9186_v2, %v7899_v0 }
 0x3d6   : > { %6321 = vst [vmem:[%s10738_s29 + $0x78] sm:$0xff] %v5603_v16  ;;  %5807 = vmatmul.bf16.gmra.mxu2 %v11257_v1  ;;  %5836 = vmatmul.bf16.gmra.mxu3 %v11258_v62  ;;  %v7995_v33 = vld [vmem:[#allocation8 + $0x278] sm:$0xf]  ;;  %v8787_v62 = vld [vmem:[#allocation8 + $0x8a8] sm:$0xf] }
 0x3d7   : > { %5961 = vmatpush.bf16.msrb.mxu0 %v7732_v23  ;;  %6048 = vmatpush.bf16.msrb.mxu3 %v8020_v26  ;;  %v9138_v23 = vld [vmem:[#allocation8 + $0x40] sm:$0xf0]  ;;  %v9408_v1 = vld [vmem:[#allocation8 + $0x8b0] sm:$0xf0] }
 0x3d8   : > { %6020 = vmatpush.bf16.msrb.mxu2 %v7912_v19  ;;  %v7708_v26 = vor.u32 %v9138_v23, %v7707_v35  ;;  %v7695_v19 = vld [vmem:[#allocation8 + $0x20] sm:$0xf]  ;;  %v7875_v35 = vld [vmem:[#allocation8 + $0x188] sm:$0xf] }
 0x3d9   : > { %v5576_v60 = vpop.f32.mrf.mxu2  ;;  %v5605_v53 = vpop.f32.mrf.mxu3  ;;  %v7683_v23 = vld [vmem:[#allocation8 + $0x8] sm:$0xf] }
 0x3da   : > { %v5577_v7 = vadd.f32 %v5576_v60, %v5548_v34  ;;  %v5520_v58 = vpop.f32.mrf.mxu0  ;;  %v5549_v41 = vpop.f32.mrf.mxu1  ;;  %v7828_v34 = vor.u32 %v9168_v28, %v7827_v57  ;;  %v9141_v60 = vld [vmem:[#allocation8 + $0x58] sm:$0xf0]  ;;  %v7803_v28 = vld [vmem:[#allocation8 + $0xf8] sm:$0xf] }
 0x3db   : > { %v5521_v44 = vadd.f32 %v5520_v58, %v5492_v20 }
 0x3dc   : > { %v5606_v25 = vadd.f32 %v5605_v53, %v5577_v7  ;;  %5990 = vmatpush.bf16.msrb.mxu1 %v7828_v34  ;;  %v7720_v7 = vor.u32 %v9141_v60, %v7719_v47  ;;  %v8008_v53 = vor.u32 %v9213_v3, %v8007_v9  ;;  %6021 = vmatpush.bf16.msrb.mxu2 %v7900_v56  ;;  %v9183_v47 = vld [vmem:[#allocation8 + $0x1a8] sm:$0xf0]  ;;  %v7983_v3 = vld [vmem:[#allocation8 + $0x260] sm:$0xf]  ;;  %v9180_v56 = vld [vmem:[#allocation8 + $0x190] sm:$0xf0] }
 0x3dd   : > { %v5550_v8 = vadd.f32 %v5549_v41, %v5521_v44  ;;  %v7888_v60 = vor.u32 %v9183_v47, %v7887_v55  ;;  %v9135_v9 = vld [vmem:[#allocation8 + $0x28] sm:$0xf0] }
 0x3de   : > { %6324 = vst [vmem:[%s10738_s29 + $0x90] sm:$0xff] %v5606_v25  ;;  %5962 = vmatpush.bf16.msrb.mxu0 %v7720_v7  ;;  %6049 = vmatpush.bf16.msrb.mxu3 %v8008_v53  ;;  %v7696_v53 = vor.u32 %v9135_v9, %v7695_v19  ;;  %v8343_v9 = vld [vmem:[#allocation8 + $0x530] sm:$0xf] }
 0x3e0   : > { %5991 = vmatpush.bf16.msrb.mxu1 %v7816_v42  ;;  %6022 = vmatpush.bf16.msrb.mxu2 %v7888_v60  ;;  %v9159_v42 = vld [vmem:[#allocation8 + $0xe8] sm:$0xf0]  ;;  %v11259_v60 = vld [vmem:[#allocation62_spill] sm:$0xff] }
 0x3e1   : > { %v5578_v15 = vpop.f32.mrf.mxu2  ;;  %v5607_v39 = vpop.f32.mrf.mxu3 }
 0x3e2   : > { %v5579_v16 = vadd.f32 %v5578_v15, %v5550_v8  ;;  %v5619_v37 = vpop.f32.mrf.mxu0  ;;  %v5648_v24 = vpop.f32.mrf.mxu1  ;;  %v9210_v8 = vld [vmem:[#allocation8 + $0x280] sm:$0xf0]  ;;  %5963 = vmatpush.bf16.msrb.mxu0 %v7708_v26  ;;  %v7971_v26 = vld [vmem:[#allocation8 + $0x248] sm:$0xf] }
 0x3e3   : > { %v5620_v5 = vadd.f32 %v5619_v37, %v10785_v21  ;;  %v7996_v15 = vor.u32 %v9210_v8, %v7995_v33  ;;  %v7876_v33 = vor.u32 %v9180_v56, %v7875_v35  ;;  %v9132_v8 = vld [vmem:[#allocation8 + $0x10] sm:$0xf0]  ;;  %v8247_v56 = vld [vmem:[#allocation8 + $0x470] sm:$0xf] }
 0x3e4   : > { %v5608_v32 = vadd.f32 %v5607_v39, %v5579_v16  ;;  %5850 = vmatmul.bf16.vlgmr.msra.gmra.mxu0 %v10369_v36 }
 0x3e5   : > { %v5649_v54 = vadd.f32 %v5648_v24, %v5620_v5  ;;  %5879 = vmatmul.bf16.vlgmr.msra.gmra.mxu1 %v10424_v61  ;;  %6050 = vmatpush.bf16.msrb.mxu3 %v7996_v15  ;;  %v9204_v15 = vld [vmem:[#allocation8 + $0x250] sm:$0xf0] }
 0x3e6   : > { %6327 = vst [vmem:[%s10738_s29 + $0xa8] sm:$0xff] %v5608_v32  ;;  %5908 = vmatmul.bf16.vlgmr.msra.gmra.mxu2 %v10489_v46  ;;  %5937 = vmatmul.bf16.vlgmr.msra.gmra.mxu3 %v10568_v45  ;;  %v9339_v45 = vld [vmem:[#allocation8 + $0x688] sm:$0xf0] }
 0x3e7   : > { %5964 = vmatpush.bf16.msrb.mxu0 %v7696_v53  ;;  %6023 = vmatpush.bf16.msrb.mxu2 %v7876_v33  ;;  %v9249_v53 = vld [vmem:[#allocation8 + $0x3b8] sm:$0xf0]  ;;  %v9411_v46 = vld [vmem:[#allocation8 + $0x8c8] sm:$0xf0] }
 0x3e9   : > { %v5677_v20 = vpop.f32.mrf.mxu2  ;;  %v5706_v41 = vpop.f32.mrf.mxu3 }
 0x3ea   : > { %v5678_v58 = vadd.f32 %v5677_v20, %v5649_v54  ;;  %v5621_v25 = vpop.f32.mrf.mxu0  ;;  %v5650_v18 = vpop.f32.mrf.mxu1  ;;  %v9162_v54 = vld [vmem:[#allocation8 + $0x100] sm:$0xf0]  ;;  %v9207_v20 = vld [vmem:[#allocation8 + $0x268] sm:$0xf0] }
 0x3eb   : > { %v5622_v44 = vadd.f32 %v5621_v25, %v10785_v21  ;;  %v7804_v11 = vor.u32 %v9162_v54, %v7803_v28 }
 0x3ec   : > { %v10794_v29 = vadd.f32 %v5706_v41, %v5678_v58  ;;  %v7984_v58 = vor.u32 %v9207_v20, %v7983_v3  ;;  %v9297_v3 = vld [vmem:[#allocation8 + $0x538] sm:$0xf0]  ;;  %v8151_v20 = vld [vmem:[#allocation8 + $0x3b0] sm:$0xf] }
 0x3ed   : > { %v5651_v59 = vadd.f32 %v5650_v18, %v5622_v44  ;;  %5992 = vmatpush.bf16.msrb.mxu1 %v7804_v11 }
 0x3ee   : > { %6051 = vmatpush.bf16.msrb.mxu3 %v7984_v58  ;;  %v8439_v58 = vld [vmem:[#allocation8 + $0x5f0] sm:$0xf] }
 0x3f1   : > { %v5679_v16 = vpop.f32.mrf.mxu2  ;;  %v5708_v37 = vpop.f32.mrf.mxu3 }
 0x3f2   : > { %v5680_v39 = vadd.f32 %v5679_v16, %v5651_v59  ;;  %v5624_v5 = vpop.f32.mrf.mxu0  ;;  %v5653_v32 = vpop.f32.mrf.mxu1  ;;  %v7791_v59 = vld [vmem:[#allocation8 + $0xe0] sm:$0xf]  ;;  %v7684_v16 = vor.u32 %v9132_v8, %v7683_v23  ;;  %v9273_v23 = vld [vmem:[#allocation8 + $0x478] sm:$0xf0] }
 0x3f3   : > { %v5625_v24 = vadd.f32 %v5624_v5, %v10785_v21  ;;  %v7792_v2 = vor.u32 %v9159_v42, %v7791_v59  ;;  %v7779_v5 = vld [vmem:[#allocation8 + $0xc8] sm:$0xf]  ;;  %v8248_v8 = vor.u32 %v9273_v23, %v8247_v56  ;;  %v8415_v56 = vld [vmem:[#allocation8 + $0x5c0] sm:$0xf]  ;;  %v9315_v23 = vld [vmem:[#allocation8 + $0x5c8] sm:$0xf0] }
 0x3f4   : > { %v10797_v57 = vadd.f32 %v5708_v37, %v5680_v39  ;;  %5855 = vmatmul.bf16.gmra.mxu0 %v10383_v48  ;;  %v7972_v39 = vor.u32 %v9204_v15, %v7971_v26  ;;  %v8331_v26 = vld [vmem:[#allocation8 + $0x518] sm:$0xf]  ;;  %v9294_v15 = vld [vmem:[#allocation8 + $0x520] sm:$0xf0] }
 0x3f5   : > { %v5654_v34 = vadd.f32 %v5653_v32, %v5625_v24  ;;  %5884 = vmatmul.bf16.gmra.mxu1 %v10440_v10  ;;  %5965 = vmatpush.bf16.msrb.mxu0 %v7684_v16  ;;  %v9156_v24 = vld [vmem:[#allocation8 + $0xd0] sm:$0xf0]  ;;  %v8139_v16 = vld [vmem:[#allocation8 + $0x398] sm:$0xf] }
 0x3f6   : > { %5913 = vmatmul.bf16.gmra.mxu2 %v10509_v30  ;;  %5942 = vmatmul.bf16.gmra.mxu3 %v10589_v31  ;;  %v9342_v31 = vld [vmem:[#allocation8 + $0x6a0] sm:$0xf0] }
 0x3f7   : > { %5993 = vmatpush.bf16.msrb.mxu1 %v7792_v2  ;;  %6052 = vmatpush.bf16.msrb.mxu3 %v7972_v39  ;;  %v8332_v39 = vor.u32 %v9294_v15, %v8331_v26  ;;  %v8416_v26 = vor.u32 %v9315_v23, %v8415_v56  ;;  %v8211_v23 = vld [vmem:[#allocation8 + $0x428] sm:$0xf] }
 0x3f9   : > { %v5682_v7 = vpop.f32.mrf.mxu2  ;;  %v5711_v25 = vpop.f32.mrf.mxu3 }
 0x3fa   : > { %v5683_v41 = vadd.f32 %v5682_v7, %v5654_v34  ;;  %v5626_v44 = vpop.f32.mrf.mxu0  ;;  %v5655_v52 = vpop.f32.mrf.mxu1  ;;  %v7780_v34 = vor.u32 %v9156_v24, %v7779_v5  ;;  %v8344_v7 = vor.u32 %v9297_v3, %v8343_v9  ;;  %v8427_v5 = vld [vmem:[#allocation8 + $0x5d8] sm:$0xf]  ;;  %v9318_v24 = vld [vmem:[#allocation8 + $0x5e0] sm:$0xf0] }
 0x3fb   : > { %v5627_v18 = vadd.f32 %v5626_v44, %v10785_v21  ;;  %v8152_v44 = vor.u32 %v9249_v53, %v8151_v20  ;;  %v8235_v20 = vld [vmem:[#allocation8 + $0x458] sm:$0xf] }
 0x3fc   : > { %v10804_v51 = vadd.f32 %v5711_v25, %v5683_v41  ;;  %5994 = vmatpush.bf16.msrb.mxu1 %v7780_v34  ;;  %v9321_v41 = vld [vmem:[#allocation8 + $0x5f8] sm:$0xf0]  ;;  %6132 = vmatpush.bf16.msra.mxu2 %v8344_v7  ;;  %v9270_v7 = vld [vmem:[#allocation8 + $0x460] sm:$0xf0] }
 0x3fd   : > { %v5656_v0 = vadd.f32 %v5655_v52, %v5627_v18  ;;  %v8440_v18 = vor.u32 %v9321_v41, %v8439_v58  ;;  %6074 = vmatpush.bf16.msra.mxu0 %v8152_v44  ;;  %v11260_v58 = vld [vmem:[#allocation51_spill] sm:$0xff]  ;;  %v8236_v41 = vor.u32 %v9270_v7, %v8235_v20  ;;  %v9240_v20 = vld [vmem:[#allocation8 + $0x370] sm:$0xf0]  ;;  %v8403_v7 = vld [vmem:[#allocation8 + $0x5a8] sm:$0xf] }
 0x3fe   : > { %v11262_v44 = vld [vmem:[#allocation59_spill] sm:$0xff] }
 0x3ff   : > { %6161 = vmatpush.bf16.msra.mxu3 %v8440_v18  ;;  %v11263_v18 = vld [vmem:[#allocation63_spill] sm:$0xff] }
 0x400   : > { %6103 = vmatpush.bf16.msra.mxu1 %v8248_v8  ;;  %6133 = vmatpush.bf16.msra.mxu2 %v8332_v39 }
 0x401   : > { %v5684_v37 = vpop.f32.mrf.mxu2  ;;  %v5713_v28 = vpop.f32.mrf.mxu3 }
 0x402   : > { %v5685_v32 = vadd.f32 %v5684_v37, %v5656_v0  ;;  %v5629_v54 = vpop.f32.mrf.mxu0  ;;  %v5658_v55 = vpop.f32.mrf.mxu1  ;;  %v9246_v37 = vld [vmem:[#allocation8 + $0x3a0] sm:$0xf0] }
 0x403   : > { %v5630_v11 = vadd.f32 %v5629_v54, %v10785_v21 }
 0x404   : > { %v10807_v47 = vadd.f32 %v5713_v28, %v5685_v32  ;;  %5860 = vmatmul.bf16.gmra.mxu0 %v10395_v6  ;;  %v8140_v32 = vor.u32 %v9246_v37, %v8139_v16  ;;  %v8428_v28 = vor.u32 %v9318_v24, %v8427_v5  ;;  %6104 = vmatpush.bf16.msra.mxu1 %v8236_v41  ;;  %v8523_v6 = vld [vmem:[#allocation8 + $0x698] sm:$0xf] }
 0x405   : > { %v5659_v19 = vadd.f32 %v5658_v55, %v5630_v11  ;;  %5889 = vmatmul.bf16.gmra.mxu1 %v10456_v38  ;;  %v8715_v38 = vld [vmem:[#allocation8 + $0x818] sm:$0xf]  ;;  %v8524_v10 = vor.u32 %v9342_v31, %v8523_v6  ;;  %v9366_v31 = vld [vmem:[#allocation8 + $0x760] sm:$0xf0] }
 0x406   : > { %5918 = vmatmul.bf16.gmra.mxu2 %v10529_v50  ;;  %5947 = vmatmul.bf16.gmra.mxu3 %v11259_v60  ;;  %v9417_v60 = vld [vmem:[#allocation8 + $0x8f8] sm:$0xf0]  ;;  %v11278_v6 = vld [vmem:[#allocation30_spill] sm:$0xff] }
 0x407   : > { %6075 = vmatpush.bf16.msra.mxu0 %v8140_v32  ;;  %6162 = vmatpush.bf16.msra.mxu3 %v8428_v28  ;;  %v8223_v32 = vld [vmem:[#allocation8 + $0x440] sm:$0xf]  ;;  %v9267_v28 = vld [vmem:[#allocation8 + $0x448] sm:$0xf0] }
 0x409   : > { %v5687_v25 = vpop.f32.mrf.mxu2  ;;  %v5716_v59 = vpop.f32.mrf.mxu3 }
 0x40a   : > { %v5688_v52 = vadd.f32 %v5687_v25, %v5659_v19  ;;  %v5631_v42 = vpop.f32.mrf.mxu0  ;;  %v5660_v2 = vpop.f32.mrf.mxu1  ;;  %v11261_v25 = vld [vmem:[#allocation55_spill] sm:$0xff] }
 0x40b   : > { %v5632_v0 = vadd.f32 %v5631_v42, %v10785_v21  ;;  %v8127_v42 = vld [vmem:[#allocation8 + $0x380] sm:$0xf]  ;;  %6163 = vmatpush.bf16.msra.mxu3 %v8416_v26 }
 0x40c   : > { %v10814_v35 = vadd.f32 %v5716_v59, %v5688_v52  ;;  %v8319_v52 = vld [vmem:[#allocation8 + $0x500] sm:$0xf]  ;;  %v9291_v59 = vld [vmem:[#allocation8 + $0x508] sm:$0xf0] }
 0x40d   : > { %v5661_v33 = vadd.f32 %v5660_v2, %v5632_v0  ;;  %v8320_v0 = vor.u32 %v9291_v59, %v8319_v52  ;;  %v9243_v2 = vld [vmem:[#allocation8 + $0x388] sm:$0xf0] }
 0x40e   : > { %v8128_v8 = vor.u32 %v9243_v2, %v8127_v42 }
 0x40f   : > { %6134 = vmatpush.bf16.msra.mxu2 %v8320_v0 }
 0x410   : > { %6076 = vmatpush.bf16.msra.mxu0 %v8128_v8  ;;  %v11264_v8 = vld [vmem:[#allocation16_spill] sm:$0xff] }
 0x411   : > { %v5689_v54 = vpop.f32.mrf.mxu2  ;;  %v5718_v11 = vpop.f32.mrf.mxu3 }
 0x412   : > { %v5690_v34 = vadd.f32 %v5689_v54, %v5661_v33  ;;  %v5634_v55 = vpop.f32.mrf.mxu0  ;;  %v5663_v9 = vpop.f32.mrf.mxu1 }
 0x413   : > { %v5635_v19 = vadd.f32 %v5634_v55, %v10785_v21  ;;  %v9288_v55 = vld [vmem:[#allocation8 + $0x4f0] sm:$0xf0] }
 0x414   : > { %v10817_v3 = vadd.f32 %v5718_v11, %v5690_v34  ;;  %5865 = vmatmul.bf16.gmra.mxu0 %v11260_v58  ;;  %v8224_v34 = vor.u32 %v9267_v28, %v8223_v32  ;;  %v8307_v11 = vld [vmem:[#allocation8 + $0x4e8] sm:$0xf]  ;;  %v8103_v32 = vld [vmem:[#allocation8 + $0x350] sm:$0xf] }
 0x415   : > { %v5664_v53 = vadd.f32 %v5663_v9, %v5635_v19  ;;  %5894 = vmatmul.bf16.gmra.mxu1 %v11261_v25  ;;  %v8115_v19 = vld [vmem:[#allocation8 + $0x368] sm:$0xf]  ;;  %v8308_v9 = vor.u32 %v9288_v55, %v8307_v11  ;;  %v9309_v11 = vld [vmem:[#allocation8 + $0x598] sm:$0xf0] }
 0x416   : > { %5923 = vmatmul.bf16.gmra.mxu2 %v11262_v44  ;;  %5952 = vmatmul.bf16.gmra.mxu3 %v11263_v18  ;;  %v8116_v41 = vor.u32 %v9240_v20, %v8115_v19  ;;  %v9228_v44 = vld [vmem:[#allocation8 + $0x310] sm:$0xf0]  ;;  %v8355_v25 = vld [vmem:[#allocation8 + $0x548] sm:$0xf] }
 0x417   : > { %6105 = vmatpush.bf16.msra.mxu1 %v8224_v34  ;;  %6135 = vmatpush.bf16.msra.mxu2 %v8308_v9  ;;  %v8391_v34 = vld [vmem:[#allocation8 + $0x590] sm:$0xf] }
 0x418   : > { %6077 = vmatpush.bf16.msra.mxu0 %v8116_v41  ;;  %v8392_v9 = vor.u32 %v9309_v11, %v8391_v34  ;;  %v8199_v41 = vld [vmem:[#allocation8 + $0x410] sm:$0xf]  ;;  %v9258_v34 = vld [vmem:[#allocation8 + $0x400] sm:$0xf0] }
 0x419   : > { %v5692_v33 = vpop.f32.mrf.mxu2  ;;  %v5721_v16 = vpop.f32.mrf.mxu3  ;;  %v11268_v11 = vld [vmem:[#allocation17_spill] sm:$0xff] }
 0x41a   : > { %v5693_v15 = vadd.f32 %v5692_v33, %v5664_v53  ;;  %v5636_v39 = vpop.f32.mrf.mxu0  ;;  %v5665_v5 = vpop.f32.mrf.mxu1  ;;  %v9312_v53 = vld [vmem:[#allocation8 + $0x5b0] sm:$0xf0] }
 0x41b   : > { %v5637_v37 = vadd.f32 %v5636_v39, %v10785_v21  ;;  %v8404_v52 = vor.u32 %v9312_v53, %v8403_v7  ;;  %v9264_v33 = vld [vmem:[#allocation8 + $0x430] sm:$0xf0]  ;;  %v11267_v39 = vld [vmem:[#allocation25_spill] sm:$0xff] }
 0x41c   : > { %v10824_v24 = vadd.f32 %v5721_v16, %v5693_v15  ;;  %v8212_v26 = vor.u32 %v9264_v33, %v8211_v23  ;;  %v11265_v15 = vld [vmem:[#allocation20_spill] sm:$0xff]  ;;  %v8091_v23 = vld [vmem:[#allocation8 + $0x338] sm:$0xf] }
 0x41d   : > { %v5666_v54 = vadd.f32 %v5665_v5, %v5637_v37  ;;  %6164 = vmatpush.bf16.msra.mxu3 %v8404_v52  ;;  %v11266_v16 = vld [vmem:[#allocation24_spill] sm:$0xff]  ;;  %v8295_v37 = vld [vmem:[#allocation8 + $0x4d0] sm:$0xf]  ;;  %v9285_v5 = vld [vmem:[#allocation8 + $0x4d8] sm:$0xf0] }
 0x41e   : > { %6106 = vmatpush.bf16.msra.mxu1 %v8212_v26  ;;  %v8296_v28 = vor.u32 %v9285_v5, %v8295_v37  ;;  %v9261_v52 = vld [vmem:[#allocation8 + $0x418] sm:$0xf0]  ;;  %v8379_v26 = vld [vmem:[#allocation8 + $0x578] sm:$0xf] }
 0x420   : > { %6136 = vmatpush.bf16.msra.mxu2 %v8296_v28 }
 0x421   : > { %v5694_v21 = vpop.f32.mrf.mxu2  ;;  %v5723_v42 = vpop.f32.mrf.mxu3  ;;  %6165 = vmatpush.bf16.msra.mxu3 %v8392_v9  ;;  %v11269_v9 = vld [vmem:[#allocation21_spill] sm:$0xff] }
 0x422   : > { %v5695_v59 = vadd.f32 %v5694_v21, %v5666_v54  ;;  %v10826_v0 = vpop.f32.mrf.mxu0  ;;  %v10828_v2 = vpop.f32.mrf.mxu1  ;;  %v9237_v54 = vld [vmem:[#allocation8 + $0x358] sm:$0xf0]  ;;  %v8200_v21 = vor.u32 %v9261_v52, %v8199_v41  ;;  %v11270_v41 = vld [vmem:[#allocation26_spill] sm:$0xff] }
 0x423   : > { %v8104_v19 = vor.u32 %v9237_v54, %v8103_v32  ;;  %v8187_v54 = vld [vmem:[#allocation8 + $0x3f8] sm:$0xf]  ;;  %v11271_v52 = vld [vmem:[#allocation27_spill] sm:$0xff] }
 0x424   : > { %v10830_v56 = vadd.f32 %v5723_v42, %v5695_v59  ;;  %5966 = vmatmul.bf16.vlgmr.msrb.gmra.mxu0 %v11264_v8  ;;  %v8283_v59 = vld [vmem:[#allocation8 + $0x4b8] sm:$0xf]  ;;  %v9282_v42 = vld [vmem:[#allocation8 + $0x4c0] sm:$0xf0]  ;;  %6107 = vmatpush.bf16.msra.mxu1 %v8200_v21  ;;  %v8271_v21 = vld [vmem:[#allocation8 + $0x4a0] sm:$0xf] }
 0x425   : > { %5995 = vmatmul.bf16.vlgmr.msrb.gmra.mxu1 %v11265_v15  ;;  %6078 = vmatpush.bf16.msra.mxu0 %v8104_v19  ;;  %v8284_v33 = vor.u32 %v9282_v42, %v8283_v59  ;;  %v9234_v8 = vld [vmem:[#allocation8 + $0x340] sm:$0xf0]  ;;  %v8188_v19 = vor.u32 %v9258_v34, %v8187_v54  ;;  %v9279_v59 = vld [vmem:[#allocation8 + $0x4a8] sm:$0xf0]  ;;  %v8079_v42 = vld [vmem:[#allocation8 + $0x320] sm:$0xf] }
 0x426   : > { %6024 = vmatmul.bf16.vlgmr.msrb.gmra.mxu2 %v11266_v16  ;;  %6053 = vmatmul.bf16.vlgmr.msrb.gmra.mxu3 %v11267_v39  ;;  %v9306_v15 = vld [vmem:[#allocation8 + $0x580] sm:$0xf0]  ;;  %v8092_v16 = vor.u32 %v9234_v8, %v8091_v23  ;;  %v8272_v23 = vor.u32 %v9279_v59, %v8271_v21  ;;  %v8367_v8 = vld [vmem:[#allocation8 + $0x560] sm:$0xf]  ;;  %v9276_v21 = vld [vmem:[#allocation8 + $0x490] sm:$0xf0] }
 0x427   : > { %v8380_v39 = vor.u32 %v9306_v15, %v8379_v26  ;;  %6137 = vmatpush.bf16.msra.mxu2 %v8284_v33  ;;  %v9231_v33 = vld [vmem:[#allocation8 + $0x328] sm:$0xf0]  ;;  %v8067_v59 = vld [vmem:[#allocation8 + $0x308] sm:$0xf] }
 0x428   : > { %6108 = vmatpush.bf16.msra.mxu1 %v8188_v19  ;;  %v9303_v26 = vld [vmem:[#allocation8 + $0x568] sm:$0xf0]  ;;  %v8175_v19 = vld [vmem:[#allocation8 + $0x3e0] sm:$0xf] }
 0x429   : > { %v10836_v55 = vpop.f32.mrf.mxu2  ;;  %v10838_v20 = vpop.f32.mrf.mxu3  ;;  %6079 = vmatpush.bf16.msra.mxu0 %v8092_v16  ;;  %6166 = vmatpush.bf16.msra.mxu3 %v8380_v39  ;;  %v8080_v16 = vor.u32 %v9231_v33, %v8079_v42  ;;  %v8368_v39 = vor.u32 %v9303_v26, %v8367_v8  ;;  %v9300_v42 = vld [vmem:[#allocation8 + $0x550] sm:$0xf0]  ;;  %v8068_v33 = vor.u32 %v9228_v44, %v8067_v59  ;;  %v11275_v44 = vld [vmem:[#allocation29_spill] sm:$0xff] }
 0x42a   : > { %v10840_v7 = vpop.f32.mrf.mxu0  ;;  %v10842_v53 = vpop.f32.mrf.mxu1  ;;  %v8356_v8 = vor.u32 %v9300_v42, %v8355_v25  ;;  %v11274_v25 = vld [vmem:[#allocation28_spill] sm:$0xff]  ;;  %v8535_v59 = vld [vmem:[#allocation8 + $0x6b0] sm:$0xf] }
 0x42b   : > { %6138 = vmatpush.bf16.msra.mxu2 %v8272_v23  ;;  %v8163_v23 = vld [vmem:[#allocation8 + $0x3c8] sm:$0xf] }
 0x42d   : > { %6080 = vmatpush.bf16.msra.mxu0 %v8080_v16  ;;  %6167 = vmatpush.bf16.msra.mxu3 %v8368_v39  ;;  %v9252_v16 = vld [vmem:[#allocation8 + $0x3d0] sm:$0xf0] }
 0x431   : > { %v10844_v37 = vpop.f32.mrf.mxu2  ;;  %v10846_v5 = vpop.f32.mrf.mxu3  ;;  %6081 = vmatpush.bf16.msra.mxu0 %v8068_v33  ;;  %6168 = vmatpush.bf16.msra.mxu3 %v8356_v8  ;;  %v9345_v33 = vld [vmem:[#allocation8 + $0x6b8] sm:$0xf0]  ;;  %v8823_v8 = vld [vmem:[#allocation8 + $0x8f0] sm:$0xf] }
 0x432   : > { %v10848_v32 = vpop.f32.mrf.mxu0  ;;  %v10850_v28 = vpop.f32.mrf.mxu1 }
 0x434   : > { %5971 = vmatmul.bf16.gmra.mxu0 %v11268_v11 }
 0x435   : > { %6000 = vmatmul.bf16.gmra.mxu1 %v11269_v9  ;;  %v9255_v9 = vld [vmem:[#allocation8 + $0x3e8] sm:$0xf0] }
 0x436   : > { %6029 = vmatmul.bf16.gmra.mxu2 %v11270_v41  ;;  %6058 = vmatmul.bf16.gmra.mxu3 %v11271_v52  ;;  %v8176_v41 = vor.u32 %v9255_v9, %v8175_v19  ;;  %v8259_v52 = vld [vmem:[#allocation8 + $0x488] sm:$0xf]  ;;  %v8164_v9 = vor.u32 %v9252_v16, %v8163_v23  ;;  %v8536_v23 = vor.u32 %v9345_v33, %v8535_v59  ;;  %v8811_v59 = vld [vmem:[#allocation8 + $0x8d8] sm:$0xf] }
 0x437   : > { %v8260_v18 = vor.u32 %v9276_v21, %v8259_v52  ;;  %v11272_v52 = vld [vmem:[#allocation18_spill] sm:$0xff]  ;;  %v9393_v21 = vld [vmem:[#allocation8 + $0x838] sm:$0xf0]  ;;  %v8824_v16 = vor.u32 %v9417_v60, %v8823_v8  ;;  %v9414_v60 = vld [vmem:[#allocation8 + $0x8e0] sm:$0xf0] }
 0x438   : > { %6109 = vmatpush.bf16.msra.mxu1 %v8176_v41  ;;  %v11273_v41 = vld [vmem:[#allocation22_spill] sm:$0xff]  ;;  %6190 = vmatpush.bf16.msrb.mxu0 %v8536_v23  ;;  %v8812_v8 = vor.u32 %v9414_v60, %v8811_v59  ;;  %v9387_v59 = vld [vmem:[#allocation8 + $0x808] sm:$0xf0]  ;;  %v8511_v60 = vld [vmem:[#allocation8 + $0x680] sm:$0xf] }
 0x439   : > { %v10856_v15 = vpop.f32.mrf.mxu2  ;;  %v10858_v11 = vpop.f32.mrf.mxu3  ;;  %6139 = vmatpush.bf16.msra.mxu2 %v8260_v18  ;;  %v8727_v18 = vld [vmem:[#allocation8 + $0x830] sm:$0xf]  ;;  %6277 = vmatpush.bf16.msrb.mxu3 %v8824_v16  ;;  %v11276_v16 = vld [vmem:[#allocation19_spill] sm:$0xff] }
 0x43a   : > { %v10860_v54 = vpop.f32.mrf.mxu0  ;;  %v10862_v34 = vpop.f32.mrf.mxu1  ;;  %v8728_v42 = vor.u32 %v9393_v21, %v8727_v18  ;;  %v9390_v21 = vld [vmem:[#allocation8 + $0x820] sm:$0xf0] }
 0x43b   : > { %v8716_v30 = vor.u32 %v9390_v21, %v8715_v38  ;;  %v8619_v38 = vld [vmem:[#allocation8 + $0x758] sm:$0xf]  ;;  %v8703_v21 = vld [vmem:[#allocation8 + $0x800] sm:$0xf] }
 0x43c   : > { %6110 = vmatpush.bf16.msra.mxu1 %v8164_v9  ;;  %6191 = vmatpush.bf16.msrb.mxu0 %v8524_v10  ;;  %v5736_v10 = vadd.f32 %v10826_v0, %v10794_v29 }
 0x43d   : > { %6248 = vmatpush.bf16.msrb.mxu2 %v8728_v42  ;;  %6278 = vmatpush.bf16.msrb.mxu3 %v8812_v8  ;;  %v8799_v8 = vld [vmem:[#allocation8 + $0x8c0] sm:$0xf] }
 0x43e   : > { %v5765_v29 = vadd.f32 %v10828_v2, %v5736_v10  ;;  %v8788_v2 = vor.u32 %v9408_v1, %v8787_v62  ;;  %v8595_v1 = vld [vmem:[#allocation8 + $0x728] sm:$0xf]  ;;  %v9360_v62 = vld [vmem:[#allocation8 + $0x730] sm:$0xf0] }
 0x440   : > { %v5794_v0 = vadd.f32 %v10836_v55, %v5765_v29 }
 0x441   : > { %v10864_v26 = vpop.f32.mrf.mxu2  ;;  %v10866_v39 = vpop.f32.mrf.mxu3  ;;  %6249 = vmatpush.bf16.msrb.mxu2 %v8716_v30  ;;  %v8704_v30 = vor.u32 %v9387_v59, %v8703_v21  ;;  %v8691_v21 = vld [vmem:[#allocation8 + $0x7e8] sm:$0xf] }
 0x442   : > { %v10868_v19 = vpop.f32.mrf.mxu0  ;;  %v10870_v58 = vpop.f32.mrf.mxu1  ;;  %v5823_v55 = vadd.f32 %v10838_v20, %v5794_v0  ;;  %v11282_v20 = vld [vmem:[#allocation41_spill] sm:$0xff]  ;;  %v8596_v0 = vor.u32 %v9360_v62, %v8595_v1 }
 0x443   : > { %v8583_v62 = vld [vmem:[#allocation8 + $0x710] sm:$0xf] }
 0x444   : > { %5976 = vmatmul.bf16.gmra.mxu0 %v11272_v52 }
 0x445   : > { %6005 = vmatmul.bf16.gmra.mxu1 %v11273_v41  ;;  %6250 = vmatpush.bf16.msrb.mxu2 %v8704_v30 }
 0x446   : > { %6034 = vmatmul.bf16.gmra.mxu2 %v11274_v25  ;;  %6063 = vmatmul.bf16.gmra.mxu3 %v11275_v44  ;;  %v8631_v25 = vld [vmem:[#allocation8 + $0x770] sm:$0xf]  ;;  %v9369_v44 = vld [vmem:[#allocation8 + $0x778] sm:$0xf0] }
 0x447   : > { %v8632_v18 = vor.u32 %v9369_v44, %v8631_v25  ;;  %v11277_v25 = vld [vmem:[#allocation23_spill] sm:$0xff] }
 0x448   : > { %v11279_v44 = vld [vmem:[#allocation31_spill] sm:$0xff] }
 0x449   : > { %v10876_v50 = vpop.f32.mrf.mxu2  ;;  %v10878_v9 = vpop.f32.mrf.mxu3  ;;  %6219 = vmatpush.bf16.msrb.mxu1 %v8632_v18  ;;  %v8620_v18 = vor.u32 %v9366_v31, %v8619_v38  ;;  %v8607_v31 = vld [vmem:[#allocation8 + $0x740] sm:$0xf] }
 0x44a   : > { %v10880_v52 = vpop.f32.mrf.mxu0  ;;  %v10882_v41 = vpop.f32.mrf.mxu1 }
 0x44d   : > { %6220 = vmatpush.bf16.msrb.mxu1 %v8620_v18  ;;  %v9384_v18 = vld [vmem:[#allocation8 + $0x7f0] sm:$0xf0] }
 0x451   : > { %v10884_v33 = vpop.f32.mrf.mxu2  ;;  %v10886_v42 = vpop.f32.mrf.mxu3 }
 0x452   : > { %v10888_v48 = vpop.f32.mrf.mxu0  ;;  %v10890_v23 = vpop.f32.mrf.mxu1 }
 0x454   : > { %5981 = vmatmul.bf16.gmra.mxu0 %v11276_v16 }
 0x455   : > { %6010 = vmatmul.bf16.gmra.mxu1 %v11277_v25  ;;  %v8512_v25 = vor.u32 %v9339_v45, %v8511_v60  ;;  %v8499_v45 = vld [vmem:[#allocation8 + $0x668] sm:$0xf]  ;;  %v5738_v60 = vadd.f32 %v10840_v7, %v10797_v57 }
 0x456   : > { %6039 = vmatmul.bf16.gmra.mxu2 %v11278_v6  ;;  %6068 = vmatmul.bf16.gmra.mxu3 %v11279_v44  ;;  %v8800_v6 = vor.u32 %v9411_v46, %v8799_v8  ;;  %v9363_v44 = vld [vmem:[#allocation8 + $0x748] sm:$0xf0]  ;;  %v9336_v46 = vld [vmem:[#allocation8 + $0x670] sm:$0xf0]  ;;  %v8692_v8 = vor.u32 %v9384_v18, %v8691_v21  ;;  %v11281_v21 = vld [vmem:[#allocation40_spill] sm:$0xff] }
 0x457   : > { %6192 = vmatpush.bf16.msrb.mxu0 %v8512_v25  ;;  %v8608_v59 = vor.u32 %v9363_v44, %v8607_v31  ;;  %v8500_v30 = vor.u32 %v9336_v46, %v8499_v45  ;;  %v5767_v31 = vadd.f32 %v10842_v53, %v5738_v60  ;;  %v11280_v44 = vld [vmem:[#allocation36_spill] sm:$0xff]  ;;  %v9381_v18 = vld [vmem:[#allocation8 + $0x7d8] sm:$0xf0]  ;;  %v8487_v45 = vld [vmem:[#allocation8 + $0x650] sm:$0xf]  ;;  %v5741_v53 = vadd.f32 %v10848_v32, %v10804_v51 }
 0x458   : > { %6279 = vmatpush.bf16.msrb.mxu3 %v8800_v6  ;;  %6251 = vmatpush.bf16.msrb.mxu2 %v8692_v8  ;;  %v8775_v8 = vld [vmem:[#allocation8 + $0x890] sm:$0xf] }
 0x459   : > { %v10898_v16 = vpop.f32.mrf.mxu2  ;;  %v10900_v61 = vpop.f32.mrf.mxu3  ;;  %6221 = vmatpush.bf16.msrb.mxu1 %v8608_v59  ;;  %v5796_v7 = vadd.f32 %v10844_v37, %v5767_v31  ;;  %v8679_v59 = vld [vmem:[#allocation8 + $0x7d0] sm:$0xf]  ;;  %v9405_v37 = vld [vmem:[#allocation8 + $0x898] sm:$0xf0]  ;;  %v5770_v51 = vadd.f32 %v10850_v28, %v5741_v53 }
 0x45a   : > { %v10902_v36 = vpop.f32.mrf.mxu0  ;;  %v10904_v38 = vpop.f32.mrf.mxu1  ;;  %v8680_v60 = vor.u32 %v9381_v18, %v8679_v59  ;;  %v8667_v59 = vld [vmem:[#allocation8 + $0x7b8] sm:$0xf]  ;;  %v9378_v18 = vld [vmem:[#allocation8 + $0x7c0] sm:$0xf0] }
 0x45b   : > { %6193 = vmatpush.bf16.msrb.mxu0 %v8500_v30 }
 0x45c   : > { %6280 = vmatpush.bf16.msrb.mxu3 %v8788_v2  ;;  %6252 = vmatpush.bf16.msrb.mxu2 %v8680_v60  ;;  %v9330_v60 = vld [vmem:[#allocation8 + $0x640] sm:$0xf0] }
 0x45d   : > { %6222 = vmatpush.bf16.msrb.mxu1 %v8596_v0 }
 0x461   : > { %v10910_v25 = vpop.f32.mrf.mxu2  ;;  %v10913_v10 = vpop.f32.mrf.mxu3 }
 0x462   : > { %v5851_v6 = vpop.f32.mrf.mxu0  ;;  %v5880_v29 = vpop.f32.mrf.mxu1 }
 0x463   : > { %v5852_v57 = vadd.f32 %v5851_v6, %v5823_v55  ;;  %v8776_v55 = vor.u32 %v9405_v37, %v8775_v8  ;;  %v5825_v6 = vadd.f32 %v10846_v5, %v5796_v7  ;;  %v8475_v5 = vld [vmem:[#allocation8 + $0x638] sm:$0xf]  ;;  %v5743_v7 = vadd.f32 %v10860_v54, %v10807_v47  ;;  %v9402_v8 = vld [vmem:[#allocation8 + $0x880] sm:$0xf0] }
 0x464   : > { %6082 = vmatmul.bf16.vlgmr.msra.gmra.mxu0 %v11243_v14  ;;  %v9333_v14 = vld [vmem:[#allocation8 + $0x658] sm:$0xf0]  ;;  %v8476_v53 = vor.u32 %v9330_v60, %v8475_v5  ;;  %v9351_v60 = vld [vmem:[#allocation8 + $0x6e8] sm:$0xf0] }
 0x465   : > { %6111 = vmatmul.bf16.vlgmr.msra.gmra.mxu1 %v11280_v44  ;;  %v5881_v46 = vadd.f32 %v5880_v29, %v5852_v57  ;;  %v8488_v2 = vor.u32 %v9333_v14, %v8487_v45  ;;  %6281 = vmatpush.bf16.msrb.mxu3 %v8776_v55  ;;  %v5799_v57 = vadd.f32 %v10856_v15, %v5770_v51  ;;  %v8763_v14 = vld [vmem:[#allocation8 + $0x878] sm:$0xf]  ;;  %v8655_v51 = vld [vmem:[#allocation8 + $0x7a0] sm:$0xf] }
 0x466   : > { %6140 = vmatmul.bf16.vlgmr.msra.gmra.mxu2 %v11281_v21  ;;  %6169 = vmatmul.bf16.vlgmr.msra.gmra.mxu3 %v11282_v20  ;;  %v9357_v20 = vld [vmem:[#allocation8 + $0x718] sm:$0xf0]  ;;  %v8764_v15 = vor.u32 %v9402_v8, %v8763_v14  ;;  %v5772_v47 = vadd.f32 %v10862_v34, %v5743_v7  ;;  %v5746_v34 = vadd.f32 %v10868_v19, %v10814_v35 }
 0x467   : > { %6194 = vmatpush.bf16.msrb.mxu0 %v8488_v2  ;;  %v8584_v0 = vor.u32 %v9357_v20, %v8583_v62  ;;  %v5828_v37 = vadd.f32 %v10858_v11, %v5799_v57  ;;  %v8571_v11 = vld [vmem:[#allocation8 + $0x6f8] sm:$0xf]  ;;  %v9327_v62 = vld [vmem:[#allocation8 + $0x628] sm:$0xf0] }
 0x468   : > { %v9399_v20 = vld [vmem:[#allocation8 + $0x868] sm:$0xf0]  ;;  %v5775_v35 = vadd.f32 %v10870_v58, %v5746_v34 }
 0x469   : > { %v5909_v30 = vpop.f32.mrf.mxu2  ;;  %v5938_v44 = vpop.f32.mrf.mxu3  ;;  %6223 = vmatpush.bf16.msrb.mxu1 %v8584_v0  ;;  %6282 = vmatpush.bf16.msrb.mxu3 %v8764_v15  ;;  %v8451_v15 = vld [vmem:[#allocation8 + $0x608] sm:$0xf] }
 0x46a   : > { %v5910_v31 = vadd.f32 %v5909_v30, %v5881_v46  ;;  %v5853_v21 = vpop.f32.mrf.mxu0  ;;  %v5882_v1 = vpop.f32.mrf.mxu1  ;;  %v8668_v46 = vor.u32 %v9378_v18, %v8667_v59  ;;  %v5804_v14 = vadd.f32 %v10876_v50, %v5775_v35  ;;  %v9348_v50 = vld [vmem:[#allocation8 + $0x6d0] sm:$0xf0] }
 0x46b   : > { %v5854_v29 = vadd.f32 %v5853_v21, %v5825_v6  ;;  %6195 = vmatpush.bf16.msrb.mxu0 %v8476_v53  ;;  %v9354_v21 = vld [vmem:[#allocation8 + $0x700] sm:$0xf0]  ;;  %v9372_v53 = vld [vmem:[#allocation8 + $0x790] sm:$0xf0] }
 0x46c   : > { %v5939_v32 = vadd.f32 %v5938_v44, %v5910_v31  ;;  %6253 = vmatpush.bf16.msrb.mxu2 %v8668_v46  ;;  %v5801_v44 = vadd.f32 %v10864_v26, %v5772_v47  ;;  %v8751_v26 = vld [vmem:[#allocation8 + $0x860] sm:$0xf] }
 0x46d   : > { %v5883_v45 = vadd.f32 %v5882_v1, %v5854_v29  ;;  %v8572_v1 = vor.u32 %v9354_v21, %v8571_v11  ;;  %v8463_v29 = vld [vmem:[#allocation8 + $0x620] sm:$0xf] }
 0x46e   : > { %6307 = vst [vmem:[%s10738_s29 + $0x8] sm:$0xff] %v5939_v32  ;;  %v9375_v32 = vld [vmem:[#allocation8 + $0x7a8] sm:$0xf0]  ;;  %v5830_v59 = vadd.f32 %v10866_v39, %v5801_v44  ;;  %v8559_v46 = vld [vmem:[#allocation8 + $0x6e0] sm:$0xf]  ;;  %v5833_v44 = vadd.f32 %v10878_v9, %v5804_v14  ;;  %v5751_v9 = vadd.f32 %v10888_v48, %v10824_v24 }
 0x46f   : > { %6224 = vmatpush.bf16.msrb.mxu1 %v8572_v1  ;;  %v8560_v8 = vor.u32 %v9351_v60, %v8559_v46 }
 0x471   : > { %v5911_v28 = vpop.f32.mrf.mxu2  ;;  %v5940_v2 = vpop.f32.mrf.mxu3 }
 0x472   : > { %v5912_v30 = vadd.f32 %v5911_v28, %v5883_v45  ;;  %v5856_v55 = vpop.f32.mrf.mxu0  ;;  %v5885_v6 = vpop.f32.mrf.mxu1  ;;  %v8643_v28 = vld [vmem:[#allocation8 + $0x788] sm:$0xf] }
 0x473   : > { %v5857_v31 = vadd.f32 %v5856_v55, %v5828_v37  ;;  %v8644_v39 = vor.u32 %v9372_v53, %v8643_v28  ;;  %v9324_v37 = vld [vmem:[#allocation8 + $0x610] sm:$0xf0]  ;;  %6225 = vmatpush.bf16.msrb.mxu1 %v8560_v8 }
 0x474   : > { %v5941_v54 = vadd.f32 %v5940_v2, %v5912_v30  ;;  %6087 = vmatmul.bf16.gmra.mxu0 %v11247_v63  ;;  %v8656_v63 = vor.u32 %v9375_v32, %v8655_v51  ;;  %v8739_v30 = vld [vmem:[#allocation8 + $0x848] sm:$0xf]  ;;  %v5748_v2 = vadd.f32 %v10880_v52, %v10817_v3  ;;  %v8452_v58 = vor.u32 %v9324_v37, %v8451_v15 }
 0x475   : > { %6116 = vmatmul.bf16.gmra.mxu1 %v11248_v17  ;;  %v5886_v57 = vadd.f32 %v5885_v6, %v5857_v31  ;;  %v8464_v17 = vor.u32 %v9327_v62, %v8463_v29  ;;  %v9396_v6 = vld [vmem:[#allocation8 + $0x850] sm:$0xf0]  ;;  %v8547_v31 = vld [vmem:[#allocation8 + $0x6c8] sm:$0xf] }
 0x476   : > { %6310 = vst [vmem:[%s10738_s29 + $0x20] sm:$0xff] %v5941_v54  ;;  %6145 = vmatmul.bf16.gmra.mxu2 %v11249_v43  ;;  %6174 = vmatmul.bf16.gmra.mxu3 %v11250_v27  ;;  %v8752_v43 = vor.u32 %v9399_v20, %v8751_v26  ;;  %v8740_v54 = vor.u32 %v9396_v6, %v8739_v30  ;;  %v11288_v6 = vld [vmem:[#allocation60_spill] sm:$0xff] }
 0x477   : > { %6254 = vmatpush.bf16.msrb.mxu2 %v8656_v63  ;;  %6196 = vmatpush.bf16.msrb.mxu0 %v8464_v17  ;;  %v8548_v51 = vor.u32 %v9348_v50, %v8547_v31  ;;  %v5777_v3 = vadd.f32 %v10882_v41, %v5748_v2  ;;  %v11285_v2 = vld [vmem:[#allocation48_spill] sm:$0xff] }
 0x478   : > { %6283 = vmatpush.bf16.msrb.mxu3 %v8752_v43 }
 0x479   : > { %v5914_v0 = vpop.f32.mrf.mxu2  ;;  %v5943_v18 = vpop.f32.mrf.mxu3  ;;  %6226 = vmatpush.bf16.msrb.mxu1 %v8548_v51  ;;  %v5806_v34 = vadd.f32 %v10884_v33, %v5777_v3  ;;  %v5780_v33 = vadd.f32 %v10890_v23, %v5751_v9 }
 0x47a   : > { %v5915_v27 = vadd.f32 %v5914_v0, %v5886_v57  ;;  %v5858_v5 = vpop.f32.mrf.mxu0  ;;  %v5887_v7 = vpop.f32.mrf.mxu1 }
 0x47b   : > { %v5859_v45 = vadd.f32 %v5858_v5, %v5830_v59  ;;  %6255 = vmatpush.bf16.msrb.mxu2 %v8644_v39  ;;  %6197 = vmatpush.bf16.msrb.mxu0 %v8452_v58  ;;  %v5835_v63 = vadd.f32 %v10886_v42, %v5806_v34  ;;  %v11287_v58 = vld [vmem:[#allocation56_spill] sm:$0xff] }
 0x47c   : > { %v5944_v19 = vadd.f32 %v5943_v18, %v5915_v27  ;;  %6284 = vmatpush.bf16.msrb.mxu3 %v8740_v54 }
 0x47d   : > { %v5888_v55 = vadd.f32 %v5887_v7, %v5859_v45 }
 0x47e   : > { %6313 = vst [vmem:[%s10738_s29 + $0x38] sm:$0xff] %v5944_v19 }
 0x481   : > { %v5916_v47 = vpop.f32.mrf.mxu2  ;;  %v5945_v21 = vpop.f32.mrf.mxu3 }
 0x482   : > { %v5917_v11 = vadd.f32 %v5916_v47, %v5888_v55  ;;  %v5861_v1 = vpop.f32.mrf.mxu0  ;;  %v5890_v32 = vpop.f32.mrf.mxu1  ;;  %v11286_v55 = vld [vmem:[#allocation52_spill] sm:$0xff] }
 0x483   : > { %v5862_v29 = vadd.f32 %v5861_v1, %v5833_v44 }
 0x484   : > { %v5946_v52 = vadd.f32 %v5945_v21, %v5917_v11  ;;  %6092 = vmatmul.bf16.gmra.mxu0 %v11251_v12 }
 0x485   : > { %6121 = vmatmul.bf16.gmra.mxu1 %v11252_v13  ;;  %v5891_v57 = vadd.f32 %v5890_v32, %v5862_v29  ;;  %v5809_v13 = vadd.f32 %v10898_v16, %v5780_v33 }
 0x486   : > { %6316 = vst [vmem:[%s10738_s29 + $0x50] sm:$0xff] %v5946_v52  ;;  %6150 = vmatmul.bf16.gmra.mxu2 %v11253_v4  ;;  %6179 = vmatmul.bf16.gmra.mxu3 %v11254_v49  ;;  %v5753_v4 = vadd.f32 %v10902_v36, %v10830_v56  ;;  %v11283_v36 = vld [vmem:[#allocation46_spill] sm:$0xff]  ;;  %v11284_v56 = vld [vmem:[#allocation47_spill] sm:$0xff] }
 0x487   : > { %v5838_v24 = vadd.f32 %v10900_v61, %v5809_v13 }
 0x488   : > { %v5782_v18 = vadd.f32 %v10904_v38, %v5753_v4 }
 0x489   : > { %v5919_v41 = vpop.f32.mrf.mxu2  ;;  %v5948_v26 = vpop.f32.mrf.mxu3 }
 0x48a   : > { %v5920_v62 = vadd.f32 %v5919_v41, %v5891_v57  ;;  %v5863_v12 = vpop.f32.mrf.mxu0  ;;  %v5892_v20 = vpop.f32.mrf.mxu1  ;;  %v5811_v16 = vadd.f32 %v10910_v25, %v5782_v18  ;;  %v9519_v25 = vld [vmem:[#allocation10] sm:$0x7]  ;;  %v11289_v41 = vld [vmem:[#allocation49_spill] sm:$0xff] }
 0x48b   : > { %v5864_v17 = vadd.f32 %v5863_v12, %v5835_v63  ;;  %v10971_v14 = vperm.slane %v9519_v25, 2  ;;  %v11290_v63 = vld [vmem:[#allocation53_spill] sm:$0xff] }
 0x48c   : > { %v5949_v0 = vadd.f32 %v5948_v26, %v5920_v62  ;;  %v5840_v35 = vadd.f32 %v10913_v10, %v5811_v16  ;;  %v11291_v62 = vld [vmem:[#allocation57_spill] sm:$0xff]  ;;  %v11294_v16 = vld [vmem:[#allocation54_spill] sm:$0xff] }
 0x48d   : > { %v5893_v48 = vadd.f32 %v5892_v20, %v5864_v17  ;;  %v11292_v26 = vld [vmem:[#allocation61_spill] sm:$0xff] }
 0x48e   : > { %6319 = vst [vmem:[%s10738_s29 + $0x68] sm:$0xff] %v5949_v0 }
 0x491   : > { %v5921_v49 = vpop.f32.mrf.mxu2  ;;  %v5950_v43 = vpop.f32.mrf.mxu3 }
 0x492   : > { %v5922_v42 = vadd.f32 %v5921_v49, %v5893_v48  ;;  %v5866_v59 = vpop.f32.mrf.mxu0  ;;  %v5895_v27 = vpop.f32.mrf.mxu1 }
 0x493   : > { %v5867_v5 = vadd.f32 %v5866_v59, %v5838_v24 }
 0x494   : > { %v5951_v23 = vadd.f32 %v5950_v43, %v5922_v42  ;;  %6097 = vmatmul.bf16.gmra.mxu0 %v11255_v40 }
 0x495   : > { %6126 = vmatmul.bf16.gmra.mxu1 %v11256_v22  ;;  %v5896_v61 = vadd.f32 %v5895_v27, %v5867_v5  ;;  %v11293_v5 = vld [vmem:[#allocation50_spill] sm:$0xff] }
 0x496   : > { %6322 = vst [vmem:[%s10738_s29 + $0x80] sm:$0xff] %v5951_v23  ;;  %6155 = vmatmul.bf16.gmra.mxu2 %v11283_v36  ;;  %6184 = vmatmul.bf16.gmra.mxu3 %v11284_v56  ;;  %v11295_v36 = vld [vmem:[#allocation58_spill] sm:$0xff] }
 0x497   : > { %v11296_v56 = vld [vmem:[#allocation62_spill] sm:$0xff] }
 0x499   : > { %v5924_v7 = vpop.f32.mrf.mxu2  ;;  %v5953_v38 = vpop.f32.mrf.mxu3 }
 0x49a   : > { %v5925_v19 = vadd.f32 %v5924_v7, %v5896_v61  ;;  %v5868_v45 = vpop.f32.mrf.mxu0  ;;  %v5897_v46 = vpop.f32.mrf.mxu1 }
 0x49b   : > { %v5869_v40 = vadd.f32 %v5868_v45, %v5840_v35 }
 0x49c   : > { %v5954_v60 = vadd.f32 %v5953_v38, %v5925_v19 }
 0x49d   : > { %v5898_v22 = vadd.f32 %v5897_v46, %v5869_v40 }
 0x49e   : > { %6325 = vst [vmem:[%s10738_s29 + $0x98] sm:$0xff] %v5954_v60 }
 0x4a1   : > { %v5926_v8 = vpop.f32.mrf.mxu2  ;;  %v5955_v53 = vpop.f32.mrf.mxu3 }
 0x4a2   : > { %v5927_v28 = vadd.f32 %v5926_v8, %v5898_v22  ;;  %v5967_v39 = vpop.f32.mrf.mxu0  ;;  %v5996_v37 = vpop.f32.mrf.mxu1 }
 0x4a3   : > { %v5968_v15 = vadd.f32 %v5967_v39, %v10971_v14 }
 0x4a4   : > { %v5956_v10 = vadd.f32 %v5955_v53, %v5927_v28  ;;  %6198 = vmatmul.bf16.vlgmr.msrb.gmra.mxu0 %v11285_v2  ;;  %v11300_v2 = vld [vmem:[#allocation63_spill] sm:$0xff] }
 0x4a5   : > { %v5997_v30 = vadd.f32 %v5996_v37, %v5968_v15  ;;  %6227 = vmatmul.bf16.vlgmr.msrb.gmra.mxu1 %v11286_v55  ;;  %v11297_v37 = vld [vmem:[#allocation51_spill] sm:$0xff] }
 0x4a6   : > { %6328 = vst [vmem:[%s10738_s29 + $0xb0] sm:$0xff] %v5956_v10  ;;  %6256 = vmatmul.bf16.vlgmr.msrb.gmra.mxu2 %v11287_v58  ;;  %6285 = vmatmul.bf16.vlgmr.msrb.gmra.mxu3 %v11288_v6  ;;  %v11298_v10 = vld [vmem:[#allocation55_spill] sm:$0xff] }
 0x4a9   : > { %v6025_v47 = vpop.f32.mrf.mxu2  ;;  %v6054_v31 = vpop.f32.mrf.mxu3 }
 0x4aa   : > { %v6026_v54 = vadd.f32 %v6025_v47, %v5997_v30  ;;  %v5969_v50 = vpop.f32.mrf.mxu0  ;;  %v5998_v11 = vpop.f32.mrf.mxu1  ;;  %v11299_v30 = vld [vmem:[#allocation59_spill] sm:$0xff] }
 0x4ab   : > { %v5970_v44 = vadd.f32 %v5969_v50, %v10971_v14 }
 0x4ac   : > { %v10980_v21 = vadd.f32 %v6054_v31, %v6026_v54 }
 0x4ad   : > { %v5999_v1 = vadd.f32 %v5998_v11, %v5970_v44 }
 0x4b1   : > { %v6027_v51 = vpop.f32.mrf.mxu2  ;;  %v6056_v3 = vpop.f32.mrf.mxu3 }
 0x4b2   : > { %v6028_v32 = vadd.f32 %v6027_v51, %v5999_v1  ;;  %v5972_v52 = vpop.f32.mrf.mxu0  ;;  %v6001_v34 = vpop.f32.mrf.mxu1 }
 0x4b3   : > { %v5973_v29 = vadd.f32 %v5972_v52, %v10971_v14 }
 0x4b4   : > { %v10983_v9 = vadd.f32 %v6056_v3, %v6028_v32  ;;  %6203 = vmatmul.bf16.gmra.mxu0 %v11289_v41 }
 0x4b5   : > { %v6002_v57 = vadd.f32 %v6001_v34, %v5973_v29  ;;  %6232 = vmatmul.bf16.gmra.mxu1 %v11290_v63 }
 0x4b6   : > { %6261 = vmatmul.bf16.gmra.mxu2 %v11291_v62  ;;  %6290 = vmatmul.bf16.gmra.mxu3 %v11292_v26 }
 0x4b9   : > { %v6030_v12 = vpop.f32.mrf.mxu2  ;;  %v6059_v33 = vpop.f32.mrf.mxu3 }
 0x4ba   : > { %v6031_v20 = vadd.f32 %v6030_v12, %v6002_v57  ;;  %v5974_v0 = vpop.f32.mrf.mxu0  ;;  %v6003_v13 = vpop.f32.mrf.mxu1 }
 0x4bb   : > { %v5975_v17 = vadd.f32 %v5974_v0, %v10971_v14 }
 0x4bc   : > { %v10990_v4 = vadd.f32 %v6059_v33, %v6031_v20 }
 0x4bd   : > { %v6004_v48 = vadd.f32 %v6003_v13, %v5975_v17 }
 0x4c1   : > { %v6032_v49 = vpop.f32.mrf.mxu2  ;;  %v6061_v42 = vpop.f32.mrf.mxu3 }
 0x4c2   : > { %v6033_v24 = vadd.f32 %v6032_v49, %v6004_v48  ;;  %v5977_v43 = vpop.f32.mrf.mxu0  ;;  %v6006_v27 = vpop.f32.mrf.mxu1 }
 0x4c3   : > { %v5978_v59 = vadd.f32 %v5977_v43, %v10971_v14 }
 0x4c4   : > { %v10993_v18 = vadd.f32 %v6061_v42, %v6033_v24  ;;  %6208 = vmatmul.bf16.gmra.mxu0 %v11293_v5 }
 0x4c5   : > { %v6007_v23 = vadd.f32 %v6006_v27, %v5978_v59  ;;  %6237 = vmatmul.bf16.gmra.mxu1 %v11294_v16 }
 0x4c6   : > { %6266 = vmatmul.bf16.gmra.mxu2 %v11295_v36  ;;  %6295 = vmatmul.bf16.gmra.mxu3 %v11296_v56 }
 0x4c9   : > { %v6035_v61 = vpop.f32.mrf.mxu2  ;;  %v6064_v35 = vpop.f32.mrf.mxu3 }
 0x4ca   : > { %v6036_v7 = vadd.f32 %v6035_v61, %v6007_v23  ;;  %v5979_v19 = vpop.f32.mrf.mxu0  ;;  %v6008_v45 = vpop.f32.mrf.mxu1 }
 0x4cb   : > { %v5980_v38 = vadd.f32 %v5979_v19, %v10971_v14 }
 0x4cc   : > { %v11000_v46 = vadd.f32 %v6064_v35, %v6036_v7 }
 0x4cd   : > { %v6009_v60 = vadd.f32 %v6008_v45, %v5980_v38 }
 0x4d1   : > { %v6037_v40 = vpop.f32.mrf.mxu2  ;;  %v6066_v22 = vpop.f32.mrf.mxu3 }
 0x4d2   : > { %v6038_v25 = vadd.f32 %v6037_v40, %v6009_v60  ;;  %v5982_v8 = vpop.f32.mrf.mxu0  ;;  %v6011_v53 = vpop.f32.mrf.mxu1 }
 0x4d3   : > { %v5983_v28 = vadd.f32 %v5982_v8, %v10971_v14 }
 0x4d4   : > { %v11003_v39 = vadd.f32 %v6066_v22, %v6038_v25  ;;  %6213 = vmatmul.bf16.gmra.mxu0 %v11297_v37 }
 0x4d5   : > { %v6012_v15 = vadd.f32 %v6011_v53, %v5983_v28  ;;  %6242 = vmatmul.bf16.gmra.mxu1 %v11298_v10 }
 0x4d6   : > { %6271 = vmatmul.bf16.gmra.mxu2 %v11299_v30  ;;  %6300 = vmatmul.bf16.gmra.mxu3 %v11300_v2 }
 0x4d9   : > { %v6040_v55 = vpop.f32.mrf.mxu2  ;;  %v6069_v6 = vpop.f32.mrf.mxu3 }
 0x4da   : > { %v6041_v58 = vadd.f32 %v6040_v55, %v6012_v15  ;;  %v5984_v47 = vpop.f32.mrf.mxu0  ;;  %v6013_v31 = vpop.f32.mrf.mxu1 }
 0x4db   : > { %v5985_v54 = vadd.f32 %v5984_v47, %v10971_v14 }
 0x4dc   : > { %v11010_v50 = vadd.f32 %v6069_v6, %v6041_v58 }
 0x4dd   : > { %v6014_v44 = vadd.f32 %v6013_v31, %v5985_v54 }
 0x4e1   : > { %v6042_v11 = vpop.f32.mrf.mxu2  ;;  %v6071_v51 = vpop.f32.mrf.mxu3 }
 0x4e2   : > { %v6043_v1 = vadd.f32 %v6042_v11, %v6014_v44  ;;  %v6083_v32 = vpop.f32.mrf.mxu0  ;;  %v6112_v3 = vpop.f32.mrf.mxu1 }
 0x4e3   : > { %v6084_v36 = vadd.f32 %v6083_v32, %v10980_v21 }
 0x4e4   : > { %v11012_v52 = vadd.f32 %v6071_v51, %v6043_v1 }
 0x4e5   : > { %v6113_v19 = vadd.f32 %v6112_v3, %v6084_v36 }
 0x4e9   : > { %v6141_v29 = vpop.f32.mrf.mxu2  ;;  %v6170_v34 = vpop.f32.mrf.mxu3 }
 0x4ea   : > { %v6085_v57 = vpop.f32.mrf.mxu0  ;;  %v6114_v41 = vpop.f32.mrf.mxu1  ;;  %v6142_v38 = vadd.f32 %v6141_v29, %v6113_v19 }
 0x4eb   : > { %v6086_v45 = vadd.f32 %v6085_v57, %v10983_v9 }
 0x4ec   : > { %v6171_v40 = vadd.f32 %v6170_v34, %v6142_v38 }
 0x4ed   : > { %v6115_v21 = vadd.f32 %v6114_v41, %v6086_v45 }
 0x4f1   : > { %v6143_v63 = vpop.f32.mrf.mxu2  ;;  %v6172_v62 = vpop.f32.mrf.mxu3 }
 0x4f2   : > { %v6088_v26 = vpop.f32.mrf.mxu0  ;;  %v6117_v12 = vpop.f32.mrf.mxu1  ;;  %v6144_v53 = vadd.f32 %v6143_v63, %v6115_v21 }
 0x4f3   : > { %v6089_v15 = vadd.f32 %v6088_v26, %v10990_v4 }
 0x4f4   : > { %v6173_v30 = vadd.f32 %v6172_v62, %v6144_v53 }
 0x4f5   : > { %v6118_v6 = vadd.f32 %v6117_v12, %v6089_v15 }
 0x4f9   : > { %v6146_v14 = vpop.f32.mrf.mxu2  ;;  %v6175_v20 = vpop.f32.mrf.mxu3 }
 0x4fa   : > { %v6090_v33 = vpop.f32.mrf.mxu0  ;;  %v6119_v0 = vpop.f32.mrf.mxu1  ;;  %v6147_v31 = vadd.f32 %v6146_v14, %v6118_v6 }
 0x4fb   : > { %v6091_v44 = vadd.f32 %v6090_v33, %v10993_v18 }
 0x4fc   : > { %v6176_v51 = vadd.f32 %v6175_v20, %v6147_v31 }
 0x4fd   : > { %v6120_v34 = vadd.f32 %v6119_v0, %v6091_v44 }
 0x501   : > { %v6148_v17 = vpop.f32.mrf.mxu2  ;;  %v6177_v13 = vpop.f32.mrf.mxu3 }
 0x502   : > { %v6093_v48 = vpop.f32.mrf.mxu0  ;;  %v6122_v49 = vpop.f32.mrf.mxu1  ;;  %v6149_v63 = vadd.f32 %v6148_v17, %v6120_v34 }
 0x503   : > { %v6094_v62 = vadd.f32 %v6093_v48, %v11000_v46 }
 0x504   : > { %v6178_v14 = vadd.f32 %v6177_v13, %v6149_v63 }
 0x505   : > { %v6123_v20 = vadd.f32 %v6122_v49, %v6094_v62 }
 0x509   : > { %v6151_v24 = vpop.f32.mrf.mxu2  ;;  %v11014_v42 = vpop.f32.mrf.mxu3 }
 0x50a   : > { %v6095_v43 = vpop.f32.mrf.mxu0  ;;  %v11016_v59 = vpop.f32.mrf.mxu1 }
 0x50b   : > { %v6096_v0 = vadd.f32 %v6095_v43, %v11003_v39 }
 0x511   : > { %v11018_v27 = vpop.f32.mrf.mxu2  ;;  %v11020_v23 = vpop.f32.mrf.mxu3 }
 0x512   : > { %v11022_v5 = vpop.f32.mrf.mxu0  ;;  %v11024_v16 = vpop.f32.mrf.mxu1 }
 0x519   : > { %v11027_v56 = vpop.f32.mrf.mxu2  ;;  %v11029_v61 = vpop.f32.mrf.mxu3 }
 0x51a   : > { %v11031_v7 = vpop.f32.mrf.mxu0  ;;  %v11033_v35 = vpop.f32.mrf.mxu1 }
 0x521   : > { %v11036_v60 = vpop.f32.mrf.mxu2  ;;  %v11038_v25 = vpop.f32.mrf.mxu3 }
 0x522   : > { %v6199_v22 = vpop.f32.mrf.mxu0  ;;  %v6228_v8 = vpop.f32.mrf.mxu1 }
 0x523   : > { %v6200_v28 = vadd.f32 %v6199_v22, %v6171_v40  ;;  %v6152_v40 = vadd.f32 %v6151_v24, %v6123_v20  ;;  %v6099_v24 = vadd.f32 %v11022_v5, %v11010_v50  ;;  %v6101_v50 = vadd.f32 %v11031_v7, %v11012_v52 }
 0x525   : > { %v6229_v37 = vadd.f32 %v6228_v8, %v6200_v28  ;;  %v6181_v8 = vadd.f32 %v11014_v42, %v6152_v40  ;;  %v6125_v28 = vadd.f32 %v11016_v59, %v6096_v0  ;;  %v6130_v31 = vadd.f32 %v11033_v35, %v6101_v50 }
 0x527   : > { %v6154_v15 = vadd.f32 %v11018_v27, %v6125_v28 }
 0x529   : > { %v6257_v10 = vpop.f32.mrf.mxu2  ;;  %v6286_v55 = vpop.f32.mrf.mxu3 }
 0x52a   : > { %v6258_v2 = vadd.f32 %v6257_v10, %v6229_v37  ;;  %v6201_v58 = vpop.f32.mrf.mxu0  ;;  %v6230_v9 = vpop.f32.mrf.mxu1  ;;  %v6183_v37 = vadd.f32 %v11020_v23, %v6154_v15 }
 0x52b   : > { %v6202_v54 = vadd.f32 %v6201_v58, %v6173_v30 }
 0x52c   : > { %v6287_v47 = vadd.f32 %v6286_v55, %v6258_v2  ;;  %v6128_v55 = vadd.f32 %v11024_v16, %v6099_v24 }
 0x52d   : > { %v6231_v11 = vadd.f32 %v6230_v9, %v6202_v54 }
 0x52e   : > { %6308 = vst [vmem:[%s10738_s29 + $0x10] sm:$0xff] %v6287_v47  ;;  %v6157_v9 = vadd.f32 %v11027_v56, %v6128_v55  ;;  %v6159_v56 = vadd.f32 %v11036_v60, %v6130_v31 }
 0x530   : > { %v6186_v23 = vadd.f32 %v11029_v61, %v6157_v9  ;;  %v6188_v52 = vadd.f32 %v11038_v25, %v6159_v56 }
 0x531   : > { %v6259_v1 = vpop.f32.mrf.mxu2  ;;  %v6288_v4 = vpop.f32.mrf.mxu3 }
 0x532   : > { %v6260_v32 = vadd.f32 %v6259_v1, %v6231_v11  ;;  %v6204_v3 = vpop.f32.mrf.mxu0  ;;  %v6233_v29 = vpop.f32.mrf.mxu1 }
 0x533   : > { %v6205_v41 = vadd.f32 %v6204_v3, %v6176_v51 }
 0x534   : > { %v6289_v57 = vadd.f32 %v6288_v4, %v6260_v32 }
 0x535   : > { %v6234_v26 = vadd.f32 %v6233_v29, %v6205_v41 }
 0x536   : > { %6311 = vst [vmem:[%s10738_s29 + $0x28] sm:$0xff] %v6289_v57 }
 0x539   : > { %v6262_v12 = vpop.f32.mrf.mxu2  ;;  %v6291_v18 = vpop.f32.mrf.mxu3 }
 0x53a   : > { %v6263_v36 = vadd.f32 %v6262_v12, %v6234_v26  ;;  %v6206_v33 = vpop.f32.mrf.mxu0  ;;  %v6235_v19 = vpop.f32.mrf.mxu1 }
 0x53b   : > { %v6207_v45 = vadd.f32 %v6206_v33, %v6178_v14 }
 0x53c   : > { %v6292_v38 = vadd.f32 %v6291_v18, %v6263_v36 }
 0x53d   : > { %v6236_v22 = vadd.f32 %v6235_v19, %v6207_v45 }
 0x53e   : > { %6314 = vst [vmem:[%s10738_s29 + $0x40] sm:$0xff] %v6292_v38 }
 0x541   : > { %v6264_v17 = vpop.f32.mrf.mxu2  ;;  %v6293_v48 = vpop.f32.mrf.mxu3 }
 0x542   : > { %v6265_v46 = vadd.f32 %v6264_v17, %v6236_v22  ;;  %v6209_v21 = vpop.f32.mrf.mxu0  ;;  %v6238_v13 = vpop.f32.mrf.mxu1 }
 0x543   : > { %v6210_v49 = vadd.f32 %v6209_v21, %v6181_v8 }
 0x544   : > { %v6294_v53 = vadd.f32 %v6293_v48, %v6265_v46 }
 0x545   : > { %v6239_v39 = vadd.f32 %v6238_v13, %v6210_v49 }
 0x546   : > { %6317 = vst [vmem:[%s10738_s29 + $0x58] sm:$0xff] %v6294_v53 }
 0x549   : > { %v6267_v43 = vpop.f32.mrf.mxu2  ;;  %v6296_v10 = vpop.f32.mrf.mxu3 }
 0x54a   : > { %v6268_v42 = vadd.f32 %v6267_v43, %v6239_v39  ;;  %v6211_v30 = vpop.f32.mrf.mxu0  ;;  %v6240_v2 = vpop.f32.mrf.mxu1 }
 0x54b   : > { %v6212_v58 = vadd.f32 %v6211_v30, %v6183_v37 }
 0x54c   : > { %v6297_v59 = vadd.f32 %v6296_v10, %v6268_v42 }
 0x54d   : > { %v6241_v27 = vadd.f32 %v6240_v2, %v6212_v58 }
 0x54e   : > { %6320 = vst [vmem:[%s10738_s29 + $0x70] sm:$0xff] %v6297_v59 }
 0x551   : > { %v6269_v5 = vpop.f32.mrf.mxu2  ;;  %v6298_v47 = vpop.f32.mrf.mxu3 }
 0x552   : > { %v6270_v6 = vadd.f32 %v6269_v5, %v6241_v27  ;;  %v6214_v54 = vpop.f32.mrf.mxu0  ;;  %v6243_v11 = vpop.f32.mrf.mxu1 }
 0x553   : > { %v6215_v44 = vadd.f32 %v6214_v54, %v6186_v23 }
 0x554   : > { %v6299_v16 = vadd.f32 %v6298_v47, %v6270_v6 }
 0x555   : > { %v6244_v1 = vadd.f32 %v6243_v11, %v6215_v44 }
 0x556   : > { %6323 = vst [vmem:[%s10738_s29 + $0x88] sm:$0xff] %v6299_v16 }
 0x559   : > { %v6272_v51 = vpop.f32.mrf.mxu2  ;;  %v6301_v61 = vpop.f32.mrf.mxu3 }
 0x55a   : > { %v6273_v7 = vadd.f32 %v6272_v51, %v6244_v1  ;;  %v6216_v32 = vpop.f32.mrf.mxu0  ;;  %v6245_v3 = vpop.f32.mrf.mxu1 }
 0x55b   : > { %v6217_v35 = vadd.f32 %v6216_v32, %v6188_v52 }
 0x55c   : > { %v6302_v4 = vadd.f32 %v6301_v61, %v6273_v7 }
 0x55d   : > { %v6246_v60 = vadd.f32 %v6245_v3, %v6217_v35 }
 0x55e   : > { %6326 = vst [vmem:[%s10738_s29 + $0xa0] sm:$0xff] %v6302_v4 }
 0x561   : > { %v6274_v29 = vpop.f32.mrf.mxu2  ;;  %v6303_v25 = vpop.f32.mrf.mxu3 }
 0x562   : > { %v6275_v34 = vadd.f32 %v6274_v29, %v6246_v60 }
 0x564   : > { %v6304_v57 = vadd.f32 %v6303_v25, %v6275_v34 }
 0x566   : > { %6329 = vst [vmem:[%s10738_s29 + $0xb8] sm:$0xff] %v6304_v57 }
 0x567   : > { %9697 = shalt.err (!%p9694_p10)
}
 0x568   : > { %s9754_s1 = smov 384   ;;  %s9755_s6 = smov 24  }
 0x569   : > { %9441 = dma.vmem_to_hbm [thread:$0]  (%p9873_p3), %s6345_s12, 3072, %s6347_s13, %s6331_s22, %s9754_s1, %s9754_s1, %s9755_s6  }
 0x56a PF: > { %s6361_s24 = sand.u32 1, %s9732_s18   ;;  %p11301_p12 = scmp.ge.s32.totalorder %s9744_s21, 2 }
 0x56b   : > { %s6362_s29 = scalar_lea.sflag [#allocation4], %s6361_s24 }
 0x56c   : > { %p9461_p13 = pnand %p11301_p12, %p9821_p6 }
 0x56e   : > { %p9462_p0 = pneg %p9461_p13 }
 0x570   : > { %9727 = dma.done.wait (%p9462_p0), %s6362_s29, 3072  }
 0x571   : > { %9729 = vsyncadd (%p9462_p0), %s6362_s29, 4294964224  ;;  %p20_p5 = scmp.ge.s32.totalorder %s9863_s11, 4   ;;  %s11302_s18 = smov %s9736_s19 }
 0x572   : > { %s11303_s19 = smov %s9740_s20  ;;  %s11304_s20 = smov %s9879_s17 }
 0x573   : > { %s11305_s21 = smov %s9863_s11  ;;  %22 = sbr.rel (!%p20_p5) target bundleno = 9 (0x9), region = 101 }
 0x578   :  { %6368 = vsyncpa [#allocation3], 1 }
 0x579   :  { %6370 = vsyncpa [#allocation3 + $0x1], 1 }
 0x57a   :  { %6371 = vsyncpa [#allocation6], 1 }
 0x57b   :  { %6372 = vsyncpa [#allocation9], 1 }
 0x57c   :  { %6373 = vsyncpa [#allocation4], 1 }
 0x57d   :  { %6375 = vsyncpa [#allocation4 + $0x1], 1 }

</bundles_post_ra>
